<compile_context>
chip_gen: v7x
topology: tpu7x:2x2x1
jax: 0.10.0
libtpu: 0.0.40
codegen_flags: <defaults>
</compile_context>

<pallas_src>
import functools

import jax
import jax.numpy as jnp
import numpy as np
from jax.experimental import pallas as pl
from jax.experimental.pallas import tpu as pltpu


# ---------------------------------------------------------------------------
# In-kernel helpers
# ---------------------------------------------------------------------------
def _silu(x):
    # x * sigmoid(x); exp and approx reciprocal both go to the (otherwise idle) EUP.
    return x * pl.reciprocal(1.0 + jnp.exp(-x), approx=True)


def _make_w_masks(wp, real_w):
    """(1, wp, 1) validity masks for the 4 nonzero W-shifts of a 5-wide 'same' pool.

    Derived by rolling a tiny index iota with the *same* pltpu.roll the data
    will use (roll sign-convention agnostic).  A mask rejects (a) wrapped
    sources and (b) sources inside the zero-padded columns (src >= real_w).
    Shape (1, wp, 1) broadcasts for free in jnp.where against (h, wp, c) data.
    """
    wi = jax.lax.broadcasted_iota(jnp.int32, (1, wp, 1), 1)
    shifts = (1, 2, wp - 2, wp - 1)              # covers logical offsets {-2,-1,+1,+2}
    masks = []
    for sh in shifts:
        src = pltpu.roll(wi, shift=sh, axis=1)   # original W-index of data now at each slot
        masks.append(jnp.logical_and(jnp.abs(src - wi) <= 2, src < real_w))
    return shifts, masks


# ---------------------------------------------------------------------------
# Kernel
# ---------------------------------------------------------------------------
def sppf_kernel(x_ref, w1_ref, b1_ref, w2a_ref, w2b_ref, b2_ref, o_ref, hbuf,
                *, h, wp, real_w):
    hw = h * wp
    c_p = w1_ref.shape[1]

    # cv1: 1x1 conv == channel matmul (BN scale pre-folded) + bias + SiLU.
    # x arrives already 2D (hw, c1p) bf16 -> straight into the MXU, f32 accumulation.
    t = jnp.dot(x_ref[0], w1_ref[...], preferred_element_type=jnp.float32)
    t = _silu(t + b1_ref[...])                                  # (hw, c_p) f32

    # cv2 branch 0 issued now: this MXU work overlaps the VPU-heavy pooling below.
    acc = jnp.dot(t.astype(jnp.bfloat16), w2a_ref[...],
                  preferred_element_type=jnp.float32)           # (hw, c2p) f32

    # ---- three chained 5x5 / stride-1 / pad-2 max pools (separable W then H) ----
    shifts, masks = _make_w_masks(wp, real_w)                   # tiny, computed once
    neg = -jnp.inf
    # -inf border rows of the H-pool scratch; real rows live at [2 : h+2].
    hbuf[0:2] = jnp.full((2, wp, c_p), neg, jnp.float32)
    hbuf[h + 2:h + 4] = jnp.full((2, wp, c_p), neg, jnp.float32)

    def pool5x5(a3):                                            # (h, wp, c_p) f32
        # W direction: 4 XLU rolls masked against wrap / padded columns.
        m = a3
        for sh, msk in zip(shifts, masks):
            r = pltpu.roll(a3, shift=sh, axis=1)
            m = jnp.maximum(m, jnp.where(msk, r, neg))
        # H direction: write once into the scratch, max over 5 static-offset reads.
        hbuf[2:h + 2] = m
        out = hbuf[0:h]
        for k in range(1, 5):
            out = jnp.maximum(out, hbuf[k:k + h])
        return out

    t3 = t.reshape(h, wp, c_p)                                  # layout-free (wp % 8 == 0)
    y1 = pool5x5(t3)
    y2 = pool5x5(y1)
    y3 = pool5x5(y2)

    # cv2 branches 1..3 fused into one K = 3*c_p matmul (lane-aligned bf16 concat,
    # no channel concat on the f32 path, single accumulator add).
    ycat = jnp.concatenate(
        [y1.reshape(hw, c_p).astype(jnp.bfloat16),
         y2.reshape(hw, c_p).astype(jnp.bfloat16),
         y3.reshape(hw, c_p).astype(jnp.bfloat16)], axis=-1)    # (hw, 3*c_p) bf16
    acc = acc + jnp.dot(ycat, w2b_ref[...], preferred_element_type=jnp.float32)

    o = _silu(acc + b2_ref[...])
    o_ref[0] = o.astype(o_ref.dtype)                            # bf16, lane-dense store


# ---------------------------------------------------------------------------
# Host-side parameter preparation + wrapper
# ---------------------------------------------------------------------------
def _round_up(n, m):
    return ((n + m - 1) // m) * m


def _vmem_limit_bytes():
    """<= half of physical VMEM, capped at 64 MiB (32 MiB on v7x's 64 MiB VMEM)."""
    cap = 64 * 1024 * 1024          # conservative fallback -> 32 MiB limit
    try:
        info = pltpu.get_tpu_info()
        for attr in ("vmem_capacity_bytes", "vmem_size_bytes", "vmem_bytes"):
            v = getattr(info, attr, None)
            if v:
                cap = int(v)
                break
    except Exception:
        pass
    return max(16 * 1024 * 1024, min(64 * 1024 * 1024, cap // 2))


def prepare_params(w1, s1, b1, w2, s2, b2):
    """Fold BN scales into conv weights, split cv2 into branch-0 / branches-1..3
    slabs, zero-pad all channel dims to multiples of 128, cast weights to bf16."""
    c1, c_ = w1.shape
    c2 = w2.shape[1]
    c1p, c_p, c2p = _round_up(c1, 128), _round_up(c_, 128), _round_up(c2, 128)

    w1f = w1 * s1.reshape(1, -1)                            # fold cv1 BN scale
    w2f = (w2 * s2.reshape(1, -1)).reshape(4, c_, c2)       # fold cv2 BN scale + split

    w1p = jnp.zeros((c1p, c_p), jnp.float32).at[:c1, :c_].set(w1f)
    w2p = jnp.zeros((4, c_p, c2p), jnp.float32).at[:, :c_, :c2].set(w2f)
    w2a = w2p[0]                                            # (c_p, c2p): x branch
    w2b = w2p[1:].reshape(3 * c_p, c2p)                     # (3*c_p, c2p): y1,y2,y3
    b1p = jnp.zeros((1, c_p), jnp.float32).at[0, :c_].set(b1.reshape(-1))
    b2p = jnp.zeros((1, c2p), jnp.float32).at[0, :c2].set(b2.reshape(-1))
    # Padded c_ channels give SiLU(0) = 0 and their w2 rows are zero -> inert.
    return (w1p.astype(jnp.bfloat16), b1p,
            w2a.astype(jnp.bfloat16), w2b.astype(jnp.bfloat16), b2p)


def sppf_forward_nhwc(x_nhwc, w1, s1, b1, w2, s2, b2):
    """Core NHWC entry point: (N, H, W, C1) -> (N, H, W, C2) in bfloat16."""
    n, h, w, c1 = x_nhwc.shape
    c2 = w2.shape[1]
    assert h >= 5 and w >= 5, "SPPF expects spatial dims >= pool size (5)"

    w1p, b1p, w2a, w2b, b2p = prepare_params(w1, s1, b1, w2, s2, b2)
    c1p, c_p = w1p.shape
    c2p = w2a.shape[1]
    wp = _round_up(w, 8)                 # W -> sublane dim; pad so reshapes are free

    # bf16 input DMA (x is only ever an MXU operand); pad W + channels; pre-flatten
    # so the kernel never reshapes bf16 data.
    x = x_nhwc.astype(jnp.bfloat16)
    if wp != w or c1p != c1:
        x = jnp.pad(x, ((0, 0), (0, 0), (0, wp - w), (0, c1p - c1)))
    x = x.reshape(n, h * wp, c1p)

    kernel = functools.partial(sppf_kernel, h=h, wp=wp, real_w=w)

    out = pl.pallas_call(
        kernel,
        out_shape=jax.ShapeDtypeStruct((n, h * wp, c2p), jnp.bfloat16),
        grid=(n,),
        in_specs=[
            pl.BlockSpec((1, h * wp, c1p), lambda i: (i, 0, 0)),
            pl.BlockSpec((c1p, c_p), lambda i: (0, 0)),
            pl.BlockSpec((1, c_p), lambda i: (0, 0)),
            pl.BlockSpec((c_p, c2p), lambda i: (0, 0)),
            pl.BlockSpec((3 * c_p, c2p), lambda i: (0, 0)),
            pl.BlockSpec((1, c2p), lambda i: (0, 0)),
        ],
        out_specs=pl.BlockSpec((1, h * wp, c2p), lambda i: (i, 0, 0)),
        scratch_shapes=[pltpu.VMEM((h + 4, wp, c_p), jnp.float32)],  # H-pool scratch
        compiler_params=pltpu.CompilerParams(
            dimension_semantics=("parallel",),     # shard batch across TCs (v7x)
            vmem_limit_bytes=_vmem_limit_bytes(),  # 64 MiB on v5e/v6e, 32 MiB on v7x
        ),
    )(x, w1p, b1p, w2a, w2b, b2p)

    out = out.reshape(n, h, wp, c2p)[:, :, :w, :c2]
    return out


def sppf_forward(x_nchw, w1, s1, b1, w2, s2, b2):
    """PyTorch-convention wrapper: (N, C1, H, W) -> (N, C2, H, W).
    If the surrounding network is NHWC, call sppf_forward_nhwc directly and
    avoid these two full-tensor transposes."""
    x = jnp.transpose(x_nchw, (0, 2, 3, 1))
    out = sppf_forward_nhwc(x, w1, s1, b1, w2, s2, b2)
    return jnp.transpose(out, (0, 3, 1, 2)).astype(x_nchw.dtype)


# ---------------------------------------------------------------------------
# Deterministic synthetic parameters + pure-JAX reference
# ---------------------------------------------------------------------------
def make_params(key, c1, c2):
    """Logical (unfolded, unpadded) params; BN in eval mode as scale/bias."""
    c_ = c1 // 2
    k1, k2 = jax.random.split(key, 2)
    eps = 1e-5

    w1_t = 0.1 * jax.random.normal(k1, (c_, c1), jnp.float32)   # (c_out, c_in)
    w2_t = 0.1 * jax.random.normal(k2, (c2, 4 * c_), jnp.float32)
    w1 = w1_t.T                                                  # (c_in, c_out)
    w2 = w2_t.T

    def fold_bn(c):
        gamma = 1.0 + 0.10 * jnp.arange(c, dtype=jnp.float32)
        beta = 0.05 * jnp.arange(c, dtype=jnp.float32)
        mean = 0.01 * jnp.arange(c, dtype=jnp.float32)
        var = 1.0 + 0.02 * jnp.arange(c, dtype=jnp.float32)
        scale = gamma / jnp.sqrt(var + eps)
        bias = beta - mean * scale
        return scale.reshape(1, c), bias.reshape(1, c)

    s1, b1 = fold_bn(c_)
    s2, b2 = fold_bn(c2)
    return w1, s1, b1, w2, s2, b2


def sppf_reference(x_nchw, w1, s1, b1, w2, s2, b2):
    """Pure-JAX f32 reference (lax.reduce_window) for correctness checking."""
    x = jnp.transpose(x_nchw, (0, 2, 3, 1)).astype(jnp.float32)
    t = jnp.einsum("nhwc,cd->nhwd", x, w1) * s1.reshape(1, 1, 1, -1) + b1.reshape(1, 1, 1, -1)
    t = t * jax.nn.sigmoid(t)

    def mp(a):
        return jax.lax.reduce_window(
            a, -jnp.inf, jax.lax.max,
            window_dimensions=(1, 5, 5, 1), window_strides=(1, 1, 1, 1),
            padding=[(0, 0), (2, 2), (2, 2), (0, 0)])

    y1 = mp(t); y2 = mp(y1); y3 = mp(y2)
    cat = jnp.concatenate([t, y1, y2, y3], axis=-1)
    o = jnp.einsum("nhwc,cd->nhwd", cat, w2) * s2.reshape(1, 1, 1, -1) + b2.reshape(1, 1, 1, -1)
    o = o * jax.nn.sigmoid(o)
    return jnp.transpose(o, (0, 3, 1, 2))


if __name__ == "__main__":
    key = jax.random.PRNGKey(0)
    kx, kp = jax.random.split(key)

    # W=20 deliberately exercises the W-padding (wp=24) + boundary-mask path.
    N, C1, H, W = 2, 4, 16, 20
    C2 = 4
    x = jax.random.normal(kx, (N, C1, H, W), jnp.float32)

    w1, s1, b1, w2, s2, b2 = make_params(kp, C1, C2)

    out = sppf_forward(x, w1, s1, b1, w2, s2, b2)
    out = jax.block_until_ready(out)
    assert out.shape == (N, C2, H, W), out.shape

    ref = jax.block_until_ready(sppf_reference(x, w1, s1, b1, w2, s2, b2))
    # bf16 MXU operands / bf16 I/O (f32 accumulation) vs f32 reference.
    np.testing.assert_allclose(np.asarray(out, np.float32), np.asarray(ref),
                               rtol=2e-2, atol=2e-2)

    print("KERNEL_OK")
</pallas_src>

<mosaic_0001>
module attributes {stable_mosaic.version = 11 : i64} {
  func.func @sppf_kernel(%arg0: i32, %arg1: memref<1x384x128xbf16, #tpu.memory_space<vmem>>, %arg2: memref<128x128xbf16, #tpu.memory_space<vmem>>, %arg3: memref<1x128xf32, #tpu.memory_space<vmem>>, %arg4: memref<128x128xbf16, #tpu.memory_space<vmem>>, %arg5: memref<384x128xbf16, #tpu.memory_space<vmem>>, %arg6: memref<1x128xf32, #tpu.memory_space<vmem>>, %arg7: memref<1x384x128xbf16, #tpu.memory_space<vmem>>, %arg8: memref<20x24x128xf32, #tpu.memory_space<vmem>>) attributes {dimension_semantics = [#tpu.dimension_semantics<parallel>], iteration_bounds = array<i64: 2>, scalar_prefetch = 0 : i64, scratch_operands = 1 : i64, tpu.core_type = #tpu.core_type<tc>, window_params = [{transform_indices = @transform_0, window_bounds = array<i64: 1, 384, 128>}, {pipeline_mode = #tpu.pipeline_mode<synchronous>, transform_indices = @transform_1, window_bounds = array<i64: 128, 128>}, {pipeline_mode = #tpu.pipeline_mode<synchronous>, transform_indices = @transform_2, window_bounds = array<i64: 1, 128>}, {pipeline_mode = #tpu.pipeline_mode<synchronous>, transform_indices = @transform_3, window_bounds = array<i64: 128, 128>}, {pipeline_mode = #tpu.pipeline_mode<synchronous>, transform_indices = @transform_4, window_bounds = array<i64: 384, 128>}, {pipeline_mode = #tpu.pipeline_mode<synchronous>, transform_indices = @transform_5, window_bounds = array<i64: 1, 128>}, {transform_indices = @transform_6, window_bounds = array<i64: 1, 384, 128>}]} {
    %c0 = arith.constant 0 : index
    %c0_0 = arith.constant 0 : index
    %c0_1 = arith.constant 0 : index
    %0 = vector.load %arg1[%c0, %c0_0, %c0_1] : memref<1x384x128xbf16, #tpu.memory_space<vmem>>, vector<1x384x128xbf16>
    %1 = vector.shape_cast %0 : vector<1x384x128xbf16> to vector<384x128xbf16>
    %c0_2 = arith.constant 0 : index
    %c0_3 = arith.constant 0 : index
    %2 = vector.load %arg2[%c0_2, %c0_3] : memref<128x128xbf16, #tpu.memory_space<vmem>>, vector<128x128xbf16>
    %cst = arith.constant dense<0.000000e+00> : vector<384x128xf32>
    %3 = tpu.matmul %1, %2, %cst {dimension_numbers = #tpu.dot_dimension_numbers<[1], [0], [0], [1], [0, 0, 1, 1], [], []>} : vector<384x128xbf16>, vector<128x128xbf16>, vector<384x128xf32> -> vector<384x128xf32>
    %c0_4 = arith.constant 0 : index
    %c0_5 = arith.constant 0 : index
    %4 = vector.load %arg3[%c0_4, %c0_5] : memref<1x128xf32, #tpu.memory_space<vmem>>, vector<1x128xf32>
    %5 = vector.broadcast %4 : vector<1x128xf32> to vector<384x128xf32>
    %6 = arith.addf %3, %5 : vector<384x128xf32>
    %cst_6 = arith.constant 0.000000e+00 : f32
    %7 = vector.broadcast %cst_6 : f32 to vector<384x128xf32>
    %8 = arith.subf %7, %6 : vector<384x128xf32>
    %9 = math.exp %8 : vector<384x128xf32>
    %cst_7 = arith.constant 1.000000e+00 : f32
    %10 = vector.broadcast %cst_7 : f32 to vector<384x128xf32>
    %11 = arith.addf %10, %9 : vector<384x128xf32>
    %12 = tpu.reciprocal %11 {approx = true} : vector<384x128xf32> -> vector<384x128xf32>
    %13 = arith.mulf %6, %12 : vector<384x128xf32>
    %14 = arith.truncf %13 : vector<384x128xf32> to vector<384x128xbf16>
    %c0_8 = arith.constant 0 : index
    %c0_9 = arith.constant 0 : index
    %15 = vector.load %arg4[%c0_8, %c0_9] : memref<128x128xbf16, #tpu.memory_space<vmem>>, vector<128x128xbf16>
    %cst_10 = arith.constant dense<0.000000e+00> : vector<384x128xf32>
    %16 = tpu.matmul %14, %15, %cst_10 {dimension_numbers = #tpu.dot_dimension_numbers<[1], [0], [0], [1], [0, 0, 1, 1], [], []>} : vector<384x128xbf16>, vector<128x128xbf16>, vector<384x128xf32> -> vector<384x128xf32>
    %17 = tpu.iota {dimensions = array<i32: 1>} : vector<1x24x1xi32>
    %c1_i32 = arith.constant 1 : i32
    %18 = tpu.dynamic_rotate %17 by %c1_i32 dim 1 : vector<1x24x1xi32>, i32 -> vector<1x24x1xi32>
    %19 = arith.subi %18, %17 : vector<1x24x1xi32>
    %20 = math.absi %19 : vector<1x24x1xi32>
    %c2_i32 = arith.constant 2 : i32
    %21 = vector.broadcast %c2_i32 : i32 to vector<1x24x1xi32>
    %22 = arith.cmpi sle, %20, %21 : vector<1x24x1xi32>
    %c20_i32 = arith.constant 20 : i32
    %23 = vector.broadcast %c20_i32 : i32 to vector<1x24x1xi32>
    %24 = arith.cmpi slt, %18, %23 : vector<1x24x1xi32>
    %25 = arith.andi %22, %24 : vector<1x24x1xi1>
    %c2_i32_11 = arith.constant 2 : i32
    %26 = tpu.dynamic_rotate %17 by %c2_i32_11 dim 1 : vector<1x24x1xi32>, i32 -> vector<1x24x1xi32>
    %27 = arith.subi %26, %17 : vector<1x24x1xi32>
    %28 = math.absi %27 : vector<1x24x1xi32>
    %c2_i32_12 = arith.constant 2 : i32
    %29 = vector.broadcast %c2_i32_12 : i32 to vector<1x24x1xi32>
    %30 = arith.cmpi sle, %28, %29 : vector<1x24x1xi32>
    %c20_i32_13 = arith.constant 20 : i32
    %31 = vector.broadcast %c20_i32_13 : i32 to vector<1x24x1xi32>
    %32 = arith.cmpi slt, %26, %31 : vector<1x24x1xi32>
    %33 = arith.andi %30, %32 : vector<1x24x1xi1>
    %c22_i32 = arith.constant 22 : i32
    %34 = tpu.dynamic_rotate %17 by %c22_i32 dim 1 : vector<1x24x1xi32>, i32 -> vector<1x24x1xi32>
    %35 = arith.subi %34, %17 : vector<1x24x1xi32>
    %36 = math.absi %35 : vector<1x24x1xi32>
    %c2_i32_14 = arith.constant 2 : i32
    %37 = vector.broadcast %c2_i32_14 : i32 to vector<1x24x1xi32>
    %38 = arith.cmpi sle, %36, %37 : vector<1x24x1xi32>
    %c20_i32_15 = arith.constant 20 : i32
    %39 = vector.broadcast %c20_i32_15 : i32 to vector<1x24x1xi32>
    %40 = arith.cmpi slt, %34, %39 : vector<1x24x1xi32>
    %41 = arith.andi %38, %40 : vector<1x24x1xi1>
    %c23_i32 = arith.constant 23 : i32
    %42 = tpu.dynamic_rotate %17 by %c23_i32 dim 1 : vector<1x24x1xi32>, i32 -> vector<1x24x1xi32>
    %43 = arith.subi %42, %17 : vector<1x24x1xi32>
    %44 = math.absi %43 : vector<1x24x1xi32>
    %c2_i32_16 = arith.constant 2 : i32
    %45 = vector.broadcast %c2_i32_16 : i32 to vector<1x24x1xi32>
    %46 = arith.cmpi sle, %44, %45 : vector<1x24x1xi32>
    %c20_i32_17 = arith.constant 20 : i32
    %47 = vector.broadcast %c20_i32_17 : i32 to vector<1x24x1xi32>
    %48 = arith.cmpi slt, %42, %47 : vector<1x24x1xi32>
    %49 = arith.andi %46, %48 : vector<1x24x1xi1>
    %cst_18 = arith.constant 0xFF800000 : f32
    %50 = vector.broadcast %cst_18 : f32 to vector<2x24x128xf32>
    %c0_19 = arith.constant 0 : index
    %c0_20 = arith.constant 0 : index
    %c0_21 = arith.constant 0 : index
    %51 = vector.load %arg8[%c0_19, %c0_20, %c0_21] : memref<20x24x128xf32, #tpu.memory_space<vmem>>, vector<2x24x128xf32>
    tpu.vector_store %arg8[%c0_19, %c0_20, %c0_21], %50 {strides = array<i32>} : memref<20x24x128xf32, #tpu.memory_space<vmem>>, vector<2x24x128xf32>,
    %cst_22 = arith.constant 0xFF800000 : f32
    %52 = vector.broadcast %cst_22 : f32 to vector<2x24x128xf32>
    %c18 = arith.constant 18 : index
    %c0_23 = arith.constant 0 : index
    %c0_24 = arith.constant 0 : index
    %53 = vector.load %arg8[%c18, %c0_23, %c0_24] : memref<20x24x128xf32, #tpu.memory_space<vmem>>, vector<2x24x128xf32>
    tpu.vector_store %arg8[%c18, %c0_23, %c0_24], %52 {strides = array<i32>} : memref<20x24x128xf32, #tpu.memory_space<vmem>>, vector<2x24x128xf32>,
    %54 = vector.shape_cast %13 : vector<384x128xf32> to vector<16x24x128xf32>
    %c1_i32_25 = arith.constant 1 : i32
    %55 = tpu.dynamic_rotate %54 by %c1_i32_25 dim 1 : vector<16x24x128xf32>, i32 -> vector<16x24x128xf32>
    %cst_26 = arith.constant 0xFF800000 : f32
    %56 = vector.shape_cast %25 : vector<1x24x1xi1> to vector<1x24x1xi1>
    %57 = vector.broadcast %56 : vector<1x24x1xi1> to vector<16x24x128xi1>
    %58 = vector.broadcast %cst_26 : f32 to vector<16x24x128xf32>
    %59 = arith.select %57, %55, %58 : vector<16x24x128xi1>, vector<16x24x128xf32>
    %60 = arith.maximumf %54, %59 : vector<16x24x128xf32>
    %c2_i32_27 = arith.constant 2 : i32
    %61 = tpu.dynamic_rotate %54 by %c2_i32_27 dim 1 : vector<16x24x128xf32>, i32 -> vector<16x24x128xf32>
    %cst_28 = arith.constant 0xFF800000 : f32
    %62 = vector.shape_cast %33 : vector<1x24x1xi1> to vector<1x24x1xi1>
    %63 = vector.broadcast %62 : vector<1x24x1xi1> to vector<16x24x128xi1>
    %64 = vector.broadcast %cst_28 : f32 to vector<16x24x128xf32>
    %65 = arith.select %63, %61, %64 : vector<16x24x128xi1>, vector<16x24x128xf32>
    %66 = arith.maximumf %60, %65 : vector<16x24x128xf32>
    %c22_i32_29 = arith.constant 22 : i32
    %67 = tpu.dynamic_rotate %54 by %c22_i32_29 dim 1 : vector<16x24x128xf32>, i32 -> vector<16x24x128xf32>
    %cst_30 = arith.constant 0xFF800000 : f32
    %68 = vector.shape_cast %41 : vector<1x24x1xi1> to vector<1x24x1xi1>
    %69 = vector.broadcast %68 : vector<1x24x1xi1> to vector<16x24x128xi1>
    %70 = vector.broadcast %cst_30 : f32 to vector<16x24x128xf32>
    %71 = arith.select %69, %67, %70 : vector<16x24x128xi1>, vector<16x24x128xf32>
    %72 = arith.maximumf %66, %71 : vector<16x24x128xf32>
    %c23_i32_31 = arith.constant 23 : i32
    %73 = tpu.dynamic_rotate %54 by %c23_i32_31 dim 1 : vector<16x24x128xf32>, i32 -> vector<16x24x128xf32>
    %cst_32 = arith.constant 0xFF800000 : f32
    %74 = vector.shape_cast %49 : vector<1x24x1xi1> to vector<1x24x1xi1>
    %75 = vector.broadcast %74 : vector<1x24x1xi1> to vector<16x24x128xi1>
    %76 = vector.broadcast %cst_32 : f32 to vector<16x24x128xf32>
    %77 = arith.select %75, %73, %76 : vector<16x24x128xi1>, vector<16x24x128xf32>
    %78 = arith.maximumf %72, %77 : vector<16x24x128xf32>
    %c2 = arith.constant 2 : index
    %c0_33 = arith.constant 0 : index
    %c0_34 = arith.constant 0 : index
    %79 = vector.load %arg8[%c2, %c0_33, %c0_34] : memref<20x24x128xf32, #tpu.memory_space<vmem>>, vector<16x24x128xf32>
    tpu.vector_store %arg8[%c2, %c0_33, %c0_34], %78 {strides = array<i32>} : memref<20x24x128xf32, #tpu.memory_space<vmem>>, vector<16x24x128xf32>,
    %c0_35 = arith.constant 0 : index
    %c0_36 = arith.constant 0 : index
    %c0_37 = arith.constant 0 : index
    %80 = vector.load %arg8[%c0_35, %c0_36, %c0_37] : memref<20x24x128xf32, #tpu.memory_space<vmem>>, vector<16x24x128xf32>
    %c1 = arith.constant 1 : index
    %c0_38 = arith.constant 0 : index
    %c0_39 = arith.constant 0 : index
    %81 = vector.load %arg8[%c1, %c0_38, %c0_39] : memref<20x24x128xf32, #tpu.memory_space<vmem>>, vector<16x24x128xf32>
    %82 = arith.maximumf %80, %81 : vector<16x24x128xf32>
    %c2_40 = arith.constant 2 : index
    %c0_41 = arith.constant 0 : index
    %c0_42 = arith.constant 0 : index
    %83 = vector.load %arg8[%c2_40, %c0_41, %c0_42] : memref<20x24x128xf32, #tpu.memory_space<vmem>>, vector<16x24x128xf32>
    %84 = arith.maximumf %82, %83 : vector<16x24x128xf32>
    %c3 = arith.constant 3 : index
    %c0_43 = arith.constant 0 : index
    %c0_44 = arith.constant 0 : index
    %85 = vector.load %arg8[%c3, %c0_43, %c0_44] : memref<20x24x128xf32, #tpu.memory_space<vmem>>, vector<16x24x128xf32>
    %86 = arith.maximumf %84, %85 : vector<16x24x128xf32>
    %c4 = arith.constant 4 : index
    %c0_45 = arith.constant 0 : index
    %c0_46 = arith.constant 0 : index
    %87 = vector.load %arg8[%c4, %c0_45, %c0_46] : memref<20x24x128xf32, #tpu.memory_space<vmem>>, vector<16x24x128xf32>
    %88 = arith.maximumf %86, %87 : vector<16x24x128xf32>
    %c1_i32_47 = arith.constant 1 : i32
    %89 = tpu.dynamic_rotate %88 by %c1_i32_47 dim 1 : vector<16x24x128xf32>, i32 -> vector<16x24x128xf32>
    %cst_48 = arith.constant 0xFF800000 : f32
    %90 = vector.shape_cast %25 : vector<1x24x1xi1> to vector<1x24x1xi1>
    %91 = vector.broadcast %90 : vector<1x24x1xi1> to vector<16x24x128xi1>
    %92 = vector.broadcast %cst_48 : f32 to vector<16x24x128xf32>
    %93 = arith.select %91, %89, %92 : vector<16x24x128xi1>, vector<16x24x128xf32>
    %94 = arith.maximumf %88, %93 : vector<16x24x128xf32>
    %c2_i32_49 = arith.constant 2 : i32
    %95 = tpu.dynamic_rotate %88 by %c2_i32_49 dim 1 : vector<16x24x128xf32>, i32 -> vector<16x24x128xf32>
    %cst_50 = arith.constant 0xFF800000 : f32
    %96 = vector.shape_cast %33 : vector<1x24x1xi1> to vector<1x24x1xi1>
    %97 = vector.broadcast %96 : vector<1x24x1xi1> to vector<16x24x128xi1>
    %98 = vector.broadcast %cst_50 : f32 to vector<16x24x128xf32>
    %99 = arith.select %97, %95, %98 : vector<16x24x128xi1>, vector<16x24x128xf32>
    %100 = arith.maximumf %94, %99 : vector<16x24x128xf32>
    %c22_i32_51 = arith.constant 22 : i32
    %101 = tpu.dynamic_rotate %88 by %c22_i32_51 dim 1 : vector<16x24x128xf32>, i32 -> vector<16x24x128xf32>
    %cst_52 = arith.constant 0xFF800000 : f32
    %102 = vector.shape_cast %41 : vector<1x24x1xi1> to vector<1x24x1xi1>
    %103 = vector.broadcast %102 : vector<1x24x1xi1> to vector<16x24x128xi1>
    %104 = vector.broadcast %cst_52 : f32 to vector<16x24x128xf32>
    %105 = arith.select %103, %101, %104 : vector<16x24x128xi1>, vector<16x24x128xf32>
    %106 = arith.maximumf %100, %105 : vector<16x24x128xf32>
    %c23_i32_53 = arith.constant 23 : i32
    %107 = tpu.dynamic_rotate %88 by %c23_i32_53 dim 1 : vector<16x24x128xf32>, i32 -> vector<16x24x128xf32>
    %cst_54 = arith.constant 0xFF800000 : f32
    %108 = vector.shape_cast %49 : vector<1x24x1xi1> to vector<1x24x1xi1>
    %109 = vector.broadcast %108 : vector<1x24x1xi1> to vector<16x24x128xi1>
    %110 = vector.broadcast %cst_54 : f32 to vector<16x24x128xf32>
    %111 = arith.select %109, %107, %110 : vector<16x24x128xi1>, vector<16x24x128xf32>
    %112 = arith.maximumf %106, %111 : vector<16x24x128xf32>
    %c2_55 = arith.constant 2 : index
    %c0_56 = arith.constant 0 : index
    %c0_57 = arith.constant 0 : index
    %113 = vector.load %arg8[%c2_55, %c0_56, %c0_57] : memref<20x24x128xf32, #tpu.memory_space<vmem>>, vector<16x24x128xf32>
    tpu.vector_store %arg8[%c2_55, %c0_56, %c0_57], %112 {strides = array<i32>} : memref<20x24x128xf32, #tpu.memory_space<vmem>>, vector<16x24x128xf32>,
    %c0_58 = arith.constant 0 : index
    %c0_59 = arith.constant 0 : index
    %c0_60 = arith.constant 0 : index
    %114 = vector.load %arg8[%c0_58, %c0_59, %c0_60] : memref<20x24x128xf32, #tpu.memory_space<vmem>>, vector<16x24x128xf32>
    %c1_61 = arith.constant 1 : index
    %c0_62 = arith.constant 0 : index
    %c0_63 = arith.constant 0 : index
    %115 = vector.load %arg8[%c1_61, %c0_62, %c0_63] : memref<20x24x128xf32, #tpu.memory_space<vmem>>, vector<16x24x128xf32>
    %116 = arith.maximumf %114, %115 : vector<16x24x128xf32>
    %c2_64 = arith.constant 2 : index
    %c0_65 = arith.constant 0 : index
    %c0_66 = arith.constant 0 : index
    %117 = vector.load %arg8[%c2_64, %c0_65, %c0_66] : memref<20x24x128xf32, #tpu.memory_space<vmem>>, vector<16x24x128xf32>
    %118 = arith.maximumf %116, %117 : vector<16x24x128xf32>
    %c3_67 = arith.constant 3 : index
    %c0_68 = arith.constant 0 : index
    %c0_69 = arith.constant 0 : index
    %119 = vector.load %arg8[%c3_67, %c0_68, %c0_69] : memref<20x24x128xf32, #tpu.memory_space<vmem>>, vector<16x24x128xf32>
    %120 = arith.maximumf %118, %119 : vector<16x24x128xf32>
    %c4_70 = arith.constant 4 : index
    %c0_71 = arith.constant 0 : index
    %c0_72 = arith.constant 0 : index
    %121 = vector.load %arg8[%c4_70, %c0_71, %c0_72] : memref<20x24x128xf32, #tpu.memory_space<vmem>>, vector<16x24x128xf32>
    %122 = arith.maximumf %120, %121 : vector<16x24x128xf32>
    %c1_i32_73 = arith.constant 1 : i32
    %123 = tpu.dynamic_rotate %122 by %c1_i32_73 dim 1 : vector<16x24x128xf32>, i32 -> vector<16x24x128xf32>
    %cst_74 = arith.constant 0xFF800000 : f32
    %124 = vector.shape_cast %25 : vector<1x24x1xi1> to vector<1x24x1xi1>
    %125 = vector.broadcast %124 : vector<1x24x1xi1> to vector<16x24x128xi1>
    %126 = vector.broadcast %cst_74 : f32 to vector<16x24x128xf32>
    %127 = arith.select %125, %123, %126 : vector<16x24x128xi1>, vector<16x24x128xf32>
    %128 = arith.maximumf %122, %127 : vector<16x24x128xf32>
    %c2_i32_75 = arith.constant 2 : i32
    %129 = tpu.dynamic_rotate %122 by %c2_i32_75 dim 1 : vector<16x24x128xf32>, i32 -> vector<16x24x128xf32>
    %cst_76 = arith.constant 0xFF800000 : f32
    %130 = vector.shape_cast %33 : vector<1x24x1xi1> to vector<1x24x1xi1>
    %131 = vector.broadcast %130 : vector<1x24x1xi1> to vector<16x24x128xi1>
    %132 = vector.broadcast %cst_76 : f32 to vector<16x24x128xf32>
    %133 = arith.select %131, %129, %132 : vector<16x24x128xi1>, vector<16x24x128xf32>
    %134 = arith.maximumf %128, %133 : vector<16x24x128xf32>
    %c22_i32_77 = arith.constant 22 : i32
    %135 = tpu.dynamic_rotate %122 by %c22_i32_77 dim 1 : vector<16x24x128xf32>, i32 -> vector<16x24x128xf32>
    %cst_78 = arith.constant 0xFF800000 : f32
    %136 = vector.shape_cast %41 : vector<1x24x1xi1> to vector<1x24x1xi1>
    %137 = vector.broadcast %136 : vector<1x24x1xi1> to vector<16x24x128xi1>
    %138 = vector.broadcast %cst_78 : f32 to vector<16x24x128xf32>
    %139 = arith.select %137, %135, %138 : vector<16x24x128xi1>, vector<16x24x128xf32>
    %140 = arith.maximumf %134, %139 : vector<16x24x128xf32>
    %c23_i32_79 = arith.constant 23 : i32
    %141 = tpu.dynamic_rotate %122 by %c23_i32_79 dim 1 : vector<16x24x128xf32>, i32 -> vector<16x24x128xf32>
    %cst_80 = arith.constant 0xFF800000 : f32
    %142 = vector.shape_cast %49 : vector<1x24x1xi1> to vector<1x24x1xi1>
    %143 = vector.broadcast %142 : vector<1x24x1xi1> to vector<16x24x128xi1>
    %144 = vector.broadcast %cst_80 : f32 to vector<16x24x128xf32>
    %145 = arith.select %143, %141, %144 : vector<16x24x128xi1>, vector<16x24x128xf32>
    %146 = arith.maximumf %140, %145 : vector<16x24x128xf32>
    %c2_81 = arith.constant 2 : index
    %c0_82 = arith.constant 0 : index
    %c0_83 = arith.constant 0 : index
    %147 = vector.load %arg8[%c2_81, %c0_82, %c0_83] : memref<20x24x128xf32, #tpu.memory_space<vmem>>, vector<16x24x128xf32>
    tpu.vector_store %arg8[%c2_81, %c0_82, %c0_83], %146 {strides = array<i32>} : memref<20x24x128xf32, #tpu.memory_space<vmem>>, vector<16x24x128xf32>,
    %c0_84 = arith.constant 0 : index
    %c0_85 = arith.constant 0 : index
    %c0_86 = arith.constant 0 : index
    %148 = vector.load %arg8[%c0_84, %c0_85, %c0_86] : memref<20x24x128xf32, #tpu.memory_space<vmem>>, vector<16x24x128xf32>
    %c1_87 = arith.constant 1 : index
    %c0_88 = arith.constant 0 : index
    %c0_89 = arith.constant 0 : index
    %149 = vector.load %arg8[%c1_87, %c0_88, %c0_89] : memref<20x24x128xf32, #tpu.memory_space<vmem>>, vector<16x24x128xf32>
    %150 = arith.maximumf %148, %149 : vector<16x24x128xf32>
    %c2_90 = arith.constant 2 : index
    %c0_91 = arith.constant 0 : index
    %c0_92 = arith.constant 0 : index
    %151 = vector.load %arg8[%c2_90, %c0_91, %c0_92] : memref<20x24x128xf32, #tpu.memory_space<vmem>>, vector<16x24x128xf32>
    %152 = arith.maximumf %150, %151 : vector<16x24x128xf32>
    %c3_93 = arith.constant 3 : index
    %c0_94 = arith.constant 0 : index
    %c0_95 = arith.constant 0 : index
    %153 = vector.load %arg8[%c3_93, %c0_94, %c0_95] : memref<20x24x128xf32, #tpu.memory_space<vmem>>, vector<16x24x128xf32>
    %154 = arith.maximumf %152, %153 : vector<16x24x128xf32>
    %c4_96 = arith.constant 4 : index
    %c0_97 = arith.constant 0 : index
    %c0_98 = arith.constant 0 : index
    %155 = vector.load %arg8[%c4_96, %c0_97, %c0_98] : memref<20x24x128xf32, #tpu.memory_space<vmem>>, vector<16x24x128xf32>
    %156 = arith.maximumf %154, %155 : vector<16x24x128xf32>
    %157 = vector.shape_cast %88 : vector<16x24x128xf32> to vector<384x128xf32>
    %158 = arith.truncf %157 : vector<384x128xf32> to vector<384x128xbf16>
    %159 = vector.shape_cast %122 : vector<16x24x128xf32> to vector<384x128xf32>
    %160 = arith.truncf %159 : vector<384x128xf32> to vector<384x128xbf16>
    %161 = vector.shape_cast %156 : vector<16x24x128xf32> to vector<384x128xf32>
    %162 = arith.truncf %161 : vector<384x128xf32> to vector<384x128xbf16>
    %163 = tpu.concatenate %158, %160, %162 in 1 : vector<384x128xbf16>, vector<384x128xbf16>, vector<384x128xbf16> -> vector<384x384xbf16>
    %c0_99 = arith.constant 0 : index
    %c0_100 = arith.constant 0 : index
    %164 = vector.load %arg5[%c0_99, %c0_100] : memref<384x128xbf16, #tpu.memory_space<vmem>>, vector<384x128xbf16>
    %cst_101 = arith.constant dense<0.000000e+00> : vector<384x128xf32>
    %165 = tpu.matmul %163, %164, %cst_101 {dimension_numbers = #tpu.dot_dimension_numbers<[1], [0], [0], [1], [0, 0, 1, 1], [], []>} : vector<384x384xbf16>, vector<384x128xbf16>, vector<384x128xf32> -> vector<384x128xf32>
    %166 = arith.addf %16, %165 : vector<384x128xf32>
    %c0_102 = arith.constant 0 : index
    %c0_103 = arith.constant 0 : index
    %167 = vector.load %arg6[%c0_102, %c0_103] : memref<1x128xf32, #tpu.memory_space<vmem>>, vector<1x128xf32>
    %168 = vector.broadcast %167 : vector<1x128xf32> to vector<384x128xf32>
    %169 = arith.addf %166, %168 : vector<384x128xf32>
    %cst_104 = arith.constant 0.000000e+00 : f32
    %170 = vector.broadcast %cst_104 : f32 to vector<384x128xf32>
    %171 = arith.subf %170, %169 : vector<384x128xf32>
    %172 = math.exp %171 : vector<384x128xf32>
    %cst_105 = arith.constant 1.000000e+00 : f32
    %173 = vector.broadcast %cst_105 : f32 to vector<384x128xf32>
    %174 = arith.addf %173, %172 : vector<384x128xf32>
    %175 = tpu.reciprocal %174 {approx = true} : vector<384x128xf32> -> vector<384x128xf32>
    %176 = arith.mulf %169, %175 : vector<384x128xf32>
    %177 = arith.truncf %176 : vector<384x128xf32> to vector<384x128xbf16>
    %c0_106 = arith.constant 0 : index
    %c0_107 = arith.constant 0 : index
    %c0_108 = arith.constant 0 : index
    %178 = vector.load %arg7[%c0_106, %c0_107, %c0_108] : memref<1x384x128xbf16, #tpu.memory_space<vmem>>, vector<1x384x128xbf16>
    %179 = vector.shape_cast %178 : vector<1x384x128xbf16> to vector<384x128xbf16>
    %180 = vector.shape_cast %177 : vector<384x128xbf16> to vector<1x384x128xbf16>
    tpu.vector_store %arg7[%c0_106, %c0_107, %c0_108], %180 {strides = array<i32>} : memref<1x384x128xbf16, #tpu.memory_space<vmem>>, vector<1x384x128xbf16>,
    return
  }
  func.func @transform_0(%arg0: i32) -> (i32, i32, i32) {
    %c0_i32 = arith.constant 0 : i32
    %c0_i32_0 = arith.constant 0 : i32
    %c0_i32_1 = arith.constant 0 : i32
    return %arg0, %c0_i32, %c0_i32_0 : i32, i32, i32
  }
  func.func @transform_1(%arg0: i32) -> (i32, i32) {
    %c0_i32 = arith.constant 0 : i32
    %c0_i32_0 = arith.constant 0 : i32
    %c0_i32_1 = arith.constant 0 : i32
    return %c0_i32, %c0_i32_0 : i32, i32
  }
  func.func @transform_2(%arg0: i32) -> (i32, i32) {
    %c0_i32 = arith.constant 0 : i32
    %c0_i32_0 = arith.constant 0 : i32
    %c0_i32_1 = arith.constant 0 : i32
    return %c0_i32, %c0_i32_0 : i32, i32
  }
  func.func @transform_3(%arg0: i32) -> (i32, i32) {
    %c0_i32 = arith.constant 0 : i32
    %c0_i32_0 = arith.constant 0 : i32
    %c0_i32_1 = arith.constant 0 : i32
    return %c0_i32, %c0_i32_0 : i32, i32
  }
  func.func @transform_4(%arg0: i32) -> (i32, i32) {
    %c0_i32 = arith.constant 0 : i32
    %c0_i32_0 = arith.constant 0 : i32
    %c0_i32_1 = arith.constant 0 : i32
    return %c0_i32, %c0_i32_0 : i32, i32
  }
  func.func @transform_5(%arg0: i32) -> (i32, i32) {
    %c0_i32 = arith.constant 0 : i32
    %c0_i32_0 = arith.constant 0 : i32
    %c0_i32_1 = arith.constant 0 : i32
    return %c0_i32, %c0_i32_0 : i32, i32
  }
  func.func @transform_6(%arg0: i32) -> (i32, i32, i32) {
    %c0_i32 = arith.constant 0 : i32
    %c0_i32_0 = arith.constant 0 : i32
    %c0_i32_1 = arith.constant 0 : i32
    return %arg0, %c0_i32, %c0_i32_0 : i32, i32, i32
  }
}

</mosaic_0001>

<bundles_post_ra>
// kernel: tpu_custom_call.1
= control target key start
LH: loop header
LB: loop body
LE: loop exit
PB: predicated region body
PF: predicated region fallthrough
CT: control target
= control target key end

     0   :  { %11 = vsyncpa [#allocation4], 0  ;;  %s15757_s0 = inlined_call_operand.hbm [shape: bf16[2,384,128], index: 0, kind: input, shape index: {}]   ;;  %s15758_s1 = inlined_call_operand.hbm [shape: bf16[128,128], index: 1, kind: input, shape index: {}]   ;;  %s15759_s2 = inlined_call_operand.vmem [shape: f32[1,128], index: 2, kind: input, shape index: {}]   ;;  %s15760_s3 = inlined_call_operand.hbm [shape: bf16[128,128], index: 3, kind: input, shape index: {}]   ;;  %s15761_s4 = inlined_call_operand.hbm [shape: bf16[384,128], index: 4, kind: input, shape index: {}]   ;;  %s15762_s5 = inlined_call_operand.vmem [shape: f32[1,128], index: 5, kind: input, shape index: {}]   ;;  %s15763_s6 = inlined_call_operand.hbm [shape: bf16[2,384,128], index: 6, kind: output, shape index: {}]  }
   0x1   :  { %13 = vsyncpa [#allocation4 + $0x1], 0 }
   0x2   :  { %14 = vsyncpa [#allocation7], 0 }
   0x3   :  { %15 = vsyncpa [#allocation10], 0 }
   0x4   :  { %16 = vsyncpa [#allocation5], 0 }
   0x5   :  { %18 = vsyncpa [#allocation5 + $0x1], 0  ;;  %s8164_s21 = smov 0   ;;  %s8166_s22 = smov 0  }
   0x6   :  { %s8168_s23 = smov 0   ;;  %s8170_s24 = smov 0  }
   0x7 LB: > { %s8185_s25 = sadd.s32 4294967295, %s8117_s24   ;;  %s6754_s26 = sadd.s32 4294967294, %s8117_s24   ;;  %s8117_s24 = sphi %s8170_s24, %s17872_s24   ;;  %s8113_s23 = sphi %s8168_s23, %s17871_s23   ;;  %s8109_s22 = sphi %s8166_s22, %s17870_s22   ;;  %s8105_s21 = sphi %s8164_s21, %s17869_s21  }
   0x8   : > { %p44_p0 = scmp.ne.s32.totalorder %s8109_s22, %s8105_s21  ;;  %p15764_p1 = scmp.eq.s32.totalorder %s8185_s25, 0 }
   0x9   : > { %p179_p3 = scmp.eq.s32.totalorder %s6754_s26, 1  ;;  %p6755_p5 = scmp.ge.s32.totalorder %s8117_s24, 1 }
   0xa   : > { %p8194_p4 = por %p15764_p1, %p44_p0  ;;  %p186_p7 = scmp.lt.s32.totalorder %s8117_s24, 3 }
   0xb   : > { %p8199_p6 = por %p179_p3, %p44_p0  ;;  %s8119_s30 = smov [#allocation6]  }
   0xc   : > { %s16178_s27 = scalar_select %p8194_p4, 1, 0 }
   0xd   : > { %s16179_s28 = scalar_select %p8199_p6, 1, 0 }
   0xe   : > { %p8204_p8 = pnand %p6755_p5, %p186_p7  ;;  %s198_s7 = sshll.u32 %s8119_s30, 4  ;;  %s8208_s7 = int_to_ptr.vmem [resolvable:$true] %s198_s7 }
   0xf   : > { %s8120_s9 = smov [#allocation8]   ;;  %s8121_s11 = smov [#allocation9]  }
  0x10   : > { %s16180_s29 = scalar_select %p8204_p8, 1, 0 }
  0x11   : > { %p7409_p9 = pneg %p8204_p8  ;;  %s214_s10 = sshll.u32 %s8120_s9, 4  ;;  %s8219_s10 = int_to_ptr.vmem [resolvable:$true] %s214_s10 }
  0x12   : > { %s8221_s12 = sshll.u32 %s8121_s11, 4  ;;  %s7929_s15 = scalar_lea.hbm %s15758_s1, 1024  ;;  %s228_s12 = int_to_ptr.vmem [resolvable:$true] %s8221_s12 }
  0x13   : > { %p8215_p11 = pnand %p7409_p9, %p15764_p1  ;;  %p7930_p12 = scmp.ne.s32.totalorder %s15758_s1, %s7929_s15 }
  0x14   : > { %p7936_p5 = scmp.lt.u32.totalorder %s7929_s15, %s15758_s1 }
  0x15   : > { %p8231_p13 = pneg %p8215_p11 }
  0x17   : > { %p7932_p0 = pnand %p8231_p13, %p7930_p12 }
  0x19   : > { %p7933_p3 = pneg %p7932_p0 }
  0x1b   : > { %p7938_p7 = pnand %p7936_p5, %p7933_p3 }
  0x1d   : > { %7941 = shalt.err (!%p7938_p7)
}
  0x1e   : > { %s7942_s26 = scalar_lea.vmem %s8208_s7, 1024  ;;  %p7950_p2 = scmp.lt.s32.totalorder %s8208_s7, %s8208_s7 }
  0x1f   : > { %p7943_p9 = scmp.ne.s32.totalorder %s8208_s7, %s7942_s26  ;;  %p7951_p6 = scmp.lt.s32.totalorder %s7942_s26, %s7942_s26 }
  0x21   : > { %p7945_p10 = pnand %p7943_p9, %p8231_p13  ;;  %p7952_p12 = por %p7951_p6, %p7950_p2 }
  0x23   : > { %p7946_p1 = pneg %p7945_p10 }
  0x25   : > { %p7953_p0 = pnand %p7952_p12, %p7946_p1 }
  0x27   : > { %7956 = shalt.err (!%p7953_p0)
}
  0x28   : > { %s15767_s30 = smov 64   ;;  %s15768_s9 = smov 4  }
  0x29   : > { %7412 = dma.hbm_to_vmem [thread:$0]  (!%p8215_p11), %s15758_s1, 1024, %s8208_s7, [#allocation7], %s15767_s30, %s15767_s30, %s15768_s9  }
  0x2a   : > { %s7957_s16 = scalar_lea.hbm %s15760_s3, 1024 }
  0x2b   : > { %p7958_p1 = scmp.ne.s32.totalorder %s15760_s3, %s7957_s16  ;;  %p7964_p10 = scmp.lt.u32.totalorder %s7957_s16, %s15760_s3 }
  0x2d   : > { %p7960_p2 = pnand %p7958_p1, %p8231_p13 }
  0x2f   : > { %p7961_p6 = pneg %p7960_p2 }
  0x31   : > { %p7966_p3 = pnand %p7964_p10, %p7961_p6 }
  0x33   : > { %7969 = shalt.err (!%p7966_p3)
}
  0x34   : > { %s7970_s7 = scalar_lea.vmem %s8219_s10, 1024  ;;  %p7978_p12 = scmp.lt.s32.totalorder %s8219_s10, %s8219_s10 }
  0x35   : > { %p7971_p5 = scmp.ne.s32.totalorder %s8219_s10, %s7970_s7  ;;  %p7979_p0 = scmp.lt.s32.totalorder %s7970_s7, %s7970_s7 }
  0x37   : > { %p7973_p7 = pnand %p7971_p5, %p8231_p13  ;;  %p7980_p1 = por %p7979_p0, %p7978_p12 }
  0x39   : > { %p7974_p9 = pneg %p7973_p7 }
  0x3b   : > { %p7981_p2 = pnand %p7980_p1, %p7974_p9 }
  0x3d   : > { %7984 = shalt.err (!%p7981_p2)
}
  0x3e   : > { %7415 = dma.hbm_to_vmem [thread:$0]  (!%p8215_p11), %s15760_s3, 1024, %s8219_s10, [#allocation7], %s15767_s30, %s15767_s30, %s15768_s9  }
  0x3f   : > { %s7985_s16 = scalar_lea.hbm %s15761_s4, 3072 }
  0x40   : > { %p7986_p6 = scmp.ne.s32.totalorder %s15761_s4, %s7985_s16  ;;  %p7992_p5 = scmp.lt.u32.totalorder %s7985_s16, %s15761_s4 }
  0x42   : > { %p7988_p10 = pnand %p7986_p6, %p8231_p13 }
  0x44   : > { %p7989_p3 = pneg %p7988_p10 }
  0x46   : > { %p7994_p7 = pnand %p7992_p5, %p7989_p3 }
  0x48   : > { %7997 = shalt.err (!%p7994_p7)
}
  0x49   : > { %s7998_s7 = scalar_lea.vmem %s228_s12, 3072  ;;  %p8006_p1 = scmp.lt.s32.totalorder %s228_s12, %s228_s12 }
  0x4a   : > { %p7999_p9 = scmp.ne.s32.totalorder %s228_s12, %s7998_s7  ;;  %p8007_p2 = scmp.lt.s32.totalorder %s7998_s7, %s7998_s7 }
  0x4c   : > { %p8001_p12 = pnand %p7999_p9, %p8231_p13  ;;  %p8008_p4 = por %p8007_p2, %p8006_p1 }
  0x4e   : > { %p8002_p0 = pneg %p8001_p12 }
  0x50   : > { %p8009_p8 = pnand %p8008_p4, %p8002_p0 }
  0x52   : > { %8012 = shalt.err (!%p8009_p8)
}
  0x53   : > { %7418 = dma.hbm_to_vmem [thread:$0]  (!%p8215_p11), %s15761_s4, 3072, %s228_s12, [#allocation10], %s15767_s30, %s15767_s30, %s15768_s9  }
  0x54   : > { %s8304_s18 = sadd.s32 1, %s8117_s24   ;;  %s31_s13 = sadd.s32 1, %s8113_s23 }
  0x55   : > { %s28_s8 = ssub.s32 %s8117_s24, %s8304_s18  ;;  %p38_p8 = scmp.ne.s32.totalorder %s8113_s23, %s8109_s22 }
  0x56   : > { %p29_p4 = scmp.eq.s32.totalorder %s28_s8, 0  ;;  %p39_p13 = scmp.eq.s32.totalorder %s8117_s24, 0 }
  0x57   : > { %p7430_p6 = scmp.lt.s32.totalorder %s8117_s24, 2  ;;  %p16183_p3 = scmp.eq.s32.totalorder %s8185_s25, 1 }
  0x58   : > { %s8314_s14 = scalar_select %p29_p4, %s8113_s23, %s31_s13  }
  0x59   : > { %p40_p10 = por %p39_p13, %p38_p8  ;;  %p8318_p5 = por %p16183_p3, %p38_p8 }
  0x5a   : > { %s244_s16 = sand.u32 1, %s8113_s23   ;;  %s7390_s17 = smul.u32 3072, %s8117_s24 }
  0x5b   : > { %s7389_s12 = smul.u32 192, %s244_s16  ;;  %p8324_p11 = pnand %p7430_p6, %p40_p10 }
  0x5c   : > { %s8331_s7 = scalar_lea.hbm %s15757_s0, %s7390_s17  ;;  %s8335_s8 = scalar_lea.sflag [#allocation4], %s244_s16 }
  0x5d   : > { %s248_s10 = scalar_lea.vmem [#allocation3], %s7389_s12  ;;  %s8013_s13 = scalar_lea.hbm %s8331_s7, 3072 }
  0x5e   : > { %s255_s11 = sshll.u32 %s248_s10, 4  ;;  %p8014_p7 = scmp.ne.s32.totalorder %s8331_s7, %s8013_s13  ;;  %s8333_s11 = int_to_ptr.vmem [resolvable:$true] %s255_s11 }
  0x5f   : > { %p8015_p9 = pneg %p8324_p11  ;;  %s8018_s26 = scalar_lea.hbm %s15757_s0, 6144 }
  0x60   : > { %p8019_p1 = scmp.lt.u32.totalorder %s8331_s7, %s15757_s0  ;;  %p8020_p2 = scmp.lt.u32.totalorder %s8018_s26, %s8013_s13 }
  0x61   : > { %p8016_p12 = pnand %p8015_p9, %p8014_p7  ;;  %p8022_p8 = scmp.lt.u32.totalorder %s8013_s13, %s8331_s7 }
  0x62   : > { %p8021_p4 = por %p8020_p2, %p8019_p1 }
  0x63   : > { %p8017_p0 = pneg %p8016_p12 }
  0x64   : > { %p8023_p13 = por %p8022_p8, %p8021_p4 }
  0x66   : > { %p8024_p6 = pnand %p8023_p13, %p8017_p0 }
  0x68   : > { %8027 = shalt.err (!%p8024_p6)
}
  0x69   : > { %s8028_s16 = scalar_lea.vmem %s8333_s11, 3072  ;;  %s8124_s12 = smov [#allocation3]  }
  0x6a   : > { %p8029_p10 = scmp.ne.s32.totalorder %s8333_s11, %s8028_s16  ;;  %s8033_s10 = sshll.u32 %s8124_s12, 4  ;;  %s8034_s10 = int_to_ptr.vmem [resolvable:$false] %s8033_s10 }
  0x6b   : > { %s8035_s30 = scalar_lea.vmem %s8034_s10, 6144  ;;  %p8036_p12 = scmp.lt.s32.totalorder %s8333_s11, %s8034_s10 }
  0x6c   : > { %p8031_p3 = pnand %p8029_p10, %p8015_p9  ;;  %p8037_p1 = scmp.lt.s32.totalorder %s8035_s30, %s8028_s16 }
  0x6e   : > { %p8032_p7 = pneg %p8031_p3  ;;  %p8038_p2 = por %p8037_p1, %p8036_p12 }
  0x70   : > { %p8039_p4 = pnand %p8038_p2, %p8032_p7 }
  0x72   : > { %8042 = shalt.err (!%p8039_p4)
}
  0x73   : > { %s16186_s9 = smov 4   ;;  %s16187_s13 = smov 64  }
  0x74   : > { %7422 = dma.hbm_to_vmem [thread:$0]  (!%p8324_p11), %s8331_s7, 3072, %s8333_s11, %s8335_s8, %s16187_s13, %s16187_s13, %s16186_s9  }
  0x75   : > { %p16188_p9 = scmp.ne.s32.totalorder %s16180_s29, 0 }
  0x77   : > { %267 = sbr.rel (%p16188_p9) target bundleno = 1701 (0x6a5), region = 44 }
  0x7e   : > { %s8369_s17 = sand.u32 1, %s8109_s22   ;;  %p16189_p0 = scmp.ne.s32.totalorder %s16178_s27, 0 }
  0x7f   : > { %s7391_s20 = smul.u32 192, %s8369_s17  ;;  %s270_s26 = scalar_lea.sflag [#allocation4], %s8369_s17 }
  0x81   : > { %s8375_s19 = scalar_lea.vmem [#allocation3], %s7391_s20 }
  0x82   : > { %8088 = dma.done.wait (%p16189_p0), %s270_s26, 3072  }
  0x83   : > { %8090 = vsyncadd (%p16189_p0), %s270_s26, 4294964224  ;;  %p16190_p11 = scmp.eq.s32.totalorder %s8185_s25, 0 }
  0x85   : > { %8092 = dma.done.wait (%p16190_p11), [#allocation7], 2048   ;;  %p16191_p8 = pmov %p16190_p11 }
  0x87   : > { %8094 = vsyncadd (%p16191_p8), [#allocation7], 4294965248  ;;  %p16192_p13 = pmov %p16191_p8 }
  0x88   : > { %p16193_p6 = pmov %p16191_p8 }
  0x89   : > { %8096 = dma.done.wait (%p16192_p13), [#allocation10], 3072  }
  0x8a   : > { %8098 = vsyncadd (%p16193_p6), [#allocation10], 4294964224  ;;  %v1131_v0 = vlaneseq  ;;  %v15772_v1 = vmov 0   ;;  %v7477_v3 = vld [vmem:[#allocation6] sm:$0xff]   ;;  %v7478_v5 = vld [vmem:[#allocation6 + $0x8] sm:$0xff]   ;;  %s15450_s30 = scalar_lea.vmem [#allocation11], %s7391_s20 }
  0x8b   : > { %7476 = vset.pattern.permute.xlu1 %v15772_v1  ;;  %7475 = vset.pattern.permute.xlu0 %v15772_v1  ;;  %v7479_v7 = vld [vmem:[#allocation6 + $0x10] sm:$0xff]   ;;  %v7480_v12 = vld [vmem:[#allocation6 + $0x18] sm:$0xff]   ;;  %v7485_v14 = vld [vmem:[%s8375_s19] sm:$0xff]   ;;  %s7392_s20 = smul.u32 3072, %s8185_s25  ;;  %s6652_s26 = sshll.u32 %s15450_s30, 4  ;;  %s15712_s26 = int_to_ptr.vmem [resolvable:$true] %s6652_s26 }
  0x8c   : > { %v8391_v2 = vshrl.u32 %v1131_v0, 7  ;;  %7181 = vmatprep.subr.bf16.mxu0 %v7477_v3  ;;  %7373 = vmatprep.subr.bf16.mxu1 %v7477_v3  ;;  %v7486_v15 = vld [vmem:[%s8375_s19 + $0x40] sm:$0xff]   ;;  %v7482_v25 = vld [vmem:[#allocation6 + $0x28] sm:$0xff]   ;;  %v7483_v35 = vld [vmem:[#allocation6 + $0x30] sm:$0xff]   ;;  %s6639_s25 = scalar_lea.sflag [#allocation5], %s8369_s17  ;;  %s8043_s7 = scalar_lea.vmem %s15712_s26, 3072 }
  0x8d   : > { %7182 = vmatpush3.bf16.msra.mxu0 %v7477_v3  ;;  %7381 = vmatpush3.bf16.msra.mxu1 %v7477_v3  ;;  %v7481_v19 = vld [vmem:[#allocation6 + $0x20] sm:$0xff]   ;;  %v7484_v43 = vld [vmem:[#allocation6 + $0x38] sm:$0xff]   ;;  %v7487_v56 = vld [vmem:[%s8375_s19 + $0x8] sm:$0xff]   ;;  %s15710_s29 = scalar_lea.hbm %s15763_s6, %s7392_s20  ;;  %p8044_p10 = scmp.ne.s32.totalorder %s15712_s26, %s8043_s7 }
  0x8e   : > { %v8394_v4 = vadd.s32 8, %v8391_v2  ;;  %v8397_v6 = vadd.s32 16, %v8391_v2  ;;  %7183 = vmatprep.subr.bf16.mxu0 %v7478_v5  ;;  %7374 = vmatprep.subr.bf16.mxu1 %v7478_v5  ;;  %vm1138_vm0 = vcmp.lt.s32.totalorder %v8391_v2, 1  ;;  %v1135_v10 = vrot.slane %v8391_v2, 7  ;;  %v7488_v57 = vld [vmem:[%s8375_s19 + $0x48] sm:$0xff]   ;;  %v7489_v59 = vld [vmem:[%s8375_s19 + $0x10] sm:$0xff]  }
  0x8f   : > { %v1163_v11 = vrot.slane %v8391_v2, 6  ;;  %vm15770_vm1 = vcmp.lt.s32.totalorder %v8391_v2, 2  ;;  %7197 = vmatprep.mubr.bf16.mxu0 %v7485_v14  ;;  %7213 = vmatprep.mubr.bf16.mxu1 %v7486_v15  ;;  %vm15769_vm2 = vcmp.lt.s32.totalorder %v8391_v2, 6  ;;  %vm15771_vm3 = vcmp.lt.s32.totalorder %v8391_v2, 7  ;;  %v7490_v63 = vld [vmem:[%s8375_s19 + $0x50] sm:$0xff]   ;;  %p8045_p3 = pnand %p8044_p10, %p8318_p5  ;;  %s8126_s11 = smov [#allocation11]  }
  0x90   : > { %v1136_v8 = vrot.slane %v8394_v4, 7  ;;  %v1137_v9 = vrot.slane %v8397_v6, 7  ;;  %v1165_v13 = vrot.slane %v8397_v6, 6  ;;  %v1164_v21 = vrot.slane %v8394_v4, 6  ;;  %s8047_s8 = sshll.u32 %s8126_s11, 4  ;;  %s8048_s8 = int_to_ptr.vmem [resolvable:$false] %s8047_s8 }
  0x91   : > { %7184 = vmatpush3.bf16.msra.mxu0 %v7478_v5  ;;  %7382 = vmatpush3.bf16.msra.mxu1 %v7478_v5  ;;  %v1192_v28 = vrot.slane %v8394_v4, 2  ;;  %v1193_v34 = vrot.slane %v8397_v6, 2  ;;  %v1191_v39 = vrot.slane %v8391_v2, 2  ;;  %v1219_v50 = vrot.slane %v8391_v2, 1  ;;  %p8046_p7 = pneg %p8045_p3  ;;  %s8049_s16 = scalar_lea.vmem %s8048_s8, 6144 }
  0x92   : > { %7185 = vmatprep.subr.bf16.mxu0 %v7479_v7  ;;  %7375 = vmatprep.subr.bf16.mxu1 %v7479_v7  ;;  %v8410_v16 = vsel %vm1138_vm0, %v1136_v8, %v1137_v9  ;;  %v8414_v17 = vsel %vm1138_vm0, %v1137_v9, %v1135_v10  ;;  %v8418_v18 = vsel %vm15770_vm1, %v1165_v13, %v1163_v11  ;;  %v1220_v55 = vrot.slane %v8394_v4, 1  ;;  %p8050_p12 = scmp.lt.s32.totalorder %s15712_s26, %s8048_s8  ;;  %p8051_p1 = scmp.lt.s32.totalorder %s8049_s16, %s8043_s7 }
  0x93   : > { %v1144_v20 = vsub.s32 %v8410_v16, %v8397_v6  ;;  %v1142_v22 = vsub.s32 %v8414_v17, %v8391_v2  ;;  %v1170_v23 = vsub.s32 %v8418_v18, %v8391_v2  ;;  %v8429_v24 = vsel %vm1138_vm0, %v1135_v10, %v1136_v8 }
  0x94   : > { %v8433_v27 = vsel %vm15770_vm1, %v1164_v21, %v1165_v13  ;;  %v1143_v31 = vsub.s32 %v8429_v24, %v8394_v4  ;;  %v8441_v32 = vsel %vm15770_vm1, %v1163_v11, %v1164_v21  ;;  %vm1159_vm4 = vcmp.lt.s32.totalorder %v8410_v16, 20  ;;  %p8052_p2 = por %p8051_p1, %p8050_p12 }
  0x95   : > { %7186 = vmatpush3.bf16.msra.mxu0 %v7479_v7  ;;  %7383 = vmatpush3.bf16.msra.mxu1 %v7479_v7  ;;  %v1152_v26 = vsub.s32 0, %v1144_v20  ;;  %v1146_v29 = vsub.s32 0, %v1142_v22  ;;  %v1174_v30 = vsub.s32 0, %v1170_v23  ;;  %v1172_v33 = vsub.s32 %v8433_v27, %v8397_v6 }
  0x96   : > { %7187 = vmatprep.subr.bf16.mxu0 %v7480_v12  ;;  %7376 = vmatprep.subr.bf16.mxu1 %v7480_v12  ;;  %v1171_v37 = vsub.s32 %v8441_v32, %v8394_v4  ;;  %v8452_v38 = vsel %vm15769_vm2, %v1192_v28, %v1193_v34  ;;  %vm1157_vm5 = vcmp.lt.s32.totalorder %v8414_v17, 20  ;;  %v1149_v42 = vsub.s32 0, %v1143_v31  ;;  %p8053_p4 = pnand %p8052_p2, %p8046_p7 }
  0x97   : > { %v6800_v36 = vmin.u32 %v1152_v26, %v1144_v20  ;;  %v6798_v40 = vmin.u32 %v1146_v29, %v1142_v22  ;;  %v6801_v41 = vmin.u32 %v1174_v30, %v1170_v23  ;;  %v1180_v44 = vsub.s32 0, %v1172_v33  ;;  %v7494_v22 = vld [vmem:[%s8375_s19 + $0x60] sm:$0xff]  }
  0x98   : > { %v1199_v45 = vsub.s32 %v8452_v38, %v8394_v4  ;;  %v8460_v46 = vsel %vm15769_vm2, %v1191_v39, %v1192_v28  ;;  %v8464_v47 = vsel %vm15769_vm2, %v1193_v34, %v1191_v39  ;;  %vm1185_vm7 = vcmp.lt.s32.totalorder %v8418_v18, 20  ;;  %v7491_v18 = vld [vmem:[%s8375_s19 + $0x18] sm:$0xff]  }
  0x99   : > { %7188 = vmatpush3.bf16.msra.mxu0 %v7480_v12  ;;  %7384 = vmatpush3.bf16.msra.mxu1 %v7480_v12  ;;  %vm1156_vm6 = vcmp.le.s32.totalorder %v6800_v36, 2  ;;  %v1198_v48 = vsub.s32 %v8460_v46, %v8391_v2  ;;  %v1177_v49 = vsub.s32 0, %v1171_v37  ;;  %v1200_v51 = vsub.s32 %v8464_v47, %v8397_v6  ;;  %v7495_v36 = vld [vmem:[%s8375_s19 + $0x28] sm:$0xff]  }
  0x9a   : > { %7189 = vmatprep.subr.bf16.mxu0 %v7481_v19  ;;  %7377 = vmatprep.subr.bf16.mxu1 %v7481_v19  ;;  %vm1154_vm8 = vcmp.le.s32.totalorder %v6798_v40, 2  ;;  %vm1182_vm9 = vcmp.le.s32.totalorder %v6801_v41, 2  ;;  %v6799_v52 = vmin.u32 %v1149_v42, %v1143_v31  ;;  %v6803_v53 = vmin.u32 %v1180_v44, %v1172_v33  ;;  %vm1162_vm14 = vmand %vm1156_vm6, %vm1159_vm4  ;;  %v7497_v40 = vld [vmem:[%s8375_s19 + $0x30] sm:$0xff]   ;;  %v7499_v42 = vld [vmem:[%s8375_s19 + $0x38] sm:$0xff]  }
  0x9b   : > { %v1205_v54 = vsub.s32 0, %v1199_v45  ;;  %v1202_v58 = vsub.s32 0, %v1198_v48  ;;  %vm1158_vm10 = vcmp.lt.s32.totalorder %v8429_v24, 20  ;;  %v6802_v60 = vmin.u32 %v1177_v49, %v1171_v37  ;;  %vm1160_vm2 = vmand %vm1154_vm8, %vm1157_vm5  ;;  %v7496_v37 = vld [vmem:[%s8375_s19 + $0x68] sm:$0xff]   ;;  %v7498_v41 = vld [vmem:[%s8375_s19 + $0x70] sm:$0xff]  }
  0x9c   : > { %v1224_v61 = vsel %vm15771_vm3, %v1219_v50, %v1220_v55  ;;  %v1208_v62 = vsub.s32 0, %v1200_v51  ;;  %vm1187_vm11 = vcmp.lt.s32.totalorder %v8433_v27, 20  ;;  %vm1155_vm12 = vcmp.le.s32.totalorder %v6799_v52, 2  ;;  %vm1188_vm4 = vmand %vm1182_vm9, %vm1185_vm7  ;;  %v7501_v44 = vld [vmem:[%s8375_s19 + $0x80] sm:$0xff]   ;;  %v7506_v49 = vld [vmem:[%s8375_s19 + $0xa8] sm:$0xff]  }
  0x9d   : > { %7190 = vmatpush3.bf16.msra.mxu0 %v7481_v19  ;;  %7385 = vmatpush3.bf16.msra.mxu1 %v7481_v19  ;;  %v1226_v0 = vsub.s32 %v1224_v61, %v8391_v2  ;;  %vm1184_vm13 = vcmp.le.s32.totalorder %v6803_v53, 2  ;;  %v6805_v3 = vmin.u32 %v1205_v54, %v1199_v45  ;;  %vm1186_vm15 = vcmp.lt.s32.totalorder %v8441_v32, 20  ;;  %vm8503_vm5 = vmand %vm1155_vm12, %vm1158_vm10  ;;  %v7492_v19 = vld [vmem:[%s8375_s19 + $0x58] sm:$0xff]   ;;  %v7502_v45 = vld [vmem:[%s8375_s19 + $0x88] sm:$0xff]  }
  0x9e   : > { %7191 = vmatprep.subr.bf16.mxu0 %v7482_v25  ;;  %7378 = vmatprep.subr.bf16.mxu1 %v7482_v25  ;;  %v6804_v5 = vmin.u32 %v1202_v58, %v1198_v48  ;;  %v1221_v8 = vrot.slane %v8397_v6, 1  ;;  %v1358_v9 = vsel %vm1162_vm14, 1, %v15772_v1  ;;  %vm1183_vm1 = vcmp.le.s32.totalorder %v6802_v60, 2  ;;  %vm8516_vm7 = vmand %vm1184_vm13, %vm1187_vm11  ;;  %v7505_v48 = vld [vmem:[%s8375_s19 + $0xa0] sm:$0xff]  }
  0x9f   : > { %v1230_v7 = vsub.s32 0, %v1226_v0  ;;  %v6806_v10 = vmin.u32 %v1208_v62, %v1200_v51  ;;  %v1356_v11 = vsel %vm1160_vm2, 1, %v15772_v1  ;;  %vm1211_vm2 = vcmp.le.s32.totalorder %v6805_v3, 2  ;;  %1366 = vperm.xlu1 %7476, %v1358_v9   ;;  %vm8529_vm12 = vmand %vm1183_vm1, %vm1186_vm15  ;;  %v7508_v51 = vld [vmem:[%s8375_s19 + $0xb8] sm:$0xff]   ;;  %v8581_v52 = vld [vmem:[%s15759_s2] ss:$0 sm:$0xff] }
  0xa0   : > { %v1225_v13 = vsel %vm15771_vm3, %v1221_v8, %v1219_v50  ;;  %v1223_v14 = vsel %vm15771_vm3, %v1220_v55, %v1221_v8  ;;  %vm1214_vm6 = vcmp.lt.s32.totalorder %v8452_v38, 20  ;;  %1360 = vperm.xlu0 %7475, %v1356_v11   ;;  %v1563_v20 = vsel %vm1188_vm4, 1, %v15772_v1  ;;  %v7507_v50 = vld [vmem:[%s8375_s19 + $0xb0] sm:$0xff]   ;;  %16204 = vst [vmem:[#allocation16_spill] sm:$0xff] %v8581_v52 }
  0xa1   : > { %7192 = vmatpush3.bf16.msra.mxu0 %v7482_v25  ;;  %7386 = vmatpush3.bf16.msra.mxu1 %v7482_v25  ;;  %v6807_v12 = vmin.u32 %v1230_v7, %v1226_v0  ;;  %v1228_v16 = vsub.s32 %v1225_v13, %v8397_v6  ;;  %v1227_v17 = vsub.s32 %v1223_v14, %v8394_v4  ;;  %vm1210_vm8 = vcmp.le.s32.totalorder %v6804_v5, 2  ;;  %v7493_v6 = vld [vmem:[%s8375_s19 + $0x20] sm:$0xff]   ;;  %vm8536_vm13 = vmand %vm1211_vm2, %vm1214_vm6 }
  0xa2   : > { %7193 = vmatprep.subr.bf16.mxu0 %v7483_v35  ;;  %7379 = vmatprep.subr.bf16.mxu1 %v7483_v35  ;;  %vm1213_vm9 = vcmp.lt.s32.totalorder %v8460_v46, 20  ;;  %vm1241_vm10 = vcmp.lt.s32.totalorder %v1224_v61, 20  ;;  %v1357_v4 = vsel %vm8503_vm5, 1, %v15772_v1  ;;  %vm1212_vm14 = vcmp.le.s32.totalorder %v6806_v10, 2  ;;  %v7503_v46 = vld [vmem:[%s8375_s19 + $0x90] sm:$0xff]  }
  0xa3   : > { %vm1238_vm11 = vcmp.le.s32.totalorder %v6807_v12, 2  ;;  %v1236_v24 = vsub.s32 0, %v1228_v16  ;;  %v1233_v25 = vsub.s32 0, %v1227_v17  ;;  %vm1215_vm4 = vcmp.lt.s32.totalorder %v8464_v47, 20  ;;  %vm8541_vm5 = vmand %vm1210_vm8, %vm1213_vm9  ;;  %1567 = vperm.xlu1 %7476, %v1563_v20   ;;  %v7504_v47 = vld [vmem:[%s8375_s19 + $0x98] sm:$0xff]  }
  0xa4   : > { %vm1243_vm1 = vcmp.lt.s32.totalorder %v1225_v13, 20  ;;  %1363 = vperm.xlu0 %7475, %v1357_v4   ;;  %vm1244_vm15 = vmand %vm1238_vm11, %vm1241_vm10  ;;  %vm1242_vm3 = vcmp.lt.s32.totalorder %v1223_v14, 20  ;;  %v1565_v30 = vsel %vm8516_vm7, 1, %v15772_v1  ;;  %v1564_v31 = vsel %vm8529_vm12, 1, %v15772_v1 }
  0xa5   : > { %7194 = vmatpush3.bf16.msra.mxu0 %v7483_v35  ;;  %7387 = vmatpush3.bf16.msra.mxu1 %v7483_v35  ;;  %v6809_v28 = vmin.u32 %v1236_v24, %v1228_v16  ;;  %v6808_v29 = vmin.u32 %v1233_v25, %v1227_v17  ;;  %vm1218_vm2 = vmand %vm1212_vm14, %vm1215_vm4  ;;  %v1771_v32 = vsel %vm8536_vm13, 1, %v15772_v1  ;;  %v1770_v33 = vsel %vm8541_vm5, 1, %v15772_v1 }
  0xa6   : > { %7195 = vmatprep.subr.bf16.mxu0 %v7484_v43  ;;  %7380 = vmatprep.subr.bf16.mxu1 %v7484_v43  ;;  %v1977_v34 = vsel %vm1244_vm15, 1, %v15772_v1  ;;  %v1772_v35 = vsel %vm1218_vm2, 1, %v15772_v1  ;;  %vm16227_vm10 = vcmp.lt.s32.totalorder %v8391_v2, 6  ;;  %vm16230_vm12 = vcmp.lt.s32.totalorder %v8391_v2, 7 }
  0xa7   : > { %vm1240_vm6 = vcmp.le.s32.totalorder %v6809_v28, 2  ;;  %vm1239_vm8 = vcmp.le.s32.totalorder %v6808_v29, 2  ;;  %1573 = vperm.xlu1 %7476, %v1565_v30   ;;  %v7509_v28 = vld [vmem:[#allocation9] sm:$0xff]   ;;  %vm16243_vm14 = vmmov %vm16227_vm10 }
  0xa8   : > { %vm1246_vm7 = vmand %vm1240_vm6, %vm1243_vm1  ;;  %1570 = vperm.xlu0 %7475, %v1564_v31  }
  0xa9   : > { %7196 = vmatpush3.bf16.msra.mxu0 %v7484_v43  ;;  %7388 = vmatpush3.bf16.msra.mxu1 %v7484_v43  ;;  %vm1245_vm9 = vmand %vm1239_vm8, %vm1242_vm3  ;;  %v1979_v38 = vsel %vm1246_vm7, 1, %v15772_v1  ;;  %v7500_v43 = vld [vmem:[%s8375_s19 + $0x78] sm:$0xff]   ;;  %vm16226_vm3 = vcmp.lt.s32.totalorder %v8391_v2, 2 }
  0xaa   : > { %5332 = vmatprep.subr.bf16.mxu1 %v15772_v1  ;;  %v1978_v39 = vsel %vm1245_vm9, 1, %v15772_v1  ;;  %vm16240_vm13 = vmmov %vm16226_vm3 }
  0xab   : > { %1777 = vperm.xlu1 %7476, %v1771_v32   ;;  %vm16247_vm4 = vmmov %vm16230_vm12 }
  0xac   : > { %7198 = vmatmul.mubr.bf16.vlgmr.msra.gmra.mrb[0].mxu0 %v7487_v56  ;;  %7214 = vmatmul.mubr.bf16.vlgmr.msra.gmra.mrb[0].mxu1 %v7488_v57  ;;  %vm16252_vm5 = vmmov %vm16226_vm3 }
  0xad   : > { %7201 = vmatprep.mubr.bf16.mxu0 %v7489_v59  ;;  %7217 = vmatprep.mubr.bf16.mxu1 %v7490_v63  ;;  %vm16253_vm1 = vmmov %vm16226_vm3 }
  0xae   : > { %1774 = vperm.xlu0 %7475, %v1770_v33   ;;  %5333 = vmatpush1.bf16.msra.mxu1 %v7509_v28  ;;  %vm16255_vm15 = vmmov %vm16227_vm10 }
  0xaf   : > { %1981 = vperm.xlu1 %7476, %v1977_v34   ;;  %5334 = vmatprep.subr.bf16.mxu1 %v15772_v1  ;;  %vm16257_vm2 = vmmov %vm16227_vm10 }
  0xb0   : > { %vm16260_vm6 = vmmov %vm16247_vm4 }
  0xb1   : > { %vm16262_vm8 = vmmov %vm16247_vm4 }
  0xb2   : > { %1780 = vperm.xlu0 %7475, %v1772_v35   ;;  %vm16268_vm7 = vmmov %vm16253_vm1 }
  0xb3   : > { %1987 = vperm.xlu1 %7476, %v1979_v38   ;;  %vm16271_vm9 = vmmov %vm16257_vm2 }
  0xb4   : > { %7202 = vmatmul.mubr.bf16.gmra.mrb[4].mxu0 %v7491_v18  ;;  %7218 = vmatmul.mubr.bf16.gmra.mrb[4].mxu1 %v7492_v19 }
  0xb5   : > { %7205 = vmatprep.mubr.bf16.mxu0 %v7493_v6  ;;  %7221 = vmatprep.mubr.bf16.mxu1 %v7494_v22 }
  0xb6   : > { %1984 = vperm.xlu0 %7475, %v1978_v39  }
  0xbc   : > { %7206 = vmatmul.mubr.bf16.gmra.mrb[8].mxu0 %v7495_v36  ;;  %7222 = vmatmul.mubr.bf16.gmra.mrb[8].mxu1 %v7496_v37 }
  0xbd   : > { %7209 = vmatprep.mubr.bf16.mxu0 %v7497_v40  ;;  %7225 = vmatprep.mubr.bf16.mxu1 %v7498_v41 }
  0xc4   : > { %7210 = vmatmul.mubr.bf16.gmra.mrb[12].mxu0 %v7499_v42  ;;  %7226 = vmatmul.mubr.bf16.gmra.mrb[12].mxu1 %v7500_v43 }
  0xc5   : > { %7229 = vmatprep.mubr.bf16.mxu1 %v7501_v44 }
  0xcc   : > { %7230 = vmatmul.mubr.bf16.gmra.mrb[16].mxu1 %v7502_v45 }
  0xcd   : > { %7233 = vmatprep.mubr.bf16.mxu1 %v7503_v46 }
  0xd4   : > { %7234 = vmatmul.mubr.bf16.gmra.mrb[20].mxu1 %v7504_v47 }
  0xd5   : > { %7237 = vmatprep.mubr.bf16.mxu1 %v7505_v48 }
  0xdc   : > { %7238 = vmatmul.mubr.bf16.gmra.mrb[24].mxu1 %v7506_v49 }
  0xdd   : > { %7241 = vmatprep.mubr.bf16.mxu1 %v7507_v50 }
  0xe4   : > { %7242 = vmatmul.mubr.bf16.gmra.mrb[28].mxu1 %v7508_v51 }
 0x17f   : > { %v7199_v53 = vpop.f32.mrb[0].mxu0  ;;  %v7215_v54 = vpop.f32.mrb[0].mxu1 }
 0x180   : > { %v8584_v55 = vadd.f32 %v7199_v53, %v8581_v52  ;;  %v8587_v56 = vadd.f32 %v7215_v54, %v8581_v52  ;;  %v612_v57 = vpop.f32.mrb[1].mxu0  ;;  %v676_v58 = vpop.f32.mrb[1].mxu1 }
 0x181   : > { %v8590_v59 = vadd.f32 %v8581_v52, %v612_v57  ;;  %v8593_v60 = vadd.f32 %v8581_v52, %v676_v58  ;;  %v7200_v61 = vpop.f32.mrb[2].mxu0  ;;  %v7216_v62 = vpop.f32.mrb[2].mxu1 }
 0x182   : > { %v805_v63 = vsub.f32 0.0, %v8584_v55  ;;  %v821_v0 = vsub.f32 0.0, %v8587_v56  ;;  %v8598_v3 = vadd.f32 %v7200_v61, %v8581_v52  ;;  %v8601_v5 = vadd.f32 %v7216_v62, %v8581_v52  ;;  %v615_v7 = vpop.f32.mrb[3].mxu0  ;;  %v679_v8 = vpop.f32.mrb[3].mxu1 }
 0x183   : > { %v803_v9 = vsub.f32 0.0, %v8590_v59  ;;  %v819_v10 = vsub.f32 0.0, %v8593_v60  ;;  %v8606_v11 = vadd.f32 %v8581_v52, %v615_v7  ;;  %v8609_v12 = vadd.f32 %v8581_v52, %v679_v8 }
 0x184   : > { %v855_v13 = vmul.f32 1.442695, %v805_v63  ;;  %v887_v14 = vmul.f32 1.442695, %v821_v0  ;;  %v806_v15 = vsub.f32 0.0, %v8598_v3  ;;  %v822_v16 = vsub.f32 0.0, %v8601_v5 }
 0x185   : > { %v851_v17 = vmul.f32 1.442695, %v803_v9  ;;  %v883_v18 = vmul.f32 1.442695, %v819_v10  ;;  %v804_v19 = vsub.f32 0.0, %v8606_v11  ;;  %v820_v20 = vsub.f32 0.0, %v8609_v12 }
 0x186   : > { %7541 = vpow2.f32 %v855_v13  ;;  %v857_v21 = vmul.f32 1.442695, %v806_v15  ;;  %v889_v6 = vmul.f32 1.442695, %v822_v16 }
 0x187   : > { %7543 = vpow2.f32 %v887_v14  ;;  %v7203_v22 = vpop.f32.mrb[4].mxu0  ;;  %v7219_v4 = vpop.f32.mrb[4].mxu1  ;;  %v853_v23 = vmul.f32 1.442695, %v804_v19  ;;  %v885_v29 = vmul.f32 1.442695, %v820_v20 }
 0x188   : > { %7545 = vpow2.f32 %v851_v17  ;;  %v8616_v24 = vadd.f32 %v7203_v22, %v8581_v52  ;;  %v8619_v25 = vadd.f32 %v7219_v4, %v8581_v52  ;;  %v628_v26 = vpop.f32.mrb[5].mxu0  ;;  %v692_v27 = vpop.f32.mrb[5].mxu1 }
 0x189   : > { %7547 = vpow2.f32 %v883_v18  ;;  %v8622_v30 = vadd.f32 %v8581_v52, %v628_v26  ;;  %v8625_v31 = vadd.f32 %v8581_v52, %v692_v27  ;;  %v7204_v32 = vpop.f32.mrb[6].mxu0  ;;  %v7220_v33 = vpop.f32.mrb[6].mxu1 }
 0x18a   : > { %7549 = vpow2.f32 %v857_v21  ;;  %v809_v34 = vsub.f32 0.0, %v8616_v24  ;;  %v825_v35 = vsub.f32 0.0, %v8619_v25  ;;  %v8630_v36 = vadd.f32 %v7204_v32, %v8581_v52  ;;  %v631_v37 = vpop.f32.mrb[7].mxu0  ;;  %v695_v38 = vpop.f32.mrb[7].mxu1 }
 0x18b   : > { %7551 = vpow2.f32 %v889_v6  ;;  %v807_v39 = vsub.f32 0.0, %v8622_v30  ;;  %v823_v40 = vsub.f32 0.0, %v8625_v31  ;;  %v8635_v41 = vadd.f32 %v7220_v33, %v8581_v52 }
 0x18c   : > { %7553 = vpow2.f32 %v853_v23  ;;  %v863_v42 = vmul.f32 1.442695, %v809_v34  ;;  %v895_v43 = vmul.f32 1.442695, %v825_v35  ;;  %v810_v44 = vsub.f32 0.0, %v8630_v36 }
 0x18d   : > { %7555 = vpow2.f32 %v885_v29  ;;  %v859_v45 = vmul.f32 1.442695, %v807_v39  ;;  %v891_v46 = vmul.f32 1.442695, %v823_v40  ;;  %v826_v47 = vsub.f32 0.0, %v8635_v41 }
 0x18e   : > { %7557 = vpow2.f32 %v863_v42  ;;  %v865_v48 = vmul.f32 1.442695, %v810_v44  ;;  %v8641_v49 = vadd.f32 %v8581_v52, %v631_v37  ;;  %v8644_v50 = vadd.f32 %v8581_v52, %v695_v38 }
 0x18f   : > { %7559 = vpow2.f32 %v895_v43  ;;  %v8646_v51 = vmul.f32 1.442695, %v826_v47  ;;  %v7207_v53 = vpop.f32.mrb[8].mxu0  ;;  %v7223_v54 = vpop.f32.mrb[8].mxu1 }
 0x190   : > { %v7542_v57 = vpop.eup %7541  ;;  %7561 = vpow2.f32 %v859_v45  ;;  %v808_v58 = vsub.f32 0.0, %v8641_v49  ;;  %v824_v61 = vsub.f32 0.0, %v8644_v50  ;;  %v8651_v62 = vadd.f32 %v7207_v53, %v8581_v52  ;;  %v644_v63 = vpop.f32.mrb[9].mxu0 }
 0x191   : > { %v708_v0 = vpop.f32.mrb[9].mxu1  ;;  %v7544_v7 = vpop.eup %7543  ;;  %v949_v8 = vadd.f32 1.0, %v7542_v57  ;;  %7563 = vpow2.f32 %v891_v46  ;;  %v8654_v9 = vadd.f32 %v7223_v54, %v8581_v52  ;;  %v8657_v10 = vadd.f32 %v8581_v52, %v644_v63 }
 0x192   : > { %v7208_v13 = vpop.f32.mrb[10].mxu0  ;;  %v7224_v14 = vpop.f32.mrb[10].mxu1  ;;  %v965_v16 = vadd.f32 1.0, %v7544_v7  ;;  %7565 = vpow2.f32 %v865_v48  ;;  %v8659_v17 = vmul.f32 1.442695, %v808_v58  ;;  %v813_v6 = vsub.f32 0.0, %v8651_v62 }
 0x193   : > { %16205 = vst [vmem:[#allocation17_spill] sm:$0xff] %v8657_v10  ;;  %v7546_v15 = vpop.eup %7545  ;;  %v8661_v18 = vmul.f32 1.442695, %v824_v61  ;;  %v647_v19 = vpop.f32.mrb[11].mxu0  ;;  %7567 = vrcp.f32 %v949_v8  ;;  %v829_v22 = vsub.f32 0.0, %v8654_v9  ;;  %v811_v27 = vsub.f32 0.0, %v8657_v10 }
 0x194   : > { %v7548_v20 = vpop.eup %7547  ;;  %v947_v21 = vadd.f32 1.0, %v7546_v15  ;;  %v711_v4 = vpop.f32.mrb[11].mxu1  ;;  %7569 = vrcp.f32 %v965_v16  ;;  %v8667_v28 = vadd.f32 %v8581_v52, %v708_v0  ;;  %v8669_v33 = vmul.f32 1.442695, %v813_v6  ;;  %v7510_v6 = vld [vmem:[#allocation9 + $0x8] sm:$0xff]  }
 0x195   : > { %v7550_v23 = vpop.eup %7549  ;;  %v963_v26 = vadd.f32 1.0, %v7548_v20  ;;  %v8671_v34 = vmul.f32 1.442695, %v829_v22  ;;  %v8673_v38 = vmul.f32 1.442695, %v811_v27  ;;  %v8677_v43 = vadd.f32 %v7208_v13, %v8581_v52  ;;  %5335 = vmatpush1.bf16.msra.mxu1 %v7510_v6 }
 0x196   : > { %16206 = vst [vmem:[#allocation18_spill] sm:$0xff] %v8667_v28  ;;  %v7552_v29 = vpop.eup %7551  ;;  %7571 = vrcp.f32 %v947_v21  ;;  %v950_v32 = vadd.f32 1.0, %v7550_v23  ;;  %v827_v39 = vsub.f32 0.0, %v8667_v28  ;;  %v8680_v44 = vadd.f32 %v7224_v14, %v8581_v52  ;;  %5336 = vmatprep.subr.bf16.mxu1 %v15772_v1 }
 0x197   : > { %v7554_v35 = vpop.eup %7553  ;;  %7573 = vrcp.f32 %v963_v26  ;;  %v966_v37 = vadd.f32 1.0, %v7552_v29  ;;  %16207 = vst [vmem:[#allocation19_spill] sm:$0xff] %v8677_v43  ;;  %v7211_v45 = vpop.f32.mrb[12].mxu0  ;;  %v8685_v54 = vadd.f32 %v8581_v52, %v647_v19  ;;  %v814_v0 = vsub.f32 0.0, %v8677_v43 }
 0x198   : > { %v7556_v40 = vpop.eup %7555  ;;  %7575 = vrcp.f32 %v950_v32  ;;  %v948_v42 = vadd.f32 1.0, %v7554_v35  ;;  %16208 = vst [vmem:[#allocation20_spill] sm:$0xff] %v8680_v44  ;;  %v7227_v46 = vpop.f32.mrb[12].mxu1  ;;  %v8682_v53 = vmul.f32 1.442695, %v827_v39  ;;  %v830_v7 = vsub.f32 0.0, %v8680_v44 }
 0x199   : > { %v7558_v47 = vpop.eup %7557  ;;  %7577 = vrcp.f32 %v966_v37  ;;  %v964_v48 = vadd.f32 1.0, %v7556_v40  ;;  %16209 = vst [vmem:[#allocation21_spill] sm:$0xff] %v8685_v54  ;;  %v660_v57 = vpop.f32.mrb[13].mxu0  ;;  %v812_v16 = vsub.f32 0.0, %v8685_v54  ;;  %v8697_v19 = vadd.f32 %v8581_v52, %v711_v4 }
 0x19a   : > { %v8687_v58 = vpop.f32.mrb[13].mxu1  ;;  %v7560_v61 = vpop.eup %7559  ;;  %7579 = vrcp.f32 %v948_v42  ;;  %v953_v63 = vadd.f32 1.0, %v7558_v47  ;;  %v8703_v26 = vmul.f32 1.442695, %v814_v0  ;;  %v8705_v27 = vmul.f32 1.442695, %v830_v7 }
 0x19b   : > { %v8691_v8 = vpop.f32.mrb[14].mxu0  ;;  %v8693_v13 = vpop.f32.mrb[14].mxu1  ;;  %7581 = vrcp.f32 %v964_v48  ;;  %v969_v15 = vadd.f32 1.0, %v7560_v61  ;;  %16212 = vst [vmem:[#allocation24_spill] sm:$0xff] %v8697_v19  ;;  %v8707_v35 = vmul.f32 1.442695, %v812_v16  ;;  %v8711_v40 = vadd.f32 %v7211_v45, %v8581_v52 }
 0x19c   : > { %16210 = vst [vmem:[#allocation22_spill] sm:$0xff] %v8691_v8  ;;  %16211 = vst [vmem:[#allocation23_spill] sm:$0xff] %v8693_v13  ;;  %v7562_v14 = vpop.eup %7561  ;;  %v8699_v20 = vpop.f32.mrb[15].mxu0  ;;  %7583 = vrcp.f32 %v953_v63  ;;  %v828_v4 = vsub.f32 0.0, %v8697_v19  ;;  %v8714_v42 = vadd.f32 %v7227_v46, %v8581_v52  ;;  %v8723_v63 = vadd.f32 %v8581_v52, %v660_v57 }
 0x19d   : > { %16213 = vst [vmem:[#allocation25_spill] sm:$0xff] %v8699_v20  ;;  %v8701_v21 = vpop.f32.mrb[15].mxu1  ;;  %v7564_v22 = vpop.eup %7563  ;;  %v951_v23 = vadd.f32 1.0, %v7562_v14  ;;  %7585 = vrcp.f32 %v969_v15  ;;  %16215 = vst [vmem:[#allocation27_spill] sm:$0xff] %v8711_v40  ;;  %v817_v45 = vsub.f32 0.0, %v8711_v40 }
 0x19e   : > { %16214 = vst [vmem:[#allocation26_spill] sm:$0xff] %v8701_v21  ;;  %v7566_v29 = vpop.eup %7565  ;;  %v967_v32 = vadd.f32 1.0, %v7564_v22  ;;  %16216 = vst [vmem:[#allocation28_spill] sm:$0xff] %v8714_v42  ;;  %v8720_v61 = vmul.f32 1.442695, %v828_v4  ;;  %v833_v46 = vsub.f32 0.0, %v8714_v42  ;;  %v8796_v21 = vpop.permute.xlu1 %1366 }
 0x19f   : > { %v7568_v37 = vpop.eup %7567  ;;  %7587 = vrcp.f32 %v951_v23  ;;  %v954_v39 = vadd.f32 1.0, %v7566_v29  ;;  %16218 = vst [vmem:[#allocation30_spill] sm:$0xff] %v8723_v63  ;;  %v8730_v14 = vpop.f32.mrb[16].mxu1  ;;  %vm1370_vm11 = vcmp.eq.s32.totalorder %v8796_v21, 1 }
 0x1a0   : > { %v7570_v47 = vpop.eup %7569  ;;  %v8718_v48 = vmul.f32 %v7568_v37, %v8584_v55  ;;  %7589 = vrcp.f32 %v967_v32  ;;  %16220 = vst [vmem:[#allocation32_spill] sm:$0xff] %v8730_v14  ;;  %v8736_v22 = vpop.f32.mrb[17].mxu1  ;;  %v8756_v32 = vmul.f32 1.442695, %v817_v45  ;;  %v8758_v4 = vmul.f32 1.442695, %v833_v46 }
 0x1a1   : > { %v7572_v0 = vpop.eup %7571  ;;  %v8726_v7 = vmul.f32 %v7570_v47, %v8587_v56  ;;  %7591 = vrcp.f32 %v954_v39  ;;  %16221 = vst [vmem:[#allocation33_spill] sm:$0xff] %v8736_v22  ;;  %v8855_v44 = vpop.permute.xlu0 %1360 }
 0x1a2   : > { %16217 = vst [vmem:[#allocation29_spill] sm:$0xff] %v8718_v48  ;;  %v7574_v15 = vpop.eup %7573  ;;  %v15774_v55 = vrot.slane %v8718_v48, 7  ;;  %v15775_v16 = vrot.slane %v8718_v48, 6  ;;  %v15777_v6 = vrot.slane %v8718_v48, 2  ;;  %v8743_v39 = vmul.f32 %v7572_v0, %v8590_v59  ;;  %16249 = vst [vmem:[#allocation46_spill] sm:$0xff] %v8855_v44  ;;  %v8929_v10 = vpop.permute.xlu1 %1567 }
 0x1a3   : > { %16219 = vst [vmem:[#allocation31_spill] sm:$0xff] %v8726_v7  ;;  %v7576_v56 = vpop.eup %7575  ;;  %v8746_v47 = vmul.f32 %v7574_v15, %v8593_v60  ;;  %7593 = vpow2.f32 %v8646_v51  ;;  %v16229_v45 = vrot.slane %v8718_v48, 1  ;;  %v16237_v40 = vrot.slane %v8726_v7, 7  ;;  %16277 = vst [vmem:[#allocation53_spill] sm:$0xff] %v8929_v10 }
 0x1a4   : > { %v7578_v37 = vpop.eup %7577  ;;  %16222 = vst [vmem:[#allocation34_spill] sm:$0xff] %v8743_v39  ;;  %v8749_v1 = vmul.f32 %v7576_v56, %v8598_v3  ;;  %7595 = vpow2.f32 %v8659_v17  ;;  %v1260_v0 = vrot.slane %v8743_v39, 7  ;;  %v1467_v60 = vrot.slane %v8743_v39, 6 }
 0x1a5   : > { %16223 = vst [vmem:[#allocation35_spill] sm:$0xff] %v8746_v47  ;;  %v7580_v57 = vpop.eup %7579  ;;  %v8753_v23 = vmul.f32 %v7578_v37, %v8601_v5  ;;  %v1674_v3 = vrot.slane %v8743_v39, 2  ;;  %v1881_v15 = vrot.slane %v8743_v39, 1  ;;  %7597 = vpow2.f32 %v8661_v18 }
 0x1a6   : > { %16224 = vst [vmem:[#allocation36_spill] sm:$0xff] %v8749_v1  ;;  %v7582_v59 = vpop.eup %7581  ;;  %v8772_v37 = vsel %vm1138_vm0, %v15774_v55, %v1260_v0  ;;  %v8778_v29 = vsel %vm16226_vm3, %v15775_v16, %v1467_v60  ;;  %v8804_v22 = vmul.f32 %v7580_v57, %v8606_v11  ;;  %v16239_v57 = vrot.slane %v8726_v7, 6  ;;  %vm16275_vm3 = vmmov %vm16247_vm4 }
 0x1a7   : > { %16225 = vst [vmem:[#allocation37_spill] sm:$0xff] %v8753_v23  ;;  %v7584_v51 = vpop.eup %7583  ;;  %v8784_v17 = vsel %vm16227_vm10, %v15777_v6, %v1674_v3  ;;  %v8790_v5 = vsel %vm16230_vm12, %v16229_v45, %v1881_v15  ;;  %v8807_v16 = vmul.f32 %v7582_v59, %v8609_v12  ;;  %v16238_v11 = vrot.slane %v8753_v23, 6 }
 0x1a8   : > { %v7586_v46 = vpop.eup %7585  ;;  %16228 = vst [vmem:[#allocation38_spill] sm:$0xff] %v8784_v17  ;;  %16231 = vst [vmem:[#allocation39_spill] sm:$0xff] %v8790_v5  ;;  %v8810_v14 = vmul.f32 %v7584_v51, %v8616_v24  ;;  %v16236_v17 = vrot.slane %v8753_v23, 7  ;;  %v16241_v24 = vrot.slane %v8753_v23, 2  ;;  %v16245_v51 = vrot.slane %v8753_v23, 1 }
 0x1a9   : > { %v7588_v56 = vpop.eup %7587  ;;  %16232 = vst [vmem:[#allocation40_spill] sm:$0xff] %v8804_v22  ;;  %16233 = vst [vmem:[#allocation41_spill] sm:$0xff] %v8807_v16  ;;  %v8813_v6 = vmul.f32 %v7586_v46, %v8619_v25  ;;  %v8829_v12 = vsel %vm16240_vm13, %v16239_v57, %v16238_v11  ;;  %v16242_v25 = vrot.slane %v8726_v7, 2  ;;  %v1276_v46 = vrot.slane %v8804_v22, 7 }
 0x1aa   : > { %v7590_v42 = vpop.eup %7589  ;;  %16234 = vst [vmem:[#allocation42_spill] sm:$0xff] %v8810_v14  ;;  %v8821_v45 = vsel %vm1138_vm0, %v16237_v40, %v16236_v17  ;;  %v16246_v40 = vrot.slane %v8726_v7, 1  ;;  %v1483_v11 = vrot.slane %v8804_v22, 6  ;;  %v1690_v57 = vrot.slane %v8804_v22, 2 }
 0x1ab   : > { %v7592_v55 = vpop.eup %7591  ;;  %16235 = vst [vmem:[#allocation43_spill] sm:$0xff] %v8813_v6  ;;  %v8837_v59 = vsel %vm16243_vm14, %v16242_v25, %v16241_v24  ;;  %v1897_v5 = vrot.slane %v8804_v22, 1  ;;  %v8863_v43 = vsel %vm1138_vm0, %v1260_v0, %v1276_v46  ;;  %v16251_v24 = vrot.slane %v8718_v48, 6  ;;  %vm16285_vm14 = vmmov %vm16253_vm1 }
 0x1ac   : > { %16244 = vst [vmem:[#allocation44_spill] sm:$0xff] %v8837_v59  ;;  %v8845_v17 = vsel %vm16247_vm4, %v16246_v40, %v16245_v51  ;;  %v16250_v40 = vrot.slane %v8718_v48, 7  ;;  %v8873_v54 = vsel %vm16253_vm1, %v1467_v60, %v1483_v11  ;;  %v16254_v59 = vrot.slane %v8718_v48, 2  ;;  %vm16287_vm4 = vmmov %vm16257_vm2 }
 0x1ad   : > { %16248 = vst [vmem:[#allocation45_spill] sm:$0xff] %v8845_v17  ;;  %v7594_v19 = vpop.eup %7593  ;;  %v8869_v25 = vsel %vm16252_vm5, %v1483_v11, %v16251_v24  ;;  %v8883_v0 = vsel %vm16257_vm2, %v1674_v3, %v1690_v57  ;;  %v8893_v60 = vsel %vm16262_vm8, %v1881_v15, %v1897_v5  ;;  %v16264_v11 = vrot.slane %v8807_v16, 7  ;;  %vm16291_vm5 = vmmov %vm16275_vm3 }
 0x1ae   : > { %v7596_v51 = vpop.eup %7595  ;;  %v1308_v17 = vsel %vm1138_vm0, %v1276_v46, %v16250_v40  ;;  %v8879_v20 = vsel %vm16255_vm15, %v1690_v57, %v16254_v59  ;;  %16258 = vst [vmem:[#allocation48_spill] sm:$0xff] %v8883_v0  ;;  %v16259_v46 = vrot.slane %v8718_v48, 1  ;;  %16263 = vst [vmem:[#allocation50_spill] sm:$0xff] %v8893_v60  ;;  %v16265_v40 = vrot.slane %v8746_v47, 7 }
 0x1af   : > { %16256 = vst [vmem:[#allocation47_spill] sm:$0xff] %v8879_v20  ;;  %v16266_v3 = vrot.slane %v8807_v16, 6  ;;  %v16267_v57 = vrot.slane %v8746_v47, 6  ;;  %v16270_v15 = vrot.slane %v8746_v47, 2  ;;  %vm16070_vm10 = vcmp.eq.s32.totalorder %v8855_v44, 1  ;;  %v8998_v20 = vpop.permute.xlu1 %1573  ;;  %vm16297_vm15 = vmmov %vm16253_vm1 }
 0x1b0   : > { %v8889_v24 = vsel %vm16260_vm6, %v1897_v5, %v16259_v46  ;;  %v1313_v59 = vsel %vm1138_vm0, %v16265_v40, %v16264_v11  ;;  %v16269_v46 = vrot.slane %v8807_v16, 2  ;;  %v16274_v11 = vrot.slane %v8746_v47, 1  ;;  %vm16299_vm6 = vmmov %vm16287_vm4 }
 0x1b1   : > { %16261 = vst [vmem:[#allocation49_spill] sm:$0xff] %v8889_v24  ;;  %v8907_v0 = vsel %vm16268_vm7, %v16267_v57, %v16266_v3  ;;  %v16273_v24 = vrot.slane %v8807_v16, 1  ;;  %v8942_v57 = vmul.f32 %v7590_v42, %v8625_v31  ;;  %v8945_v28 = vmul.f32 %v7592_v55, %v8630_v36  ;;  %vm16302_vm8 = vmmov %vm16287_vm4 }
 0x1b2   : > { %v8915_v5 = vsel %vm16271_vm9, %v16270_v15, %v16269_v46  ;;  %v970_v46 = vadd.f32 1.0, %v7594_v19  ;;  %vm1575_vm12 = vcmp.eq.s32.totalorder %v8929_v10, 1  ;;  %v8948_v15 = vpop.permute.xlu0 %1363  ;;  %v952_v47 = vadd.f32 1.0, %v7596_v51  ;;  %vm16305_vm7 = vmmov %vm16275_vm3 }
 0x1b3   : > { %16272 = vst [vmem:[#allocation51_spill] sm:$0xff] %v8915_v5  ;;  %v8923_v40 = vsel %vm16275_vm3, %v16274_v11, %v16273_v24  ;;  %v8936_v24 = vpop.f32.mrb[18].mxu1  ;;  %v8939_v11 = vmul.f32 %v7588_v56, %v8622_v30  ;;  %16280 = vst [vmem:[#allocation56_spill] sm:$0xff] %v8942_v57  ;;  %v8953_v5 = vsel %vm1370_vm11, %v1308_v17, -inf  ;;  %v8957_v30 = vsel %vm1370_vm11, %v1313_v59, -inf }
 0x1b4   : > { %16276 = vst [vmem:[#allocation52_spill] sm:$0xff] %v8923_v40  ;;  %16278 = vst [vmem:[#allocation54_spill] sm:$0xff] %v8936_v24  ;;  %vm1369_vm13 = vcmp.eq.s32.totalorder %v8948_v15, 1  ;;  %v1298_v18 = vrot.slane %v8942_v57, 7  ;;  %v1505_v55 = vrot.slane %v8942_v57, 6  ;;  %v1712_v56 = vrot.slane %v8942_v57, 2 }
 0x1b5   : > { %16279 = vst [vmem:[#allocation55_spill] sm:$0xff] %v8939_v11  ;;  %16281 = vst [vmem:[#allocation57_spill] sm:$0xff] %v8945_v28  ;;  %v15787_v31 = vrot.slane %v8939_v11, 7  ;;  %v15788_v36 = vrot.slane %v8939_v11, 6  ;;  %v15789_v19 = vrot.slane %v8939_v11, 2  ;;  %v1919_v17 = vrot.slane %v8942_v57, 1 }
 0x1b6   : > { %16282 = vst [vmem:[#allocation58_spill] sm:$0xff] %v8948_v15  ;;  %v16283_v51 = vrot.slane %v8749_v1, 7  ;;  %v16284_v3 = vrot.slane %v8749_v1, 6  ;;  %v16286_v42 = vrot.slane %v8749_v1, 2  ;;  %v16289_v24 = vrot.slane %v8939_v11, 1  ;;  %vm16308_vm9 = vmmov %vm16275_vm3 }
 0x1b7   : > { %v16294_v13 = vrot.slane %v8726_v7, 7  ;;  %vm1577_vm2 = vcmp.eq.s32.totalorder %v8998_v20, 1  ;;  %7599 = vrcp.f32 %v970_v46  ;;  %v16311_v52 = vrot.slane %v8810_v14, 7 }
 0x1b8   : > { %v1325_v59 = vsel %vm1138_vm0, %v16283_v51, %v15787_v31  ;;  %v8980_v60 = vsel %vm16285_vm14, %v16284_v3, %v15788_v36  ;;  %v8988_v40 = vsel %vm16287_vm4, %v16286_v42, %v15789_v19  ;;  %v16290_v51 = vrot.slane %v8749_v1, 1  ;;  %vm16314_vm14 = vmmov %vm16253_vm1 }
 0x1b9   : > { %16288 = vst [vmem:[#allocation59_spill] sm:$0xff] %v8988_v40  ;;  %v16293_v3 = vrot.slane %v8753_v23, 7  ;;  %v1346_v42 = vsel %vm1138_vm0, %v1298_v18, %v16294_v13  ;;  %v16295_v19 = vrot.slane %v8753_v23, 6  ;;  %v16301_v13 = vrot.slane %v8726_v7, 2 }
 0x1ba   : > { %v8996_v31 = vsel %vm16291_vm5, %v16290_v51, %v16289_v24  ;;  %v16296_v24 = vrot.slane %v8726_v7, 6  ;;  %v16313_v46 = vrot.slane %v8810_v14, 6  ;;  %7601 = vrcp.f32 %v952_v47 }
 0x1bb   : > { %16292 = vst [vmem:[#allocation60_spill] sm:$0xff] %v8996_v31  ;;  %v1314_v36 = vsel %vm1138_vm0, %v16293_v3, %v1298_v18  ;;  %v1521_v40 = vsel %vm16253_vm1, %v16295_v19, %v1505_v55  ;;  %v16298_v31 = vrot.slane %v8753_v23, 2  ;;  %v9027_v18 = vsel %vm16302_vm8, %v1712_v56, %v16301_v13  ;;  %vm16340_vm8 = vmmov %vm16253_vm1 }
 0x1bc   : > { %v1553_v51 = vsel %vm16297_vm15, %v1505_v55, %v16296_v24  ;;  %16303 = vst [vmem:[#allocation62_spill] sm:$0xff] %v9027_v18  ;;  %v16304_v19 = vrot.slane %v8753_v23, 1  ;;  %v16307_v55 = vrot.slane %v8726_v7, 1  ;;  %v16312_v13 = vrot.slane %v8945_v28, 6  ;;  %vm16332_vm15 = vmmov %vm16287_vm4 }
 0x1bd   : > { %v9021_v3 = vsel %vm16299_vm6, %v16298_v31, %v1712_v56  ;;  %v9041_v31 = vpop.permute.xlu0 %1570  ;;  %7603 = vpow2.f32 %v8669_v33  ;;  %v1578_v47 = vsel %vm1575_vm12, %v8778_v29, -inf  ;;  %v9114_v29 = vsel %vm1369_vm13, %v8821_v45, -inf  ;;  %vm16334_vm6 = vmmov %vm16291_vm5 }
 0x1be   : > { %16300 = vst [vmem:[#allocation61_spill] sm:$0xff] %v9021_v3  ;;  %v9033_v8 = vsel %vm16305_vm7, %v16304_v19, %v1919_v17  ;;  %v9039_v24 = vsel %vm16308_vm9, %v1919_v17, %v16307_v55  ;;  %16310 = vst [vmem:[#allocation65_spill] sm:$0xff] %v9041_v31  ;;  %v15793_v3 = vrot.slane %v8945_v28, 7  ;;  %vm1576_vm3 = vcmp.eq.s32.totalorder %v9041_v31, 1 }
 0x1bf   : > { %16306 = vst [vmem:[#allocation63_spill] sm:$0xff] %v9033_v8  ;;  %16309 = vst [vmem:[#allocation64_spill] sm:$0xff] %v9039_v24  ;;  %v1391_v19 = vsel %vm1370_vm11, %v1314_v36, -inf  ;;  %v1421_v17 = vmax.f32 %v8718_v48, %v8953_v5  ;;  %v1436_v55 = vmax.f32 %v8807_v16, %v8957_v30  ;;  %v1533_v36 = vsel %vm16314_vm14, %v16313_v46, %v16312_v13 }
 0x1c0   : > { %v1326_v56 = vsel %vm1138_vm0, %v16311_v52, %v15793_v3  ;;  %v16315_v8 = vrot.slane %v8945_v28, 2  ;;  %v16316_v5 = vrot.slane %v8810_v14, 2  ;;  %v16317_v48 = vrot.slane %v8945_v28, 1  ;;  %v9082_v3 = vpop.f32.mrb[19].mxu1  ;;  %vm16342_vm7 = vmmov %vm16253_vm1 }
 0x1c1   : > { %v16318_v24 = vrot.slane %v8810_v14, 1  ;;  %16319 = vst [vmem:[#allocation66_spill] sm:$0xff] %v9082_v3  ;;  %v1439_v13 = vmax.f32 %v8942_v57, %v1391_v19  ;;  %v1371_v46 = vsel %vm16070_vm10, %v8772_v37, -inf  ;;  %7605 = vpow2.f32 %v8671_v34  ;;  %vm16344_vm9 = vmmov %vm16287_vm4 }
 0x1c2   : > { %v9072_v30 = vsel %vm16287_vm4, %v16316_v5, %v16315_v8  ;;  %v1389_v8 = vsel %vm16070_vm10, %v1346_v42, -inf  ;;  %v7598_v5 = vpop.eup %7597  ;;  %v1419_v16 = vmax.f32 %v8743_v39, %v1371_v46  ;;  %v1596_v37 = vsel %vm1575_vm12, %v1553_v51, -inf  ;;  %v7511_v51 = vld [vmem:[#allocation9 + $0x10] sm:$0xff]   ;;  %vm16346_vm14 = vmmov %vm16287_vm4 }
 0x1c3   : > { %v9080_v52 = vsel %vm16291_vm5, %v16318_v24, %v16317_v48  ;;  %v1437_v48 = vmax.f32 %v8726_v7, %v1389_v8  ;;  %v968_v24 = vadd.f32 1.0, %v7598_v5  ;;  %v1372_v42 = vsel %vm1369_vm13, %v8863_v43, -inf  ;;  %5337 = vmatpush1.bf16.msra.mxu1 %v7511_v51  ;;  %vm16349_vm4 = vmmov %vm16291_vm5 }
 0x1c4   : > { %7607 = vpow2.f32 %v8673_v38  ;;  %v9103_v33 = vmax.f32 %v1419_v16, %v1578_v47  ;;  %v1375_v46 = vsel %vm1369_vm13, %v1325_v59, -inf  ;;  %v1378_v34 = vsel %vm1369_vm13, %v1326_v56, -inf  ;;  %v7600_v47 = vpop.eup %7599  ;;  %vm16352_vm5 = vmmov %vm16349_vm4 }
 0x1c5   : > { %v9105_v19 = vmax.f32 %v1437_v48, %v1596_v37  ;;  %7609 = vrcp.f32 %v968_v24  ;;  %v1420_v43 = vmax.f32 %v8804_v22, %v1372_v42  ;;  %v1423_v38 = vmax.f32 %v8939_v11, %v1375_v46 }
 0x1c6   : > { %7611 = vpow2.f32 %v8682_v53  ;;  %v1426_v16 = vmax.f32 %v8945_v28, %v1378_v34  ;;  %v1580_v56 = vsel %vm1577_vm2, %v8869_v25, -inf  ;;  %v1595_v45 = vsel %vm1577_vm2, %v8907_v0, -inf }
 0x1c7   : > { %7613 = vpow2.f32 %v8703_v26  ;;  %v1598_v53 = vsel %vm1577_vm2, %v1521_v40, -inf  ;;  %v9132_v8 = vmax.f32 %v1421_v17, %v1580_v56  ;;  %v9134_v5 = vmax.f32 %v1436_v55, %v1595_v45 }
 0x1c8   : > { %7615 = vpow2.f32 %v8705_v27  ;;  %v9136_v48 = vmax.f32 %v1439_v13, %v1598_v53  ;;  %v16323_v26 = vmov 0   ;;  %v1579_v25 = vsel %vm1576_vm3, %v8873_v54, -inf  ;;  %v7602_v54 = vpop.eup %7601 }
 0x1c9   : > { %16320 = vst [vmem:[#allocation67_spill] sm:$0xff] %v9132_v8  ;;  %16321 = vst [vmem:[#allocation68_spill] sm:$0xff] %v9134_v5  ;;  %5338 = vmatprep.subr.bf16.mxu1 %v16323_v26  ;;  %7617 = vpow2.f32 %v8707_v35  ;;  %v1582_v0 = vsel %vm1576_vm3, %v8980_v60, -inf  ;;  %v1585_v27 = vsel %vm1576_vm3, %v1533_v36, -inf  ;;  %v9149_v40 = vmul.f32 %v7600_v47, %v8635_v41  ;;  %v7604_v41 = vpop.eup %7603 }
 0x1ca   : > { %16322 = vst [vmem:[#allocation69_spill] sm:$0xff] %v9136_v48  ;;  %7619 = vpow2.f32 %v8720_v61  ;;  %v9155_v35 = vsel %vm1576_vm3, %v8829_v12, -inf  ;;  %v815_v17 = vsub.f32 0.0, %v8723_v63  ;;  %v9159_v55 = vmax.f32 %v1420_v43, %v1579_v25 }
 0x1cb   : > { %16324 = vst [vmem:[#allocation70_spill] sm:$0xff] %v9149_v40  ;;  %7621 = vpow2.f32 %v8756_v32  ;;  %v9161_v60 = vmax.f32 %v1423_v38, %v1582_v0  ;;  %v9163_v36 = vmax.f32 %v1426_v16, %v1585_v27  ;;  %v1299_v13 = vrot.slane %v9149_v40, 7  ;;  %v7606_v37 = vpop.eup %7605 }
 0x1cc   : > { %16325 = vst [vmem:[#allocation71_spill] sm:$0xff] %v9159_v55  ;;  %v1506_v61 = vrot.slane %v9149_v40, 6  ;;  %v1713_v24 = vrot.slane %v9149_v40, 2  ;;  %v1920_v12 = vrot.slane %v9149_v40, 1  ;;  %v9170_v42 = vmul.f32 %v7602_v54, %v8641_v49 }
 0x1cd   : > { %16326 = vst [vmem:[#allocation72_spill] sm:$0xff] %v9161_v60  ;;  %16327 = vst [vmem:[#allocation73_spill] sm:$0xff] %v9163_v36  ;;  %v957_v32 = vadd.f32 1.0, %v7604_v41  ;;  %7623 = vpow2.f32 %v8758_v4  ;;  %v9173_v46 = vmul.f32 1.442695, %v815_v17  ;;  %v16329_v43 = vrot.slane %v8813_v6, 7 }
 0x1ce   : > { %16328 = vst [vmem:[#allocation74_spill] sm:$0xff] %v9170_v42  ;;  %v7608_v34 = vpop.eup %7607  ;;  %v16330_v38 = vrot.slane %v8813_v6, 6  ;;  %v16331_v49 = vrot.slane %v8813_v6, 2  ;;  %v16333_v4 = vrot.slane %v8813_v6, 1  ;;  %v1293_v47 = vrot.slane %v9170_v42, 7 }
 0x1cf   : > { %v1315_v51 = vsel %vm1138_vm0, %v16329_v43, %v1299_v13  ;;  %v7610_v53 = vpop.eup %7609  ;;  %v1500_v25 = vrot.slane %v9170_v42, 6  ;;  %v1707_v0 = vrot.slane %v9170_v42, 2  ;;  %v1914_v27 = vrot.slane %v9170_v42, 1 }
 0x1d0   : > { %v9183_v16 = vsel %vm16253_vm1, %v16330_v38, %v1506_v61  ;;  %v9189_v56 = vsel %vm16332_vm15, %v16331_v49, %v1713_v24  ;;  %v9195_v45 = vsel %vm16334_vm6, %v16333_v4, %v1920_v12  ;;  %v7612_v17 = vpop.eup %7611  ;;  %v9202_v54 = vmul.f32 %v7610_v53, %v8644_v50  ;;  %vm16356_vm15 = vmmov %vm16253_vm1 }
 0x1d1   : > { %16335 = vst [vmem:[#allocation75_spill] sm:$0xff] %v9195_v45  ;;  %v9206_v41 = vsel %vm1370_vm11, %v1315_v51, -inf  ;;  %7625 = vrcp.f32 %v957_v32  ;;  %v973_v43 = vadd.f32 1.0, %v7606_v37  ;;  %v7614_v38 = vpop.eup %7613  ;;  %v16337_v49 = vrot.slane %v8939_v11, 7  ;;  %vm16358_vm6 = vmmov %vm16344_vm9 }
 0x1d2   : > { %16336 = vst [vmem:[#allocation76_spill] sm:$0xff] %v9202_v54  ;;  %v16338_v59 = vrot.slane %v8749_v1, 7  ;;  %v16339_v50 = vrot.slane %v8939_v11, 6  ;;  %v16341_v51 = vrot.slane %v8749_v1, 6  ;;  %v7616_v32 = vpop.eup %7615  ;;  %v16343_v7 = vrot.slane %v8939_v11, 2 }
 0x1d3   : > { %v1309_v4 = vsel %vm1138_vm0, %v16337_v49, %v1293_v47  ;;  %v16345_v22 = vrot.slane %v8749_v1, 2  ;;  %v1267_v39 = vrot.slane %v9202_v54, 7  ;;  %v1474_v45 = vrot.slane %v9202_v54, 6 }
 0x1d4   : > { %v1341_v57 = vsel %vm1138_vm0, %v1293_v47, %v16338_v59  ;;  %v1516_v53 = vsel %vm16340_vm8, %v16339_v50, %v1500_v25  ;;  %v1548_v37 = vsel %vm16342_vm7, %v1500_v25, %v16341_v51  ;;  %v9228_v49 = vsel %vm16344_vm9, %v16343_v7, %v1707_v0  ;;  %v7618_v7 = vpop.eup %7617  ;;  %vm16359_vm8 = vmmov %vm16358_vm6 }
 0x1d5   : > { %v9234_v59 = vsel %vm16346_vm14, %v1707_v0, %v16345_v22  ;;  %v16348_v47 = vrot.slane %v8939_v11, 1  ;;  %v16351_v25 = vrot.slane %v8749_v1, 1  ;;  %v1681_v22 = vrot.slane %v9202_v54, 2  ;;  %v7620_v11 = vpop.eup %7619  ;;  %vm16362_vm7 = vmmov %vm16349_vm4 }
 0x1d6   : > { %16347 = vst [vmem:[#allocation77_spill] sm:$0xff] %v9234_v59  ;;  %v1888_v0 = vrot.slane %v9202_v54, 1  ;;  %7627 = vrcp.f32 %v973_v43  ;;  %v1347_v48 = vsel %vm1138_vm0, %v1299_v13, %v1267_v39  ;;  %v16355_v5 = vrot.slane %v8813_v6, 6  ;;  %vm16364_vm9 = vmmov %vm16349_vm4  ;;  %v16435_v59 = vld [vmem:[#allocation24_spill] sm:$0xff] }
 0x1d7   : > { %v9240_v50 = vsel %vm16349_vm4, %v16348_v47, %v1914_v27  ;;  %v9246_v51 = vsel %vm16352_vm5, %v1914_v27, %v16351_v25  ;;  %v1376_v47 = vsel %vm1370_vm11, %v1309_v4, -inf  ;;  %v1374_v27 = vsel %vm16070_vm10, %v1341_v57, -inf  ;;  %v7622_v25 = vpop.eup %7621  ;;  %vm16396_vm4 = vmmov %vm16253_vm1 }
 0x1d8   : > { %16350 = vst [vmem:[#allocation78_spill] sm:$0xff] %v9240_v50  ;;  %16353 = vst [vmem:[#allocation79_spill] sm:$0xff] %v9246_v51  ;;  %v1442_v50 = vmax.f32 %v9149_v40, %v9206_v41  ;;  %v16354_v51 = vrot.slane %v8813_v6, 7  ;;  %v1538_v4 = vsel %vm16253_vm1, %v1474_v45, %v16355_v5  ;;  %v1554_v41 = vsel %vm16356_vm15, %v1506_v61, %v1474_v45  ;;  %v7624_v61 = vpop.eup %7623 }
 0x1d9   : > { %v16357_v43 = vrot.slane %v8813_v6, 2  ;;  %v9288_v5 = vsel %vm16364_vm9, %v1920_v12, %v1888_v0  ;;  %v1424_v45 = vmax.f32 %v9170_v42, %v1376_v47  ;;  %v955_v40 = vadd.f32 1.0, %v7608_v34  ;;  %vm16398_vm5 = vmmov %vm16253_vm1 }
 0x1da   : > { %v1331_v3 = vsel %vm1138_vm0, %v1267_v39, %v16354_v51  ;;  %v9278_v51 = vsel %vm16359_vm8, %v1713_v24, %v1681_v22  ;;  %v16361_v39 = vrot.slane %v8813_v6, 1  ;;  %16365 = vst [vmem:[#allocation82_spill] sm:$0xff] %v9288_v5  ;;  %v1422_v24 = vmax.f32 %v8749_v1, %v1374_v27  ;;  %vm16400_vm1 = vmmov %vm16358_vm6 }
 0x1db   : > { %v9274_v57 = vsel %vm16358_vm6, %v1681_v22, %v16357_v43  ;;  %16360 = vst [vmem:[#allocation80_spill] sm:$0xff] %v9278_v51  ;;  %v1392_v43 = vsel %vm16070_vm10, %v1347_v48, -inf  ;;  %v9294_v22 = vpop.permute.xlu1 %1777  ;;  %v971_v51 = vadd.f32 1.0, %v7612_v17  ;;  %v974_v18 = vadd.f32 1.0, %v7616_v32  ;;  %v7626_v34 = vpop.eup %7625  ;;  %vm16402_vm15 = vmmov %vm16400_vm1 }
 0x1dc   : > { %v9284_v13 = vsel %vm16362_vm7, %v1888_v0, %v16361_v39  ;;  %16366 = vst [vmem:[#allocation83_spill] sm:$0xff] %v9294_v22  ;;  %v1440_v8 = vmax.f32 %v9202_v54, %v1392_v43  ;;  %v958_v39 = vadd.f32 1.0, %v7614_v38  ;;  %vm15890_vm14 = vcmp.eq.s32.totalorder %v9294_v22, 1  ;;  %vm16405_vm6 = vmmov %vm16362_vm7 }
 0x1dd   : > { %16363 = vst [vmem:[#allocation81_spill] sm:$0xff] %v9284_v13  ;;  %7629 = vrcp.f32 %v955_v40  ;;  %v1581_v12 = vsel %vm1575_vm12, %v1548_v37, -inf  ;;  %v1599_v0 = vsel %vm1575_vm12, %v1554_v41, -inf  ;;  %v956_v48 = vadd.f32 1.0, %v7618_v7  ;;  %v16386_v41 = vld [vmem:[#allocation18_spill] sm:$0xff]  ;;  %vm16408_vm8 = vmmov %vm16405_vm6 }
 0x1de   : > { %7631 = vrcp.f32 %v971_v51  ;;  %v9302_v47 = vmax.f32 %v1422_v24, %v1581_v12  ;;  %v9304_v27 = vmax.f32 %v1440_v8, %v1599_v0  ;;  %v972_v43 = vadd.f32 1.0, %v7620_v11  ;;  %vm16414_vm7 = vmmov %vm16396_vm4 }
 0x1df   : > { %v9307_v17 = vmul.f32 %v7626_v34, %v8651_v62  ;;  %7633 = vrcp.f32 %v958_v39  ;;  %v1393_v40 = vsel %vm1369_vm13, %v1331_v3, -inf  ;;  %v1583_v38 = vsel %vm1577_vm2, %v1516_v53, -inf  ;;  %vm16417_vm9 = vmmov %vm16400_vm1 }
 0x1e0   : > { %7635 = vrcp.f32 %v974_v18  ;;  %v1441_v37 = vmax.f32 %v8813_v6, %v1393_v40  ;;  %v1601_v32 = vsel %vm1577_vm2, %v9183_v16, -inf  ;;  %v961_v8 = vadd.f32 1.0, %v7622_v25  ;;  %v7628_v3 = vpop.eup %7627 }
 0x1e1   : > { %16367 = vst [vmem:[#allocation84_spill] sm:$0xff] %v9307_v17  ;;  %7637 = vrcp.f32 %v956_v48  ;;  %v9321_v51 = vmax.f32 %v1424_v45, %v1583_v38  ;;  %v9323_v18 = vmax.f32 %v1442_v50, %v1601_v32  ;;  %v977_v53 = vadd.f32 1.0, %v7624_v61  ;;  %v16374_v50 = vld [vmem:[#allocation16_spill] sm:$0xff]  ;;  %v16379_v38 = vld [vmem:[#allocation47_spill] sm:$0xff] }
 0x1e2   : > { %v9326_v24 = vmul.f32 %v7628_v3, %v8654_v9  ;;  %7639 = vrcp.f32 %v972_v43  ;;  %v1600_v16 = vsel %vm1576_vm3, %v1538_v4, -inf  ;;  %v16371_v25 = vmax.f32 %v8753_v23, %v9114_v29  ;;  %v16376_v9 = vld [vmem:[#allocation22_spill] sm:$0xff] }
 0x1e3   : > { %16368 = vst [vmem:[#allocation85_spill] sm:$0xff] %v9321_v51  ;;  %16369 = vst [vmem:[#allocation86_spill] sm:$0xff] %v9323_v18  ;;  %7641 = vrcp.f32 %v961_v8  ;;  %v9336_v12 = vmax.f32 %v1441_v37, %v1600_v16  ;;  %v9340_v45 = vadd.f32 %v16374_v50, %v8687_v58  ;;  %v9344_v61 = vadd.f32 %v16376_v9, %v16374_v50  ;;  %v16378_v58 = vld [vmem:[#allocation23_spill] sm:$0xff]  ;;  %v16384_v16 = vld [vmem:[#allocation17_spill] sm:$0xff] }
 0x1e4   : > { %16370 = vst [vmem:[#allocation87_spill] sm:$0xff] %v9326_v24  ;;  %v9334_v39 = vmax.f32 %v16371_v25, %v9155_v35  ;;  %7643 = vrcp.f32 %v977_v53  ;;  %v9354_v43 = vadd.f32 %v16378_v58, %v16374_v50  ;;  %v9360_v37 = vsel %vm15890_vm14, %v16379_v38, -inf  ;;  %v16382_v8 = vld [vmem:[#allocation51_spill] sm:$0xff]  ;;  %v16425_v18 = vld [vmem:[#allocation20_spill] sm:$0xff] }
 0x1e5   : > { %16373 = vst [vmem:[#allocation89_spill] sm:$0xff] %v9336_v12  ;;  %16375 = vst [vmem:[#allocation16_spill] sm:$0xff] %v9340_v45  ;;  %v831_v35 = vsub.f32 0.0, %v9340_v45  ;;  %v818_v34 = vsub.f32 0.0, %v9344_v61  ;;  %7645 = vpow2.f32 %v9173_v46  ;;  %v9365_v32 = vsel %vm15890_vm14, %v9228_v49, -inf  ;;  %v16388_v49 = vld [vmem:[#allocation61_spill] sm:$0xff] }
 0x1e6   : > { %16372 = vst [vmem:[#allocation88_spill] sm:$0xff] %v9334_v39  ;;  %16377 = vst [vmem:[#allocation22_spill] sm:$0xff] %v9344_v61  ;;  %v9370_v3 = vsel %vm15890_vm14, %v16382_v8, -inf  ;;  %v9386_v62 = vsel %vm15890_vm14, %v16388_v49, -inf  ;;  %v9401_v49 = vpop.f32.mrb[20].mxu1  ;;  %v16393_v48 = vrot.slane %v8945_v28, 7 }
 0x1e7   : > { %v7630_v40 = vpop.eup %7629  ;;  %16380 = vst [vmem:[#allocation23_spill] sm:$0xff] %v9360_v37  ;;  %16381 = vst [vmem:[#allocation47_spill] sm:$0xff] %v9365_v32  ;;  %v9375_v46 = vmul.f32 1.442695, %v831_v35  ;;  %v9377_v9 = vmul.f32 1.442695, %v818_v34 }
 0x1e8   : > { %16383 = vst [vmem:[#allocation51_spill] sm:$0xff] %v9370_v3  ;;  %v7632_v53 = vpop.eup %7631  ;;  %v9373_v25 = vmul.f32 %v7630_v40, %v16384_v16  ;;  %16389 = vst [vmem:[#allocation61_spill] sm:$0xff] %v9386_v62  ;;  %v9391_v40 = vsel %vm15890_vm14, %v9189_v56, -inf  ;;  %v16391_v35 = vld [vmem:[#allocation25_spill] sm:$0xff]  ;;  %v16394_v0 = vrot.slane %v8810_v14, 7  ;;  %v16395_v54 = vrot.slane %v8945_v28, 6 }
 0x1e9   : > { %v7634_v38 = vpop.eup %7633  ;;  %v9381_v7 = vmul.f32 %v7632_v53, %v16386_v41  ;;  %16390 = vst [vmem:[#allocation90_spill] sm:$0xff] %v9391_v40  ;;  %v9395_v34 = vadd.f32 %v16374_v50, %v16391_v35  ;;  %16392 = vst [vmem:[#allocation25_spill] sm:$0xff] %v9401_v49  ;;  %v16397_v29 = vrot.slane %v8810_v14, 6  ;;  %v16420_v5 = vrot.slane %v9326_v24, 1 }
 0x1ea   : > { %16385 = vst [vmem:[#allocation17_spill] sm:$0xff] %v9373_v25  ;;  %v7636_v8 = vpop.eup %7635  ;;  %v1294_v16 = vrot.slane %v9373_v25, 7  ;;  %v1501_v41 = vrot.slane %v9373_v25, 6  ;;  %v1708_v53 = vrot.slane %v9373_v25, 2  ;;  %v1915_v58 = vrot.slane %v9373_v25, 1 }
 0x1eb   : > { %16387 = vst [vmem:[#allocation18_spill] sm:$0xff] %v9381_v7  ;;  %v7638_v35 = vpop.eup %7637  ;;  %v9496_v51 = vmul.f32 %v7636_v8, %v16425_v18  ;;  %v16431_v61 = vrot.slane %v9307_v17, 2  ;;  %v16438_v13 = vrot.slane %v9307_v17, 6  ;;  %7647 = vpow2.f32 %v9375_v46 }
 0x1ec   : > { %v1310_v4 = vsel %vm1138_vm0, %v16393_v48, %v1294_v16  ;;  %v1342_v6 = vsel %vm1138_vm0, %v1294_v16, %v16394_v0  ;;  %v9419_v56 = vsel %vm16396_vm4, %v16395_v54, %v1501_v41  ;;  %v1549_v50 = vsel %vm16398_vm5, %v1501_v41, %v16397_v29  ;;  %v7640_v11 = vpop.eup %7639  ;;  %vm16421_vm4 = vmmov %vm16405_vm6 }
 0x1ed   : > { %v1377_v48 = vsel %vm16070_vm10, %v1342_v6, -inf  ;;  %v9429_v23 = vsel %vm1370_vm11, %v1310_v4, -inf  ;;  %v16399_v0 = vrot.slane %v8945_v28, 2  ;;  %v16401_v54 = vrot.slane %v8810_v14, 2  ;;  %v9443_v29 = vpop.eup %7641  ;;  %16426 = vst [vmem:[#allocation20_spill] sm:$0xff] %v9496_v51 }
 0x1ee   : > { %v1425_v6 = vmax.f32 %v8810_v14, %v1377_v48  ;;  %v16404_v41 = vrot.slane %v8945_v28, 1  ;;  %v16412_v4 = vrot.slane %v9381_v7, 6  ;;  %v16413_v28 = vrot.slane %v9326_v24, 6 }
 0x1ef   : > { %v9435_v16 = vsel %vm16400_vm1, %v16399_v0, %v1708_v53  ;;  %v9441_v42 = vsel %vm16402_vm15, %v1708_v53, %v16401_v54  ;;  %v16407_v0 = vrot.slane %v8810_v14, 1  ;;  %v16410_v53 = vrot.slane %v9381_v7, 7  ;;  %vm16433_vm15 = vmmov %vm16421_vm4 }
 0x1f0   : > { %16403 = vst [vmem:[#allocation91_spill] sm:$0xff] %v9441_v42  ;;  %v9452_v1 = vsel %vm16405_vm6, %v16404_v41, %v1915_v58  ;;  %v16411_v54 = vrot.slane %v9326_v24, 7  ;;  %v1555_v41 = vsel %vm16414_vm7, %v16413_v28, %v16412_v4  ;;  %v16415_v14 = vrot.slane %v9381_v7, 2  ;;  %v16423_v4 = vld [vmem:[#allocation19_spill] sm:$0xff]  ;;  %vm16439_vm6 = vmmov %vm16398_vm5 }
 0x1f1   : > { %16406 = vst [vmem:[#allocation92_spill] sm:$0xff] %v9452_v1  ;;  %v9458_v49 = vsel %vm16408_vm8, %v1915_v58, %v16407_v0  ;;  %v16416_v1 = vrot.slane %v9326_v24, 2  ;;  %v16419_v0 = vrot.slane %v9381_v7, 1  ;;  %v9548_v63 = vmul.f32 %v7640_v11, %v16435_v59  ;;  %vm16440_vm8 = vmmov %vm16398_vm5 }
 0x1f2   : > { %16409 = vst [vmem:[#allocation93_spill] sm:$0xff] %v9458_v49  ;;  %v1348_v48 = vsel %vm1138_vm0, %v16411_v54, %v16410_v53  ;;  %v9488_v54 = vpop.eup %7643  ;;  %v9493_v49 = vmul.f32 %v7634_v38, %v16423_v4  ;;  %vm16442_vm7 = vmmov %vm16400_vm1  ;;  %7649 = vpow2.f32 %v9377_v9  ;;  %v816_v46 = vsub.f32 0.0, %v9395_v34 }
 0x1f3   : > { %v9478_v58 = vsel %vm16417_vm9, %v16416_v1, %v16415_v14  ;;  %v9486_v53 = vsel %vm16421_vm4, %v16420_v5, %v16419_v0  ;;  %v1395_v28 = vsel %vm16070_vm10, %v1348_v48, -inf  ;;  %v1584_v1 = vsel %vm1575_vm12, %v1549_v50, -inf  ;;  %v9500_v14 = vpop.eup %7645  ;;  %v16427_v0 = vld [vmem:[#allocation21_spill] sm:$0xff]  ;;  %16436 = vst [vmem:[#allocation24_spill] sm:$0xff] %v9548_v63  ;;  %vm16443_vm9 = vmmov %vm16400_vm1 }
 0x1f4   : > { %16418 = vst [vmem:[#allocation94_spill] sm:$0xff] %v9478_v58  ;;  %16422 = vst [vmem:[#allocation95_spill] sm:$0xff] %v9486_v53  ;;  %v1443_v3 = vmax.f32 %v9381_v7, %v1395_v28  ;;  %v1602_v5 = vsel %vm1575_vm12, %v1555_v41, -inf  ;;  %v9506_v53 = vmul.f32 %v7638_v35, %v16427_v0  ;;  %v9508_v48 = vmax.f32 %v1425_v6, %v1584_v1 }
 0x1f5   : > { %16424 = vst [vmem:[#allocation19_spill] sm:$0xff] %v9493_v49  ;;  %v1295_v38 = vrot.slane %v9493_v49, 7  ;;  %v1502_v18 = vrot.slane %v9493_v49, 6  ;;  %v1709_v8 = vrot.slane %v9493_v49, 2  ;;  %v1916_v50 = vrot.slane %v9493_v49, 1 }
 0x1f6   : > { %16428 = vst [vmem:[#allocation21_spill] sm:$0xff] %v9506_v53  ;;  %v16429_v35 = vrot.slane %v9307_v17, 7  ;;  %v16430_v1 = vrot.slane %v9307_v17, 6  ;;  %v16432_v58 = vrot.slane %v9307_v17, 1  ;;  %v1263_v28 = vrot.slane %v9506_v53, 7 }
 0x1f7   : > { %v9530_v4 = vsel %vm16400_vm1, %v16431_v61, %v1709_v8  ;;  %v1470_v51 = vrot.slane %v9506_v53, 6  ;;  %v1884_v61 = vrot.slane %v9506_v53, 1  ;;  %v9545_v42 = vmax.f32 %v1443_v3, %v1602_v5  ;;  %vm16451_vm1 = vmmov %vm16439_vm6 }
 0x1f8   : > { %v1311_v6 = vsel %vm1138_vm0, %v16429_v35, %v1295_v38  ;;  %v1518_v0 = vsel %vm16398_vm5, %v16430_v1, %v1502_v18  ;;  %v9536_v41 = vsel %vm16433_vm15, %v16432_v58, %v1916_v50  ;;  %v1677_v1 = vrot.slane %v9506_v53, 2  ;;  %vm16446_vm5 = vmmov %vm16421_vm4 }
 0x1f9   : > { %16434 = vst [vmem:[#allocation96_spill] sm:$0xff] %v9536_v41  ;;  %v1382_v35 = vsel %vm1370_vm11, %v1311_v6, -inf  ;;  %v16437_v58 = vrot.slane %v9307_v17, 7  ;;  %v1343_v41 = vsel %vm1138_vm0, %v1295_v38, %v1263_v28  ;;  %v1550_v3 = vsel %vm16440_vm8, %v1502_v18, %v1470_v51  ;;  %vm16453_vm15 = vmmov %vm16451_vm1 }
 0x1fa   : > { %v1430_v45 = vmax.f32 %v9493_v49, %v1382_v35  ;;  %v1534_v35 = vsel %vm16439_vm6, %v1470_v51, %v16438_v13  ;;  %v1380_v59 = vsel %vm16070_vm10, %v1343_v41, -inf  ;;  %v1587_v11 = vsel %vm1575_vm12, %v1550_v3, -inf  ;;  %vm16455_vm6 = vmmov %vm16442_vm7 }
 0x1fb   : > { %v1327_v6 = vsel %vm1138_vm0, %v1263_v28, %v16437_v58  ;;  %v16441_v5 = vrot.slane %v9307_v17, 2  ;;  %v9574_v38 = vsel %vm16443_vm9, %v1709_v8, %v1677_v1  ;;  %v1428_v13 = vmax.f32 %v9506_v53, %v1380_v59  ;;  %vm16457_vm8 = vmmov %vm16455_vm6 }
 0x1fc   : > { %16444 = vst [vmem:[#allocation97_spill] sm:$0xff] %v9574_v38  ;;  %v16445_v51 = vrot.slane %v9307_v17, 1  ;;  %v9585_v28 = vsel %vm16446_vm5, %v1916_v50, %v1884_v61  ;;  %v1284_v41 = vrot.slane %v9548_v63, 7  ;;  %v1491_v3 = vrot.slane %v9548_v63, 6  ;;  %vm16462_vm9 = vmmov %vm16421_vm4 }
 0x1fd   : > { %v9570_v58 = vsel %vm16442_vm7, %v1677_v1, %v16441_v5  ;;  %16447 = vst [vmem:[#allocation98_spill] sm:$0xff] %v9585_v28  ;;  %v1698_v5 = vrot.slane %v9548_v63, 2  ;;  %v1905_v8 = vrot.slane %v9548_v63, 1  ;;  %v1381_v1 = vsel %vm1369_vm13, %v1327_v6, -inf  ;;  %vm16459_vm7 = vmmov %vm16421_vm4 }
 0x1fe   : > { %v9581_v18 = vsel %vm16421_vm4, %v1884_v61, %v16445_v51  ;;  %v9593_v59 = vmax.f32 %v1428_v13, %v1587_v11  ;;  %v16448_v51 = vrot.slane %v9326_v24, 7  ;;  %v16449_v50 = vrot.slane %v9381_v7, 7 }
 0x1ff   : > { %v1429_v53 = vmax.f32 %v9307_v17, %v1381_v1  ;;  %v16450_v38 = vrot.slane %v9326_v24, 6  ;;  %v16452_v11 = vrot.slane %v9381_v7, 6  ;;  %v16458_v17 = vrot.slane %v9326_v24, 1 }
 0x200   : > { %v1316_v49 = vsel %vm1138_vm0, %v1284_v41, %v16448_v51  ;;  %v1332_v61 = vsel %vm1138_vm0, %v16449_v50, %v1284_v41  ;;  %v16454_v51 = vrot.slane %v9326_v24, 2  ;;  %v16456_v50 = vrot.slane %v9381_v7, 2 }
 0x201   : > { %v1397_v28 = vsel %vm1370_vm11, %v1316_v49, -inf  ;;  %v1523_v6 = vsel %vm16451_vm1, %v1491_v3, %v16450_v38  ;;  %v1539_v13 = vsel %vm16453_vm15, %v16452_v11, %v1491_v3  ;;  %v9627_v38 = vsel %vm16459_vm7, %v1905_v8, %v16458_v17  ;;  %vm16495_vm15 = vmmov %vm16455_vm6 }
 0x202   : > { %v1730_v41 = vsel %vm16455_vm6, %v1698_v5, %v16454_v51  ;;  %v1445_v1 = vmax.f32 %v9326_v24, %v1397_v28  ;;  %v1746_v49 = vsel %vm16457_vm8, %v16456_v50, %v1698_v5  ;;  %16460 = vst [vmem:[#allocation99_spill] sm:$0xff] %v9627_v38  ;;  %v16461_v3 = vrot.slane %v9381_v7, 1  ;;  %v16463_v24 = vld [vmem:[#allocation27_spill] sm:$0xff]  ;;  %v16467_v38 = vld [vmem:[#allocation28_spill] sm:$0xff]  ;;  %vm16497_vm6 = vmmov %vm16459_vm7 }
 0x203   : > { %v1396_v28 = vsel %vm1369_vm13, %v1332_v61, -inf  ;;  %v1586_v51 = vsel %vm1577_vm2, %v9419_v56, -inf  ;;  %v1589_v5 = vsel %vm1577_vm2, %v1518_v0, -inf  ;;  %v1604_v17 = vsel %vm1577_vm2, %v1523_v6, -inf  ;;  %vm16521_vm7 = vmmov %vm16451_vm1 }
 0x204   : > { %v9633_v11 = vsel %vm16462_vm9, %v16461_v3, %v1905_v8  ;;  %v1444_v50 = vmax.f32 %v9548_v63, %v1396_v28  ;;  %v9647_v7 = vmul.f32 %v9443_v29, %v16463_v24  ;;  %v16465_v8 = vmax.f32 %v9373_v25, %v9429_v23  ;;  %v7648_v25 = vpop.eup %7647  ;;  %vm16524_vm9 = vmmov %vm16495_vm15 }
 0x205   : > { %v9654_v3 = vmax.f32 %v1430_v45, %v1589_v5  ;;  %v9656_v56 = vmax.f32 %v1445_v1, %v1604_v17  ;;  %v9660_v0 = vmul.f32 %v9488_v54, %v16467_v38  ;;  %v1588_v6 = vsel %vm1576_vm3, %v1534_v35, -inf  ;;  %v16481_v38 = vld [vmem:[#allocation59_spill] sm:$0xff]  ;;  %v9740_v1 = vpop.f32.mrb[21].mxu1 }
 0x206   : > { %16464 = vst [vmem:[#allocation27_spill] sm:$0xff] %v9647_v7  ;;  %v9652_v61 = vmax.f32 %v16465_v8, %v1586_v51  ;;  %v1603_v24 = vsel %vm1576_vm3, %v1539_v13, -inf  ;;  %v959_v35 = vadd.f32 1.0, %v9500_v14  ;;  %v9675_v5 = vmax.f32 %v1429_v53, %v1588_v6  ;;  %v7512_v6 = vld [vmem:[#allocation9 + $0x18] sm:$0xff]  }
 0x207   : > { %16466 = vst [vmem:[#allocation100_spill] sm:$0xff] %v9656_v56  ;;  %16468 = vst [vmem:[#allocation28_spill] sm:$0xff] %v9660_v0  ;;  %v9677_v13 = vmax.f32 %v1444_v50, %v1603_v24  ;;  %v16471_v17 = vsub.f32 0.0, %v9354_v43  ;;  %v9686_v51 = vsel %vm15890_vm14, %v9435_v16, -inf  ;;  %v9691_v14 = vsel %vm15890_vm14, %v9530_v4, -inf  ;;  %v9714_v16 = vpop.permute.xlu1 %1981  ;;  %v16477_v4 = vld [vmem:[#allocation26_spill] sm:$0xff]  ;;  %5339 = vmatpush1.bf16.msra.mxu1 %v7512_v6 }
 0x208   : > { %16469 = vst [vmem:[#allocation101_spill] sm:$0xff] %v9675_v5  ;;  %16472 = vst [vmem:[#allocation103_spill] sm:$0xff] %v9686_v51  ;;  %7651 = vrcp.f32 %v959_v35  ;;  %v9695_v53 = vsel %vm15890_vm14, %v1730_v41, -inf  ;;  %v877_v24 = vmul.f32 1.442695, %v816_v46  ;;  %vm1989_vm5 = vcmp.eq.s32.totalorder %v9714_v16, 1  ;;  %5340 = vmatprep.subr.bf16.mxu1 %v16323_v26 }
 0x209   : > { %16470 = vst [vmem:[#allocation102_spill] sm:$0xff] %v9677_v13  ;;  %v913_v8 = vmul.f32 1.442695, %v16471_v17  ;;  %16473 = vst [vmem:[#allocation104_spill] sm:$0xff] %v9691_v14  ;;  %v9719_v50 = vld [vmem:[%s15759_s2] ss:$0 sm:$0xff] }
 0x20a   : > { %16474 = vst [vmem:[#allocation105_spill] sm:$0xff] %v9695_v53  ;;  %16476 = vst [vmem:[#allocation107_spill] sm:$0xff] %v9719_v50  ;;  %v9723_v46 = vadd.f32 %v9719_v50, %v16477_v4  ;;  %v16478_v35 = vld [vmem:[#allocation32_spill] sm:$0xff]  ;;  %v16511_v13 = vld [vmem:[#allocation22_spill] sm:$0xff] }
 0x20b   : > { %7653 = vpow2.f32 %v913_v8  ;;  %v9712_v8 = vpop.permute.xlu0 %1774  ;;  %v9729_v17 = vadd.f32 %v9719_v50, %v16478_v35  ;;  %v16480_v41 = vld [vmem:[#allocation48_spill] sm:$0xff]  ;;  %16482 = vst [vmem:[#allocation32_spill] sm:$0xff] %v9740_v1 }
 0x20c   : > { %16475 = vst [vmem:[#allocation106_spill] sm:$0xff] %v9712_v8  ;;  %vm1782_vm4 = vcmp.eq.s32.totalorder %v9712_v8, 1  ;;  %7655 = vpow2.f32 %v877_v24  ;;  %v832_v35 = vsub.f32 0.0, %v9723_v46  ;;  %v16483_v24 = vld [vmem:[#allocation44_spill] sm:$0xff] }
 0x20d   : > { %16479 = vst [vmem:[#allocation26_spill] sm:$0xff] %v9729_v17  ;;  %v1785_v9 = vsel %vm1782_vm4, %v16480_v41, -inf  ;;  %v1788_v54 = vsel %vm1782_vm4, %v16481_v38, -inf  ;;  %v1791_v4 = vsel %vm1782_vm4, %v9072_v30, -inf  ;;  %v1794_v6 = vsel %vm1782_vm4, %v9570_v58, -inf  ;;  %v16485_v53 = vld [vmem:[#allocation60_spill] sm:$0xff] }
 0x20e   : > { %v1803_v41 = vsel %vm1782_vm4, %v16483_v24, -inf  ;;  %v1806_v38 = vsel %vm1782_vm4, %v9274_v57, -inf  ;;  %v1809_v30 = vsel %vm1782_vm4, %v1746_v49, -inf  ;;  %v1833_v45 = vmax.f32 %v9103_v33, %v1785_v9  ;;  %v16484_v57 = vld [vmem:[#allocation50_spill] sm:$0xff] }
 0x20f   : > { %v1836_v28 = vmax.f32 %v9302_v47, %v1788_v54  ;;  %v1839_v23 = vmax.f32 %v9508_v48, %v1791_v4  ;;  %v909_v29 = vmul.f32 1.442695, %v832_v35  ;;  %v1842_v58 = vmax.f32 %v9593_v59, %v1794_v6  ;;  %v7650_v48 = vpop.eup %7649  ;;  %v9777_v54 = vpop.f32.mrb[22].mxu1  ;;  %v16490_v6 = vld [vmem:[#allocation30_spill] sm:$0xff] }
 0x210   : > { %v1851_v63 = vmax.f32 %v9105_v19, %v1803_v41  ;;  %v1854_v24 = vmax.f32 %v9304_v27, %v1806_v38  ;;  %v1857_v1 = vmax.f32 %v9545_v42, %v1809_v30  ;;  %v1992_v49 = vsel %vm1989_vm5, %v16484_v57, -inf  ;;  %v16486_v42 = vld [vmem:[#allocation45_spill] sm:$0xff]  ;;  %16487 = vst [vmem:[#allocation48_spill] sm:$0xff] %v9777_v54  ;;  %v16509_v54 = vld [vmem:[#allocation80_spill] sm:$0xff] }
 0x211   : > { %v1995_v33 = vsel %vm1989_vm5, %v16485_v53, -inf  ;;  %v1998_v47 = vsel %vm1989_vm5, %v9080_v52, -inf  ;;  %v975_v59 = vadd.f32 1.0, %v7648_v25  ;;  %7657 = vpow2.f32 %v909_v29  ;;  %v16488_v53 = vld [vmem:[#allocation81_spill] sm:$0xff]  ;;  %v9785_v29 = vpop.f32.mrb[23].mxu1 }
 0x212   : > { %v2001_v19 = vsel %vm1989_vm5, %v9581_v18, -inf  ;;  %v2010_v27 = vsel %vm1989_vm5, %v16486_v42, -inf  ;;  %v7652_v9 = vpop.eup %7651  ;;  %v962_v4 = vadd.f32 1.0, %v7650_v48  ;;  %v2013_v35 = vsel %vm1989_vm5, %v16488_v53, -inf  ;;  %16489 = vst [vmem:[#allocation59_spill] sm:$0xff] %v9785_v29 }
 0x213   : > { %v2016_v52 = vsel %vm1989_vm5, %v9633_v11, -inf  ;;  %v2040_v25 = vmax.f32 %v1833_v45, %v1992_v49  ;;  %v9788_v41 = vmul.f32 %v7652_v9, %v16490_v6  ;;  %7659 = vrcp.f32 %v975_v59 }
 0x214   : > { %v2043_v38 = vmax.f32 %v1836_v28, %v1995_v33  ;;  %v9790_v30 = vmax.f32 %v1839_v23, %v1998_v47  ;;  %7661 = vrcp.f32 %v962_v4  ;;  %v9792_v48 = vmax.f32 %v1842_v58, %v2001_v19 }
 0x215   : > { %v7654_v18 = vpop.eup %7653  ;;  %16491 = vst [vmem:[#allocation44_spill] sm:$0xff] %v9788_v41  ;;  %v9794_v42 = vmax.f32 %v1851_v63, %v2010_v27  ;;  %v15826_v53 = vrot.slane %v9788_v41, 7  ;;  %v15825_v11 = vrot.slane %v9788_v41, 6  ;;  %v15824_v45 = vrot.slane %v9788_v41, 2 }
 0x216   : > { %v978_v57 = vadd.f32 1.0, %v7654_v18  ;;  %v15823_v49 = vrot.slane %v9788_v41, 1  ;;  %v7656_v9 = vpop.eup %7655  ;;  %v9800_v59 = vmax.f32 %v1854_v24, %v2013_v35  ;;  %v9802_v23 = vmax.f32 %v1857_v1, %v2016_v52 }
 0x217   : > { %v2240_v28 = vmax.f32 %v2040_v25, %v2043_v38  ;;  %v16492_v63 = vrot.slane %v9647_v7, 7  ;;  %v16493_v33 = vrot.slane %v9647_v7, 6  ;;  %v16494_v1 = vrot.slane %v9647_v7, 2 }
 0x218   : > { %7663 = vrcp.f32 %v978_v57  ;;  %v16496_v19 = vrot.slane %v9647_v7, 1  ;;  %v960_v52 = vadd.f32 1.0, %v7656_v9  ;;  %v2243_v25 = vmax.f32 %v2043_v38, %v9790_v30 }
 0x219   : > { %v1344_v58 = vsel %vm1138_vm0, %v16492_v63, %v15826_v53  ;;  %v1551_v47 = vsel %vm16451_vm1, %v16493_v33, %v15825_v11  ;;  %v1758_v24 = vsel %vm16495_vm15, %v16494_v1, %v15824_v45  ;;  %v2258_v57 = vmax.f32 %v9794_v42, %v9800_v59  ;;  %v7513_v33 = vld [vmem:[#allocation9 + $0x20] sm:$0xff]   ;;  %v16500_v63 = vld [vmem:[#allocation33_spill] sm:$0xff]  ;;  %vm16527_vm1 = vmmov %vm16497_vm6 }
 0x21a   : > { %v9828_v27 = vsel %vm16497_vm6, %v16496_v19, %v15823_v49  ;;  %v1383_v4 = vsel %vm16070_vm10, %v1344_v58, -inf  ;;  %v1590_v35 = vsel %vm1575_vm12, %v1551_v47, -inf  ;;  %7665 = vrcp.f32 %v960_v52  ;;  %v9849_v47 = vpop.permute.xlu0 %1780  ;;  %5341 = vmatpush1.bf16.msra.mxu1 %v7513_v33  ;;  %v16502_v49 = vld [vmem:[#allocation38_spill] sm:$0xff]  ;;  %v16504_v33 = vld [vmem:[#allocation91_spill] sm:$0xff]  ;;  %v16505_v45 = vld [vmem:[#allocation97_spill] sm:$0xff] }
 0x21b   : > { %16498 = vst [vmem:[#allocation50_spill] sm:$0xff] %v9828_v27  ;;  %v1431_v18 = vmax.f32 %v9788_v41, %v1383_v4  ;;  %v9843_v58 = vmax.f32 %v2240_v28, %v9790_v30  ;;  %v9846_v9 = vmax.f32 %v2243_v25, %v9792_v48  ;;  %v837_v38 = vsub.f32 0.0, %v9729_v17  ;;  %v7658_v1 = vpop.eup %7657  ;;  %5342 = vmatprep.subr.bf16.mxu1 %v16323_v26  ;;  %v7514_v11 = vld [vmem:[#allocation9 + $0x28] sm:$0xff]   ;;  %vm16533_vm15 = vmmov %vm16521_vm7 }
 0x21c   : > { %v9854_v4 = vmax.f32 %v2258_v57, %v9802_v23  ;;  %vm16052_vm8 = vcmp.eq.s32.totalorder %v9849_v47, 1  ;;  %v9859_v52 = vadd.f32 %v9719_v50, %v16500_v63  ;;  %v976_v28 = vadd.f32 1.0, %v7658_v1  ;;  %v16503_v57 = vld [vmem:[#allocation77_spill] sm:$0xff]  ;;  %vm16535_vm6 = vmmov %vm16521_vm7 }
 0x21d   : > { %16499 = vst [vmem:[#allocation60_spill] sm:$0xff] %v9843_v58  ;;  %v9851_v19 = vmax.f32 %v1431_v18, %v1590_v35  ;;  %v9863_v25 = vmax.f32 %v9843_v58, %v9792_v48  ;;  %v919_v6 = vmul.f32 1.442695, %v837_v38  ;;  %v9868_v35 = vsel %vm16052_vm8, %v16502_v49, -inf  ;;  %v7660_v18 = vpop.eup %7659  ;;  %v16506_v58 = vld [vmem:[#allocation16_spill] sm:$0xff] }
 0x21e   : > { %v9874_v63 = vsel %vm16052_vm8, %v16503_v57, -inf  ;;  %v9879_v1 = vsel %vm16052_vm8, %v16504_v33, -inf  ;;  %v9884_v38 = vsel %vm16052_vm8, %v16505_v45, -inf  ;;  %v9888_v49 = vsel %vm16052_vm8, %v1758_v24, -inf  ;;  %v7662_v53 = vpop.eup %7661  ;;  %v16508_v57 = vld [vmem:[#allocation62_spill] sm:$0xff]  ;;  %5343 = vmatpush1.bf16.msra.mxu1 %v7514_v11 }
 0x21f   : > { %16501 = vst [vmem:[#allocation45_spill] sm:$0xff] %v9863_v25  ;;  %v9891_v29 = vmul.f32 %v7660_v18, %v16506_v58  ;;  %7667 = vrcp.f32 %v976_v28  ;;  %v9896_v33 = vsel %vm16052_vm8, %v16508_v57, -inf  ;;  %v9901_v45 = vsel %vm16052_vm8, %v16509_v54, -inf  ;;  %v16513_v24 = vld [vmem:[#allocation94_spill] sm:$0xff]  ;;  %v9912_v18 = vpop.f32.mrb[24].mxu1  ;;  %5344 = vmatprep.subr.bf16.mxu1 %v16323_v26 }
 0x220   : > { %16510 = vst [vmem:[#allocation30_spill] sm:$0xff] %v9901_v45  ;;  %v9904_v40 = vmul.f32 %v7662_v53, %v16511_v13  ;;  %7669 = vpow2.f32 %v919_v6  ;;  %v9909_v58 = vsel %vm16052_vm8, %v16513_v24, -inf  ;;  %16515 = vst [vmem:[#allocation77_spill] sm:$0xff] %v9912_v18  ;;  %v9918_v53 = vpop.f32.mrb[25].mxu1  ;;  %v16517_v18 = vld [vmem:[#allocation20_spill] sm:$0xff] }
 0x221   : > { %16507 = vst [vmem:[#allocation81_spill] sm:$0xff] %v9891_v29  ;;  %16514 = vst [vmem:[#allocation38_spill] sm:$0xff] %v9909_v58  ;;  %v15839_v12 = vrot.slane %v9891_v29, 7  ;;  %v16518_v54 = vrot.slane %v16517_v18, 7  ;;  %v16519_v13 = vrot.slane %v9891_v29, 6  ;;  %v16522_v14 = vrot.slane %v9891_v29, 2 }
 0x222   : > { %16512 = vst [vmem:[#allocation33_spill] sm:$0xff] %v9904_v40  ;;  %v7664_v57 = vpop.eup %7663  ;;  %16516 = vst [vmem:[#allocation91_spill] sm:$0xff] %v9918_v53  ;;  %v1265_v6 = vrot.slane %v9904_v40, 7  ;;  %v1472_v24 = vrot.slane %v9904_v40, 6  ;;  %v1679_v28 = vrot.slane %v9904_v40, 2  ;;  %v1886_v11 = vrot.slane %v9904_v40, 1 }
 0x223   : > { %v1333_v62 = vsel %vm1138_vm0, %v16518_v54, %v15839_v12  ;;  %v16520_v53 = vrot.slane %v16517_v18, 6  ;;  %v16523_v5 = vrot.slane %v16517_v18, 2  ;;  %v16525_v36 = vrot.slane %v9891_v29, 1  ;;  %v7515_v58 = vld [vmem:[#allocation9 + $0x30] sm:$0xff]  }
 0x224   : > { %v16526_v32 = vrot.slane %v16517_v18, 1  ;;  %v1399_v12 = vsel %vm1369_vm13, %v1333_v62, -inf  ;;  %v7666_v27 = vpop.eup %7665  ;;  %5345 = vmatpush1.bf16.msra.mxu1 %v7515_v58 }
 0x225   : > { %v1540_v39 = vsel %vm16521_vm7, %v16520_v53, %v16519_v13  ;;  %v1747_v51 = vsel %vm16524_vm9, %v16523_v5, %v16522_v14  ;;  %v16528_v53 = vld [vmem:[#allocation35_spill] sm:$0xff]  ;;  %v16530_v5 = vld [vmem:[#allocation41_spill] sm:$0xff]  ;;  %vm16537_vm7 = vmmov %vm16524_vm9  ;;  %5346 = vmatprep.subr.bf16.mxu1 %v16323_v26 }
 0x226   : > { %v9949_v54 = vsel %vm16527_vm1, %v16526_v32, %v16525_v36  ;;  %v1606_v13 = vsel %vm1576_vm3, %v1540_v39, -inf  ;;  %v16529_v60 = vrot.slane %v16528_v53, 7  ;;  %v16531_v14 = vrot.slane %v16530_v5, 7  ;;  %vm16539_vm9 = vmmov %vm16537_vm7 }
 0x227   : > { %v1447_v36 = vmax.f32 %v9891_v29, %v1399_v12  ;;  %v16532_v39 = vrot.slane %v16528_v53, 6  ;;  %v16536_v56 = vrot.slane %v16528_v53, 2 }
 0x228   : > { %v1329_v37 = vsel %vm1138_vm0, %v1265_v6, %v16529_v60  ;;  %v1345_v55 = vsel %vm1138_vm0, %v16531_v14, %v1265_v6  ;;  %v16534_v6 = vrot.slane %v16530_v5, 6 }
 0x229   : > { %v1386_v32 = vsel %vm16070_vm10, %v1345_v55, -inf  ;;  %v1387_v62 = vsel %vm1369_vm13, %v1329_v37, -inf  ;;  %v1536_v17 = vsel %vm16533_vm15, %v1472_v24, %v16532_v39  ;;  %v9980_v14 = vmax.f32 %v1447_v36, %v1606_v13  ;;  %vm16544_vm15 = vmmov %vm16527_vm1 }
 0x22a   : > { %v1434_v60 = vmax.f32 %v9904_v40, %v1386_v32  ;;  %v1435_v50 = vmax.f32 %v16528_v53, %v1387_v62  ;;  %v1552_v12 = vsel %vm16535_vm6, %v16534_v6, %v1472_v24  ;;  %v1594_v55 = vsel %vm1576_vm3, %v1536_v17, -inf  ;;  %v9994_v24 = vpop.f32.mrb[26].mxu1  ;;  %v7668_v40 = vpop.eup %7667 }
 0x22b   : > { %v1593_v37 = vsel %vm1575_vm12, %v1552_v12, -inf  ;;  %v1743_v32 = vsel %vm16537_vm7, %v1679_v28, %v16536_v56  ;;  %v16538_v62 = vrot.slane %v16530_v5, 2  ;;  %16540 = vst [vmem:[#allocation97_spill] sm:$0xff] %v9994_v24  ;;  %v16542_v13 = vrot.slane %v16528_v53, 1 }
 0x22c   : > { %v9996_v6 = vmax.f32 %v1434_v60, %v1593_v37  ;;  %v9998_v17 = vmax.f32 %v1435_v50, %v1594_v55  ;;  %v16543_v12 = vrot.slane %v16530_v5, 1  ;;  %v10014_v60 = vmul.f32 %v7666_v27, %v9395_v34  ;;  %v10024_v37 = vpop.eup %7669 }
 0x22d   : > { %v9992_v39 = vsel %vm16539_vm9, %v16538_v62, %v1679_v28  ;;  %v1950_v36 = vsel %vm16527_vm1, %v1886_v11, %v16542_v13  ;;  %v10011_v28 = vmul.f32 %v7664_v57, %v9354_v43  ;;  %v10018_v50 = vsel %vm1782_vm4, %v1743_v32, -inf  ;;  %vm16558_vm9 = vmmov %vm16527_vm1 }
 0x22e   : > { %16541 = vst [vmem:[#allocation16_spill] sm:$0xff] %v9998_v17  ;;  %v10008_v56 = vsel %vm16544_vm15, %v16543_v12, %v1886_v11  ;;  %16547 = vst [vmem:[#allocation22_spill] sm:$0xff] %v10014_v60  ;;  %v10022_v55 = vsel %vm1782_vm4, %v1747_v51, -inf  ;;  %v10029_v13 = vmul.f32 %v7668_v40, %v9723_v46  ;;  %v10035_v34 = vsel %vm1989_vm5, %v1950_v36, -inf  ;;  %v10041_v12 = vpop.f32.mrb[27].mxu1 }
 0x22f   : > { %16545 = vst [vmem:[#allocation62_spill] sm:$0xff] %v10008_v56  ;;  %16546 = vst [vmem:[#allocation80_spill] sm:$0xff] %v10011_v28  ;;  %v15850_v27 = vrot.slane %v10011_v28, 7  ;;  %v1280_v40 = vrot.slane %v10014_v60, 7  ;;  %v1487_v46 = vrot.slane %v10014_v60, 6  ;;  %v1694_v11 = vrot.slane %v10014_v60, 2 }
 0x230   : > { %16549 = vst [vmem:[#allocation94_spill] sm:$0xff] %v10029_v13  ;;  %16550 = vst [vmem:[#allocation108_spill] sm:$0xff] %v10041_v12  ;;  %v1901_v43 = vrot.slane %v10014_v60, 1  ;;  %v16551_v36 = vrot.slane %v9660_v0, 7  ;;  %v16552_v57 = vrot.slane %v10011_v28, 6  ;;  %v16553_v32 = vrot.slane %v9660_v0, 6 }
 0x231   : > { %v16554_v53 = vrot.slane %v10011_v28, 2  ;;  %v16555_v12 = vrot.slane %v9660_v0, 2  ;;  %v16556_v62 = vrot.slane %v10011_v28, 1  ;;  %v16557_v17 = vrot.slane %v9660_v0, 1  ;;  %vm16562_vm1 = vmmov %vm16535_vm6  ;;  %v10159_v8 = vpop.f32.mrb[28].mxu1 }
 0x232   : > { %v1334_v51 = vsel %vm1138_vm0, %v16551_v36, %v15850_v27  ;;  %v1541_v5 = vsel %vm16535_vm6, %v16553_v32, %v16552_v57  ;;  %v16559_v32 = vrot.slane %v9647_v7, 7  ;;  %vm16564_vm15 = vmmov %vm16562_vm1  ;;  %16577 = vst [vmem:[#allocation109_spill] sm:$0xff] %v10159_v8 }
 0x233   : > { %v1748_v24 = vsel %vm16537_vm7, %v16555_v12, %v16554_v53  ;;  %v1955_v36 = vsel %vm16558_vm9, %v16557_v17, %v16556_v62  ;;  %v1402_v27 = vsel %vm1369_vm13, %v1334_v51, -inf  ;;  %v1609_v57 = vsel %vm1576_vm3, %v1541_v5, -inf  ;;  %vm16566_vm6 = vmmov %vm16537_vm7 }
 0x234   : > { %v1312_v56 = vsel %vm1138_vm0, %v1280_v40, %v16559_v32  ;;  %v16560_v53 = vrot.slane %v9788_v41, 7  ;;  %v1450_v0 = vmax.f32 %v10011_v28, %v1402_v27  ;;  %v16561_v5 = vrot.slane %v9647_v7, 6  ;;  %vm16568_vm7 = vmmov %vm16566_vm6 }
 0x235   : > { %v1385_v62 = vsel %vm1370_vm11, %v1312_v56, -inf }
 0x236   : > { %v1328_v12 = vsel %vm1138_vm0, %v16560_v53, %v1280_v40  ;;  %v1519_v51 = vsel %vm16562_vm1, %v1487_v46, %v16561_v5  ;;  %v1433_v45 = vmax.f32 %v9647_v7, %v1385_v62  ;;  %v16563_v40 = vrot.slane %v9788_v41, 6  ;;  %vm16571_vm1 = vmmov %vm16558_vm9 }
 0x237   : > { %v1384_v17 = vsel %vm1369_vm13, %v1328_v12, -inf  ;;  %v1592_v53 = vsel %vm1577_vm2, %v1519_v51, -inf  ;;  %v10100_v12 = vmax.f32 %v1450_v0, %v1609_v57  ;;  %v16565_v5 = vrot.slane %v9647_v7, 2 }
 0x238   : > { %v1432_v32 = vmax.f32 %v10014_v60, %v1384_v17  ;;  %v1535_v27 = vsel %vm16564_vm15, %v16563_v40, %v1487_v46  ;;  %v16567_v62 = vrot.slane %v9788_v41, 2  ;;  %v10114_v40 = vmax.f32 %v1433_v45, %v1592_v53  ;;  %v7516_v53 = vld [vmem:[#allocation9 + $0x38] sm:$0xff]  }
 0x239   : > { %v1591_v56 = vsel %vm1576_vm3, %v1535_v27, -inf  ;;  %v1726_v17 = vsel %vm16566_vm6, %v1694_v11, %v16565_v5  ;;  %v16569_v57 = vrot.slane %v9647_v7, 1  ;;  %v16570_v27 = vrot.slane %v9788_v41, 1  ;;  %vm16576_vm6 = vmmov %vm16564_vm15  ;;  %5347 = vmatpush1.bf16.msra.mxu1 %v7516_v53 }
 0x23a   : > { %v1742_v60 = vsel %vm16568_vm7, %v16567_v62, %v1694_v11  ;;  %v10112_v46 = vmax.f32 %v1432_v32, %v1591_v56  ;;  %v10118_v0 = vsel %vm15890_vm14, %v1726_v17, -inf  ;;  %v1301_v45 = vrot.slane %v10029_v13, 7  ;;  %5348 = vmatprep.subr.bf16.mxu1 %v16323_v26 }
 0x23b   : > { %v10124_v51 = vsel %vm16558_vm9, %v1901_v43, %v16569_v57  ;;  %v1949_v58 = vsel %vm16571_vm1, %v16570_v27, %v1901_v43  ;;  %v1508_v11 = vrot.slane %v10029_v13, 6  ;;  %v1715_v32 = vrot.slane %v10029_v13, 2  ;;  %vm16581_vm9 = vmmov %vm16568_vm7 }
 0x23c   : > { %v1922_v5 = vrot.slane %v10029_v13, 1  ;;  %v1797_v17 = vsel %vm1782_vm4, %v1742_v60, -inf  ;;  %v10141_v62 = vsel %vm1782_vm4, %v1748_v24, -inf  ;;  %v16572_v43 = vrot.slane %v9891_v29, 7 }
 0x23d   : > { %v16573_v27 = vrot.slane %v16517_v18, 7  ;;  %v16574_v56 = vrot.slane %v9891_v29, 6  ;;  %v16575_v60 = vrot.slane %v16517_v18, 6 }
 0x23e   : > { %v1317_v57 = vsel %vm1138_vm0, %v16572_v43, %v1301_v45 }
 0x23f   : > { %v1349_v7 = vsel %vm1138_vm0, %v1301_v45, %v16573_v27  ;;  %v1524_v41 = vsel %vm16564_vm15, %v16574_v56, %v1508_v11  ;;  %v1556_v24 = vsel %vm16576_vm6, %v1508_v11, %v16575_v60  ;;  %v1400_v31 = vsel %vm1370_vm11, %v1317_v57, -inf  ;;  %v10169_v27 = vpop.f32.mrb[29].mxu1  ;;  %vm16585_vm15 = vmmov %vm16571_vm1 }
 0x240   : > { %v1398_v43 = vsel %vm16070_vm10, %v1349_v7, -inf  ;;  %v1605_v45 = vsel %vm1575_vm12, %v1556_v24, -inf  ;;  %v1607_v56 = vsel %vm1577_vm2, %v1524_v41, -inf  ;;  %16578 = vst [vmem:[#allocation110_spill] sm:$0xff] %v10169_v27  ;;  %v1448_v53 = vmax.f32 %v10029_v13, %v1400_v31 }
 0x241   : > { %v1446_v11 = vmax.f32 %v16517_v18, %v1398_v43  ;;  %v16579_v60 = vrot.slane %v9891_v29, 2  ;;  %v16580_v57 = vrot.slane %v16517_v18, 2  ;;  %v16583_v27 = vrot.slane %v9891_v29, 1 }
 0x242   : > { %v16584_v31 = vrot.slane %v16517_v18, 1  ;;  %v1845_v13 = vmax.f32 %v9851_v19, %v1797_v17  ;;  %v10210_v29 = vsel %vm1989_vm5, %v1955_v36, -inf  ;;  %v16586_v19 = vmax.f32 %v9996_v6, %v10018_v50  ;;  %v16616_v18 = vld [vmem:[#allocation82_spill] sm:$0xff] }
 0x243   : > { %v1731_v7 = vsel %vm16568_vm7, %v16579_v60, %v1715_v32  ;;  %v1763_v24 = vsel %vm16581_vm9, %v1715_v32, %v16580_v57  ;;  %v10190_v43 = vsel %vm16571_vm1, %v16583_v27, %v1922_v5  ;;  %v1653_v8 = vmax.f32 %v1446_v11, %v1605_v45 }
 0x244   : > { %v10184_v41 = vsel %vm15890_vm14, %v1731_v7, -inf  ;;  %v10196_v60 = vsel %vm16585_vm15, %v1922_v5, %v16584_v31  ;;  %v10199_v32 = vmax.f32 %v1448_v53, %v1607_v56  ;;  %v2004_v57 = vsel %vm1989_vm5, %v1949_v58, -inf  ;;  %v16611_v7 = vld [vmem:[#allocation26_spill] sm:$0xff] }
 0x245   : > { %16582 = vst [vmem:[#allocation111_spill] sm:$0xff] %v10184_v41  ;;  %v2019_v27 = vsel %vm1989_vm5, %v9949_v54, -inf  ;;  %v2052_v5 = vmax.f32 %v1845_v13, %v2004_v57  ;;  %v2055_v17 = vmax.f32 %v16586_v19, %v10035_v34  ;;  %v1860_v45 = vmax.f32 %v1653_v8, %v10022_v55 }
 0x246   : > { %v981_v56 = vadd.f32 1.0, %v10024_v37  ;;  %v10221_v58 = vsel %vm16052_vm8, %v9992_v39, -inf  ;;  %v10225_v54 = vsel %vm16052_vm8, %v1763_v24, -inf  ;;  %v16587_v6 = vmax.f32 %v9790_v30, %v9792_v48 }
 0x247   : > { %v2249_v13 = vmax.f32 %v9792_v48, %v2052_v5  ;;  %v2252_v36 = vmax.f32 %v2052_v5, %v2055_v17  ;;  %v2255_v11 = vmax.f32 %v2055_v17, %v9794_v42  ;;  %v10232_v50 = vmax.f32 %v1860_v45, %v2019_v27 }
 0x248   : > { %v2342_v8 = vmax.f32 %v16587_v6, %v2052_v5  ;;  %v2436_v55 = vmax.f32 %v9846_v9, %v2052_v5  ;;  %v10236_v39 = vmax.f32 %v9863_v25, %v2052_v5  ;;  %7671 = vrcp.f32 %v981_v56  ;;  %v16591_v9 = vld [vmem:[#allocation67_spill] sm:$0xff] }
 0x249   : > { %v2345_v37 = vmax.f32 %v2249_v13, %v2055_v17  ;;  %v2348_v34 = vmax.f32 %v2252_v36, %v9794_v42  ;;  %v2351_v53 = vmax.f32 %v2255_v11, %v9800_v59  ;;  %v16590_v30 = vsub.f32 0.0, %v9859_v52  ;;  %v16593_v13 = vld [vmem:[#allocation85_spill] sm:$0xff] }
 0x24a   : > { %16588 = vst [vmem:[#allocation112_spill] sm:$0xff] %v10236_v39  ;;  %v2439_v24 = vmax.f32 %v2342_v8, %v2055_v17  ;;  %v10242_v57 = vmax.f32 %v2436_v55, %v2055_v17  ;;  %v1835_v27 = vmax.f32 %v16591_v9, %v9868_v35  ;;  %v1838_v17 = vmax.f32 %v16593_v13, %v9874_v63  ;;  %v16597_v63 = vld [vmem:[#allocation68_spill] sm:$0xff]  ;;  %v16604_v13 = vld [vmem:[#allocation54_spill] sm:$0xff] }
 0x24b   : > { %v915_v48 = vmul.f32 1.442695, %v16590_v30  ;;  %v2442_v5 = vmax.f32 %v2345_v37, %v9794_v42  ;;  %v2445_v19 = vmax.f32 %v2348_v34, %v9800_v59  ;;  %v2448_v45 = vmax.f32 %v2351_v53, %v9802_v23  ;;  %v16599_v37 = vld [vmem:[#allocation30_spill] sm:$0xff]  ;;  %v16602_v53 = vld [vmem:[#allocation100_spill] sm:$0xff]  ;;  %v10279_v30 = vpop.permute.xlu1 %1987 }
 0x24c   : > { %16589 = vst [vmem:[#allocation113_spill] sm:$0xff] %v10242_v57  ;;  %v10252_v56 = vmax.f32 %v2439_v24, %v9794_v42  ;;  %v1841_v36 = vmax.f32 %v9652_v61, %v9879_v1  ;;  %v1844_v11 = vmax.f32 %v9654_v3, %v9884_v38  ;;  %v1847_v42 = vmax.f32 %v10114_v40, %v9888_v49  ;;  %v16598_v61 = vld [vmem:[#allocation69_spill] sm:$0xff]  ;;  %v16600_v3 = vld [vmem:[#allocation86_spill] sm:$0xff]  ;;  %v16608_v49 = vld [vmem:[#allocation79_spill] sm:$0xff] }
 0x24d   : > { %7673 = vpow2.f32 %v915_v48  ;;  %v10261_v35 = vmax.f32 %v2442_v5, %v9800_v59  ;;  %v10264_v6 = vmax.f32 %v2445_v19, %v9802_v23  ;;  %v10267_v8 = vmax.f32 %v2448_v45, %v10232_v50  ;;  %v16601_v34 = vld [vmem:[#allocation38_spill] sm:$0xff]  ;;  %v10281_v48 = vpop.f32.mrb[30].mxu1  ;;  %v16607_v5 = vld [vmem:[#allocation39_spill] sm:$0xff]  ;;  %v16615_v9 = vld [vmem:[#allocation64_spill] sm:$0xff] }
 0x24e   : > { %16592 = vst [vmem:[#allocation67_spill] sm:$0xff] %v10252_v56  ;;  %v1850_v55 = vmax.f32 %v16597_v63, %v10221_v58  ;;  %v1853_v1 = vmax.f32 %v16598_v61, %v9896_v33  ;;  %v1856_v38 = vmax.f32 %v16600_v3, %v16599_v37  ;;  %v1859_v24 = vmax.f32 %v16602_v53, %v16601_v34  ;;  %v16605_v63 = vld [vmem:[#allocation107_spill] sm:$0xff]  ;;  %v16606_v37 = vld [vmem:[#allocation66_spill] sm:$0xff] }
 0x24f   : > { %16594 = vst [vmem:[#allocation85_spill] sm:$0xff] %v10261_v35  ;;  %16595 = vst [vmem:[#allocation114_spill] sm:$0xff] %v10264_v6  ;;  %v1862_v45 = vmax.f32 %v10199_v32, %v10225_v54  ;;  %v10294_v61 = vadd.f32 %v16605_v63, %v16604_v13  ;;  %vm15959_vm6 = vcmp.eq.s32.totalorder %v10279_v30, 1  ;;  %v10299_v3 = vadd.f32 %v16605_v63, %v16606_v37  ;;  %v16609_v54 = vld [vmem:[#allocation93_spill] sm:$0xff]  ;;  %v16610_v58 = vld [vmem:[#allocation98_spill] sm:$0xff] }
 0x250   : > { %16596 = vst [vmem:[#allocation115_spill] sm:$0xff] %v10267_v8  ;;  %16603 = vst [vmem:[#allocation68_spill] sm:$0xff] %v10281_v48  ;;  %v1994_v33 = vsel %vm15959_vm6, %v16607_v5, -inf  ;;  %v1997_v32 = vsel %vm15959_vm6, %v16608_v49, -inf  ;;  %v2000_v13 = vsel %vm15959_vm6, %v16609_v54, -inf  ;;  %v2003_v37 = vsel %vm15959_vm6, %v16610_v58, -inf }
 0x251   : > { %v838_v34 = vsub.f32 0.0, %v10294_v61  ;;  %v16613_v19 = vld [vmem:[#allocation50_spill] sm:$0xff]  ;;  %v2012_v54 = vsel %vm15959_vm6, %v16615_v9, -inf  ;;  %v2015_v58 = vsel %vm15959_vm6, %v16616_v18, -inf  ;;  %v836_v18 = vsub.f32 0.0, %v10299_v3 }
 0x252   : > { %v7672_v53 = vpop.eup %7671  ;;  %v2006_v5 = vsel %vm15959_vm6, %v16613_v19, -inf  ;;  %v16614_v40 = vld [vmem:[#allocation62_spill] sm:$0xff]  ;;  %v2021_v19 = vsel %vm15959_vm6, %v10196_v60, -inf  ;;  %v2063_v25 = vmax.f32 %v1856_v38, %v2015_v58  ;;  %v16618_v60 = vmax.f32 %v9800_v59, %v9802_v23 }
 0x253   : > { %v10316_v31 = vmul.f32 %v7672_v53, %v16611_v7  ;;  %v2009_v49 = vsel %vm15959_vm6, %v16614_v40, -inf  ;;  %v16617_v7 = vld [vmem:[#allocation95_spill] sm:$0xff]  ;;  %v921_v39 = vmul.f32 1.442695, %v838_v34  ;;  %v10344_v41 = vmax.f32 %v1862_v45, %v2021_v19  ;;  %v10355_v45 = vpop.permute.xlu0 %1984 }
 0x254   : > { %v2018_v53 = vsel %vm15959_vm6, %v16617_v7, -inf  ;;  %v10350_v6 = vmax.f32 %v16618_v60, %v10232_v50  ;;  %v2042_v40 = vmax.f32 %v1835_v27, %v1994_v33  ;;  %v917_v56 = vmul.f32 1.442695, %v836_v18 }
 0x255   : > { %16612 = vst [vmem:[#allocation69_spill] sm:$0xff] %v10316_v31  ;;  %v10342_v48 = vmax.f32 %v1859_v24, %v2018_v53  ;;  %7675 = vpow2.f32 %v921_v39  ;;  %v2045_v34 = vmax.f32 %v1838_v17, %v1997_v32  ;;  %v2048_v24 = vmax.f32 %v1841_v36, %v2000_v13  ;;  %v16619_v32 = vld [vmem:[#allocation25_spill] sm:$0xff] }
 0x256   : > { %v2054_v59 = vmax.f32 %v1847_v42, %v2006_v5  ;;  %v2057_v53 = vmax.f32 %v1850_v55, %v2009_v49  ;;  %v2060_v27 = vmax.f32 %v1853_v1, %v2012_v54  ;;  %vm1990_vm7 = vcmp.eq.s32.totalorder %v10355_v45, 1  ;;  %v16622_v5 = vld [vmem:[#allocation49_spill] sm:$0xff] }
 0x257   : > { %v7674_v57 = vpop.eup %7673  ;;  %v2263_v9 = vmax.f32 %v2063_v25, %v10342_v48  ;;  %v2242_v39 = vmax.f32 %v2042_v40, %v2045_v34  ;;  %v2245_v33 = vmax.f32 %v2045_v34, %v2048_v24  ;;  %v10363_v36 = vadd.f32 %v16605_v63, %v16619_v32 }
 0x258   : > { %v979_v7 = vadd.f32 1.0, %v7674_v57  ;;  %v2051_v57 = vmax.f32 %v1844_v11, %v2003_v37  ;;  %v2254_v17 = vmax.f32 %v2054_v59, %v2057_v53  ;;  %v2257_v11 = vmax.f32 %v2057_v53, %v2060_v27 }
 0x259   : > { %v10358_v58 = vmax.f32 %v2263_v9, %v10344_v41  ;;  %v2260_v13 = vmax.f32 %v2060_v27, %v2063_v25  ;;  %v10367_v9 = vpop.f32.mrb[31].mxu1  ;;  %v10372_v49 = vsel %vm1990_vm7, %v16622_v5, -inf  ;;  %v16639_v38 = vrot.slane %v10011_v28, 7 }
 0x25a   : > { %7677 = vrcp.f32 %v979_v7  ;;  %v2248_v19 = vmax.f32 %v2048_v24, %v2051_v57  ;;  %v2251_v18 = vmax.f32 %v2051_v57, %v2054_v59  ;;  %v2341_v37 = vmax.f32 %v2245_v33, %v2051_v57  ;;  %16621 = vst [vmem:[#allocation86_spill] sm:$0xff] %v10367_v9 }
 0x25b   : > { %7679 = vpow2.f32 %v917_v56  ;;  %v10365_v56 = vmax.f32 %v2242_v39, %v2048_v24  ;;  %v2350_v1 = vmax.f32 %v2254_v17, %v2060_v27  ;;  %v2353_v54 = vmax.f32 %v2257_v11, %v2063_v25  ;;  %v16624_v39 = vld [vmem:[#allocation78_spill] sm:$0xff] }
 0x25c   : > { %v2344_v42 = vmax.f32 %v2248_v19, %v2054_v59  ;;  %v2347_v55 = vmax.f32 %v2251_v18, %v2057_v53  ;;  %v10375_v40 = vmax.f32 %v2260_v13, %v10342_v48  ;;  %v2438_v7 = vmax.f32 %v2341_v37, %v2054_v59 }
 0x25d   : > { %16620 = vst [vmem:[#allocation30_spill] sm:$0xff] %v10365_v56  ;;  %v10378_v63 = vmax.f32 %v10365_v56, %v2051_v57  ;;  %v2447_v24 = vmax.f32 %v2350_v1, %v2063_v25  ;;  %v10383_v33 = vsel %vm1990_vm7, %v16624_v39, -inf  ;;  %v2450_v19 = vmax.f32 %v2353_v54, %v10342_v48  ;;  %v16635_v39 = vld [vmem:[#allocation63_spill] sm:$0xff] }
 0x25e   : > { %v2441_v60 = vmax.f32 %v2344_v42, %v2057_v53  ;;  %v2444_v34 = vmax.f32 %v2347_v55, %v2060_v27  ;;  %v10391_v32 = vmax.f32 %v2438_v7, %v2057_v53  ;;  %v16630_v42 = vld [vmem:[#allocation92_spill] sm:$0xff]  ;;  %vm16643_vm9 = vcmp.lt.s32.totalorder %v8391_v2, 2  ;;  %v16669_v56 = vld [vmem:[#allocation103_spill] sm:$0xff] }
 0x25f   : > { %16623 = vst [vmem:[#allocation38_spill] sm:$0xff] %v10378_v63  ;;  %v10389_v17 = vmax.f32 %v10378_v63, %v2054_v59  ;;  %v7676_v57 = vpop.eup %7675  ;;  %v10398_v37 = vmax.f32 %v2447_v24, %v10342_v48  ;;  %v1999_v55 = vsel %vm1990_vm7, %v16630_v42, -inf  ;;  %v10404_v54 = vmax.f32 %v2450_v19, %v10344_v41  ;;  %v16632_v59 = vld [vmem:[#allocation96_spill] sm:$0xff]  ;;  %vm16645_vm1 = vmmov %vm16643_vm9  ;;  %v16668_v63 = vld [vmem:[#allocation73_spill] sm:$0xff] }
 0x260   : > { %16626 = vst [vmem:[#allocation54_spill] sm:$0xff] %v10391_v32  ;;  %v10393_v11 = vmax.f32 %v2441_v60, %v2060_v27  ;;  %v10395_v13 = vmax.f32 %v2444_v34, %v2063_v25  ;;  %v982_v5 = vadd.f32 1.0, %v7676_v57  ;;  %v2002_v53 = vsel %vm1990_vm7, %v16632_v59, -inf  ;;  %v16634_v34 = vld [vmem:[#allocation52_spill] sm:$0xff] }
 0x261   : > { %16625 = vst [vmem:[#allocation100_spill] sm:$0xff] %v10389_v17  ;;  %16629 = vst [vmem:[#allocation39_spill] sm:$0xff] %v10398_v37  ;;  %v2005_v25 = vsel %vm1990_vm7, %v10124_v51, -inf  ;;  %v2008_v24 = vsel %vm1990_vm7, %v16634_v34, -inf  ;;  %v10422_v19 = vsel %vm1990_vm7, %v16635_v39, -inf  ;;  %v15876_v42 = vrot.slane %v10404_v54, 7 }
 0x262   : > { %16627 = vst [vmem:[#allocation107_spill] sm:$0xff] %v10393_v11  ;;  %16628 = vst [vmem:[#allocation66_spill] sm:$0xff] %v10395_v13  ;;  %v15874_v60 = vrot.slane %v10395_v13, 7  ;;  %7681 = vrcp.f32 %v982_v5  ;;  %v16636_v34 = vrot.slane %v10261_v35, 7  ;;  %v16640_v37 = vld [vmem:[#allocation28_spill] sm:$0xff]  ;;  %v16646_v32 = vrot.slane %v10011_v28, 2 }
 0x263   : > { %16631 = vst [vmem:[#allocation79_spill] sm:$0xff] %v10404_v54  ;;  %v16641_v13 = vrot.slane %v16640_v37, 7  ;;  %vm16647_vm15 = vcmp.lt.s32.totalorder %v8391_v2, 6 }
 0x264   : > { %v7678_v1 = vpop.eup %7677  ;;  %v2657_v5 = vsel %vm1138_vm0, %v15874_v60, %v16636_v34  ;;  %v16642_v60 = vrot.slane %v10011_v28, 6 }
 0x265   : > { %v7680_v27 = vpop.eup %7679  ;;  %v10413_v7 = vmul.f32 %v7678_v1, %v9859_v52 }
 0x266   : > { %v980_v57 = vadd.f32 1.0, %v7680_v27  ;;  %v16637_v27 = vrot.slane %v10267_v8, 7 }
 0x267   : > { %16633 = vst [vmem:[#allocation93_spill] sm:$0xff] %v10413_v7  ;;  %v1302_v52 = vrot.slane %v10413_v7, 7  ;;  %v1509_v1 = vrot.slane %v10413_v7, 6  ;;  %v1716_v59 = vrot.slane %v10413_v7, 2  ;;  %v1923_v18 = vrot.slane %v10413_v7, 1 }
 0x268   : > { %7683 = vrcp.f32 %v980_v57  ;;  %v10442_v39 = vsel %vm1138_vm0, %v15876_v42, %v16637_v27  ;;  %v16644_v27 = vrot.slane %v16640_v37, 6 }
 0x269   : > { %16638 = vst [vmem:[#allocation98_spill] sm:$0xff] %v10442_v39  ;;  %v1318_v57 = vsel %vm1138_vm0, %v16639_v38, %v1302_v52  ;;  %v1350_v34 = vsel %vm1138_vm0, %v1302_v52, %v16641_v13  ;;  %v1525_v11 = vsel %vm16643_vm9, %v16642_v60, %v1509_v1  ;;  %vm16649_vm9 = vmmov %vm16647_vm15 }
 0x26a   : > { %v1557_v42 = vsel %vm16645_vm1, %v1509_v1, %v16644_v27  ;;  %v1401_v51 = vsel %vm16070_vm10, %v1350_v34, -inf  ;;  %v1403_v38 = vsel %vm1370_vm11, %v1318_v57, -inf  ;;  %v1610_v13 = vsel %vm1577_vm2, %v1525_v11, -inf }
 0x26b   : > { %v1608_v39 = vsel %vm1575_vm12, %v1557_v42, -inf  ;;  %v1449_v52 = vmax.f32 %v16640_v37, %v1401_v51  ;;  %v1451_v60 = vmax.f32 %v10413_v7, %v1403_v38  ;;  %v1732_v1 = vsel %vm16647_vm15, %v16646_v32, %v1716_v59 }
 0x26c   : > { %v16648_v34 = vrot.slane %v16640_v37, 2  ;;  %v10481_v42 = vsel %vm15890_vm14, %v1732_v1, -inf  ;;  %v16650_v51 = vrot.slane %v10011_v28, 1  ;;  %vm16651_vm1 = vcmp.lt.s32.totalorder %v8391_v2, 7 }
 0x26d   : > { %v16652_v38 = vrot.slane %v16640_v37, 1  ;;  %vm16653_vm15 = vmmov %vm16651_vm1  ;;  %v1656_v7 = vmax.f32 %v1449_v52, %v1608_v39  ;;  %v1658_v17 = vmax.f32 %v1451_v60, %v1610_v13  ;;  %v16657_v39 = vld [vmem:[#allocation75_spill] sm:$0xff] }
 0x26e   : > { %v1764_v57 = vsel %vm16649_vm9, %v1716_v59, %v16648_v34  ;;  %v1939_v27 = vsel %vm16651_vm1, %v16650_v51, %v1923_v18  ;;  %v10499_v34 = vsel %vm16070_vm10, %v2657_v5, -inf  ;;  %v16656_v51 = vrot.slane %v10404_v54, 2  ;;  %v16659_v59 = vld [vmem:[#allocation99_spill] sm:$0xff] }
 0x26f   : > { %v1817_v11 = vsel %vm16052_vm8, %v1764_v57, -inf  ;;  %v1971_v32 = vsel %vm16653_vm15, %v1923_v18, %v16652_v38  ;;  %16654 = vst [vmem:[#allocation26_spill] sm:$0xff] %v10499_v34  ;;  %v16655_v57 = vrot.slane %v10267_v8, 2  ;;  %v10511_v13 = vsel %vm1990_vm7, %v16657_v39, -inf  ;;  %v16666_v5 = vld [vmem:[#allocation47_spill] sm:$0xff]  ;;  %vm16685_vm15 = vmmov %vm16649_vm9 }
 0x270   : > { %v2024_v1 = vsel %vm15959_vm6, %v1971_v32, -inf  ;;  %v1863_v52 = vmax.f32 %v1656_v7, %v10141_v62  ;;  %v1865_v60 = vmax.f32 %v1658_v17, %v1817_v11  ;;  %v7682_v32 = vpop.eup %7681  ;;  %v10532_v62 = vsel %vm1990_vm7, %v1939_v27, -inf  ;;  %v16660_v17 = vld [vmem:[#allocation71_spill] sm:$0xff] }
 0x271   : > { %v3043_v28 = vsel %vm16649_vm9, %v16656_v51, %v16655_v57  ;;  %v10523_v57 = vsel %vm1990_vm7, %v16659_v59, -inf  ;;  %v10528_v51 = vsel %vm1990_vm7, %v10190_v43, -inf  ;;  %v16661_v7 = vld [vmem:[#allocation23_spill] sm:$0xff]  ;;  %v10544_v59 = vmul.f32 %v7682_v32, %v10294_v61  ;;  %v16665_v43 = vld [vmem:[#allocation72_spill] sm:$0xff] }
 0x272   : > { %v10518_v38 = vsel %vm16052_vm8, %v3043_v28, -inf  ;;  %v16662_v28 = vmax.f32 %v16660_v17, %v16661_v7  ;;  %v10541_v39 = vmax.f32 %v1863_v52, %v10210_v29  ;;  %v10546_v18 = vmax.f32 %v1865_v60, %v2024_v1  ;;  %v7684_v34 = vpop.eup %7683  ;;  %v16671_v7 = vld [vmem:[#allocation101_spill] sm:$0xff]  ;;  %v16672_v29 = vld [vmem:[#allocation104_spill] sm:$0xff] }
 0x273   : > { %16658 = vst [vmem:[#allocation50_spill] sm:$0xff] %v10518_v38  ;;  %16663 = vst [vmem:[#allocation62_spill] sm:$0xff] %v10544_v59  ;;  %v16667_v37 = vmax.f32 %v16665_v43, %v16666_v5  ;;  %v16670_v17 = vmax.f32 %v16668_v63, %v16669_v56  ;;  %v16673_v52 = vmax.f32 %v16671_v7, %v16672_v29  ;;  %v16675_v60 = vld [vmem:[#allocation16_spill] sm:$0xff]  ;;  %v16676_v5 = vld [vmem:[#allocation51_spill] sm:$0xff]  ;;  %v1717_v32 = vrot.slane %v10544_v59, 2 }
 0x274   : > { %v10538_v11 = vmax.f32 %v16662_v28, %v10372_v49  ;;  %16664 = vst [vmem:[#allocation64_spill] sm:$0xff] %v10546_v18  ;;  %v16674_v61 = vmax.f32 %v10112_v46, %v10118_v0  ;;  %v16678_v56 = vmax.f32 %v9854_v4, %v10232_v50  ;;  %v1924_v46 = vrot.slane %v10544_v59, 1 }
 0x275   : > { %v10552_v27 = vmax.f32 %v16667_v37, %v10383_v33  ;;  %v10557_v49 = vmax.f32 %v16670_v17, %v1999_v55  ;;  %v10562_v28 = vmax.f32 %v16673_v52, %v2002_v53  ;;  %v16677_v33 = vmax.f32 %v16675_v60, %v16676_v5  ;;  %v7517_v52 = vld [vmem:[#allocation9 + $0x40] sm:$0xff]  }
 0x276   : > { %v10567_v1 = vmax.f32 %v16674_v61, %v2005_v25  ;;  %v10578_v63 = vmax.f32 %v16678_v56, %v10541_v39  ;;  %v1303_v55 = vrot.slane %v10544_v59, 7  ;;  %v1510_v53 = vrot.slane %v10544_v59, 6  ;;  %5349 = vmatpush1.bf16.msra.mxu1 %v7517_v52 }
 0x277   : > { %v10572_v37 = vmax.f32 %v16677_v33, %v2008_v24  ;;  %v10585_v0 = vmul.f32 %v7684_v34, %v10299_v3  ;;  %v16681_v7 = vrot.slane %v10316_v31, 7  ;;  %v16682_v34 = vrot.slane %v10316_v31, 6  ;;  %5350 = vmatprep.subr.bf16.mxu1 %v16323_v26 }
 0x278   : > { %16679 = vst [vmem:[#allocation82_spill] sm:$0xff] %v10578_v63  ;;  %vm16683_vm1 = vcmp.lt.s32.totalorder %v8391_v2, 2  ;;  %v16684_v60 = vrot.slane %v10316_v31, 2  ;;  %v16686_v33 = vrot.slane %v10316_v31, 1  ;;  %vm16687_vm9 = vcmp.lt.s32.totalorder %v8391_v2, 7 }
 0x279   : > { %16680 = vst [vmem:[#allocation95_spill] sm:$0xff] %v10585_v0  ;;  %v1319_v29 = vsel %vm1138_vm0, %v16681_v7, %v1303_v55  ;;  %v1526_v61 = vsel %vm16683_vm1, %v16682_v34, %v1510_v53  ;;  %v1271_v34 = vrot.slane %v10585_v0, 7  ;;  %v1478_v43 = vrot.slane %v10585_v0, 6 }
 0x27a   : > { %v1406_v3 = vsel %vm1370_vm11, %v1319_v29, -inf  ;;  %v1733_v5 = vsel %vm16685_vm15, %v16684_v60, %v1717_v32  ;;  %v1940_v56 = vsel %vm16687_vm9, %v16686_v33, %v1924_v46  ;;  %v1613_v29 = vsel %vm1577_vm2, %v1526_v61, -inf  ;;  %vm16692_vm15 = vmmov %vm16683_vm1 }
 0x27b   : > { %v1454_v7 = vmax.f32 %v10544_v59, %v1406_v3  ;;  %v10617_v17 = vsel %vm15890_vm14, %v1733_v5, -inf  ;;  %v1685_v60 = vrot.slane %v10585_v0, 2  ;;  %v1892_v4 = vrot.slane %v10585_v0, 1 }
 0x27c   : > { %v16688_v3 = vmax.f32 %v9802_v23, %v10232_v50  ;;  %v16689_v5 = vrot.slane %v10316_v31, 7  ;;  %v1351_v25 = vsel %vm1138_vm0, %v1303_v55, %v1271_v34  ;;  %v16690_v24 = vmax.f32 %v10342_v48, %v10344_v41  ;;  %v7518_v23 = vld [vmem:[#allocation9 + $0x48] sm:$0xff]  }
 0x27d   : > { %v1661_v61 = vmax.f32 %v1454_v7, %v1613_v29  ;;  %v16691_v29 = vrot.slane %v10316_v31, 6  ;;  %v1558_v55 = vsel %vm16692_vm15, %v1510_v53, %v1478_v43  ;;  %5351 = vmatpush1.bf16.msra.mxu1 %v7518_v23  ;;  %vm16695_vm9 = vcmp.lt.s32.totalorder %v8391_v2, 6 }
 0x27e   : > { %v10627_v33 = vmax.f32 %v16688_v3, %v10541_v39  ;;  %v1335_v52 = vsel %vm1138_vm0, %v1271_v34, %v16689_v5  ;;  %v10640_v59 = vmax.f32 %v16690_v24, %v10546_v18  ;;  %v1404_v3 = vsel %vm16070_vm10, %v1351_v25, -inf  ;;  %5352 = vmatprep.subr.bf16.mxu1 %v16323_v26 }
 0x27f   : > { %v1405_v7 = vsel %vm1369_vm13, %v1335_v52, -inf  ;;  %v1542_v5 = vsel %vm16683_vm1, %v1478_v43, %v16691_v29  ;;  %v1452_v34 = vmax.f32 %v10585_v0, %v1404_v3  ;;  %v1611_v24 = vsel %vm1575_vm12, %v1558_v55, -inf  ;;  %vm16696_vm1 = vmmov %vm16695_vm9  ;;  %v7519_v0 = vld [vmem:[#allocation9 + $0x50] sm:$0xff]  }
 0x280   : > { %v1453_v48 = vmax.f32 %v10316_v31, %v1405_v7  ;;  %v1612_v25 = vsel %vm1576_vm3, %v1542_v5, -inf  ;;  %v16694_v52 = vrot.slane %v10316_v31, 2  ;;  %v1765_v29 = vsel %vm16696_vm1, %v1717_v32, %v1685_v60 }
 0x281   : > { %v16697_v53 = vrot.slane %v10316_v31, 1  ;;  %vm16698_vm15 = vcmp.lt.s32.totalorder %v8391_v2, 7  ;;  %v1659_v7 = vmax.f32 %v1452_v34, %v1611_v24  ;;  %5353 = vmatpush1.bf16.msra.mxu1 %v7519_v0 }
 0x282   : > { %v1749_v9 = vsel %vm16695_vm9, %v1685_v60, %v16694_v52  ;;  %vm16699_vm14 = vmmov %vm16698_vm15  ;;  %v1660_v23 = vmax.f32 %v1453_v48, %v1612_v25  ;;  %v1820_v52 = vsel %vm16052_vm8, %v1765_v29, -inf  ;;  %v16701_v48 = vmax.f32 %v10375_v40, %v10344_v41  ;;  %v16704_v29 = vld [vmem:[#allocation61_spill] sm:$0xff]  ;;  %5354 = vmatprep.subr.bf16.mxu1 %v16323_v26 }
 0x283   : > { %v1956_v43 = vsel %vm16698_vm15, %v1892_v4, %v16697_v53  ;;  %v1972_v3 = vsel %vm16699_vm14, %v1924_v46, %v1892_v4  ;;  %v1818_v55 = vsel %vm1782_vm4, %v1749_v9, -inf  ;;  %v1868_v32 = vmax.f32 %v1661_v61, %v1820_v52  ;;  %v7520_v52 = vld [vmem:[#allocation9 + $0x58] sm:$0xff]   ;;  %vm16720_vm14 = vmmov %vm16696_vm1 }
 0x284   : > { %v2025_v60 = vsel %vm1989_vm5, %v1956_v43, -inf  ;;  %v2027_v53 = vsel %vm15959_vm6, %v1972_v3, -inf  ;;  %v2454_v46 = vmax.f32 %v10350_v6, %v10541_v39  ;;  %v1866_v4 = vmax.f32 %v1659_v7, %v1818_v55  ;;  %v16703_v6 = vld [vmem:[#allocation88_spill] sm:$0xff]  ;;  %v16707_v3 = vld [vmem:[#allocation90_spill] sm:$0xff] }
 0x285   : > { %v1867_v34 = vmax.f32 %v1660_v23, %v10617_v17  ;;  %v2456_v9 = vmax.f32 %v10358_v58, %v10546_v18  ;;  %v10688_v61 = vmax.f32 %v16701_v48, %v10546_v18  ;;  %v10690_v24 = vmax.f32 %v1868_v32, %v2027_v53  ;;  %v16706_v58 = vld [vmem:[#allocation89_spill] sm:$0xff]  ;;  %5355 = vmatpush1.bf16.msra.mxu1 %v7520_v52 }
 0x286   : > { %v2026_v25 = vsel %vm1990_vm7, %v1940_v56, -inf  ;;  %v16705_v43 = vmax.f32 %v16703_v6, %v16704_v29  ;;  %v16708_v7 = vmax.f32 %v16706_v58, %v16707_v3  ;;  %v10707_v40 = vmax.f32 %v1866_v4, %v2025_v60  ;;  %5356 = vmatprep.subr.bf16.mxu1 %v16323_v26  ;;  %v16716_v60 = vld [vmem:[#allocation105_spill] sm:$0xff]  ;;  %v16718_v4 = vld [vmem:[#allocation111_spill] sm:$0xff] }
 0x287   : > { %16702 = vst [vmem:[#allocation25_spill] sm:$0xff] %v10688_v61  ;;  %v15896_v0 = vrot.slane %v10688_v61, 7  ;;  %v16709_v32 = vmax.f32 %v10344_v41, %v10546_v18  ;;  %v10723_v53 = vmax.f32 %v2456_v9, %v10690_v24  ;;  %v16711_v48 = vmax.f32 %v10232_v50, %v10541_v39  ;;  %v7524_v56 = vld [vmem:[#allocation9 + $0x88] sm:$0xff]   ;;  %v16776_v18 = vld [vmem:[#allocation100_spill] sm:$0xff] }
 0x288   : > { %v10698_v17 = vmax.f32 %v16705_v43, %v10422_v19  ;;  %v10704_v23 = vmax.f32 %v16708_v7, %v10511_v13  ;;  %v10736_v29 = vmax.f32 %v2454_v46, %v10707_v40  ;;  %v16713_v52 = vrot.slane %v10578_v63, 7  ;;  %v16715_v19 = vld [vmem:[#allocation102_spill] sm:$0xff] }
 0x289   : > { %v10718_v13 = vmax.f32 %v16709_v32, %v10690_v24  ;;  %16710 = vst [vmem:[#allocation49_spill] sm:$0xff] %v10723_v53  ;;  %v10731_v6 = vmax.f32 %v16711_v48, %v10707_v40  ;;  %v15895_v43 = vrot.slane %v10723_v53, 7  ;;  %v15893_v58 = vrot.slane %v10723_v53, 2  ;;  %v7521_v48 = vld [vmem:[#allocation9 + $0x60] sm:$0xff]  }
 0x28a   : > { %16712 = vst [vmem:[#allocation78_spill] sm:$0xff] %v10736_v29  ;;  %v15894_v50 = vrot.slane %v10736_v29, 7  ;;  %v15892_v32 = vrot.slane %v10736_v29, 2  ;;  %v10753_v55 = vsel %vm1138_vm0, %v15896_v0, %v16713_v52  ;;  %v16717_v41 = vmax.f32 %v16715_v19, %v16716_v60  ;;  %5357 = vmatpush1.bf16.msra.mxu1 %v7521_v48  ;;  %v7522_v60 = vld [vmem:[#allocation9 + $0x80] sm:$0xff]  }
 0x28b   : > { %16714 = vst [vmem:[#allocation92_spill] sm:$0xff] %v10753_v55  ;;  %v16719_v46 = vmax.f32 %v9980_v14, %v16718_v4  ;;  %v16722_v14 = vmax.f32 %v10100_v12, %v10481_v42  ;;  %v10786_v19 = vmax.f32 %v1867_v34, %v2026_v25  ;;  %5358 = vmatprep.subr.bf16.mxu1 %v16323_v26  ;;  %v7523_v34 = vld [vmem:[#allocation9 + $0x68] sm:$0xff]   ;;  %vm16746_vm9 = vcmp.lt.s32.totalorder %v8391_v2, 2 }
 0x28c   : > { %v2065_v7 = vmax.f32 %v16717_v41, %v10523_v57  ;;  %v2661_v52 = vsel %vm1138_vm0, %v15895_v43, %v15894_v50  ;;  %v10778_v57 = vsel %vm16720_vm14, %v15893_v58, %v15892_v32  ;;  %v2241_v41 = vmax.f32 %v10538_v11, %v10552_v27  ;;  %7245 = vmatprep.subr.bf16.mxu0 %v7522_v60  ;;  %vm16748_vm1 = vmmov %vm16746_vm9 }
 0x28d   : > { %v10764_v9 = vmax.f32 %v16719_v46, %v10528_v51  ;;  %16721 = vst [vmem:[#allocation96_spill] sm:$0xff] %v10778_v57  ;;  %v10784_v51 = vmax.f32 %v16722_v14, %v10532_v62  ;;  %v10790_v4 = vsel %vm16070_vm10, %v2661_v52, -inf  ;;  %v2244_v46 = vmax.f32 %v10552_v27, %v10557_v49  ;;  %7246 = vmatpush3.bf16.msra.mxu0 %v7522_v60  ;;  %vm16751_vm15 = vmmov %vm16748_vm1 }
 0x28e   : > { %16724 = vst [vmem:[#allocation63_spill] sm:$0xff] %v10790_v4  ;;  %v2247_v32 = vmax.f32 %v10557_v49, %v10562_v28  ;;  %v2250_v42 = vmax.f32 %v10562_v28, %v10567_v1  ;;  %v2253_v62 = vmax.f32 %v10567_v1, %v10572_v37  ;;  %v2256_v11 = vmax.f32 %v10572_v37, %v10698_v17  ;;  %vm16791_vm14 = vmmov %vm16748_vm1 }
 0x28f   : > { %16723 = vst [vmem:[#allocation52_spill] sm:$0xff] %v10784_v51  ;;  %v2259_v27 = vmax.f32 %v10698_v17, %v10704_v23  ;;  %v2262_v25 = vmax.f32 %v10704_v23, %v2065_v7  ;;  %v2265_v48 = vmax.f32 %v2065_v7, %v10764_v9  ;;  %v10814_v14 = vmax.f32 %v2241_v41, %v10557_v49 }
 0x290   : > { %v2340_v58 = vmax.f32 %v2244_v46, %v10562_v28  ;;  %v2343_v12 = vmax.f32 %v2247_v32, %v10567_v1  ;;  %v2346_v3 = vmax.f32 %v2250_v42, %v10572_v37  ;;  %5359 = vmatpush1.bf16.msra.mxu1 %v7523_v34  ;;  %v2349_v50 = vmax.f32 %v2253_v62, %v10698_v17  ;;  %v7525_v46 = vld [vmem:[#allocation9 + $0x70] sm:$0xff]  }
 0x291   : > { %16725 = vst [vmem:[#allocation75_spill] sm:$0xff] %v10814_v14  ;;  %v2352_v43 = vmax.f32 %v2256_v11, %v10704_v23  ;;  %v2355_v0 = vmax.f32 %v2259_v27, %v2065_v7  ;;  %v2358_v31 = vmax.f32 %v2262_v25, %v10764_v9  ;;  %5360 = vmatprep.subr.bf16.mxu1 %v16323_v26  ;;  %v16736_v25 = vrot.slane %v10261_v35, 7 }
 0x292   : > { %v10824_v49 = vmax.f32 %v2265_v48, %v10784_v51  ;;  %v10828_v60 = vmax.f32 %v10814_v14, %v10562_v28  ;;  %v2437_v32 = vmax.f32 %v2340_v58, %v10567_v1  ;;  %v2440_v41 = vmax.f32 %v2343_v12, %v10572_v37  ;;  %7247 = vmatprep.subr.bf16.mxu0 %v7524_v56 }
 0x293   : > { %v2443_v42 = vmax.f32 %v2346_v3, %v10698_v17  ;;  %v2446_v62 = vmax.f32 %v2349_v50, %v10704_v23  ;;  %v2449_v11 = vmax.f32 %v2352_v43, %v2065_v7  ;;  %v2452_v34 = vmax.f32 %v2355_v0, %v10764_v9  ;;  %7248 = vmatpush3.bf16.msra.mxu0 %v7524_v56  ;;  %v7526_v3 = vld [vmem:[#allocation9 + $0x90] sm:$0xff]   ;;  %v7527_v56 = vld [vmem:[#allocation9 + $0x78] sm:$0xff]  }
 0x294   : > { %16726 = vst [vmem:[#allocation99_spill] sm:$0xff] %v10828_v60  ;;  %v2455_v27 = vmax.f32 %v2358_v31, %v10784_v51  ;;  %v10838_v28 = vmax.f32 %v10828_v60, %v10567_v1  ;;  %v10841_v58 = vmax.f32 %v2437_v32, %v10572_v37  ;;  %v10844_v12 = vmax.f32 %v2440_v41, %v10698_v17 }
 0x295   : > { %5361 = vmatpush1.bf16.msra.mxu1 %v7525_v46  ;;  %v10847_v50 = vmax.f32 %v2443_v42, %v10704_v23  ;;  %v10849_v43 = vmax.f32 %v2446_v62, %v2065_v7  ;;  %v10852_v0 = vmax.f32 %v2449_v11, %v10764_v9  ;;  %v10855_v31 = vmax.f32 %v2452_v34, %v10784_v51  ;;  %v7528_v62 = vld [vmem:[#allocation9 + $0x98] sm:$0xff]  }
 0x296   : > { %16727 = vst [vmem:[#allocation71_spill] sm:$0xff] %v10841_v58  ;;  %16728 = vst [vmem:[#allocation23_spill] sm:$0xff] %v10844_v12  ;;  %5362 = vmatprep.subr.bf16.mxu1 %v16323_v26  ;;  %v10859_v1 = vmax.f32 %v2455_v27, %v10786_v19  ;;  %v841_v23 = vsub.f32 0.0, %v10363_v36  ;;  %7249 = vmatprep.subr.bf16.mxu0 %v7526_v3  ;;  %v16734_v11 = vrot.slane %v10404_v54, 7  ;;  %v16735_v27 = vrot.slane %v10688_v61, 7 }
 0x297   : > { %16729 = vst [vmem:[#allocation72_spill] sm:$0xff] %v10847_v50  ;;  %16730 = vst [vmem:[#allocation47_spill] sm:$0xff] %v10849_v43  ;;  %v15898_v7 = vrot.slane %v10847_v50, 7  ;;  %v2595_v48 = vrot.slane %v10852_v0, 7  ;;  %v2596_v32 = vrot.slane %v10855_v31, 7  ;;  %7250 = vmatpush3.bf16.msra.mxu0 %v7526_v3  ;;  %v15899_v42 = vrot.slane %v10852_v0, 6 }
 0x298   : > { %16731 = vst [vmem:[#allocation73_spill] sm:$0xff] %v10852_v0  ;;  %16732 = vst [vmem:[#allocation103_spill] sm:$0xff] %v10855_v31  ;;  %v2597_v26 = vrot.slane %v10859_v1, 7  ;;  %v16738_v17 = vrot.slane %v10723_v53, 7  ;;  %v16739_v37 = vrot.slane %v10578_v63, 7  ;;  %v16740_v52 = vrot.slane %v10736_v29, 7  ;;  %7251 = vmatprep.subr.bf16.mxu0 %v7528_v62 }
 0x299   : > { %16733 = vst [vmem:[#allocation101_spill] sm:$0xff] %v10859_v1  ;;  %5363 = vmatpush1.bf16.msra.mxu1 %v7527_v56  ;;  %v2627_v34 = vsel %vm1138_vm0, %v2595_v48, %v16734_v11  ;;  %v2628_v3 = vsel %vm1138_vm0, %v2596_v32, %v16735_v27  ;;  %v2641_v46 = vsel %vm1138_vm0, %v16736_v25, %v15898_v7  ;;  %v16737_v56 = vrot.slane %v10267_v8, 7  ;;  %v16761_v29 = vld [vmem:[#allocation97_spill] sm:$0xff]  ;;  %v16770_v8 = vld [vmem:[#allocation60_spill] sm:$0xff]  ;;  %v16774_v50 = vld [vmem:[#allocation30_spill] sm:$0xff] }
 0x29a   : > { %v2629_v11 = vsel %vm1138_vm0, %v2597_v26, %v16738_v17  ;;  %v2644_v27 = vsel %vm1138_vm0, %v16739_v37, %v2596_v32  ;;  %v10902_v25 = vsel %vm1138_vm0, %v16740_v52, %v2597_v26  ;;  %v10906_v7 = vsel %vm1369_vm13, %v2641_v46, -inf  ;;  %v16771_v43 = vld [vmem:[#allocation45_spill] sm:$0xff] }
 0x29b   : > { %v2643_v41 = vsel %vm1138_vm0, %v16737_v56, %v2595_v48  ;;  %16741 = vst [vmem:[#allocation104_spill] sm:$0xff] %v10902_v25  ;;  %16742 = vst [vmem:[#allocation16_spill] sm:$0xff] %v10906_v7  ;;  %v2691_v17 = vsel %vm1370_vm11, %v2627_v34, -inf  ;;  %v10916_v37 = vsel %vm1369_vm13, %v2644_v27, -inf  ;;  %v2694_v52 = vsel %vm1370_vm11, %v2628_v3, -inf  ;;  %7252 = vmatpush3.bf16.msra.mxu0 %v7528_v62 }
 0x29c   : > { %v10910_v48 = vsel %vm1369_vm13, %v2643_v41, -inf  ;;  %16744 = vst [vmem:[#allocation106_spill] sm:$0xff] %v10916_v37  ;;  %v2697_v32 = vsel %vm1370_vm11, %v2629_v11, -inf  ;;  %v2739_v46 = vmax.f32 %v10404_v54, %v2691_v17  ;;  %v2742_v56 = vmax.f32 %v10688_v61, %v2694_v52 }
 0x29d   : > { %16743 = vst [vmem:[#allocation51_spill] sm:$0xff] %v10910_v48  ;;  %v2745_v27 = vmax.f32 %v10723_v53, %v2697_v32  ;;  %v15901_v62 = vrot.slane %v10855_v31, 6  ;;  %v16745_v11 = vrot.slane %v10404_v54, 6  ;;  %v16747_v34 = vrot.slane %v10688_v61, 6  ;;  %v16764_v61 = vld [vmem:[#allocation110_spill] sm:$0xff] }
 0x29e   : > { %v16768_v48 = vld [vmem:[#allocation86_spill] sm:$0xff]  ;;  %v2572_v0 = vrot.slane %v16770_v8, 7  ;;  %v2573_v7 = vrot.slane %v16771_v43, 7  ;;  %v15938_v35 = vrot.slane %v10838_v28, 7  ;;  %v15941_v12 = vrot.slane %v16774_v50, 7 }
 0x29f   : > { %v2819_v41 = vsel %vm16746_vm9, %v15899_v42, %v16745_v11  ;;  %v2820_v52 = vsel %vm16748_vm1, %v15901_v62, %v16747_v34  ;;  %v16749_v11 = vrot.slane %v10723_v53, 6  ;;  %v16750_v42 = vrot.slane %v10859_v1, 6  ;;  %v16757_v34 = vld [vmem:[#allocation59_spill] sm:$0xff]  ;;  %vm16795_vm9 = vmmov %vm16748_vm1 }
 0x2a0   : > { %v2883_v32 = vsel %vm1577_vm2, %v2819_v41, -inf  ;;  %v2886_v17 = vsel %vm1577_vm2, %v2820_v52, -inf  ;;  %v16759_v52 = vld [vmem:[#allocation77_spill] sm:$0xff]  ;;  %vm16797_vm1 = vcmp.lt.s32.totalorder %v8391_v2, 6 }
 0x2a1   : > { %v2821_v26 = vsel %vm16751_vm15, %v16750_v42, %v16749_v11  ;;  %v10959_v4 = vmax.f32 %v2739_v46, %v2883_v32  ;;  %v10964_v62 = vmax.f32 %v2742_v56, %v2886_v17  ;;  %v927_v46 = vmul.f32 1.442695, %v841_v23  ;;  %v7926_v32 = vld [vmem:[%s15759_s2] ss:$0 sm:$0xff] }
 0x2a2   : > { %v2889_v41 = vsel %vm1577_vm2, %v2821_v26, -inf  ;;  %v16755_v11 = vld [vmem:[#allocation32_spill] sm:$0xff]  ;;  %v10983_v3 = vadd.f32 %v7926_v32, %v16757_v34  ;;  %v10994_v42 = vadd.f32 %v7926_v32, %v16759_v52  ;;  %v16763_v52 = vld [vmem:[#allocation109_spill] sm:$0xff]  ;;  %v11014_v63 = vadd.f32 %v7926_v32, %v16764_v61 }
 0x2a3   : > { %16752 = vst [vmem:[#allocation88_spill] sm:$0xff] %v10959_v4  ;;  %16753 = vst [vmem:[#allocation61_spill] sm:$0xff] %v10964_v62  ;;  %v10968_v53 = vmax.f32 %v2745_v27, %v2889_v41  ;;  %v10977_v26 = vadd.f32 %v7926_v32, %v16755_v11  ;;  %v16756_v56 = vld [vmem:[#allocation48_spill] sm:$0xff]  ;;  %v16758_v27 = vmax.f32 %v10764_v9, %v10784_v51  ;;  %7685 = vpow2.f32 %v927_v46  ;;  %v16760_v11 = vld [vmem:[#allocation91_spill] sm:$0xff] }
 0x2a4   : > { %v10980_v17 = vadd.f32 %v7926_v32, %v16756_v56  ;;  %v10997_v57 = vadd.f32 %v7926_v32, %v16760_v11  ;;  %v11003_v9 = vadd.f32 %v7926_v32, %v16761_v29  ;;  %v845_v46 = vsub.f32 0.0, %v10994_v42  ;;  %v16762_v23 = vld [vmem:[#allocation108_spill] sm:$0xff]  ;;  %16765 = vst [vmem:[#allocation90_spill] sm:$0xff] %v11014_v63 }
 0x2a5   : > { %16754 = vst [vmem:[#allocation89_spill] sm:$0xff] %v10968_v53  ;;  %v10989_v41 = vmax.f32 %v16758_v27, %v10786_v19  ;;  %v839_v56 = vsub.f32 0.0, %v10977_v26  ;;  %v840_v53 = vsub.f32 0.0, %v10983_v3  ;;  %v11008_v1 = vadd.f32 %v7926_v32, %v16762_v23 }
 0x2a6   : > { %v842_v34 = vsub.f32 0.0, %v10980_v17  ;;  %v843_v27 = vsub.f32 0.0, %v10997_v57  ;;  %v11011_v25 = vadd.f32 %v7926_v32, %v16763_v52  ;;  %v935_v31 = vmul.f32 1.442695, %v845_v46 }
 0x2a7   : > { %v923_v11 = vmul.f32 1.442695, %v839_v56  ;;  %v925_v37 = vmul.f32 1.442695, %v840_v53  ;;  %v846_v29 = vsub.f32 0.0, %v11003_v9  ;;  %v844_v38 = vsub.f32 0.0, %v11008_v1 }
 0x2a8   : > { %v929_v62 = vmul.f32 1.442695, %v842_v34  ;;  %v931_v55 = vmul.f32 1.442695, %v843_v27  ;;  %v849_v4 = vsub.f32 0.0, %v11011_v25  ;;  %v847_v23 = vsub.f32 0.0, %v11014_v63 }
 0x2a9   : > { %7687 = vpow2.f32 %v923_v11  ;;  %v937_v56 = vmul.f32 1.442695, %v846_v29  ;;  %v933_v53 = vmul.f32 1.442695, %v844_v38  ;;  %v16766_v34 = vld [vmem:[#allocation68_spill] sm:$0xff]  ;;  %v11026_v54 = vadd.f32 %v7926_v32, %v16768_v48 }
 0x2aa   : > { %7689 = vpow2.f32 %v929_v62  ;;  %v11023_v61 = vadd.f32 %v7926_v32, %v16766_v34  ;;  %v943_v46 = vmul.f32 1.442695, %v849_v4  ;;  %v939_v27 = vmul.f32 1.442695, %v847_v23  ;;  %v16772_v38 = vld [vmem:[#allocation112_spill] sm:$0xff]  ;;  %v16773_v34 = vld [vmem:[#allocation113_spill] sm:$0xff] }
 0x2ab   : > { %7691 = vpow2.f32 %v925_v37  ;;  %16769 = vst [vmem:[#allocation105_spill] sm:$0xff] %v11026_v54  ;;  %v848_v62 = vsub.f32 0.0, %v11026_v54  ;;  %v2574_v29 = vrot.slane %v16772_v38, 7  ;;  %v2575_v52 = vrot.slane %v16773_v34, 7  ;;  %v16775_v54 = vld [vmem:[#allocation38_spill] sm:$0xff] }
 0x2ac   : > { %16767 = vst [vmem:[#allocation102_spill] sm:$0xff] %v11023_v61  ;;  %7693 = vpow2.f32 %v935_v31  ;;  %v850_v11 = vsub.f32 0.0, %v11023_v61  ;;  %v15939_v48 = vrot.slane %v10814_v14, 7  ;;  %v15937_v31 = vrot.slane %v10828_v60, 7 }
 0x2ad   : > { %7695 = vpow2.f32 %v931_v55  ;;  %v7686_v37 = vpop.eup %7685  ;;  %v941_v23 = vmul.f32 1.442695, %v848_v62  ;;  %v15940_v55 = vrot.slane %v10841_v58, 7  ;;  %v15944_v61 = vrot.slane %v16775_v54, 7 }
 0x2ae   : > { %7697 = vpow2.f32 %v937_v56  ;;  %v945_v4 = vmul.f32 1.442695, %v850_v11  ;;  %v985_v32 = vadd.f32 1.0, %v7686_v37  ;;  %v15943_v56 = vrot.slane %v16776_v18, 7  ;;  %v16777_v11 = vld [vmem:[#allocation54_spill] sm:$0xff] }
 0x2af   : > { %7699 = vpow2.f32 %v933_v53  ;;  %v2636_v53 = vsel %vm1138_vm0, %v2572_v0, %v15939_v48  ;;  %v2638_v62 = vsel %vm1138_vm0, %v2574_v29, %v15938_v35  ;;  %v2639_v37 = vsel %vm1138_vm0, %v2575_v52, %v15940_v55 }
 0x2b0   : > { %7701 = vpow2.f32 %v943_v46  ;;  %v2637_v46 = vsel %vm1138_vm0, %v2573_v7, %v15937_v31  ;;  %v2653_v31 = vsel %vm1138_vm0, %v15944_v61, %v2573_v7  ;;  %v2654_v35 = vsel %vm1138_vm0, %v15943_v56, %v2574_v29 }
 0x2b1   : > { %7703 = vrcp.f32 %v985_v32  ;;  %v11080_v7 = vsel %vm1369_vm13, %v2636_v53, -inf  ;;  %v11084_v29 = vsel %vm16070_vm10, %v2653_v31, -inf  ;;  %vm16799_vm15 = vcmp.lt.s32.totalorder %v8391_v2, 7 }
 0x2b2   : > { %7705 = vpow2.f32 %v939_v27  ;;  %v2652_v27 = vsel %vm1138_vm0, %v15941_v12, %v2572_v0  ;;  %16780 = vst [vmem:[#allocation32_spill] sm:$0xff] %v11080_v7  ;;  %16781 = vst [vmem:[#allocation48_spill] sm:$0xff] %v11084_v29 }
 0x2b3   : > { %v7688_v32 = vpop.eup %7687  ;;  %7707 = vpow2.f32 %v945_v4  ;;  %v16778_v4 = vrot.slane %v16777_v11, 7  ;;  %v11076_v0 = vsel %vm16070_vm10, %v2652_v27, -inf  ;;  %v11092_v27 = vsel %vm16070_vm10, %v2654_v35, -inf }
 0x2b4   : > { %v7690_v48 = vpop.eup %7689  ;;  %v983_v51 = vadd.f32 1.0, %v7688_v32  ;;  %7709 = vpow2.f32 %v941_v23  ;;  %16779 = vst [vmem:[#allocation111_spill] sm:$0xff] %v11076_v0  ;;  %v11088_v23 = vsel %vm1369_vm13, %v2637_v46, -inf  ;;  %16783 = vst [vmem:[#allocation77_spill] sm:$0xff] %v11092_v27  ;;  %v11104_v46 = vsel %vm1369_vm13, %v2639_v37, -inf }
 0x2b5   : > { %v2655_v55 = vsel %vm1138_vm0, %v16778_v4, %v2575_v52  ;;  %v7692_v12 = vpop.eup %7691  ;;  %v986_v63 = vadd.f32 1.0, %v7690_v48  ;;  %16782 = vst [vmem:[#allocation59_spill] sm:$0xff] %v11088_v23  ;;  %v11096_v48 = vsel %vm1369_vm13, %v2638_v62, -inf  ;;  %16786 = vst [vmem:[#allocation108_spill] sm:$0xff] %v11104_v46 }
 0x2b6   : > { %v7694_v32 = vpop.eup %7693  ;;  %7711 = vrcp.f32 %v983_v51  ;;  %v984_v52 = vadd.f32 1.0, %v7692_v12  ;;  %16784 = vst [vmem:[#allocation91_spill] sm:$0xff] %v11096_v48  ;;  %v11100_v31 = vsel %vm16070_vm10, %v2655_v55, -inf }
 0x2b7   : > { %v7696_v53 = vpop.eup %7695  ;;  %7713 = vrcp.f32 %v986_v63  ;;  %v989_v4 = vadd.f32 1.0, %v7694_v32  ;;  %16785 = vst [vmem:[#allocation97_spill] sm:$0xff] %v11100_v31  ;;  %v16790_v31 = vrot.slane %v16770_v8, 6 }
 0x2b8   : > { %v7698_v51 = vpop.eup %7697  ;;  %7715 = vrcp.f32 %v984_v52  ;;  %v987_v12 = vadd.f32 1.0, %v7696_v53 }
 0x2b9   : > { %v7700_v56 = vpop.eup %7699  ;;  %7717 = vrcp.f32 %v989_v4  ;;  %v990_v63 = vadd.f32 1.0, %v7698_v51 }
 0x2ba   : > { %v7702_v37 = vpop.eup %7701  ;;  %7719 = vrcp.f32 %v987_v12  ;;  %v988_v61 = vadd.f32 1.0, %v7700_v56  ;;  %v15947_v12 = vrot.slane %v10814_v14, 6 }
 0x2bb   : > { %v7704_v35 = vpop.eup %7703  ;;  %7721 = vrcp.f32 %v990_v63  ;;  %v993_v62 = vadd.f32 1.0, %v7702_v37 }
 0x2bc   : > { %v7706_v55 = vpop.eup %7705  ;;  %v11123_v32 = vmul.f32 %v7704_v35, %v10363_v36  ;;  %7723 = vrcp.f32 %v988_v61 }
 0x2bd   : > { %v7708_v52 = vpop.eup %7707  ;;  %7725 = vrcp.f32 %v993_v62  ;;  %v991_v53 = vadd.f32 1.0, %v7706_v55 }
 0x2be   : > { %16787 = vst [vmem:[#allocation109_spill] sm:$0xff] %v11123_v32  ;;  %v7710_v4 = vpop.eup %7709  ;;  %v994_v35 = vadd.f32 1.0, %v7708_v52  ;;  %v16794_v48 = vrot.slane %v11123_v32, 6  ;;  %v16796_v23 = vrot.slane %v11123_v32, 2  ;;  %v16798_v37 = vrot.slane %v11123_v32, 1 }
 0x2bf   : > { %7727 = vrcp.f32 %v991_v53  ;;  %v992_v56 = vadd.f32 1.0, %v7710_v4 }
 0x2c0   : > { %v7712_v62 = vpop.eup %7711  ;;  %7729 = vrcp.f32 %v994_v35 }
 0x2c1   : > { %v7714_v46 = vpop.eup %7713  ;;  %v11139_v51 = vmul.f32 %v7712_v62, %v10977_v26  ;;  %7731 = vrcp.f32 %v992_v56  ;;  %v11153_v26 = vsel %vm16791_vm14, %v16790_v31, %v15947_v12  ;;  %v16793_v12 = vrot.slane %v11123_v32, 7  ;;  %vm16808_vm14 = vmmov %vm16795_vm9 }
 0x2c2   : > { %v7716_v4 = vpop.eup %7715  ;;  %v11144_v61 = vmul.f32 %v7714_v46, %v10980_v17  ;;  %16792 = vst [vmem:[#allocation86_spill] sm:$0xff] %v11153_v26 }
 0x2c3   : > { %16788 = vst [vmem:[#allocation110_spill] sm:$0xff] %v11139_v51  ;;  %v7718_v35 = vpop.eup %7717  ;;  %v1272_v62 = vrot.slane %v11139_v51, 7  ;;  %v1479_v52 = vrot.slane %v11139_v51, 6  ;;  %v1686_v53 = vrot.slane %v11139_v51, 2  ;;  %v1893_v17 = vrot.slane %v11139_v51, 1 }
 0x2c4   : > { %16789 = vst [vmem:[#allocation68_spill] sm:$0xff] %v11144_v61  ;;  %v7720_v46 = vpop.eup %7719  ;;  %v11189_v0 = vmul.f32 %v7716_v4, %v10983_v3  ;;  %v16807_v3 = vrot.slane %v16771_v43, 6 }
 0x2c5   : > { %v7722_v31 = vpop.eup %7721  ;;  %v1352_v36 = vsel %vm1138_vm0, %v16793_v12, %v1272_v62  ;;  %v1559_v27 = vsel %vm16795_vm9, %v16794_v48, %v1479_v52  ;;  %v1766_v63 = vsel %vm16797_vm1, %v16796_v23, %v1686_v53  ;;  %v1973_v55 = vsel %vm16799_vm15, %v16798_v37, %v1893_v17  ;;  %vm16812_vm1 = vmmov %vm16795_vm9 }
 0x2c6   : > { %v7724_v56 = vpop.eup %7723  ;;  %v1407_v29 = vsel %vm16070_vm10, %v1352_v36, -inf  ;;  %v1614_v12 = vsel %vm1575_vm12, %v1559_v27, -inf  ;;  %v1823_v48 = vsel %vm16052_vm8, %v1766_v63, -inf  ;;  %v2030_v7 = vsel %vm15959_vm6, %v1973_v55, -inf  ;;  %16800 = vst [vmem:[#allocation60_spill] sm:$0xff] %v11189_v0 }
 0x2c7   : > { %v7726_v14 = vpop.eup %7725  ;;  %v1455_v23 = vmax.f32 %v11139_v51, %v1407_v29  ;;  %v11192_v37 = vmul.f32 %v7718_v35, %v10994_v42  ;;  %v11195_v36 = vmul.f32 %v7720_v46, %v10997_v57  ;;  %v11198_v27 = vmul.f32 %v7722_v31, %v11003_v9 }
 0x2c8   : > { %v11201_v63 = vmul.f32 %v7724_v56, %v11008_v1  ;;  %v11204_v55 = vmul.f32 %v7726_v14, %v11011_v25  ;;  %v16806_v29 = vrot.slane %v10828_v60, 6  ;;  %v1288_v9 = vrot.slane %v11189_v0, 7 }
 0x2c9   : > { %16801 = vst [vmem:[#allocation45_spill] sm:$0xff] %v11192_v37  ;;  %16802 = vst [vmem:[#allocation112_spill] sm:$0xff] %v11195_v36  ;;  %v11214_v4 = vpop.eup %7727  ;;  %v1662_v57 = vmax.f32 %v1455_v23, %v1614_v12  ;;  %v1495_v35 = vrot.slane %v11189_v0, 6  ;;  %v1702_v1 = vrot.slane %v11189_v0, 2  ;;  %v1909_v14 = vrot.slane %v11189_v0, 1 }
 0x2ca   : > { %16803 = vst [vmem:[#allocation30_spill] sm:$0xff] %v11198_v27  ;;  %16804 = vst [vmem:[#allocation38_spill] sm:$0xff] %v11201_v63  ;;  %v11212_v42 = vsel %vm16808_vm14, %v16807_v3, %v16806_v29  ;;  %v11223_v31 = vpop.eup %7729  ;;  %v16810_v29 = vrot.slane %v11123_v32, 7  ;;  %v1336_v23 = vsel %vm1138_vm0, %v1272_v62, %v1288_v9  ;;  %v16811_v3 = vrot.slane %v11123_v32, 6 }
 0x2cb   : > { %16805 = vst [vmem:[#allocation116_spill] sm:$0xff] %v11204_v55  ;;  %16809 = vst [vmem:[#allocation117_spill] sm:$0xff] %v11212_v42  ;;  %v1543_v46 = vsel %vm16812_vm1, %v1479_v52, %v1495_v35  ;;  %v11237_v25 = vpop.eup %7731  ;;  %v1408_v56 = vsel %vm1369_vm13, %v1336_v23, -inf  ;;  %v16813_v52 = vrot.slane %v11123_v32, 2  ;;  %vm16814_vm15 = vcmp.lt.s32.totalorder %v8391_v2, 6  ;;  %v16816_v42 = vld [vmem:[#allocation83_spill] sm:$0xff] }
 0x2cc   : > { %v1320_v12 = vsel %vm1138_vm0, %v1288_v9, %v16810_v29  ;;  %v1527_v51 = vsel %vm16795_vm9, %v1495_v35, %v16811_v3  ;;  %v1615_v29 = vsel %vm1576_vm3, %v1543_v46, -inf  ;;  %v1456_v9 = vmax.f32 %v11189_v0, %v1408_v56  ;;  %vm16815_vm14 = vmmov %vm16814_vm15 }
 0x2cd   : > { %v1409_v60 = vsel %vm1370_vm11, %v1320_v12, -inf  ;;  %v1616_v62 = vsel %vm1577_vm2, %v1527_v51, -inf  ;;  %v1734_v35 = vsel %vm16814_vm15, %v1702_v1, %v16813_v52  ;;  %v1750_v23 = vsel %vm16815_vm14, %v1686_v53, %v1702_v1  ;;  %vm16828_vm15 = vmmov %vm16815_vm14 }
 0x2ce   : > { %v1457_v3 = vmax.f32 %v11123_v32, %v1409_v60  ;;  %v1821_v12 = vsel %vm1782_vm4, %v1750_v23, -inf  ;;  %vm16817_vm9 = vcmp.eq.s32.totalorder %v16816_v42, 1  ;;  %v16818_v51 = vrot.slane %v11123_v32, 1 }
 0x2cf   : > { %v1822_v46 = vsel %vm16817_vm9, %v1734_v35, -inf  ;;  %vm16819_vm1 = vcmp.lt.s32.totalorder %v8391_v2, 7  ;;  %v1663_v0 = vmax.f32 %v1456_v9, %v1615_v29  ;;  %v1869_v52 = vmax.f32 %v1662_v57, %v1821_v12 }
 0x2d0   : > { %v1941_v56 = vsel %vm16819_vm1, %v1909_v14, %v16818_v51  ;;  %vm16820_vm6 = vmmov %vm16819_vm1  ;;  %v1664_v26 = vmax.f32 %v1457_v3, %v1616_v62  ;;  %v15972_v23 = vrot.slane %v11192_v37, 1  ;;  %v1289_v35 = vrot.slane %v11195_v36, 7 }
 0x2d1   : > { %v1957_v60 = vsel %vm16820_vm6, %v1893_v17, %v1909_v14  ;;  %v2029_v1 = vsel %vm1990_vm7, %v1941_v56, -inf  ;;  %v15967_v32 = vrot.slane %v11195_v36, 6  ;;  %v1870_v11 = vmax.f32 %v1663_v0, %v1822_v46  ;;  %vm16837_vm14 = vmmov %vm16819_vm1 }
 0x2d2   : > { %v2028_v53 = vsel %vm1989_vm5, %v1957_v60, -inf  ;;  %v1871_v51 = vmax.f32 %v1664_v26, %v1823_v48  ;;  %v15966_v17 = vrot.slane %v11195_v36, 2  ;;  %v16821_v57 = vrot.slane %v11144_v61, 7  ;;  %vm16842_vm1 = vmmov %vm16828_vm15 }
 0x2d3   : > { %v11272_v18 = vmax.f32 %v1869_v52, %v2028_v53  ;;  %v16822_v29 = vrot.slane %v11144_v61, 6  ;;  %vm16823_vm6 = vcmp.lt.s32.totalorder %v8391_v2, 2  ;;  %v15965_v9 = vrot.slane %v11195_v36, 1 }
 0x2d4   : > { %v1337_v14 = vsel %vm1138_vm0, %v16821_v57, %v1289_v35  ;;  %v15964_v0 = vrot.slane %v11198_v27, 7  ;;  %v11287_v26 = vmax.f32 %v1870_v11, %v2029_v1  ;;  %v11289_v48 = vmax.f32 %v1871_v51, %v2030_v7  ;;  %vm16840_vm9 = vmmov %vm16823_vm6 }
 0x2d5   : > { %v1544_v62 = vsel %vm16823_vm6, %v16822_v29, %v15967_v32  ;;  %v16824_v3 = vmax.f32 %v10541_v39, %v10707_v40  ;;  %v16825_v56 = vmax.f32 %v10627_v33, %v10707_v40  ;;  %v1411_v11 = vsel %vm1369_vm13, %v1337_v14, -inf  ;;  %vm16843_vm6 = vmmov %vm16837_vm14 }
 0x2d6   : > { %v1618_v7 = vsel %vm1576_vm3, %v1544_v62, -inf  ;;  %v16827_v39 = vrot.slane %v11144_v61, 2  ;;  %v16829_v33 = vmax.f32 %v10824_v49, %v10786_v19  ;;  %v16831_v51 = vmax.f32 %v10640_v59, %v10690_v24 }
 0x2d7   : > { %v11295_v12 = vmax.f32 %v16824_v3, %v11272_v18  ;;  %v11303_v60 = vmax.f32 %v16825_v56, %v11272_v18  ;;  %v1459_v14 = vmax.f32 %v11195_v36, %v1411_v11  ;;  %v15969_v11 = vrot.slane %v11198_v27, 6 }
 0x2d8   : > { %v1751_v52 = vsel %vm16828_vm15, %v16827_v39, %v15966_v17  ;;  %v11321_v1 = vmax.f32 %v16829_v33, %v11287_v26  ;;  %v11327_v57 = vmax.f32 %v16831_v51, %v11289_v48  ;;  %v15970_v59 = vrot.slane %v11198_v27, 2  ;;  %vm16846_vm15 = vmmov %vm16840_vm9 }
 0x2d9   : > { %16826 = vst [vmem:[#allocation118_spill] sm:$0xff] %v11303_v60  ;;  %v2582_v29 = vrot.slane %v11303_v60, 7  ;;  %v1666_v53 = vmax.f32 %v1459_v14, %v1618_v7  ;;  %v11351_v33 = vsel %vm1782_vm4, %v1751_v52, -inf  ;;  %v16836_v14 = vrot.slane %v11144_v61, 1  ;;  %v7529_v60 = vld [vmem:[#allocation9 + $0xa0] sm:$0xff]  }
 0x2da   : > { %16830 = vst [vmem:[#allocation119_spill] sm:$0xff] %v11321_v1  ;;  %16832 = vst [vmem:[#allocation120_spill] sm:$0xff] %v11327_v57  ;;  %v2598_v49 = vrot.slane %v11321_v1, 7  ;;  %v2614_v39 = vrot.slane %v11327_v57, 7  ;;  %v16838_v52 = vrot.slane %v11192_v37, 7  ;;  %7253 = vmatprep.subr.bf16.mxu0 %v7529_v60 }
 0x2db   : > { %7254 = vmatpush3.bf16.msra.mxu0 %v7529_v60  ;;  %v16860_v60 = vld [vmem:[#allocation52_spill] sm:$0xff] }
 0x2dc   : > { %v11343_v3 = vsel %vm1138_vm0, %v2598_v49, %v2614_v39  ;;  %v2646_v56 = vsel %vm1138_vm0, %v2582_v29, %v2598_v49  ;;  %v2662_v62 = vsel %vm1138_vm0, %v2614_v39, %v2582_v29  ;;  %v1958_v49 = vsel %vm16837_vm14, %v16836_v14, %v15965_v9  ;;  %vm16848_vm14 = vmmov %vm16840_vm9 }
 0x2dd   : > { %16833 = vst [vmem:[#allocation121_spill] sm:$0xff] %v11343_v3  ;;  %v11355_v51 = vsel %vm16070_vm10, %v2662_v62, -inf  ;;  %v11359_v7 = vsel %vm1369_vm13, %v2646_v56, -inf  ;;  %v1338_v29 = vsel %vm1138_vm0, %v16838_v52, %v15964_v0  ;;  %v2031_v39 = vsel %vm1989_vm5, %v1958_v49, -inf }
 0x2de   : > { %16834 = vst [vmem:[#allocation122_spill] sm:$0xff] %v11355_v51  ;;  %16835 = vst [vmem:[#allocation123_spill] sm:$0xff] %v11359_v7  ;;  %v1414_v46 = vsel %vm1369_vm13, %v1338_v29, -inf  ;;  %v15973_v52 = vrot.slane %v11198_v27, 1  ;;  %v1305_v0 = vrot.slane %v11201_v63, 7  ;;  %v1512_v62 = vrot.slane %v11201_v63, 6 }
 0x2df   : > { %v1462_v14 = vmax.f32 %v11198_v27, %v1414_v46  ;;  %v1719_v56 = vrot.slane %v11201_v63, 2  ;;  %v1926_v9 = vrot.slane %v11201_v63, 1  ;;  %v16839_v49 = vrot.slane %v11192_v37, 6 }
 0x2e0   : > { %v16841_v29 = vrot.slane %v11192_v37, 2  ;;  %v1959_v32 = vsel %vm16843_vm6, %v15972_v23, %v15973_v52  ;;  %v2462_v51 = vmax.f32 %v10718_v13, %v11289_v48  ;;  %v16844_v23 = vrot.slane %v11144_v61, 7 }
 0x2e1   : > { %v1545_v46 = vsel %vm16840_vm9, %v16839_v49, %v15969_v11  ;;  %vm16850_vm9 = vmmov %vm16842_vm1  ;;  %vm16852_vm6 = vcmp.eq.s32.totalorder %v16816_v42, 1  ;;  %v16855_v3 = vrot.slane %v11144_v61, 1 }
 0x2e2   : > { %v1752_v17 = vsel %vm16842_vm1, %v16841_v29, %v15970_v59  ;;  %v1621_v49 = vsel %vm1576_vm3, %v1545_v46, -inf  ;;  %v11417_v29 = vsel %vm1989_vm5, %v1959_v32, -inf  ;;  %v1321_v59 = vsel %vm1138_vm0, %v1289_v35, %v1305_v0 }
 0x2e3   : > { %v11413_v11 = vsel %vm1782_vm4, %v1752_v17, -inf  ;;  %v11421_v7 = vmax.f32 %v1462_v14, %v1621_v49  ;;  %v1353_v13 = vsel %vm1138_vm0, %v1305_v0, %v16844_v23  ;;  %v1412_v46 = vsel %vm1370_vm11, %v1321_v59, -inf }
 0x2e4   : > { %v16845_v17 = vrot.slane %v11195_v36, 6  ;;  %v1410_v32 = vsel %vm16070_vm10, %v1353_v13, -inf  ;;  %v1460_v35 = vmax.f32 %v11201_v63, %v1412_v46  ;;  %v16847_v14 = vrot.slane %v11144_v61, 6 }
 0x2e5   : > { %v1458_v0 = vmax.f32 %v11144_v61, %v1410_v32  ;;  %v16851_v46 = vrot.slane %v11144_v61, 2 }
 0x2e6   : > { %v1528_v52 = vsel %vm16846_vm15, %v16845_v17, %v1512_v62  ;;  %v1560_v49 = vsel %vm16848_vm14, %v1512_v62, %v16847_v14  ;;  %v16849_v17 = vrot.slane %v11195_v36, 2  ;;  %v7530_v62 = vld [vmem:[#allocation9 + $0xa8] sm:$0xff]   ;;  %vm16854_vm15 = vcmp.lt.s32.totalorder %v8391_v2, 7 }
 0x2e7   : > { %v1619_v23 = vsel %vm1577_vm2, %v1528_v52, -inf  ;;  %v1617_v59 = vsel %vm1575_vm12, %v1560_v49, -inf  ;;  %v1767_v63 = vsel %vm16842_vm1, %v1719_v56, %v16851_v46  ;;  %v16853_v49 = vrot.slane %v11195_v36, 1  ;;  %vm16856_vm14 = vmmov %vm16854_vm15  ;;  %7255 = vmatprep.subr.bf16.mxu0 %v7530_v62 }
 0x2e8   : > { %v1735_v13 = vsel %vm16850_vm9, %v16849_v17, %v1719_v56  ;;  %v1667_v14 = vmax.f32 %v1460_v35, %v1619_v23  ;;  %v1826_v32 = vsel %vm16052_vm8, %v1767_v63, -inf  ;;  %v1665_v17 = vmax.f32 %v1458_v0, %v1617_v59  ;;  %7256 = vmatpush3.bf16.msra.mxu0 %v7530_v62 }
 0x2e9   : > { %v1825_v52 = vsel %vm16852_vm6, %v1735_v13, -inf  ;;  %v1942_v1 = vsel %vm16854_vm15, %v16853_v49, %v1926_v9  ;;  %v1974_v56 = vsel %vm16856_vm14, %v1926_v9, %v16855_v3  ;;  %vm16857_vm9 = vcmp.eq.s32.totalorder %v10279_v30, 1 }
 0x2ea   : > { %v1873_v57 = vmax.f32 %v1666_v53, %v1825_v52  ;;  %v2032_v35 = vsel %vm1990_vm7, %v1942_v1, -inf  ;;  %v1874_v23 = vmax.f32 %v1667_v14, %v1826_v32  ;;  %v2033_v63 = vsel %vm16857_vm9, %v1974_v56, -inf  ;;  %v7531_v1 = vld [vmem:[#allocation9 + $0xb0] sm:$0xff]  }
 0x2eb   : > { %v1872_v53 = vmax.f32 %v1665_v17, %v11351_v33  ;;  %v16858_v14 = vld [vmem:[#allocation90_spill] sm:$0xff]  ;;  %v2274_v32 = vmax.f32 %v10786_v19, %v11287_v26  ;;  %v16862_v17 = vmax.f32 %v10989_v41, %v11287_v26  ;;  %7257 = vmatprep.subr.bf16.mxu0 %v7531_v1  ;;  %vm16869_vm1 = vcmp.lt.s32.totalorder %v8391_v2, 2 }
 0x2ec   : > { %v11472_v0 = vmax.f32 %v1873_v57, %v2032_v35  ;;  %v11476_v3 = vmax.f32 %v1874_v23, %v2033_v63  ;;  %v11480_v52 = vmul.f32 %v11214_v4, %v16858_v14  ;;  %v16861_v57 = vmax.f32 %v16860_v60, %v10786_v19  ;;  %v16864_v35 = vld [vmem:[#allocation64_spill] sm:$0xff]  ;;  %7258 = vmatpush3.bf16.msra.mxu0 %v7531_v1  ;;  %vm16880_vm15 = vmmov %vm16869_vm1 }
 0x2ed   : > { %v11490_v49 = vmax.f32 %v1872_v53, %v2031_v39  ;;  %v16865_v23 = vmax.f32 %v16864_v35, %v10690_v24  ;;  %v16867_v14 = vmax.f32 %v10731_v6, %v11272_v18  ;;  %v7532_v35 = vld [vmem:[#allocation9 + $0xb8] sm:$0xff]   ;;  %v16870_v59 = vrot.slane %v11198_v27, 7  ;;  %vm16882_vm14 = vmmov %vm16869_vm1 }
 0x2ee   : > { %16859 = vst [vmem:[#allocation90_spill] sm:$0xff] %v11480_v52  ;;  %v11488_v33 = vmax.f32 %v16861_v57, %v11287_v26  ;;  %v11496_v56 = vmax.f32 %v16862_v17, %v11472_v0  ;;  %v11507_v19 = vmax.f32 %v2462_v51, %v11476_v3  ;;  %v1306_v39 = vrot.slane %v11480_v52, 7  ;;  %7259 = vmatprep.subr.bf16.mxu0 %v7532_v35 }
 0x2ef   : > { %v11504_v63 = vmax.f32 %v16865_v23, %v11289_v48  ;;  %v1513_v53 = vrot.slane %v11480_v52, 6  ;;  %v1720_v41 = vrot.slane %v11480_v52, 2  ;;  %v11516_v60 = vmax.f32 %v16867_v14, %v11490_v49 }
 0x2f0   : > { %16863 = vst [vmem:[#allocation52_spill] sm:$0xff] %v11496_v56  ;;  %16866 = vst [vmem:[#allocation64_spill] sm:$0xff] %v11507_v19  ;;  %v2599_v57 = vrot.slane %v11496_v56, 7  ;;  %v15983_v17 = vrot.slane %v11496_v56, 6  ;;  %v2615_v23 = vrot.slane %v11507_v19, 7  ;;  %v15982_v9 = vrot.slane %v11507_v19, 6  ;;  %7260 = vmatpush3.bf16.msra.mxu0 %v7532_v35 }
 0x2f1   : > { %16868 = vst [vmem:[#allocation124_spill] sm:$0xff] %v11516_v60  ;;  %v2583_v6 = vrot.slane %v11516_v60, 7  ;;  %v1322_v62 = vsel %vm1138_vm0, %v16870_v59, %v1306_v39  ;;  %v16871_v14 = vrot.slane %v11192_v37, 7  ;;  %vm16876_vm6 = vcmp.lt.s32.totalorder %v8391_v2, 6 }
 0x2f2   : > { %v2631_v51 = vsel %vm1138_vm0, %v2599_v57, %v2615_v23  ;;  %v2823_v4 = vsel %vm16869_vm1, %v15983_v17, %v15982_v9  ;;  %vm16884_vm9 = vmmov %vm16876_vm6 }
 0x2f3   : > { %v1354_v13 = vsel %vm1138_vm0, %v1306_v39, %v16871_v14  ;;  %v2647_v46 = vsel %vm1138_vm0, %v2583_v6, %v2599_v57  ;;  %v11549_v36 = vsel %vm1138_vm0, %v2615_v23, %v2583_v6  ;;  %v2703_v9 = vsel %vm1370_vm11, %v2631_v51, -inf  ;;  %vm16886_vm1 = vmmov %vm16876_vm6 }
 0x2f4   : > { %16872 = vst [vmem:[#allocation125_spill] sm:$0xff] %v11549_v36  ;;  %v2895_v17 = vsel %vm1577_vm2, %v2823_v4, -inf  ;;  %v11557_v59 = vsel %vm1369_vm13, %v2647_v46, -inf  ;;  %v2751_v1 = vmax.f32 %v11507_v19, %v2703_v9  ;;  %v16874_v39 = vrot.slane %v11516_v60, 2 }
 0x2f5   : > { %16873 = vst [vmem:[#allocation126_spill] sm:$0xff] %v11557_v59  ;;  %v16875_v57 = vrot.slane %v11507_v19, 2  ;;  %v1413_v51 = vsel %vm16070_vm10, %v1354_v13, -inf  ;;  %v1415_v46 = vsel %vm1370_vm11, %v1322_v62, -inf  ;;  %v11609_v59 = vmax.f32 %v2274_v32, %v11472_v0  ;;  %v17086_v19 = vld [vmem:[#allocation85_spill] sm:$0xff] }
 0x2f6   : > { %v1461_v9 = vmax.f32 %v11192_v37, %v1413_v51  ;;  %v11577_v14 = vmax.f32 %v2751_v1, %v2895_v17  ;;  %v1463_v61 = vmax.f32 %v11480_v52, %v1415_v46  ;;  %v16883_v1 = vrot.slane %v11198_v27, 2 }
 0x2f7   : > { %v3047_v23 = vsel %vm16876_vm6, %v16875_v57, %v16874_v39  ;;  %v16879_v39 = vrot.slane %v11198_v27, 6  ;;  %v16881_v57 = vrot.slane %v11192_v37, 6  ;;  %v16885_v46 = vrot.slane %v11192_v37, 2 }
 0x2f8   : > { %v11572_v6 = vsel %vm16052_vm8, %v3047_v23, -inf  ;;  %16878 = vst [vmem:[#allocation128_spill] sm:$0xff] %v11577_v14  ;;  %v1736_v51 = vsel %vm16884_vm9, %v16883_v1, %v1720_v41  ;;  %vm16887_vm6 = vcmp.eq.s32.totalorder %v16816_v42, 1  ;;  %v1927_v1 = vrot.slane %v11480_v52, 1  ;;  %v17085_v14 = vld [vmem:[#allocation67_spill] sm:$0xff] }
 0x2f9   : > { %16877 = vst [vmem:[#allocation127_spill] sm:$0xff] %v11572_v6  ;;  %v1529_v13 = vsel %vm16880_vm15, %v16879_v39, %v1513_v53  ;;  %v1561_v23 = vsel %vm16882_vm14, %v1513_v53, %v16881_v57  ;;  %v1768_v39 = vsel %vm16886_vm1, %v1720_v41, %v16885_v46  ;;  %vm16889_vm15 = vcmp.lt.s32.totalorder %v8391_v2, 7 }
 0x2fa   : > { %v1620_v62 = vsel %vm1575_vm12, %v1561_v23, -inf  ;;  %v1622_v17 = vsel %vm1577_vm2, %v1529_v13, -inf  ;;  %v1828_v23 = vsel %vm16887_vm6, %v1736_v51, -inf  ;;  %v1829_v13 = vsel %vm16052_vm8, %v1768_v39, -inf  ;;  %vm16891_vm14 = vmmov %vm16889_vm15  ;;  %v16892_v51 = vld [vmem:[#allocation102_spill] sm:$0xff] }
 0x2fb   : > { %v1668_v35 = vmax.f32 %v1461_v9, %v1620_v62  ;;  %v1670_v57 = vmax.f32 %v1463_v61, %v1622_v17  ;;  %v1876_v4 = vmax.f32 %v11421_v7, %v1828_v23  ;;  %v2463_v9 = vmax.f32 %v11295_v12, %v11490_v49 }
 0x2fc   : > { %v2464_v61 = vmax.f32 %v11488_v33, %v11472_v0  ;;  %v16888_v62 = vrot.slane %v11198_v27, 1  ;;  %v16890_v7 = vrot.slane %v11192_v37, 1  ;;  %v11628_v39 = vmul.f32 %v11223_v31, %v16892_v51 }
 0x2fd   : > { %v1875_v41 = vmax.f32 %v1668_v35, %v11413_v11  ;;  %v1877_v46 = vmax.f32 %v1670_v57, %v1829_v13  ;;  %v2465_v11 = vmax.f32 %v11504_v63, %v11476_v3  ;;  %vm16894_vm9 = vcmp.eq.s32.totalorder %v10279_v30, 1  ;;  %v16895_v57 = vld [vmem:[#allocation105_spill] sm:$0xff] }
 0x2fe   : > { %v1943_v17 = vsel %vm16889_vm15, %v16888_v62, %v1927_v1  ;;  %v1975_v32 = vsel %vm16891_vm14, %v1927_v1, %v16890_v7  ;;  %16893 = vst [vmem:[#allocation102_spill] sm:$0xff] %v11628_v39  ;;  %v11639_v23 = vmul.f32 %v11237_v25, %v16895_v57  ;;  %v1307_v31 = vrot.slane %v11628_v39, 7 }
 0x2ff   : > { %v2035_v12 = vsel %vm1990_vm7, %v1943_v17, -inf  ;;  %v2036_v33 = vsel %vm16894_vm9, %v1975_v32, -inf  ;;  %v11635_v35 = vmax.f32 %v1875_v41, %v11417_v29  ;;  %vm16901_vm1 = vcmp.lt.s32.totalorder %v8391_v2, 2 }
 0x300   : > { %16896 = vst [vmem:[#allocation105_spill] sm:$0xff] %v11639_v23  ;;  %v11641_v13 = vmax.f32 %v1876_v4, %v2035_v12  ;;  %v11643_v63 = vmax.f32 %v1877_v46, %v2036_v33  ;;  %v1275_v41 = vrot.slane %v11639_v23, 7  ;;  %v16898_v4 = vmax.f32 %v11287_v26, %v11472_v0  ;;  %vm16904_vm15 = vmmov %vm16901_vm1 }
 0x301   : > { %v11648_v62 = vmax.f32 %v2463_v9, %v11635_v35  ;;  %vm16902_vm6 = vcmp.lt.s32.totalorder %v8391_v2, 6  ;;  %vm16906_vm14 = vmmov %vm16901_vm1  ;;  %v16049_v56 = vrot.slane %v17086_v19, 2  ;;  %v17087_v60 = vrot.slane %v16770_v8, 2 }
 0x302   : > { %v11659_v46 = vmax.f32 %v16898_v4, %v11641_v13  ;;  %v11664_v9 = vmax.f32 %v2464_v61, %v11641_v13  ;;  %v11667_v32 = vmax.f32 %v2465_v11, %v11643_v63  ;;  %vm16909_vm9 = vmmov %vm16902_vm6 }
 0x303   : > { %16897 = vst [vmem:[#allocation129_spill] sm:$0xff] %v11648_v62  ;;  %v2584_v51 = vrot.slane %v11648_v62, 7  ;;  %v2776_v12 = vrot.slane %v11648_v62, 6  ;;  %v2968_v33 = vrot.slane %v11648_v62, 2 }
 0x304   : > { %16899 = vst [vmem:[#allocation130_spill] sm:$0xff] %v11664_v9  ;;  %16900 = vst [vmem:[#allocation131_spill] sm:$0xff] %v11667_v32  ;;  %v2600_v57 = vrot.slane %v11664_v9, 7  ;;  %v2792_v26 = vrot.slane %v11664_v9, 6  ;;  %v2984_v4 = vrot.slane %v11664_v9, 2  ;;  %v2616_v61 = vrot.slane %v11667_v32, 7 }
 0x305   : > { %v2808_v7 = vrot.slane %v11667_v32, 6  ;;  %v3000_v11 = vrot.slane %v11667_v32, 2 }
 0x306   : > { %v2648_v29 = vsel %vm1138_vm0, %v2584_v51, %v2600_v57  ;;  %v2840_v17 = vsel %vm16901_vm1, %v2776_v12, %v2792_v26  ;;  %v11686_v1 = vsel %vm16902_vm6, %v2968_v33, %v2984_v4  ;;  %v2632_v52 = vsel %vm1138_vm0, %v2600_v57, %v2616_v61  ;;  %vm16911_vm1 = vmmov %vm16902_vm6 }
 0x307   : > { %16903 = vst [vmem:[#allocation132_spill] sm:$0xff] %v11686_v1  ;;  %v2664_v27 = vsel %vm1138_vm0, %v2616_v61, %v2584_v51  ;;  %v2705_v25 = vsel %vm1369_vm13, %v2648_v29, -inf  ;;  %v2824_v37 = vsel %vm16904_vm15, %v2792_v26, %v2808_v7  ;;  %v2706_v1 = vsel %vm1370_vm11, %v2632_v52, -inf  ;;  %vm16921_vm15 = vmmov %vm16906_vm14 }
 0x308   : > { %v11699_v6 = vsel %vm16070_vm10, %v2664_v27, -inf  ;;  %v2753_v53 = vmax.f32 %v11664_v9, %v2705_v25  ;;  %v2856_v57 = vsel %vm16906_vm14, %v2808_v7, %v2776_v12  ;;  %v2754_v29 = vmax.f32 %v11667_v32, %v2706_v1  ;;  %vm16924_vm14 = vmmov %vm16911_vm1 }
 0x309   : > { %16905 = vst [vmem:[#allocation133_spill] sm:$0xff] %v11699_v6  ;;  %v11711_v26 = vsel %vm1575_vm12, %v2856_v57, -inf  ;;  %v2897_v27 = vsel %vm1576_vm3, %v2840_v17, -inf  ;;  %v2898_v52 = vsel %vm1577_vm2, %v2824_v37, -inf  ;;  %v11721_v25 = vsel %vm16909_vm9, %v2984_v4, %v3000_v11 }
 0x30a   : > { %16907 = vst [vmem:[#allocation134_spill] sm:$0xff] %v11711_v26  ;;  %v11717_v61 = vmax.f32 %v2753_v53, %v2897_v27  ;;  %16910 = vst [vmem:[#allocation136_spill] sm:$0xff] %v11721_v25  ;;  %v3048_v7 = vsel %vm16911_vm1, %v3000_v11, %v2968_v33  ;;  %v11725_v1 = vmax.f32 %v2754_v29, %v2898_v52  ;;  %v16914_v17 = vrot.slane %v11648_v62, 1 }
 0x30b   : > { %v11729_v12 = vsel %vm16052_vm8, %v3048_v7, -inf  ;;  %v16915_v57 = vrot.slane %v11667_v32, 1  ;;  %vm16916_vm6 = vcmp.lt.s32.totalorder %v8391_v2, 7  ;;  %v16918_v53 = vrot.slane %v11204_v55, 7 }
 0x30c   : > { %16908 = vst [vmem:[#allocation135_spill] sm:$0xff] %v11717_v61  ;;  %16912 = vst [vmem:[#allocation137_spill] sm:$0xff] %v11725_v1  ;;  %v16919_v11 = vrot.slane %v11628_v39, 6  ;;  %v16920_v29 = vrot.slane %v11204_v55, 6  ;;  %v16922_v52 = vrot.slane %v11628_v39, 2  ;;  %v16923_v7 = vrot.slane %v11204_v55, 2 }
 0x30d   : > { %16913 = vst [vmem:[#allocation138_spill] sm:$0xff] %v11729_v12  ;;  %v11737_v37 = vsel %vm16916_vm6, %v16915_v57, %v16914_v17  ;;  %v1323_v4 = vsel %vm1138_vm0, %v16918_v53, %v1307_v31  ;;  %v16925_v57 = vrot.slane %v11628_v39, 1  ;;  %v16926_v53 = vrot.slane %v11204_v55, 1  ;;  %vm16927_vm9 = vmmov %vm16916_vm6 }
 0x30e   : > { %16917 = vst [vmem:[#allocation139_spill] sm:$0xff] %v11737_v37  ;;  %v1418_v33 = vsel %vm1370_vm11, %v1323_v4, -inf  ;;  %v1530_v27 = vsel %vm16921_vm15, %v16920_v29, %v16919_v11  ;;  %v1737_v17 = vsel %vm16924_vm14, %v16923_v7, %v16922_v52  ;;  %vm16928_vm1 = vcmp.eq.s32.totalorder %v16816_v42, 1  ;;  %vm16931_vm6 = vmmov %vm16921_vm15 }
 0x30f   : > { %v1944_v4 = vsel %vm16927_vm9, %v16926_v53, %v16925_v57  ;;  %v1466_v37 = vmax.f32 %v11628_v39, %v1418_v33  ;;  %v1625_v11 = vsel %vm1577_vm2, %v1530_v27, -inf  ;;  %v1831_v29 = vsel %vm16928_vm1, %v1737_v17, -inf  ;;  %vm16933_vm15 = vmmov %vm16931_vm6 }
 0x310   : > { %v2038_v52 = vsel %vm1990_vm7, %v1944_v4, -inf  ;;  %v16929_v7 = vrot.slane %v11204_v55, 7  ;;  %v1355_v57 = vsel %vm1138_vm0, %v1307_v31, %v1275_v41  ;;  %v1482_v53 = vrot.slane %v11639_v23, 6  ;;  %vm16936_vm9 = vmmov %vm16924_vm14 }
 0x311   : > { %v1673_v33 = vmax.f32 %v1466_v37, %v1625_v11  ;;  %v1416_v27 = vsel %vm16070_vm10, %v1355_v57, -inf  ;;  %v1689_v51 = vrot.slane %v11639_v23, 2  ;;  %v16934_v57 = vrot.slane %v11204_v55, 2 }
 0x312   : > { %v1339_v9 = vsel %vm1138_vm0, %v1275_v41, %v16929_v7  ;;  %v1464_v4 = vmax.f32 %v11639_v23, %v1416_v27  ;;  %v16930_v7 = vrot.slane %v11204_v55, 6  ;;  %v16932_v41 = vrot.slane %v11628_v39, 6 }
 0x313   : > { %v1417_v17 = vsel %vm1369_vm13, %v1339_v9, -inf  ;;  %v1753_v27 = vsel %vm16924_vm14, %v1689_v51, %v16934_v57  ;;  %v2273_v61 = vmax.f32 %v10707_v40, %v11272_v18  ;;  %v2275_v57 = vmax.f32 %v10690_v24, %v11289_v48 }
 0x314   : > { %v1465_v12 = vmax.f32 %v11204_v55, %v1417_v17  ;;  %v1546_v31 = vsel %vm16931_vm6, %v1482_v53, %v16930_v7  ;;  %v1562_v37 = vsel %vm16933_vm15, %v16932_v41, %v1482_v53  ;;  %v16935_v17 = vrot.slane %v11628_v39, 2 }
 0x315   : > { %v1623_v11 = vsel %vm1575_vm12, %v1562_v37, -inf  ;;  %v1624_v9 = vsel %vm1576_vm3, %v1546_v31, -inf  ;;  %v1830_v53 = vsel %vm1782_vm4, %v1753_v27, -inf  ;;  %v1896_v31 = vrot.slane %v11639_v23, 1 }
 0x316   : > { %v1769_v7 = vsel %vm16936_vm9, %v16935_v17, %v1689_v51  ;;  %v1671_v1 = vmax.f32 %v1464_v4, %v1623_v11  ;;  %v1672_v32 = vmax.f32 %v1465_v12, %v1624_v9  ;;  %v2276_v51 = vmax.f32 %v11272_v18, %v11490_v49 }
 0x317   : > { %v1832_v41 = vsel %vm16052_vm8, %v1769_v7, -inf  ;;  %v2278_v12 = vmax.f32 %v11289_v48, %v11476_v3  ;;  %v16937_v4 = vrot.slane %v11204_v55, 1  ;;  %vm16938_vm1 = vcmp.lt.s32.totalorder %v8391_v2, 7 }
 0x318   : > { %v1880_v37 = vmax.f32 %v1673_v33, %v1832_v41  ;;  %v1878_v25 = vmax.f32 %v1671_v1, %v1830_v53  ;;  %v1879_v6 = vmax.f32 %v1672_v32, %v1831_v29  ;;  %v16939_v11 = vrot.slane %v11628_v39, 1  ;;  %vm16940_vm6 = vmmov %vm16938_vm1 }
 0x319   : > { %v1960_v33 = vsel %vm16938_vm1, %v1896_v31, %v16937_v4  ;;  %v2279_v24 = vmax.f32 %v11490_v49, %v11635_v35  ;;  %v2281_v32 = vmax.f32 %v11476_v3, %v11643_v63  ;;  %vm16941_vm15 = vcmp.eq.s32.totalorder %v10279_v30, 1 }
 0x31a   : > { %v1976_v40 = vsel %vm16940_vm6, %v16939_v11, %v1896_v31  ;;  %v2037_v18 = vsel %vm1989_vm5, %v1960_v33, -inf  ;;  %v2086_v1 = vmax.f32 %v1879_v6, %v2038_v52  ;;  %v2369_v29 = vmax.f32 %v2273_v61, %v11490_v49 }
 0x31b   : > { %v2039_v48 = vsel %vm16941_vm15, %v1976_v40, -inf  ;;  %v2085_v9 = vmax.f32 %v1878_v25, %v2037_v18  ;;  %v2371_v17 = vmax.f32 %v2275_v57, %v11476_v3  ;;  %v2372_v7 = vmax.f32 %v2276_v51, %v11635_v35 }
 0x31c   : > { %v2087_v27 = vmax.f32 %v1880_v37, %v2039_v48  ;;  %v2374_v53 = vmax.f32 %v2278_v12, %v11643_v63  ;;  %v16942_v41 = vmax.f32 %v11472_v0, %v11641_v13  ;;  %v2466_v4 = vmax.f32 %v2369_v29, %v11635_v35 }
 0x31d   : > { %v11846_v33 = vmax.f32 %v11659_v46, %v2086_v1  ;;  %v11848_v6 = vmax.f32 %v2279_v24, %v2085_v9  ;;  %v2468_v3 = vmax.f32 %v2371_v17, %v11643_v63  ;;  %v11853_v61 = vmax.f32 %v2372_v7, %v2085_v9 }
 0x31e   : > { %v11842_v31 = vmax.f32 %v16942_v41, %v2086_v1  ;;  %v11850_v49 = vmax.f32 %v2281_v32, %v2087_v27  ;;  %v11855_v25 = vmax.f32 %v2374_v53, %v2087_v27  ;;  %v11857_v52 = vmax.f32 %v2466_v4, %v2085_v9 }
 0x31f   : > { %16944 = vst [vmem:[#allocation141_spill] sm:$0xff] %v11846_v33  ;;  %16945 = vst [vmem:[#allocation142_spill] sm:$0xff] %v11848_v6  ;;  %v16950_v0 = vmax.f32 %v11609_v59, %v11641_v13  ;;  %v2602_v35 = vrot.slane %v11846_v33, 7  ;;  %v11865_v46 = vmax.f32 %v2468_v3, %v2087_v27  ;;  %v2586_v57 = vrot.slane %v11853_v61, 7 }
 0x320   : > { %16943 = vst [vmem:[#allocation140_spill] sm:$0xff] %v11842_v31  ;;  %16946 = vst [vmem:[#allocation143_spill] sm:$0xff] %v11850_v49  ;;  %v2587_v51 = vrot.slane %v11848_v6, 7  ;;  %v2603_v63 = vrot.slane %v11842_v31, 7  ;;  %v2585_v12 = vrot.slane %v11857_v52, 7  ;;  %v2618_v40 = vrot.slane %v11855_v25, 7 }
 0x321   : > { %16947 = vst [vmem:[#allocation144_spill] sm:$0xff] %v11853_v61  ;;  %16948 = vst [vmem:[#allocation145_spill] sm:$0xff] %v11855_v25  ;;  %v11862_v37 = vmax.f32 %v16950_v0, %v2086_v1  ;;  %v2619_v59 = vrot.slane %v11850_v49, 7  ;;  %v2617_v13 = vrot.slane %v11865_v46, 7  ;;  %v2650_v24 = vsel %vm1138_vm0, %v2586_v57, %v2602_v35 }
 0x322   : > { %16949 = vst [vmem:[#allocation146_spill] sm:$0xff] %v11857_v52  ;;  %16952 = vst [vmem:[#allocation148_spill] sm:$0xff] %v11865_v46  ;;  %v11879_v32 = vsel %vm1138_vm0, %v2587_v51, %v2603_v63  ;;  %v2777_v18 = vrot.slane %v11857_v52, 6  ;;  %v2634_v48 = vsel %vm1138_vm0, %v2602_v35, %v2618_v40  ;;  %v2666_v9 = vsel %vm1138_vm0, %v2618_v40, %v2586_v57 }
 0x323   : > { %16951 = vst [vmem:[#allocation147_spill] sm:$0xff] %v11862_v37  ;;  %v2601_v11 = vrot.slane %v11862_v37, 7  ;;  %16953 = vst [vmem:[#allocation149_spill] sm:$0xff] %v11879_v32  ;;  %v2635_v1 = vsel %vm1138_vm0, %v2603_v63, %v2619_v59  ;;  %v2665_v17 = vsel %vm1138_vm0, %v2617_v13, %v2585_v12  ;;  %v2667_v7 = vsel %vm1138_vm0, %v2619_v59, %v2587_v51 }
 0x324   : > { %v2707_v41 = vsel %vm16070_vm10, %v2665_v17, -inf  ;;  %v2710_v3 = vsel %vm16070_vm10, %v2666_v9, -inf  ;;  %v11906_v0 = vsel %vm1369_vm13, %v2650_v24, -inf  ;;  %v2712_v35 = vsel %vm1370_vm11, %v2634_v48, -inf }
 0x325   : > { %v2649_v29 = vsel %vm1138_vm0, %v2585_v12, %v2601_v11  ;;  %v2633_v27 = vsel %vm1138_vm0, %v2601_v11, %v2617_v13  ;;  %16954 = vst [vmem:[#allocation150_spill] sm:$0xff] %v11906_v0  ;;  %v11912_v57 = vsel %vm16070_vm10, %v2667_v7, -inf  ;;  %v2715_v51 = vsel %vm1370_vm11, %v2635_v1, -inf }
 0x326   : > { %v2708_v53 = vsel %vm1369_vm13, %v2649_v29, -inf  ;;  %v2709_v4 = vsel %vm1370_vm11, %v2633_v27, -inf  ;;  %16955 = vst [vmem:[#allocation151_spill] sm:$0xff] %v11912_v57  ;;  %v2755_v63 = vmax.f32 %v11857_v52, %v2707_v41  ;;  %v2758_v40 = vmax.f32 %v11853_v61, %v2710_v3  ;;  %v7533_v3 = vld [vmem:[#allocation8] sm:$0xff]  }
 0x327   : > { %v2756_v12 = vmax.f32 %v11862_v37, %v2708_v53  ;;  %v2757_v11 = vmax.f32 %v11865_v46, %v2709_v4  ;;  %v2760_v13 = vmax.f32 %v11855_v25, %v2712_v35  ;;  %v2763_v48 = vmax.f32 %v11850_v49, %v2715_v51  ;;  %7309 = vmatprep.subr.bf16.mxu0 %v7533_v3 }
 0x328   : > { %v2778_v1 = vrot.slane %v11853_v61, 6  ;;  %v2793_v9 = vrot.slane %v11862_v37, 6  ;;  %v2794_v27 = vrot.slane %v11846_v33, 6  ;;  %v2809_v7 = vrot.slane %v11865_v46, 6 }
 0x329   : > { %v2810_v53 = vrot.slane %v11855_v25, 6  ;;  %v16001_v41 = vrot.slane %v11850_v49, 6  ;;  %v2969_v4 = vrot.slane %v11857_v52, 2  ;;  %vm16956_vm14 = vcmp.lt.s32.totalorder %v8391_v2, 2 }
 0x32a   : > { %v2841_v35 = vsel %vm16956_vm14, %v2777_v18, %v2793_v9  ;;  %vm16957_vm9 = vmmov %vm16956_vm14  ;;  %v2970_v24 = vrot.slane %v11853_v61, 2  ;;  %v16960_v39 = vrot.slane %v11842_v31, 6  ;;  %v17015_v31 = vld [vmem:[#allocation75_spill] sm:$0xff]  ;;  %v17037_v0 = vrot.slane %v16773_v34, 2 }
 0x32b   : > { %v2842_v51 = vsel %vm16957_vm9, %v2778_v1, %v2794_v27  ;;  %vm16958_vm1 = vmmov %vm16957_vm9 }
 0x32c   : > { %v2825_v59 = vsel %vm16958_vm1, %v2793_v9, %v2809_v7  ;;  %vm16959_vm6 = vmmov %vm16958_vm1 }
 0x32d   : > { %v2826_v17 = vsel %vm16959_vm6, %v2794_v27, %v2810_v53  ;;  %vm16961_vm15 = vmmov %vm16958_vm1  ;;  %v2900_v27 = vsel %vm1576_vm3, %v2841_v35, -inf  ;;  %v2901_v57 = vsel %vm1577_vm2, %v2825_v59, -inf  ;;  %v2985_v35 = vrot.slane %v11862_v37, 2 }
 0x32e   : > { %v2827_v55 = vsel %vm16961_vm15, %v16960_v39, %v16001_v41  ;;  %vm16962_vm14 = vmmov %vm16958_vm1  ;;  %v11965_v39 = vsel %vm1576_vm3, %v2842_v51, -inf  ;;  %v2986_v51 = vrot.slane %v11846_v33, 2  ;;  %v3001_v41 = vrot.slane %v11865_v46, 2 }
 0x32f   : > { %v2857_v23 = vsel %vm16962_vm14, %v2809_v7, %v2777_v18  ;;  %vm16963_vm9 = vmmov %vm16958_vm1  ;;  %16964 = vst [vmem:[#allocation152_spill] sm:$0xff] %v11965_v39  ;;  %v2904_v18 = vsel %vm1577_vm2, %v2826_v17, -inf  ;;  %v11973_v7 = vmax.f32 %v2756_v12, %v2900_v27  ;;  %vm16970_vm1 = vcmp.lt.s32.totalorder %v8391_v2, 6 }
 0x330   : > { %v2858_v29 = vsel %vm16963_vm9, %v2810_v53, %v2778_v1  ;;  %v2899_v9 = vsel %vm1575_vm12, %v2857_v23, -inf  ;;  %v2907_v1 = vsel %vm1577_vm2, %v2827_v55, -inf  ;;  %v2949_v53 = vmax.f32 %v2757_v11, %v2901_v57  ;;  %vm16971_vm6 = vmmov %vm16970_vm1 }
 0x331   : > { %v2902_v32 = vsel %vm1575_vm12, %v2858_v29, -inf  ;;  %v11971_v23 = vmax.f32 %v2755_v63, %v2899_v9  ;;  %16966 = vst [vmem:[#allocation154_spill] sm:$0xff] %v11973_v7  ;;  %v11977_v59 = vmax.f32 %v2760_v13, %v2904_v18  ;;  %v11979_v29 = vmax.f32 %v2763_v48, %v2907_v1  ;;  %vm16973_vm15 = vmmov %vm16970_vm1  ;;  %v17054_v7 = vld [vmem:[#allocation107_spill] sm:$0xff] }
 0x332   : > { %v11975_v3 = vmax.f32 %v2758_v40, %v2902_v32  ;;  %v3002_v55 = vrot.slane %v11855_v25, 2  ;;  %v16002_v63 = vrot.slane %v11850_v49, 2  ;;  %v3033_v32 = vsel %vm16970_vm1, %v2969_v4, %v2985_v35  ;;  %vm16974_vm14 = vmmov %vm16970_vm1 }
 0x333   : > { %16965 = vst [vmem:[#allocation153_spill] sm:$0xff] %v11971_v23  ;;  %16968 = vst [vmem:[#allocation156_spill] sm:$0xff] %v11977_v59  ;;  %v11991_v57 = vsel %vm16971_vm6, %v2970_v24, %v2986_v51  ;;  %v3161_v12 = vrot.slane %v11857_v52, 1  ;;  %v3017_v40 = vsel %vm16973_vm15, %v2985_v35, %v3001_v41  ;;  %v16978_v27 = vrot.slane %v11848_v6, 2  ;;  %v17016_v59 = vld [vmem:[#allocation32_spill] sm:$0xff] }
 0x334   : > { %16967 = vst [vmem:[#allocation155_spill] sm:$0xff] %v11975_v3  ;;  %16969 = vst [vmem:[#allocation157_spill] sm:$0xff] %v11979_v29  ;;  %v11999_v13 = vsel %vm16974_vm14, %v2986_v51, %v3002_v55  ;;  %v12005_v9 = vsel %vm16970_vm1, %v3002_v55, %v2970_v24  ;;  %v12017_v1 = vsel %vm1782_vm4, %v3033_v32, -inf  ;;  %vm16982_vm15 = vcmp.eq.s32.totalorder %v16816_v42, 1  ;;  %v17020_v3 = vld [vmem:[#allocation99_spill] sm:$0xff] }
 0x335   : > { %16972 = vst [vmem:[#allocation158_spill] sm:$0xff] %v11991_v57  ;;  %16975 = vst [vmem:[#allocation159_spill] sm:$0xff] %v11999_v13  ;;  %v12021_v35 = vsel %vm16982_vm15, %v3017_v40, -inf  ;;  %v3193_v17 = vrot.slane %v11865_v46, 1  ;;  %v16985_v11 = vrot.slane %v16772_v38, 6  ;;  %vm16986_vm14 = vcmp.lt.s32.totalorder %v8391_v2, 2 }
 0x336   : > { %vm16976_vm9 = vmmov %vm16970_vm1  ;;  %16977 = vst [vmem:[#allocation160_spill] sm:$0xff] %v12005_v9  ;;  %v16990_v32 = vrot.slane %v16770_v8, 6  ;;  %v16991_v40 = vrot.slane %v16774_v50, 6  ;;  %v16996_v46 = vrot.slane %v16771_v43, 6 }
 0x337   : > { %v3049_v48 = vsel %vm16976_vm9, %v3001_v41, %v2969_v4  ;;  %vm16979_vm6 = vmmov %vm16970_vm1  ;;  %16981 = vst [vmem:[#allocation162_spill] sm:$0xff] %v12017_v1 }
 0x338   : > { %v12013_v18 = vsel %vm16979_vm6, %v16002_v63, %v16978_v27  ;;  %16983 = vst [vmem:[#allocation163_spill] sm:$0xff] %v12021_v35  ;;  %v3093_v24 = vsel %vm16052_vm8, %v3049_v48, -inf  ;;  %v3177_v27 = vrot.slane %v11862_v37, 1  ;;  %v16984_v48 = vrot.slane %v10838_v28, 6  ;;  %vm16989_vm9 = vmmov %vm16986_vm14 }
 0x339   : > { %16980 = vst [vmem:[#allocation161_spill] sm:$0xff] %v12013_v18  ;;  %v3141_v51 = vmax.f32 %v2949_v53, %v3093_v24  ;;  %v16987_v53 = vrot.slane %v10841_v58, 6  ;;  %v16988_v24 = vrot.slane %v16773_v34, 6  ;;  %vm16992_vm1 = vmmov %vm16989_vm9  ;;  %vm16993_vm6 = vcmp.lt.s32.totalorder %v8391_v2, 7 }
 0x33a   : > { %v2830_v4 = vsel %vm16986_vm14, %v16985_v11, %v16984_v48  ;;  %v2844_v63 = vsel %vm16992_vm1, %v16991_v40, %v16990_v32  ;;  %v3209_v41 = vsel %vm16993_vm6, %v3177_v27, %v3193_v17  ;;  %vm16994_vm15 = vmmov %vm16993_vm6 }
 0x33b   : > { %v2831_v55 = vsel %vm16989_vm9, %v16988_v24, %v16987_v53  ;;  %v3225_v11 = vsel %vm16994_vm15, %v3161_v12, %v3177_v27  ;;  %vm16995_vm14 = vmmov %vm16993_vm6  ;;  %v16997_v53 = vrot.slane %v16775_v54, 6  ;;  %v12071_v32 = vsel %vm1990_vm7, %v3209_v41, -inf }
 0x33c   : > { %v3241_v48 = vsel %vm16995_vm14, %v3193_v17, %v3161_v12  ;;  %vm16998_vm9 = vmmov %vm16992_vm1  ;;  %v12067_v37 = vsel %vm1989_vm5, %v3225_v11, -inf  ;;  %17000 = vst [vmem:[#allocation165_spill] sm:$0xff] %v12071_v32  ;;  %vm17001_vm1 = vcmp.eq.s32.totalorder %v10279_v30, 1  ;;  %v17002_v17 = vrot.slane %v16772_v38, 6  ;;  %v17003_v12 = vld [vmem:[#allocation100_spill] sm:$0xff]  ;;  %v17008_v11 = vld [vmem:[#allocation54_spill] sm:$0xff] }
 0x33d   : > { %v2845_v24 = vsel %vm16998_vm9, %v16997_v53, %v16996_v46  ;;  %16999 = vst [vmem:[#allocation164_spill] sm:$0xff] %v12067_v37  ;;  %v3285_v27 = vsel %vm17001_vm1, %v3241_v48, -inf  ;;  %v17004_v40 = vrot.slane %v17003_v12, 6  ;;  %vm17005_vm6 = vmmov %vm16998_vm9  ;;  %v17007_v46 = vrot.slane %v16773_v34, 6  ;;  %v17011_v48 = vld [vmem:[#allocation86_spill] sm:$0xff] }
 0x33e   : > { %v12081_v29 = vmax.f32 %v3141_v51, %v3285_v27  ;;  %v17009_v53 = vrot.slane %v17008_v11, 6  ;;  %vm17010_vm15 = vmmov %vm17005_vm6  ;;  %v2860_v18 = vsel %vm1575_vm12, %v2844_v63, -inf  ;;  %v2861_v49 = vsel %vm1576_vm3, %v17011_v48, -inf }
 0x33f   : > { %v2846_v52 = vsel %vm17005_vm6, %v17004_v40, %v17002_v17  ;;  %v2863_v6 = vsel %vm1575_vm12, %v2845_v24, -inf  ;;  %v17012_v17 = vld [vmem:[#allocation117_spill] sm:$0xff]  ;;  %v2867_v40 = vsel %vm1576_vm3, %v2830_v4, -inf  ;;  %vm17031_vm14 = vcmp.lt.s32.totalorder %v8391_v2, 6 }
 0x340   : > { %17006 = vst [vmem:[#allocation166_spill] sm:$0xff] %v12081_v29  ;;  %v2847_v41 = vsel %vm17010_vm15, %v17009_v53, %v17007_v46  ;;  %v2864_v51 = vsel %vm1576_vm3, %v17012_v17, -inf  ;;  %v2866_v27 = vsel %vm1575_vm12, %v2846_v52, -inf  ;;  %v2870_v46 = vsel %vm1576_vm3, %v2831_v55, -inf  ;;  %v17013_v53 = vld [vmem:[#allocation111_spill] sm:$0xff]  ;;  %v17018_v52 = vld [vmem:[#allocation48_spill] sm:$0xff]  ;;  %vm17032_vm9 = vmmov %vm17031_vm14 }
 0x341   : > { %v2869_v63 = vsel %vm1575_vm12, %v2847_v41, -inf  ;;  %v17014_v48 = vmax.f32 %v16770_v8, %v17013_v53  ;;  %v17017_v17 = vmax.f32 %v17015_v31, %v17016_v59  ;;  %v17019_v25 = vmax.f32 %v16771_v43, %v17018_v52  ;;  %v17021_v41 = vld [vmem:[#allocation59_spill] sm:$0xff]  ;;  %v17023_v55 = vld [vmem:[#allocation77_spill] sm:$0xff]  ;;  %vm17033_vm1 = vmmov %vm17032_vm9 }
 0x342   : > { %v17022_v9 = vmax.f32 %v17020_v3, %v17021_v41  ;;  %v17024_v53 = vmax.f32 %v16772_v38, %v17023_v55  ;;  %vm17034_vm6 = vmmov %vm17033_vm1  ;;  %v17039_v33 = vrot.slane %v17003_v12, 2 }
 0x343   : > { %v12110_v24 = vmax.f32 %v17014_v48, %v2860_v18  ;;  %v12115_v61 = vmax.f32 %v17017_v17, %v2861_v49  ;;  %v12120_v4 = vmax.f32 %v17019_v25, %v2863_v6  ;;  %v17025_v48 = vld [vmem:[#allocation91_spill] sm:$0xff]  ;;  %v17027_v17 = vld [vmem:[#allocation97_spill] sm:$0xff]  ;;  %v17029_v25 = vld [vmem:[#allocation108_spill] sm:$0xff] }
 0x344   : > { %v12125_v13 = vmax.f32 %v17022_v9, %v2864_v51  ;;  %v12130_v18 = vmax.f32 %v17024_v53, %v2866_v27  ;;  %v17026_v59 = vmax.f32 %v10838_v28, %v17025_v48  ;;  %v17028_v52 = vmax.f32 %v16773_v34, %v17027_v17  ;;  %vm17036_vm15 = vmmov %vm17033_vm1 }
 0x345   : > { %v17030_v41 = vmax.f32 %v10841_v58, %v17029_v25  ;;  %v16016_v51 = vrot.slane %v16770_v8, 2  ;;  %v16018_v27 = vrot.slane %v16771_v43, 2  ;;  %v2973_v48 = vrot.slane %v17020_v3, 2 }
 0x346   : > { %v12135_v49 = vmax.f32 %v17026_v59, %v2867_v40  ;;  %v12140_v6 = vmax.f32 %v17028_v52, %v2869_v63  ;;  %v2972_v40 = vrot.slane %v17015_v31, 2  ;;  %v2974_v63 = vrot.slane %v10838_v28, 2 }
 0x347   : > { %v12145_v9 = vmax.f32 %v17030_v41, %v2870_v46  ;;  %v2975_v59 = vrot.slane %v10841_v58, 2  ;;  %v16021_v17 = vrot.slane %v16774_v50, 2  ;;  %v16022_v46 = vrot.slane %v16775_v54, 2 }
 0x348   : > { %v3020_v41 = vsel %vm17031_vm14, %v16016_v51, %v2972_v40  ;;  %v3021_v53 = vsel %vm17032_vm9, %v16018_v27, %v2973_v48  ;;  %v17035_v52 = vrot.slane %v16772_v38, 2  ;;  %vm17038_vm14 = vmmov %vm17033_vm1 }
 0x349   : > { %v3004_v55 = vsel %vm17033_vm1, %v2972_v40, %v16021_v17  ;;  %v3005_v25 = vsel %vm17034_vm6, %v2973_v48, %v16022_v46  ;;  %v3023_v27 = vsel %vm17038_vm14, %v17037_v0, %v2975_v59  ;;  %vm17040_vm9 = vmmov %vm17033_vm1  ;;  %v17041_v17 = vrot.slane %v17008_v11, 2 }
 0x34a   : > { %v3022_v51 = vsel %vm17036_vm15, %v17035_v52, %v2974_v63  ;;  %v3006_v40 = vsel %vm17040_vm9, %v2974_v63, %v17039_v33  ;;  %v3052_v46 = vsel %vm1782_vm4, %v3020_v41, -inf  ;;  %vm17042_vm6 = vcmp.eq.s32.totalorder %v16816_v42, 1 }
 0x34b   : > { %v3007_v48 = vsel %vm17033_vm1, %v2975_v59, %v17041_v17  ;;  %v3053_v52 = vsel %vm17042_vm6, %v3004_v55, -inf  ;;  %v3055_v39 = vsel %vm1782_vm4, %v3021_v53, -inf  ;;  %vm17043_vm15 = vmmov %vm17042_vm6  ;;  %v3058_v33 = vsel %vm1782_vm4, %v3022_v51, -inf }
 0x34c   : > { %v3056_v0 = vsel %vm17043_vm15, %v3005_v25, -inf  ;;  %vm17044_vm14 = vmmov %vm17042_vm6  ;;  %v3061_v59 = vsel %vm1782_vm4, %v3023_v27, -inf  ;;  %v3100_v55 = vmax.f32 %v12110_v24, %v3052_v46  ;;  %v3101_v41 = vmax.f32 %v12115_v61, %v3053_v52 }
 0x34d   : > { %v3059_v63 = vsel %vm17044_vm14, %v3006_v40, -inf  ;;  %vm17045_vm9 = vmmov %vm17042_vm6  ;;  %v3103_v53 = vmax.f32 %v12120_v4, %v3055_v39  ;;  %v3104_v25 = vmax.f32 %v12125_v13, %v3056_v0  ;;  %v3106_v57 = vmax.f32 %v12130_v18, %v3058_v33 }
 0x34e   : > { %v3062_v17 = vsel %vm17045_vm9, %v3007_v48, -inf  ;;  %v3107_v51 = vmax.f32 %v12135_v49, %v3059_v63  ;;  %v3109_v40 = vmax.f32 %v12140_v6, %v3061_v59  ;;  %v16031_v27 = vrot.slane %v16770_v8, 1 }
 0x34f   : > { %v3110_v29 = vmax.f32 %v12145_v9, %v3062_v17  ;;  %v16026_v48 = vrot.slane %v16771_v43, 1  ;;  %v16025_v24 = vrot.slane %v16772_v38, 1  ;;  %v16027_v61 = vrot.slane %v16773_v34, 1 }
 0x350   : > { %v3164_v39 = vrot.slane %v17015_v31, 1  ;;  %v3165_v13 = vrot.slane %v17020_v3, 1  ;;  %v3166_v4 = vrot.slane %v10838_v28, 1  ;;  %v3167_v18 = vrot.slane %v10841_v58, 1 }
 0x351   : > { %v16030_v49 = vrot.slane %v16774_v50, 1  ;;  %v16024_v6 = vrot.slane %v16775_v54, 1  ;;  %v16028_v9 = vrot.slane %v17003_v12, 1  ;;  %v16029_v46 = vrot.slane %v17008_v11, 1 }
 0x352   : > { %vm17046_vm1 = vcmp.lt.s32.totalorder %v8391_v2, 7 }
 0x353   : > { %v3212_v52 = vsel %vm17046_vm1, %v16031_v27, %v3164_v39  ;;  %vm17047_vm6 = vmmov %vm17046_vm1  ;;  %v3215_v17 = vsel %vm17046_vm1, %v16027_v61, %v3167_v18 }
 0x354   : > { %v3213_v0 = vsel %vm17047_vm6, %v16026_v48, %v3165_v13  ;;  %vm17048_vm15 = vmmov %vm17046_vm1 }
 0x355   : > { %v3196_v33 = vsel %vm17048_vm15, %v3164_v39, %v16030_v49  ;;  %vm17049_vm14 = vmmov %vm17046_vm1  ;;  %v3247_v48 = vsel %vm1989_vm5, %v3213_v0, -inf }
 0x356   : > { %v3197_v63 = vsel %vm17049_vm14, %v3165_v13, %v16024_v6  ;;  %vm17050_vm9 = vmmov %vm17046_vm1  ;;  %v3244_v6 = vsel %vm1989_vm5, %v3212_v52, -inf  ;;  %v3295_v49 = vmax.f32 %v3103_v53, %v3247_v48  ;;  %v17058_v48 = vrot.slane %v17020_v3, 7 }
 0x357   : > { %v3214_v59 = vsel %vm17050_vm9, %v16025_v24, %v3166_v4  ;;  %vm17051_vm6 = vmmov %vm17046_vm1  ;;  %v3245_v24 = vsel %vm1990_vm7, %v3196_v33, -inf  ;;  %v3248_v61 = vsel %vm1990_vm7, %v3197_v63, -inf  ;;  %vm17071_vm14 = vcmp.lt.s32.totalorder %v8391_v2, 2 }
 0x358   : > { %v3198_v39 = vsel %vm17051_vm6, %v3166_v4, %v16028_v9  ;;  %vm17052_vm15 = vmmov %vm17046_vm1  ;;  %v3250_v4 = vsel %vm1989_vm5, %v3214_v59, -inf  ;;  %v3293_v33 = vmax.f32 %v3101_v41, %v3245_v24  ;;  %v3296_v27 = vmax.f32 %v3104_v25, %v3248_v61 }
 0x359   : > { %v3199_v13 = vsel %vm17052_vm15, %v3167_v18, %v16029_v46  ;;  %v3251_v9 = vsel %vm1990_vm7, %v3198_v39, -inf  ;;  %v3253_v18 = vsel %vm1989_vm5, %v3215_v17, -inf  ;;  %v3292_v46 = vmax.f32 %v3100_v55, %v3244_v6  ;;  %vm17074_vm9 = vmmov %vm17071_vm14 }
 0x35a   : > { %v3254_v52 = vsel %vm1990_vm7, %v3199_v13, -inf  ;;  %v12275_v0 = vmax.f32 %v3106_v57, %v3250_v4  ;;  %v12277_v35 = vmax.f32 %v3107_v51, %v3251_v9  ;;  %v12279_v63 = vmax.f32 %v3109_v40, %v3253_v18  ;;  %v17063_v18 = vld [vmem:[#allocation23_spill] sm:$0xff]  ;;  %vm17077_vm1 = vmmov %vm17074_vm9 }
 0x35b   : > { %v12281_v59 = vmax.f32 %v3110_v29, %v3254_v52  ;;  %v5068_v39 = vpack.c.bf16 %v17015_v31, %v16770_v8  ;;  %v16035_v17 = vrot.slane %v17054_v7, 7  ;;  %v3490_v32 = vmax.f32 %v3292_v46, %v3295_v49  ;;  %vm17080_vm6 = vmmov %vm17077_vm1 }
 0x35c   : > { %v3491_v1 = vmax.f32 %v3293_v33, %v3296_v27  ;;  %v3493_v55 = vmax.f32 %v3295_v49, %v12275_v0  ;;  %v3494_v41 = vmax.f32 %v3296_v27, %v12277_v35  ;;  %v17055_v29 = vrot.slane %v16774_v50, 7  ;;  %vm17082_vm15 = vmmov %vm17077_vm1 }
 0x35d   : > { %17053 = vst [vmem:[#allocation86_spill] sm:$0xff] %v12281_v59  ;;  %v17056_v25 = vrot.slane %v17015_v31, 7  ;;  %v17057_v40 = vrot.slane %v16775_v54, 7  ;;  %v12305_v24 = vmax.f32 %v3490_v32, %v12275_v0  ;;  %v17059_v9 = vrot.slane %v17003_v12, 7 }
 0x35e   : > { %v12308_v61 = vmax.f32 %v3491_v1, %v12277_v35  ;;  %v12311_v49 = vmax.f32 %v3493_v55, %v12279_v63  ;;  %v12314_v6 = vmax.f32 %v3494_v41, %v12281_v59  ;;  %v17060_v46 = vrot.slane %v10838_v28, 7  ;;  %v17065_v55 = vld [vmem:[#allocation66_spill] sm:$0xff] }
 0x35f   : > { %v2620_v51 = vsel %vm1138_vm0, %v17056_v25, %v17055_v29  ;;  %v2621_v27 = vsel %vm1138_vm0, %v17058_v48, %v17057_v40  ;;  %v17061_v4 = vrot.slane %v17008_v11, 7  ;;  %v17062_v32 = vrot.slane %v10841_v58, 7  ;;  %v17067_v29 = vld [vmem:[#allocation72_spill] sm:$0xff] }
 0x360   : > { %v2622_v13 = vsel %vm1138_vm0, %v17060_v46, %v17059_v9  ;;  %v17064_v52 = vrot.slane %v17063_v18, 7  ;;  %v17066_v41 = vrot.slane %v17065_v55, 7  ;;  %v17068_v25 = vrot.slane %v17067_v29, 7 }
 0x361   : > { %v2623_v1 = vsel %vm1138_vm0, %v17062_v32, %v17061_v4  ;;  %v5092_v48 = vpack.c.bf16 %v12308_v61, %v12305_v24  ;;  %v2670_v9 = vsel %vm1370_vm11, %v2620_v51, -inf  ;;  %v2673_v46 = vsel %vm1370_vm11, %v2621_v27, -inf }
 0x362   : > { %v2624_v33 = vsel %vm1138_vm0, %v17064_v52, %v16035_v17  ;;  %v2625_v40 = vsel %vm1138_vm0, %v17068_v25, %v17066_v41  ;;  %v2676_v4 = vsel %vm1370_vm11, %v2622_v13, -inf  ;;  %v2679_v32 = vsel %vm1370_vm11, %v2623_v1, -inf }
 0x363   : > { %v2682_v52 = vsel %vm1370_vm11, %v2624_v33, -inf  ;;  %v2685_v41 = vsel %vm1370_vm11, %v2625_v40, -inf  ;;  %v2718_v25 = vmax.f32 %v16774_v50, %v2670_v9  ;;  %5364 = vmatprep.mubr.bf16.mxu1 %v5092_v48  ;;  %v2721_v51 = vmax.f32 %v16775_v54, %v2673_v46 }
 0x364   : > { %v2724_v53 = vmax.f32 %v17003_v12, %v2676_v4  ;;  %v2727_v27 = vmax.f32 %v17008_v11, %v2679_v32  ;;  %v2730_v13 = vmax.f32 %v17054_v7, %v2682_v52  ;;  %5365 = vmatmul.mubr.bf16.vlgmr.msra.gmra.mrb[32].mxu1 %v5068_v39  ;;  %v2733_v1 = vmax.f32 %v17065_v55, %v2685_v41 }
 0x365   : > { %v16037_v57 = vrot.slane %v17054_v7, 6  ;;  %v16040_v33 = vrot.slane %v17065_v55, 6  ;;  %v17069_v40 = vrot.slane %v16774_v50, 6  ;;  %v17070_v9 = vrot.slane %v17015_v31, 6 }
 0x366   : > { %v17072_v46 = vrot.slane %v16775_v54, 6  ;;  %v17073_v4 = vrot.slane %v17020_v3, 6  ;;  %v17075_v32 = vrot.slane %v17003_v12, 6  ;;  %v17076_v52 = vrot.slane %v10838_v28, 6 }
 0x367   : > { %v2812_v48 = vsel %vm17071_vm14, %v17070_v9, %v17069_v40  ;;  %v17078_v17 = vrot.slane %v17008_v11, 6  ;;  %v17079_v31 = vrot.slane %v10841_v58, 6  ;;  %vm17084_vm14 = vmmov %vm17077_vm1 }
 0x368   : > { %v2813_v39 = vsel %vm17074_vm9, %v17073_v4, %v17072_v46  ;;  %v2814_v41 = vsel %vm17077_vm1, %v17076_v52, %v17075_v32  ;;  %v2862_v9 = vsel %vm1577_vm2, %v2812_v48, -inf  ;;  %v17081_v46 = vrot.slane %v17063_v18, 6 }
 0x369   : > { %v2815_v40 = vsel %vm17080_vm6, %v17079_v31, %v17078_v17  ;;  %v17083_v32 = vrot.slane %v17067_v29, 6  ;;  %v2865_v17 = vsel %vm1577_vm2, %v2813_v39, -inf  ;;  %v2868_v48 = vsel %vm1577_vm2, %v2814_v41, -inf }
 0x36a   : > { %v2816_v4 = vsel %vm17082_vm15, %v17081_v46, %v16037_v57  ;;  %v2871_v31 = vsel %vm1577_vm2, %v2815_v40, -inf  ;;  %v2910_v57 = vmax.f32 %v2718_v25, %v2862_v9  ;;  %v2913_v37 = vmax.f32 %v2721_v51, %v2865_v17 }
 0x36b   : > { %v2817_v52 = vsel %vm17084_vm14, %v17083_v32, %v16040_v33  ;;  %v2874_v23 = vsel %vm1577_vm2, %v2816_v4, -inf  ;;  %v2916_v62 = vmax.f32 %v2724_v53, %v2868_v48  ;;  %v2919_v26 = vmax.f32 %v2727_v27, %v2871_v31 }
 0x36c   : > { %v2877_v46 = vsel %vm1577_vm2, %v2817_v52, -inf  ;;  %v2922_v32 = vmax.f32 %v2730_v13, %v2874_v23  ;;  %v16048_v39 = vrot.slane %v17085_v14, 2  ;;  %v16050_v41 = vrot.slane %v17054_v7, 2 }
 0x36d   : > { %v2925_v33 = vmax.f32 %v2733_v1, %v2877_v46  ;;  %v16051_v40 = vrot.slane %v17065_v55, 2  ;;  %v17088_v4 = vrot.slane %v16774_v50, 2  ;;  %vm17089_vm9 = vcmp.lt.s32.totalorder %v8391_v2, 6 }
 0x36e   : > { %v17090_v53 = vrot.slane %v16771_v43, 2  ;;  %v17091_v23 = vrot.slane %v16775_v54, 2  ;;  %vm17092_vm1 = vmmov %vm17089_vm9  ;;  %v17093_v27 = vrot.slane %v16772_v38, 2  ;;  %v17094_v13 = vrot.slane %v17003_v12, 2 }
 0x36f   : > { %v3036_v25 = vsel %vm17089_vm9, %v17088_v4, %v17087_v60  ;;  %vm17095_vm6 = vmmov %vm17092_vm1  ;;  %v17096_v9 = vrot.slane %v16773_v34, 2  ;;  %v17097_v52 = vrot.slane %v17008_v11, 2 }
 0x370   : > { %v3037_v51 = vsel %vm17092_vm1, %v17091_v23, %v17090_v53  ;;  %v3038_v1 = vsel %vm17095_vm6, %v17094_v13, %v17093_v27  ;;  %vm17098_vm15 = vmmov %vm17092_vm1  ;;  %v3054_v48 = vsel %vm16052_vm8, %v3036_v25, -inf }
 0x371   : > { %v3039_v60 = vsel %vm17098_vm15, %v17097_v52, %v17096_v9  ;;  %vm17099_vm14 = vmmov %vm17092_vm1  ;;  %v3057_v31 = vsel %vm16052_vm8, %v3037_v51, -inf  ;;  %v3060_v4 = vsel %vm16052_vm8, %v3038_v1, -inf  ;;  %v3102_v51 = vmax.f32 %v2910_v57, %v3054_v48 }
 0x372   : > { %v3040_v17 = vsel %vm17099_vm14, %v16050_v41, %v16048_v39  ;;  %vm17100_vm9 = vmmov %vm17092_vm1  ;;  %v3063_v53 = vsel %vm16052_vm8, %v3039_v60, -inf  ;;  %v3105_v27 = vmax.f32 %v2913_v37, %v3057_v31  ;;  %v3108_v13 = vmax.f32 %v2916_v62, %v3060_v4 }
 0x373   : > { %v3041_v46 = vsel %vm17100_vm9, %v16051_v40, %v16049_v56  ;;  %v3066_v23 = vsel %vm16052_vm8, %v3040_v17, -inf  ;;  %v3111_v9 = vmax.f32 %v2919_v26, %v3063_v53  ;;  %v16053_v56 = vrot.slane %v17085_v14, 1 }
 0x374   : > { %v3069_v25 = vsel %vm16052_vm8, %v3041_v46, -inf  ;;  %v3114_v52 = vmax.f32 %v2922_v32, %v3066_v23  ;;  %v16055_v41 = vrot.slane %v17086_v19, 1  ;;  %v16054_v1 = vrot.slane %v17054_v7, 1 }
 0x375   : > { %v3117_v39 = vmax.f32 %v2925_v33, %v3069_v25  ;;  %v16056_v60 = vrot.slane %v17065_v55, 1  ;;  %v17101_v40 = vrot.slane %v16770_v8, 1  ;;  %v17102_v17 = vrot.slane %v16774_v50, 1 }
 0x376   : > { %vm17103_vm1 = vcmp.lt.s32.totalorder %v8391_v2, 7  ;;  %v17104_v62 = vrot.slane %v16771_v43, 1  ;;  %v17105_v26 = vrot.slane %v16775_v54, 1  ;;  %v17107_v33 = vrot.slane %v16772_v38, 1 }
 0x377   : > { %v3228_v57 = vsel %vm17103_vm1, %v17102_v17, %v17101_v40  ;;  %vm17106_vm6 = vmmov %vm17103_vm1  ;;  %v17108_v32 = vrot.slane %v17003_v12, 1  ;;  %v17110_v8 = vrot.slane %v16773_v34, 1  ;;  %v17111_v31 = vrot.slane %v17008_v11, 1 }
 0x378   : > { %v3229_v37 = vsel %vm17106_vm6, %v17105_v26, %v17104_v62  ;;  %vm17109_vm15 = vmmov %vm17103_vm1  ;;  %vm17113_vm9 = vcmp.eq.s32.totalorder %v10279_v30, 1  ;;  %v3232_v4 = vsel %vm17103_vm1, %v16054_v1, %v16053_v56  ;;  %v17144_v11 = vrot.slane %v17085_v14, 2 }
 0x379   : > { %v3230_v48 = vsel %vm17109_vm15, %v17108_v32, %v17107_v33  ;;  %vm17112_vm14 = vmmov %vm17103_vm1  ;;  %v3246_v46 = vsel %vm17113_vm9, %v3228_v57, -inf  ;;  %v4204_v34 = vrot.slane %v12305_v24, 2 }
 0x37a   : > { %v3231_v40 = vsel %vm17112_vm14, %v17111_v31, %v17110_v8  ;;  %vm17114_vm6 = vmmov %vm17103_vm1  ;;  %v3294_v26 = vmax.f32 %v3102_v51, %v3246_v46  ;;  %v2768_v46 = vrot.slane %v17085_v14, 6 }
 0x37b   : > { %v3233_v53 = vsel %vm17114_vm6, %v16056_v60, %v16055_v41  ;;  %vm17115_vm15 = vmmov %vm17113_vm9  ;;  %v3255_v17 = vsel %vm17113_vm9, %v3231_v40, -inf  ;;  %v5069_v40 = vpack.c.bf16 %v16771_v43, %v16774_v50  ;;  %v17122_v50 = vrot.slane %v17067_v29, 6 }
 0x37c   : > { %v3249_v23 = vsel %vm17115_vm15, %v3229_v37, -inf  ;;  %vm17116_vm14 = vmmov %vm17113_vm9  ;;  %v12514_v8 = vmax.f32 %v3111_v9, %v3255_v17  ;;  %v17123_v43 = vrot.slane %v17086_v19, 6  ;;  %v17142_v60 = vrot.slane %v17054_v7, 2 }
 0x37d   : > { %v3252_v25 = vsel %vm17116_vm14, %v3230_v48, -inf  ;;  %vm17117_vm8 = vmmov %vm17113_vm9  ;;  %v3297_v33 = vmax.f32 %v3105_v27, %v3249_v23  ;;  %v12522_v48 = vmax.f32 %v12305_v24, %v12279_v63  ;;  %vm17137_vm9 = vcmp.lt.s32.totalorder %v8391_v2, 6 }
 0x37e   : > { %v3258_v57 = vsel %vm17117_vm8, %v3232_v4, -inf  ;;  %vm17118_vm1 = vmmov %vm17117_vm8  ;;  %v3300_v32 = vmax.f32 %v3108_v13, %v3252_v25  ;;  %17119 = vst [vmem:[#allocation117_spill] sm:$0xff] %v12514_v8  ;;  %v12528_v4 = vmax.f32 %v12308_v61, %v12281_v59  ;;  %vm17124_vm8 = vcmp.lt.s32.totalorder %v8391_v2, 2 }
 0x37f   : > { %v3261_v62 = vsel %vm17118_vm1, %v3233_v53, -inf  ;;  %v12516_v31 = vmax.f32 %v3114_v52, %v3258_v57  ;;  %v3492_v51 = vmax.f32 %v3294_v26, %v3297_v33  ;;  %v2576_v52 = vrot.slane %v17085_v14, 7  ;;  %vm17128_vm6 = vmmov %vm17124_vm8 }
 0x380   : > { %v12518_v37 = vmax.f32 %v3117_v39, %v3261_v62  ;;  %v3495_v27 = vmax.f32 %v3297_v33, %v3300_v32  ;;  %v3498_v13 = vmax.f32 %v3300_v32, %v12514_v8  ;;  %v5070_v39 = vpack.c.bf16 %v16775_v54, %v17020_v3  ;;  %vm17132_vm15 = vmmov %vm17128_vm6 }
 0x381   : > { %17120 = vst [vmem:[#allocation111_spill] sm:$0xff] %v12516_v31  ;;  %v2833_v53 = vsel %vm17124_vm8, %v17123_v43, %v17122_v50  ;;  %v12543_v23 = vmax.f32 %v3492_v51, %v3300_v32  ;;  %v17126_v54 = vmov %v17123_v43  ;;  %v17127_v3 = vrot.slane %v17065_v55, 6  ;;  %vm17134_vm14 = vmmov %vm17128_vm6 }
 0x382   : > { %17121 = vst [vmem:[#allocation75_spill] sm:$0xff] %v12518_v37  ;;  %v3591_v25 = vmax.f32 %v3495_v27, %v12514_v8  ;;  %v12547_v17 = vmax.f32 %v3498_v13, %v12516_v31  ;;  %v17129_v62 = vrot.slane %v17063_v18, 7  ;;  %v17130_v33 = vrot.slane %v17054_v7, 7  ;;  %vm17143_vm1 = vmmov %vm17137_vm9 }
 0x383   : > { %v2849_v57 = vsel %vm17128_vm6, %v17127_v3, %v17126_v54  ;;  %v17131_v51 = vrot.slane %v17063_v18, 6  ;;  %v17133_v13 = vrot.slane %v17054_v7, 6  ;;  %v5093_v3 = vpack.c.bf16 %v12522_v48, %v12543_v23  ;;  %vm17145_vm8 = vmmov %vm17143_vm1 }
 0x384   : > { %17125 = vst [vmem:[#allocation32_spill] sm:$0xff] %v12547_v17  ;;  %v2640_v26 = vsel %vm1138_vm0, %v2576_v52, %v17129_v62  ;;  %v2656_v32 = vsel %vm1138_vm0, %v17130_v33, %v2576_v52  ;;  %v3687_v43 = vmax.f32 %v3591_v25, %v12516_v31  ;;  %v12578_v52 = vmax.f32 %v12543_v23, %v12514_v8  ;;  %vm17148_vm6 = vmmov %vm17143_vm1 }
 0x385   : > { %v2832_v27 = vsel %vm17132_vm15, %v2768_v46, %v17131_v51  ;;  %v2848_v50 = vsel %vm17134_vm14, %v17133_v13, %v2768_v46  ;;  %v2680_v62 = vsel %vm16070_vm10, %v2656_v32, -inf  ;;  %v2681_v33 = vsel %vm1369_vm13, %v2640_v26, -inf  ;;  %5372 = vmatprep.mubr.bf16.mxu1 %v5093_v3 }
 0x386   : > { %v2872_v46 = vsel %vm1575_vm12, %v2848_v50, -inf  ;;  %v2873_v25 = vsel %vm1576_vm3, %v2832_v27, -inf  ;;  %v12589_v51 = vmax.f32 %v3687_v43, %v12518_v37  ;;  %v5094_v13 = vpack.c.bf16 %v12578_v52, %v12528_v4  ;;  %5373 = vmatmul.mubr.bf16.gmra.mrb[36].mxu1 %v5069_v40  ;;  %v17138_v40 = vld [vmem:[#allocation26_spill] sm:$0xff] }
 0x387   : > { %v2728_v9 = vmax.f32 %v17085_v14, %v2680_v62  ;;  %v2729_v32 = vmax.f32 %v17063_v18, %v2681_v33  ;;  %v2875_v26 = vsel %vm1575_vm12, %v2849_v57, -inf  ;;  %v2876_v50 = vsel %vm1576_vm3, %v2833_v53, -inf  ;;  %v17140_v57 = vld [vmem:[#allocation16_spill] sm:$0xff] }
 0x388   : > { %v2976_v27 = vrot.slane %v17063_v18, 2  ;;  %v17135_v43 = vrot.slane %v17065_v55, 2  ;;  %v17136_v3 = vrot.slane %v17067_v29, 2  ;;  %5380 = vmatprep.mubr.bf16.mxu1 %v5094_v13  ;;  %v17139_v33 = vmax.f32 %v17086_v19, %v17138_v40 }
 0x389   : > { %v2920_v62 = vmax.f32 %v2728_v9, %v2872_v46  ;;  %v2921_v56 = vmax.f32 %v2729_v32, %v2873_v25  ;;  %v17141_v41 = vmax.f32 %v17067_v29, %v17140_v57  ;;  %v17147_v46 = vrot.slane %v17086_v19, 2 }
 0x38a   : > { %v3009_v54 = vsel %vm17137_vm9, %v17136_v3, %v17135_v43  ;;  %v2923_v1 = vmax.f32 %v17139_v33, %v2875_v26  ;;  %v3008_v36 = vsel %vm17143_vm1, %v2976_v27, %v17142_v60  ;;  %v3024_v13 = vsel %vm17145_vm8, %v17144_v11, %v2976_v27 }
 0x38b   : > { %v2924_v53 = vmax.f32 %v17141_v41, %v2876_v50  ;;  %v17146_v9 = vmov %v17136_v3  ;;  %vm17149_vm15 = vcmp.eq.s32.totalorder %v16816_v42, 1  ;;  %v3064_v32 = vsel %vm1782_vm4, %v3024_v13, -inf }
 0x38c   : > { %v3025_v25 = vsel %vm17148_vm6, %v17147_v46, %v17146_v9  ;;  %v3068_v41 = vsel %vm17149_vm15, %v3009_v54, -inf  ;;  %vm17150_vm14 = vmmov %vm17149_vm15  ;;  %v3112_v50 = vmax.f32 %v2920_v62, %v3064_v32  ;;  %v3168_v3 = vrot.slane %v17063_v18, 1 }
 0x38d   : > { %v3065_v60 = vsel %vm17150_vm14, %v3008_v36, -inf  ;;  %v3067_v26 = vsel %vm1782_vm4, %v3025_v25, -inf  ;;  %v3116_v11 = vmax.f32 %v2924_v53, %v3068_v41  ;;  %v17151_v40 = vrot.slane %v17065_v55, 1 }
 0x38e   : > { %v3113_v27 = vmax.f32 %v2921_v56, %v3065_v60  ;;  %v3115_v43 = vmax.f32 %v2923_v1, %v3067_v26  ;;  %v17152_v33 = vrot.slane %v17067_v29, 1  ;;  %vm17153_vm9 = vcmp.lt.s32.totalorder %v8391_v2, 7  ;;  %5381 = vmatmul.mubr.bf16.gmra.mrb[40].mxu1 %v5070_v39 }
 0x38f   : > { %v17155_v36 = vrot.slane %v17086_v19, 1  ;;  %vm17156_vm1 = vmmov %vm17153_vm9  ;;  %v12649_v56 = vmax.f32 %v12578_v52, %v12516_v31  ;;  %v3820_v1 = vrot.slane %v12305_v24, 7  ;;  %v17157_v62 = vrot.slane %v17054_v7, 1 }
 0x390   : > { %v3201_v54 = vsel %vm17153_vm9, %v17152_v33, %v17151_v40  ;;  %v17154_v57 = vmov %v17152_v33  ;;  %vm17158_vm8 = vmmov %vm17156_vm1  ;;  %v17159_v9 = vrot.slane %v17085_v14, 1  ;;  %vm17164_vm15 = vcmp.lt.s32.totalorder %v8391_v2, 2 }
 0x391   : > { %v3217_v13 = vsel %vm17156_vm1, %v17155_v36, %v17154_v57  ;;  %v3200_v53 = vsel %vm17158_vm8, %v3168_v3, %v17157_v62  ;;  %vm17160_vm6 = vmmov %vm17156_vm1  ;;  %v3260_v41 = vsel %vm1990_vm7, %v3201_v54, -inf  ;;  %v3821_v57 = vrot.slane %v12522_v48, 7 }
 0x392   : > { %v3216_v46 = vsel %vm17160_vm6, %v17159_v9, %v3168_v3  ;;  %v3259_v25 = vsel %vm1989_vm5, %v3217_v13, -inf  ;;  %v3257_v60 = vsel %vm1990_vm7, %v3200_v53, -inf  ;;  %v12670_v40 = vmax.f32 %v3116_v11, %v3260_v41  ;;  %vm17165_vm14 = vmmov %vm17164_vm15 }
 0x393   : > { %v3256_v32 = vsel %vm1989_vm5, %v3216_v46, -inf  ;;  %v12668_v26 = vmax.f32 %v3115_v43, %v3259_v25  ;;  %v12674_v3 = vmax.f32 %v3113_v27, %v3257_v60  ;;  %v3836_v36 = vrot.slane %v12308_v61, 7  ;;  %vm17166_vm9 = vmmov %vm17165_vm14 }
 0x394   : > { %17162 = vst [vmem:[#allocation99_spill] sm:$0xff] %v12670_v40  ;;  %v12672_v33 = vmax.f32 %v3112_v50, %v3256_v32  ;;  %v3837_v54 = vrot.slane %v12528_v4, 7  ;;  %v3852_v13 = vrot.slane %v12543_v23, 7  ;;  %v3853_v62 = vrot.slane %v12578_v52, 7  ;;  %vm17167_vm1 = vmmov %vm17166_vm9 }
 0x395   : > { %17161 = vst [vmem:[#allocation48_spill] sm:$0xff] %v12668_v26  ;;  %v3854_v43 = vrot.slane %v12649_v56, 7  ;;  %v12696_v9 = vmax.f32 %v12528_v4, %v12674_v3  ;;  %v3686_v25 = vmax.f32 %v12314_v6, %v12674_v3  ;;  %v3884_v27 = vsel %vm1138_vm0, %v3820_v1, %v3836_v36  ;;  %vm17168_vm8 = vmmov %vm17167_vm1 }
 0x396   : > { %v12692_v53 = vmax.f32 %v12522_v48, %v12672_v33  ;;  %v3685_v46 = vmax.f32 %v12311_v49, %v12672_v33  ;;  %v3868_v32 = vsel %vm1138_vm0, %v3836_v36, %v3852_v13  ;;  %v3869_v60 = vsel %vm1138_vm0, %v3837_v54, %v3853_v62  ;;  %vm17169_vm6 = vmmov %vm17167_vm1 }
 0x397   : > { %v12715_v49 = vmax.f32 %v3686_v25, %v12670_v40  ;;  %v3838_v11 = vrot.slane %v12696_v9, 7  ;;  %v3885_v41 = vsel %vm1138_vm0, %v3821_v57, %v3837_v54  ;;  %v3900_v55 = vsel %vm1138_vm0, %v3852_v13, %v3820_v1 }
 0x398   : > { %v5095_v50 = vpack.c.bf16 %v12696_v9, %v12692_v53  ;;  %v12712_v39 = vmax.f32 %v3685_v46, %v12668_v26  ;;  %v3822_v6 = vrot.slane %v12692_v53, 7  ;;  %v3901_v36 = vsel %vm1138_vm0, %v3853_v62, %v3821_v57 }
 0x399   : > { %v3916_v29 = vsel %vm16070_vm10, %v3900_v55, -inf  ;;  %v3917_v19 = vsel %vm1369_vm13, %v3884_v27, -inf  ;;  %v3870_v54 = vsel %vm1138_vm0, %v3838_v11, %v3854_v43  ;;  %v3918_v57 = vsel %vm1370_vm11, %v3868_v32, -inf }
 0x39a   : > { %5388 = vmatprep.mubr.bf16.mxu1 %v5095_v50  ;;  %v16061_v46 = vrot.slane %v12712_v39, 7  ;;  %v3902_v25 = vsel %vm1138_vm0, %v3854_v43, %v3822_v6  ;;  %v3886_v1 = vsel %vm1138_vm0, %v3822_v6, %v3838_v11  ;;  %v3919_v13 = vsel %vm16070_vm10, %v3901_v36, -inf }
 0x39b   : > { %v17163_v62 = vrot.slane %v12589_v51, 7  ;;  %v3920_v50 = vsel %vm1369_vm13, %v3885_v41, -inf  ;;  %v3921_v43 = vsel %vm1370_vm11, %v3869_v60, -inf  ;;  %v3922_v11 = vsel %vm16070_vm10, %v3902_v25, -inf }
 0x39c   : > { %v3923_v27 = vsel %vm1369_vm13, %v3886_v1, -inf  ;;  %v3924_v32 = vsel %vm1370_vm11, %v3870_v54, -inf  ;;  %v3964_v36 = vmax.f32 %v12305_v24, %v3916_v29  ;;  %v3966_v41 = vmax.f32 %v12543_v23, %v3918_v57 }
 0x39d   : > { %v3903_v55 = vsel %vm1138_vm0, %v17163_v62, %v16061_v46  ;;  %v3965_v62 = vmax.f32 %v12308_v61, %v3917_v19  ;;  %v3967_v60 = vmax.f32 %v12522_v48, %v3919_v13  ;;  %v3968_v46 = vmax.f32 %v12528_v4, %v3920_v50 }
 0x39e   : > { %v3925_v6 = vsel %vm16070_vm10, %v3903_v55, -inf  ;;  %v3969_v25 = vmax.f32 %v12578_v52, %v3921_v43  ;;  %v3970_v1 = vmax.f32 %v12692_v53, %v3922_v11  ;;  %v3971_v7 = vmax.f32 %v12696_v9, %v3923_v27  ;;  %vm17170_vm10 = vmmov %vm17167_vm1 }
 0x39f   : > { %v3972_v54 = vmax.f32 %v12649_v56, %v3924_v32  ;;  %v3973_v55 = vmax.f32 %v12712_v39, %v3925_v6  ;;  %v4012_v29 = vrot.slane %v12305_v24, 6  ;;  %v4013_v19 = vrot.slane %v12522_v48, 6 }
 0x3a0   : > { %v4014_v57 = vrot.slane %v12692_v53, 6  ;;  %v4028_v50 = vrot.slane %v12308_v61, 6  ;;  %v4029_v43 = vrot.slane %v12528_v4, 6  ;;  %v4030_v11 = vrot.slane %v12696_v9, 6 }
 0x3a1   : > { %v4044_v27 = vrot.slane %v12543_v23, 6  ;;  %v4045_v32 = vrot.slane %v12578_v52, 6  ;;  %v4046_v6 = vrot.slane %v12649_v56, 6  ;;  %v17173_v40 = vrot.slane %v12712_v39, 6 }
 0x3a2   : > { %v4076_v14 = vsel %vm17164_vm15, %v4012_v29, %v4028_v50  ;;  %v4077_v13 = vsel %vm17165_vm14, %v4013_v19, %v4029_v43  ;;  %v4078_v58 = vsel %vm17166_vm9, %v4014_v57, %v4030_v11  ;;  %vm17171_vm15 = vmmov %vm17167_vm1  ;;  %v17174_v26 = vrot.slane %v12589_v51, 6 }
 0x3a3   : > { %v4060_v12 = vsel %vm17167_vm1, %v4028_v50, %v4044_v27  ;;  %v4061_v31 = vsel %vm17168_vm8, %v4029_v43, %v4045_v32  ;;  %v4062_v18 = vsel %vm17169_vm6, %v4030_v11, %v4046_v6  ;;  %v4092_v8 = vsel %vm17170_vm10, %v4044_v27, %v4012_v29  ;;  %vm17172_vm14 = vmmov %vm17167_vm1 }
 0x3a4   : > { %v4093_v37 = vsel %vm17171_vm15, %v4045_v32, %v4013_v19  ;;  %v4094_v17 = vsel %vm17172_vm14, %v4046_v6, %v4014_v57  ;;  %vm17175_vm9 = vmmov %vm17167_vm1  ;;  %v4108_v43 = vsel %vm1575_vm12, %v4092_v8, -inf  ;;  %v4109_v11 = vsel %vm1576_vm3, %v4076_v14, -inf }
 0x3a5   : > { %v4095_v50 = vsel %vm17175_vm9, %v17174_v26, %v17173_v40  ;;  %v4110_v29 = vsel %vm1577_vm2, %v4060_v12, -inf  ;;  %v4111_v19 = vsel %vm1575_vm12, %v4093_v37, -inf  ;;  %v4112_v57 = vsel %vm1576_vm3, %v4077_v13, -inf }
 0x3a6   : > { %v4113_v27 = vsel %vm1577_vm2, %v4061_v31, -inf  ;;  %v4114_v26 = vsel %vm1575_vm12, %v4094_v17, -inf  ;;  %v4115_v8 = vsel %vm1576_vm3, %v4078_v58, -inf  ;;  %v4116_v14 = vsel %vm1577_vm2, %v4062_v18, -inf }
 0x3a7   : > { %v4117_v12 = vsel %vm1575_vm12, %v4095_v50, -inf  ;;  %v12824_v40 = vmax.f32 %v3964_v36, %v4108_v43  ;;  %v12826_v37 = vmax.f32 %v3965_v62, %v4109_v11  ;;  %v12828_v13 = vmax.f32 %v3966_v41, %v4110_v29 }
 0x3a8   : > { %v12830_v32 = vmax.f32 %v3967_v60, %v4111_v19  ;;  %v12832_v31 = vmax.f32 %v3968_v46, %v4112_v57  ;;  %v12834_v17 = vmax.f32 %v3969_v25, %v4113_v27  ;;  %v12836_v6 = vmax.f32 %v3970_v1, %v4114_v26 }
 0x3a9   : > { %v12838_v58 = vmax.f32 %v3971_v7, %v4115_v8  ;;  %v12840_v18 = vmax.f32 %v3972_v54, %v4116_v14  ;;  %v12842_v59 = vmax.f32 %v3973_v55, %v4117_v12  ;;  %v4205_v36 = vrot.slane %v12522_v48, 2 }
 0x3aa   : > { %v4206_v62 = vrot.slane %v12692_v53, 2  ;;  %v4207_v41 = vrot.slane %v12712_v39, 2  ;;  %v4220_v60 = vrot.slane %v12308_v61, 2  ;;  %v4221_v46 = vrot.slane %v12528_v4, 2 }
 0x3ab   : > { %v4222_v25 = vrot.slane %v12696_v9, 2  ;;  %v4223_v1 = vrot.slane %v12715_v49, 2  ;;  %v4236_v7 = vrot.slane %v12543_v23, 2  ;;  %v4237_v54 = vrot.slane %v12578_v52, 2 }
 0x3ac   : > { %v4238_v55 = vrot.slane %v12649_v56, 2  ;;  %vm17176_vm10 = vcmp.lt.s32.totalorder %v8391_v2, 6  ;;  %v4396_v11 = vrot.slane %v12305_v24, 1 }
 0x3ad   : > { %v4268_v50 = vsel %vm17176_vm10, %v4204_v34, %v4220_v60  ;;  %vm17177_vm1 = vmmov %vm17176_vm10 }
 0x3ae   : > { %v4269_v43 = vsel %vm17177_vm1, %v4205_v36, %v4221_v46  ;;  %vm17178_vm8 = vmmov %vm17177_vm1  ;;  %v4285_v8 = vsel %vm17177_vm1, %v4237_v54, %v4205_v36  ;;  %v4300_v12 = vsel %vm1782_vm4, %v4268_v50, -inf }
 0x3af   : > { %v4252_v29 = vsel %vm17178_vm8, %v4220_v60, %v4236_v7  ;;  %vm17179_vm6 = vmmov %vm17177_vm1  ;;  %v4348_v50 = vmax.f32 %v12824_v40, %v4300_v12  ;;  %v4397_v40 = vrot.slane %v12522_v48, 1 }
 0x3b0   : > { %v4253_v19 = vsel %vm17179_vm6, %v4221_v46, %v4237_v54  ;;  %vm17180_vm15 = vmmov %vm17177_vm1  ;;  %vm17185_vm6 = vcmp.eq.s32.totalorder %v16816_v42, 1 }
 0x3b1   : > { %v4270_v57 = vsel %vm17180_vm15, %v4206_v62, %v4222_v25  ;;  %vm17181_vm14 = vmmov %vm17177_vm1  ;;  %v4301_v60 = vsel %vm17185_vm6, %v4252_v29, -inf  ;;  %vm17186_vm15 = vcmp.eq.s32.totalorder %v9849_v47, 1 }
 0x3b2   : > { %v4271_v27 = vsel %vm17181_vm14, %v4207_v41, %v4223_v1  ;;  %vm17182_vm9 = vmmov %vm17177_vm1 }
 0x3b3   : > { %v4254_v26 = vsel %vm17182_vm9, %v4222_v25, %v4238_v55  ;;  %vm17183_vm10 = vmmov %vm17177_vm1  ;;  %v4303_v25 = vsel %vm1782_vm4, %v4269_v43, -inf  ;;  %v4349_v43 = vmax.f32 %v12826_v37, %v4301_v60  ;;  %v4398_v37 = vrot.slane %v12692_v53, 1 }
 0x3b4   : > { %v4284_v24 = vsel %vm17183_vm10, %v4236_v7, %v4204_v34  ;;  %vm17184_vm8 = vmmov %vm17177_vm1  ;;  %v3839_v53 = vrot.slane %v12715_v49, 7 }
 0x3b5   : > { %v4286_v14 = vsel %vm17184_vm8, %v4238_v55, %v4206_v62  ;;  %v4302_v46 = vsel %vm17186_vm15, %v4284_v24, -inf  ;;  %vm17187_vm14 = vmmov %vm17185_vm6  ;;  %v4306_v62 = vsel %vm1782_vm4, %v4270_v57, -inf  ;;  %v4309_v55 = vsel %vm1782_vm4, %v4271_v27, -inf }
 0x3b6   : > { %v4304_v34 = vsel %vm17187_vm14, %v4253_v19, -inf  ;;  %vm17188_vm9 = vmmov %vm17186_vm15  ;;  %v4350_v29 = vmax.f32 %v12828_v13, %v4302_v46  ;;  %v4351_v19 = vmax.f32 %v12830_v32, %v4303_v25  ;;  %v4357_v27 = vmax.f32 %v12842_v59, %v4309_v55 }
 0x3b7   : > { %v4305_v36 = vsel %vm17188_vm9, %v4285_v8, -inf  ;;  %vm17189_vm10 = vmmov %vm17185_vm6  ;;  %v4352_v24 = vmax.f32 %v12832_v31, %v4304_v34  ;;  %v4399_v13 = vrot.slane %v12712_v39, 1  ;;  %v4412_v32 = vrot.slane %v12308_v61, 1 }
 0x3b8   : > { %v4307_v7 = vsel %vm17189_vm10, %v4254_v26, -inf  ;;  %vm17190_vm1 = vmmov %vm17188_vm9  ;;  %v4353_v57 = vmax.f32 %v12834_v17, %v4305_v36  ;;  %v4354_v26 = vmax.f32 %v12836_v6, %v4306_v62  ;;  %v4413_v31 = vrot.slane %v12528_v4, 1 }
 0x3b9   : > { %v4308_v54 = vsel %vm17190_vm1, %v4286_v14, -inf  ;;  %v4355_v8 = vmax.f32 %v12838_v58, %v4307_v7  ;;  %v4414_v17 = vrot.slane %v12696_v9, 1  ;;  %v4415_v6 = vrot.slane %v12715_v49, 1 }
 0x3ba   : > { %v4356_v14 = vmax.f32 %v12840_v18, %v4308_v54  ;;  %v4428_v58 = vrot.slane %v12543_v23, 1  ;;  %v4429_v18 = vrot.slane %v12578_v52, 1  ;;  %v4430_v59 = vrot.slane %v12649_v56, 1 }
 0x3bb   : > { %vm17191_vm8 = vcmp.lt.s32.totalorder %v8391_v2, 7 }
 0x3bc   : > { %v4460_v48 = vsel %vm17191_vm8, %v4396_v11, %v4412_v32  ;;  %vm17192_vm6 = vmmov %vm17191_vm8 }
 0x3bd   : > { %v4444_v61 = vsel %vm17192_vm6, %v4412_v32, %v4428_v58  ;;  %vm17193_vm15 = vmmov %vm17192_vm6  ;;  %v4492_v34 = vsel %vm1989_vm5, %v4460_v48, -inf }
 0x3be   : > { %v4461_v4 = vsel %vm17193_vm15, %v4397_v40, %v4413_v31  ;;  %vm17194_vm14 = vmmov %vm17192_vm6  ;;  %v4493_v36 = vsel %vm1990_vm7, %v4444_v61, -inf }
 0x3bf   : > { %v4462_v9 = vsel %vm17194_vm14, %v4398_v37, %v4414_v17  ;;  %vm17195_vm9 = vmmov %vm17192_vm6  ;;  %vm17201_vm14 = vcmp.eq.s32.totalorder %v10279_v30, 1  ;;  %v4495_v7 = vsel %vm1989_vm5, %v4461_v4, -inf }
 0x3c0   : > { %v4463_v23 = vsel %vm17195_vm9, %v4399_v13, %v4415_v6  ;;  %vm17196_vm10 = vmmov %vm17192_vm6  ;;  %v4498_v55 = vsel %vm1989_vm5, %v4462_v9, -inf }
 0x3c1   : > { %v4445_v52 = vsel %vm17196_vm10, %v4413_v31, %v4429_v18  ;;  %vm17197_vm1 = vmmov %vm17192_vm6  ;;  %v4501_v32 = vsel %vm1989_vm5, %v4463_v23, -inf  ;;  %v4540_v31 = vmax.f32 %v4348_v50, %v4492_v34  ;;  %v12970_v61 = vmax.f32 %v4354_v26, %v4498_v55 }
 0x3c2   : > { %v4446_v12 = vsel %vm17197_vm1, %v4414_v17, %v4430_v59  ;;  %vm17198_vm8 = vmmov %vm17197_vm1  ;;  %v4541_v17 = vmax.f32 %v4349_v43, %v4493_v36  ;;  %v17206_v43 = vrot.slane %v12589_v51, 7  ;;  %v17210_v36 = vrot.slane %v12712_v39, 6 }
 0x3c3   : > { %v4476_v60 = vsel %vm17198_vm8, %v4428_v58, %v4396_v11  ;;  %vm17199_vm6 = vmmov %vm17197_vm1  ;;  %v4496_v11 = vsel %vm1990_vm7, %v4445_v52, -inf  ;;  %v12976_v52 = vmax.f32 %v4357_v27, %v4501_v32  ;;  %v4239_v32 = vrot.slane %v12589_v51, 2 }
 0x3c4   : > { %v4477_v46 = vsel %vm17199_vm6, %v4429_v18, %v4397_v40  ;;  %vm17200_vm15 = vmmov %vm17197_vm1  ;;  %v4494_v62 = vsel %vm17201_vm14, %v4476_v60, -inf  ;;  %v4499_v40 = vsel %vm1990_vm7, %v4446_v12, -inf  ;;  %v12964_v18 = vmax.f32 %v4351_v19, %v4495_v7 }
 0x3c5   : > { %v4478_v25 = vsel %vm17200_vm15, %v4430_v59, %v4398_v37  ;;  %vm17202_vm9 = vmmov %vm17201_vm14  ;;  %v4542_v58 = vmax.f32 %v4350_v29, %v4494_v62  ;;  %v12966_v59 = vmax.f32 %v4352_v24, %v4496_v11  ;;  %v12972_v4 = vmax.f32 %v4355_v8, %v4499_v40 }
 0x3c6   : > { %v4497_v54 = vsel %vm17202_vm9, %v4477_v46, -inf  ;;  %vm17203_vm10 = vmmov %vm17202_vm9  ;;  %v4738_v12 = vmax.f32 %v4540_v31, %v12964_v18  ;;  %v3871_v29 = vsel %vm1138_vm0, %v3839_v53, %v17206_v43  ;;  %v17207_v24 = vrot.slane %v12712_v39, 7 }
 0x3c7   : > { %v4500_v37 = vsel %vm17203_vm10, %v4478_v25, -inf  ;;  %v12968_v48 = vmax.f32 %v4353_v57, %v4497_v54  ;;  %v4739_v50 = vmax.f32 %v4541_v17, %v12966_v59  ;;  %v3927_v26 = vsel %vm1370_vm11, %v3871_v29, -inf  ;;  %v7534_v29 = vld [vmem:[#allocation8 + $0x8] sm:$0xff]  }
 0x3c8   : > { %v12974_v9 = vmax.f32 %v4356_v14, %v4500_v37  ;;  %v3887_v57 = vsel %vm1138_vm0, %v17207_v24, %v3839_v53  ;;  %v4031_v8 = vrot.slane %v12715_v49, 6  ;;  %v4834_v14 = vmax.f32 %v4738_v12, %v12970_v61 }
 0x3c9   : > { %17204 = vst [vmem:[#allocation59_spill] sm:$0xff] %v12968_v48  ;;  %v4740_v19 = vmax.f32 %v4542_v58, %v12968_v48  ;;  %v4835_v27 = vmax.f32 %v4739_v50, %v12972_v4  ;;  %v3926_v23 = vsel %vm1369_vm13, %v3887_v57, -inf  ;;  %v3975_v60 = vmax.f32 %v12589_v51, %v3927_v26  ;;  %v17212_v50 = vld [vmem:[#allocation39_spill] sm:$0xff] }
 0x3ca   : > { %17205 = vst [vmem:[#allocation77_spill] sm:$0xff] %v12974_v9  ;;  %v3974_v25 = vmax.f32 %v12715_v49, %v3926_v23  ;;  %v17208_v53 = vrot.slane %v12589_v51, 6  ;;  %vm17209_vm1 = vcmp.lt.s32.totalorder %v8391_v2, 2  ;;  %v13008_v7 = vmax.f32 %v4834_v14, %v12976_v52 }
 0x3cb   : > { %v4836_v46 = vmax.f32 %v4740_v19, %v12974_v9  ;;  %vm17211_vm8 = vmmov %vm17209_vm1  ;;  %v5116_v11 = vpack.c.bf16 %v4835_v27, %v4834_v14  ;;  %v4431_v31 = vrot.slane %v12589_v51, 1  ;;  %v5071_v58 = vpack.c.bf16 %v10838_v28, %v16772_v38 }
 0x3cc   : > { %v4063_v34 = vsel %vm17209_vm1, %v4031_v8, %v17208_v53  ;;  %v4079_v62 = vsel %vm17211_vm8, %v17210_v36, %v4031_v8  ;;  %v5096_v12 = vpack.c.bf16 %v12712_v39, %v12649_v56  ;;  %v2610_v43 = vrot.slane %v17212_v50, 7 }
 0x3cd   : > { %v4118_v54 = vsel %vm1576_vm3, %v4079_v62, -inf  ;;  %v4119_v55 = vsel %vm1577_vm2, %v4063_v34, -inf  ;;  %v5117_v17 = vpack.c.bf16 %v13008_v7, %v4836_v46  ;;  %7261 = vmatprep.mubr.bf16.mxu0 %v5116_v11  ;;  %vm17213_vm6 = vcmp.lt.s32.totalorder %v8391_v2, 6  ;;  %5389 = vmatmul.mubr.bf16.gmra.mrb[44].mxu1 %v5071_v58 }
 0x3ce   : > { %v4166_v40 = vmax.f32 %v3974_v25, %v4118_v54  ;;  %v4167_v37 = vmax.f32 %v3975_v60, %v4119_v55  ;;  %v4255_v19 = vsel %vm17213_vm6, %v4223_v1, %v4239_v32  ;;  %vm17214_vm15 = vmmov %vm17213_vm6  ;;  %vm17215_vm14 = vcmp.lt.s32.totalorder %v8391_v2, 7  ;;  %5396 = vmatprep.mubr.bf16.mxu1 %v5096_v12  ;;  %v17223_v25 = vld [vmem:[#allocation114_spill] sm:$0xff] }
 0x3cf   : > { %v4287_v24 = vsel %vm17214_vm15, %v4239_v32, %v4207_v41  ;;  %v4447_v28 = vsel %vm17215_vm14, %v4415_v6, %v4431_v31  ;;  %vm17216_vm9 = vmmov %vm17215_vm14  ;;  %7262 = vmatmul.mubr.bf16.vlgmr.msra.gmra.mrb[16].mxu0 %v5117_v17  ;;  %vm17217_vm10 = vcmp.eq.s32.totalorder %v16816_v42, 1  ;;  %vm17218_vm1 = vcmp.eq.s32.totalorder %v9849_v47, 1  ;;  %v7927_v6 = vld [vmem:[#allocation8] sm:$0xff]  }
 0x3d0   : > { %v4479_v38 = vsel %vm17216_vm9, %v4431_v31, %v4399_v13  ;;  %v4310_v56 = vsel %vm17217_vm10, %v4255_v19, -inf  ;;  %v4311_v1 = vsel %vm17218_vm1, %v4287_v24, -inf  ;;  %v4502_v41 = vsel %vm1990_vm7, %v4447_v28, -inf  ;;  %7310 = vmatpush3.bf16.msra.mxu0 %v7927_v6  ;;  %v17220_v13 = vld [vmem:[#allocation47_spill] sm:$0xff] }
 0x3d1   : > { %vm17219_vm8 = vcmp.eq.s32.totalorder %v10279_v30, 1  ;;  %v4358_v39 = vmax.f32 %v4166_v40, %v4310_v56  ;;  %v4359_v26 = vmax.f32 %v4167_v37, %v4311_v1  ;;  %v17221_v8 = vrot.slane %v17220_v13, 7  ;;  %7311 = vmatprep.subr.bf16.mxu0 %v7534_v29  ;;  %v7535_v37 = vld [vmem:[#allocation8 + $0x10] sm:$0xff]  }
 0x3d2   : > { %v4503_v57 = vsel %vm17219_vm8, %v4479_v38, -inf  ;;  %v2802_v23 = vrot.slane %v17212_v50, 6  ;;  %v17224_v53 = vrot.slane %v17223_v25, 7  ;;  %v17226_v54 = vrot.slane %v17220_v13, 6 }
 0x3d3   : > { %v2626_v14 = vsel %vm1138_vm0, %v17221_v8, %v2610_v43  ;;  %v17222_v60 = vmov %v17221_v8  ;;  %v17227_v55 = vrot.slane %v17223_v25, 6  ;;  %vm17228_vm6 = vcmp.lt.s32.totalorder %v8391_v2, 2 }
 0x3d4   : > { %v2642_v34 = vsel %vm1138_vm0, %v17224_v53, %v17222_v60  ;;  %v17225_v36 = vmov %v17224_v53  ;;  %v2688_v11 = vsel %vm1370_vm11, %v2626_v14, -inf  ;;  %v13069_v32 = vmax.f32 %v4358_v39, %v4502_v41  ;;  %vm17233_vm14 = vmmov %vm17228_vm6  ;;  %7312 = vmatpush3.bf16.msra.mxu0 %v7534_v29 }
 0x3d5   : > { %v2658_v62 = vsel %vm1138_vm0, %v2610_v43, %v17225_v36  ;;  %v2834_v40 = vsel %vm17228_vm6, %v17227_v55, %v17226_v54  ;;  %v13071_v31 = vmax.f32 %v4359_v26, %v4503_v57  ;;  %vm17231_vm15 = vcmp.eq.s32.totalorder %v8855_v44, 1  ;;  %vm17235_vm9 = vmmov %vm17228_vm6  ;;  %7313 = vmatprep.subr.bf16.mxu0 %v7535_v37 }
 0x3d6   : > { %17229 = vst [vmem:[#allocation91_spill] sm:$0xff] %v13069_v32  ;;  %v2686_v17 = vsel %vm17231_vm15, %v2658_v62, -inf  ;;  %v2687_v58 = vsel %vm1369_vm13, %v2642_v34, -inf  ;;  %v2736_v19 = vmax.f32 %v17212_v50, %v2688_v11  ;;  %v17232_v24 = vmov %v17226_v54 }
 0x3d7   : > { %17230 = vst [vmem:[#allocation97_spill] sm:$0xff] %v13071_v31  ;;  %v2734_v12 = vmax.f32 %v17223_v25, %v2686_v17  ;;  %v2735_v43 = vmax.f32 %v17220_v13, %v2687_v58  ;;  %v2818_v28 = vsel %vm17233_vm14, %v17232_v24, %v2802_v23  ;;  %v13085_v38 = vmax.f32 %v4835_v27, %v13069_v32 }
 0x3d8   : > { %v13088_v56 = vmax.f32 %v4836_v46, %v13071_v31  ;;  %v17234_v1 = vmov %v17227_v55  ;;  %v2879_v57 = vsel %vm1576_vm3, %v2834_v40, -inf  ;;  %v2880_v39 = vsel %vm1577_vm2, %v2818_v28, -inf  ;;  %7314 = vmatpush3.bf16.msra.mxu0 %v7535_v37 }
 0x3d9   : > { %v2850_v41 = vsel %vm17235_vm9, %v2802_v23, %v17234_v1  ;;  %v2927_v27 = vmax.f32 %v2735_v43, %v2879_v57  ;;  %v2962_v26 = vrot.slane %v17223_v25, 2  ;;  %v2928_v14 = vmax.f32 %v2736_v19, %v2880_v39 }
 0x3da   : > { %v2878_v6 = vsel %vm1575_vm12, %v2850_v41, -inf  ;;  %v5118_v46 = vpack.c.bf16 %v13088_v56, %v13085_v38  ;;  %v2994_v23 = vrot.slane %v17212_v50, 2  ;;  %v17236_v60 = vrot.slane %v17220_v13, 2 }
 0x3db   : > { %v2926_v8 = vmax.f32 %v2734_v12, %v2878_v6  ;;  %vm17237_vm10 = vcmp.lt.s32.totalorder %v8391_v2, 6  ;;  %v3154_v53 = vrot.slane %v17223_v25, 1  ;;  %v3170_v34 = vrot.slane %v17220_v13, 1  ;;  %v17248_v6 = vld [vmem:[#allocation86_spill] sm:$0xff] }
 0x3dc   : > { %v3026_v29 = vsel %vm17237_vm10, %v2962_v26, %v17236_v60  ;;  %v3186_v36 = vrot.slane %v17212_v50, 1  ;;  %7265 = vmatprep.mubr.bf16.mxu0 %v5118_v46  ;;  %v17238_v62 = vmov %v17236_v60  ;;  %vm17239_vm1 = vmmov %vm17237_vm10  ;;  %v17241_v40 = vmax.f32 %v12275_v0, %v12279_v63  ;;  %v17251_v60 = vld [vmem:[#allocation99_spill] sm:$0xff] }
 0x3dd   : > { %v3010_v11 = vsel %vm17239_vm1, %v17238_v62, %v2994_v23  ;;  %vm17240_vm8 = vmmov %vm17239_vm1  ;;  %v3070_v55 = vsel %vm1782_vm4, %v3026_v29, -inf  ;;  %vm17242_vm6 = vcmp.eq.s32.totalorder %v16816_v42, 1  ;;  %vm17243_vm15 = vcmp.eq.s32.totalorder %v9849_v47, 1 }
 0x3de   : > { %v3042_v54 = vsel %vm17240_vm8, %v2994_v23, %v2962_v26  ;;  %v3592_v17 = vmax.f32 %v17241_v40, %v12672_v33  ;;  %v3071_v58 = vsel %vm17242_vm6, %v3010_v11, -inf  ;;  %v3118_v43 = vmax.f32 %v2926_v8, %v3070_v55  ;;  %v17256_v11 = vld [vmem:[#allocation115_spill] sm:$0xff] }
 0x3df   : > { %v3072_v12 = vsel %vm17243_vm15, %v3042_v54, -inf  ;;  %vm17244_vm14 = vcmp.lt.s32.totalorder %v8391_v2, 7  ;;  %v3119_v24 = vmax.f32 %v2927_v27, %v3071_v58  ;;  %vm17247_vm1 = vcmp.eq.s32.totalorder %v10279_v30, 1  ;;  %v17260_v40 = vld [vmem:[#allocation79_spill] sm:$0xff] }
 0x3e0   : > { %v3202_v19 = vsel %vm17244_vm14, %v3170_v34, %v3186_v36  ;;  %v3120_v28 = vmax.f32 %v2928_v14, %v3072_v12  ;;  %vm17245_vm9 = vmmov %vm17244_vm14  ;;  %v17249_v39 = vmax.f32 %v12277_v35, %v17248_v6  ;;  %v17250_v14 = vld [vmem:[#allocation48_spill] sm:$0xff]  ;;  %vm17253_vm8 = vcmp.eq.s32.totalorder %v8855_v44, 1 }
 0x3e1   : > { %v3218_v1 = vsel %vm17245_vm9, %v3154_v53, %v3170_v34  ;;  %vm17246_vm10 = vmmov %vm17245_vm9  ;;  %v3263_v41 = vsel %vm1990_vm7, %v3202_v19, -inf  ;;  %v3688_v23 = vmax.f32 %v3592_v17, %v17250_v14  ;;  %v17257_v54 = vrot.slane %v17256_v11, 6  ;;  %v17264_v19 = vld [vmem:[#allocation75_spill] sm:$0xff] }
 0x3e2   : > { %v3234_v0 = vsel %vm17246_vm10, %v3186_v36, %v3154_v53  ;;  %v3262_v37 = vsel %vm1989_vm5, %v3218_v1, -inf  ;;  %v3593_v27 = vmax.f32 %v17249_v39, %v12674_v3  ;;  %v13145_v46 = vmax.f32 %v3119_v24, %v3263_v41  ;;  %v17252_v53 = vld [vmem:[#allocation98_spill] sm:$0xff]  ;;  %v17254_v36 = vld [vmem:[#allocation73_spill] sm:$0xff] }
 0x3e3   : > { %v3264_v57 = vsel %vm17247_vm1, %v3234_v0, -inf  ;;  %v13143_v26 = vmax.f32 %v3118_v43, %v3262_v37  ;;  %v2689_v34 = vsel %vm17253_vm8, %v17252_v53, -inf  ;;  %v17255_v62 = vrot.slane %v17254_v36, 6  ;;  %v17263_v43 = vld [vmem:[#allocation32_spill] sm:$0xff]  ;;  %vm17274_vm1 = vmmov %vm17253_vm8 }
 0x3e4   : > { %v13147_v8 = vmax.f32 %v3120_v28, %v3264_v57  ;;  %v3689_v29 = vmax.f32 %v3593_v27, %v17251_v60  ;;  %vm17258_vm6 = vcmp.lt.s32.totalorder %v8391_v2, 2  ;;  %v17259_v55 = vmov %v17257_v54 }
 0x3e5   : > { %v2835_v35 = vsel %vm17258_vm6, %v17257_v54, %v17255_v62  ;;  %v17261_v58 = vrot.slane %v17260_v40, 6  ;;  %vm17262_vm15 = vmmov %vm17258_vm6  ;;  %v13167_v12 = vmax.f32 %v3688_v23, %v13143_v26  ;;  %v17265_v24 = vmax.f32 %v17263_v43, %v17264_v19 }
 0x3e6   : > { %v2737_v1 = vmax.f32 %v17256_v11, %v2689_v34  ;;  %v13179_v37 = vmax.f32 %v3689_v29, %v13145_v46  ;;  %v2882_v41 = vsel %vm1576_vm3, %v2835_v35, -inf  ;;  %v17267_v57 = vrot.slane %v17260_v40, 2  ;;  %vm17273_vm10 = vmmov %vm17258_vm6 }
 0x3e7   : > { %v2851_v17 = vsel %vm17262_vm15, %v17261_v58, %v17259_v55  ;;  %v13173_v28 = vmax.f32 %v17265_v24, %v13147_v8  ;;  %v17268_v39 = vrot.slane %v17254_v36, 2  ;;  %vm17269_vm14 = vcmp.lt.s32.totalorder %v8391_v2, 6  ;;  %vm17275_vm8 = vmmov %vm17258_vm6 }
 0x3e8   : > { %v2881_v0 = vsel %vm1575_vm12, %v2851_v17, -inf  ;;  %v17271_v53 = vrot.slane %v17256_v11, 2  ;;  %vm17272_vm9 = vmmov %vm17269_vm14  ;;  %v3824_v29 = vrot.slane %v13167_v12, 7  ;;  %v4016_v54 = vrot.slane %v13167_v12, 6 }
 0x3e9   : > { %17266 = vst [vmem:[#allocation108_spill] sm:$0xff] %v13173_v28  ;;  %v3011_v27 = vsel %vm17269_vm14, %v17268_v39, %v17267_v57  ;;  %v17270_v23 = vmov %v17268_v39  ;;  %v16083_v62 = vrot.slane %v13173_v28, 7  ;;  %v16085_v35 = vrot.slane %v13173_v28, 6  ;;  %vm17276_vm6 = vmmov %vm17272_vm9 }
 0x3ea   : > { %v3027_v34 = vsel %vm17272_vm9, %v17271_v53, %v17270_v23  ;;  %v3840_v55 = vrot.slane %v13179_v37, 7  ;;  %v4032_v58 = vrot.slane %v13179_v37, 6  ;;  %v4208_v17 = vrot.slane %v13167_v12, 2  ;;  %vm17277_vm15 = vmmov %vm17276_vm6 }
 0x3eb   : > { %v4224_v43 = vrot.slane %v13179_v37, 2  ;;  %v3904_v24 = vsel %vm1138_vm0, %v16083_v62, %v3824_v29  ;;  %v4096_v57 = vsel %vm17273_vm10, %v16085_v35, %v4016_v54  ;;  %v4240_v39 = vrot.slane %v13173_v28, 2 }
 0x3ec   : > { %v3888_v53 = vsel %vm1138_vm0, %v3824_v29, %v3840_v55  ;;  %v3928_v50 = vsel %vm17274_vm1, %v3904_v24, -inf  ;;  %v4080_v13 = vsel %vm17275_vm8, %v4016_v54, %v4032_v58  ;;  %v4120_v62 = vsel %vm1575_vm12, %v4096_v57, -inf }
 0x3ed   : > { %v3929_v25 = vsel %vm1369_vm13, %v3888_v53, -inf  ;;  %v3976_v35 = vmax.f32 %v13167_v12, %v3928_v50  ;;  %v4121_v23 = vsel %vm1576_vm3, %v4080_v13, -inf  ;;  %v4256_v29 = vsel %vm17276_vm6, %v4224_v43, %v4240_v39 }
 0x3ee   : > { %v3977_v31 = vmax.f32 %v13179_v37, %v3929_v25  ;;  %v4272_v24 = vsel %vm17277_vm15, %v4208_v17, %v4224_v43  ;;  %vm17278_vm14 = vcmp.eq.s32.totalorder %v16816_v42, 1  ;;  %v4416_v57 = vrot.slane %v13179_v37, 1  ;;  %v17281_v43 = vld [vmem:[#allocation51_spill] sm:$0xff] }
 0x3ef   : > { %v4313_v54 = vsel %vm17278_vm14, %v4256_v29, -inf  ;;  %v4168_v32 = vmax.f32 %v3976_v35, %v4120_v62  ;;  %v4312_v50 = vsel %vm1782_vm4, %v4272_v24, -inf  ;;  %v4432_v53 = vrot.slane %v13173_v28, 1  ;;  %vm17284_vm1 = vmmov %vm17278_vm14 }
 0x3f0   : > { %v2929_v13 = vmax.f32 %v2737_v1, %v2881_v0  ;;  %v4169_v48 = vmax.f32 %v3977_v31, %v4121_v23  ;;  %v17279_v9 = vrot.slane %v13167_v12, 1  ;;  %vm17280_vm9 = vcmp.lt.s32.totalorder %v8391_v2, 7 }
 0x3f1   : > { %v17282_v22 = vmax.f32 %v17254_v36, %v17281_v43  ;;  %v3073_v29 = vsel %vm1782_vm4, %v3027_v34, -inf  ;;  %v4360_v62 = vmax.f32 %v4168_v32, %v4312_v50  ;;  %vm17283_vm10 = vmmov %vm17280_vm9  ;;  %v3074_v31 = vsel %vm17284_vm1, %v3011_v27, -inf  ;;  %v17290_v43 = vld [vmem:[#allocation117_spill] sm:$0xff] }
 0x3f2   : > { %v4464_v25 = vsel %vm17280_vm9, %v17279_v9, %v4416_v57  ;;  %v4448_v35 = vsel %vm17283_vm10, %v4416_v57, %v4432_v53  ;;  %v4361_v0 = vmax.f32 %v4169_v48, %v4313_v54  ;;  %v3121_v23 = vmax.f32 %v2929_v13, %v3073_v29  ;;  %vm17287_vm8 = vmmov %vm17280_vm9  ;;  %v17291_v29 = vld [vmem:[#allocation111_spill] sm:$0xff] }
 0x3f3   : > { %v2930_v15 = vmax.f32 %v17282_v22, %v2882_v41  ;;  %v4504_v1 = vsel %vm1989_vm5, %v4464_v25, -inf  ;;  %v4505_v9 = vsel %vm1990_vm7, %v4448_v35, -inf  ;;  %v7536_v22 = vld [vmem:[#allocation8 + $0x18] sm:$0xff]   ;;  %v3155_v32 = vrot.slane %v17256_v11, 1  ;;  %vm17294_vm6 = vmmov %vm17287_vm8 }
 0x3f4   : > { %v13254_v41 = vmax.f32 %v4360_v62, %v4504_v1  ;;  %v17285_v34 = vrot.slane %v17260_v40, 1  ;;  %v17286_v57 = vrot.slane %v17254_v36, 1  ;;  %v17288_v48 = vmax.f32 %v12279_v63, %v12672_v33  ;;  %7315 = vmatprep.subr.bf16.mxu0 %v7536_v22  ;;  %vm17296_vm15 = vmmov %vm17294_vm6  ;;  %v17317_v40 = vld [vmem:[#allocation113_spill] sm:$0xff] }
 0x3f5   : > { %v3122_v24 = vmax.f32 %v2930_v15, %v3074_v31  ;;  %v13267_v54 = vmax.f32 %v4361_v0, %v4505_v9  ;;  %v17289_v13 = vmax.f32 %v17248_v6, %v12674_v3  ;;  %v17292_v62 = vmax.f32 %v17290_v43, %v17291_v29  ;;  %7316 = vmatpush3.bf16.msra.mxu0 %v7536_v22  ;;  %v17299_v43 = vld [vmem:[#allocation50_spill] sm:$0xff] }
 0x3f6   : > { %v3203_v50 = vsel %vm17287_vm8, %v17286_v57, %v17285_v34  ;;  %v3595_v27 = vmax.f32 %v17288_v48, %v17250_v14  ;;  %v5026_v63 = vmax.f32 %v13008_v7, %v13254_v41  ;;  %v17293_v1 = vmov %v17286_v57  ;;  %vm17310_vm8 = vmmov %vm17294_vm6 }
 0x3f7   : > { %v3266_v15 = vsel %vm1990_vm7, %v3203_v50, -inf  ;;  %v3596_v25 = vmax.f32 %v17289_v13, %v17251_v60  ;;  %v3597_v35 = vmax.f32 %v17292_v62, %v17264_v19  ;;  %v3219_v31 = vsel %vm17294_vm6, %v3155_v32, %v17293_v1  ;;  %v17298_v13 = vld [vmem:[#allocation88_spill] sm:$0xff] }
 0x3f8   : > { %v17295_v0 = vmov %v17285_v34  ;;  %v13289_v9 = vmax.f32 %v3122_v24, %v3266_v15  ;;  %v5027_v34 = vmax.f32 %v13085_v38, %v13267_v54  ;;  %v3265_v57 = vsel %vm1989_vm5, %v3219_v31, -inf }
 0x3f9   : > { %v3235_v6 = vsel %vm17296_vm15, %v17295_v0, %v3155_v32  ;;  %vm17297_vm14 = vcmp.eq.s32.totalorder %v10279_v30, 1  ;;  %v3691_v50 = vmax.f32 %v3595_v27, %v13143_v26  ;;  %v13298_v48 = vmax.f32 %v3121_v23, %v3265_v57 }
 0x3fa   : > { %v3267_v7 = vsel %vm17297_vm14, %v3235_v6, -inf  ;;  %v17300_v62 = vmax.f32 %v17298_v13, %v17299_v43  ;;  %v3692_v24 = vmax.f32 %v3596_v25, %v13145_v46  ;;  %v3693_v22 = vmax.f32 %v3597_v35, %v13147_v8  ;;  %vm17312_vm15 = vmmov %vm17297_vm14 }
 0x3fb   : > { %v5119_v38 = vpack.c.bf16 %v5027_v34, %v5026_v63  ;;  %v17301_v15 = vrot.slane %v13173_v28, 7  ;;  %v17302_v31 = vrot.slane %v13173_v28, 6  ;;  %vm17303_vm9 = vcmp.lt.s32.totalorder %v8391_v2, 2 }
 0x3fc   : > { %v13303_v32 = vmax.f32 %v17300_v62, %v3267_v7  ;;  %vm17304_vm10 = vcmp.lt.s32.totalorder %v8391_v2, 6  ;;  %v13318_v0 = vmax.f32 %v3691_v50, %v13298_v48  ;;  %v13321_v25 = vmax.f32 %v3692_v24, %v13289_v9  ;;  %vm17311_vm6 = vmmov %vm17303_vm9 }
 0x3fd   : > { %v3872_v1 = vsel %vm1138_vm0, %v3840_v55, %v17301_v15  ;;  %v4064_v23 = vsel %vm17303_vm9, %v4032_v58, %v17302_v31  ;;  %v4288_v27 = vsel %vm17304_vm10, %v4240_v39, %v4208_v17  ;;  %7266 = vmatmul.mubr.bf16.gmra.mrb[20].mxu0 %v5119_v38  ;;  %vm17308_vm1 = vcmp.eq.s32.totalorder %v9849_v47, 1  ;;  %vm17314_vm9 = vmmov %vm17304_vm10 }
 0x3fe   : > { %17305 = vst [vmem:[#allocation26_spill] sm:$0xff] %v13318_v0  ;;  %17306 = vst [vmem:[#allocation16_spill] sm:$0xff] %v13321_v25  ;;  %v13324_v35 = vmax.f32 %v3693_v22, %v13303_v32  ;;  %v3930_v55 = vsel %vm1370_vm11, %v3872_v1, -inf  ;;  %v4122_v58 = vsel %vm1577_vm2, %v4064_v23, -inf  ;;  %v4314_v17 = vsel %vm17308_vm1, %v4288_v27, -inf }
 0x3ff   : > { %v3978_v63 = vmax.f32 %v13173_v28, %v3930_v55  ;;  %v17309_v39 = vrot.slane %v13167_v12, 1  ;;  %v3825_v34 = vrot.slane %v13318_v0, 7  ;;  %v4017_v7 = vrot.slane %v13318_v0, 6  ;;  %vm17315_vm10 = vmmov %vm17310_vm8 }
 0x400   : > { %17307 = vst [vmem:[#allocation86_spill] sm:$0xff] %v13324_v35  ;;  %v3857_v57 = vrot.slane %v13324_v35, 7  ;;  %v4049_v50 = vrot.slane %v13324_v35, 6  ;;  %v4209_v43 = vrot.slane %v13318_v0, 2  ;;  %v4225_v62 = vrot.slane %v13321_v25, 2  ;;  %vm17319_vm1 = vmmov %vm17311_vm6 }
 0x401   : > { %v4480_v6 = vsel %vm17310_vm8, %v4432_v53, %v17309_v39  ;;  %v4170_v13 = vmax.f32 %v3978_v63, %v4122_v58  ;;  %v4401_v24 = vrot.slane %v13318_v0, 1  ;;  %v4417_v38 = vrot.slane %v13321_v25, 1  ;;  %vm17320_vm8 = vmmov %vm17319_vm1 }
 0x402   : > { %v3905_v22 = vsel %vm1138_vm0, %v3857_v57, %v3825_v34  ;;  %v4097_v53 = vsel %vm17311_vm6, %v4049_v50, %v4017_v7  ;;  %v4506_v15 = vsel %vm17312_vm15, %v4480_v6, -inf  ;;  %vm17313_vm14 = vcmp.eq.s32.totalorder %v8855_v44, 1  ;;  %vm17322_vm6 = vmmov %vm17314_vm9 }
 0x403   : > { %v3931_v1 = vsel %vm17313_vm14, %v3905_v22, -inf  ;;  %v4123_v31 = vsel %vm1575_vm12, %v4097_v53, -inf  ;;  %v4273_v23 = vsel %vm17314_vm9, %v4209_v43, %v4225_v62  ;;  %v4362_v27 = vmax.f32 %v4170_v13, %v4314_v17  ;;  %v17316_v53 = vld [vmem:[#allocation100_spill] sm:$0xff]  ;;  %vm17323_vm15 = vmmov %vm17322_vm6 }
 0x404   : > { %v3979_v55 = vmax.f32 %v13318_v0, %v3931_v1  ;;  %v4315_v63 = vsel %vm1782_vm4, %v4273_v23, -inf  ;;  %v4465_v58 = vsel %vm17315_vm10, %v4401_v24, %v4417_v38  ;;  %v4741_v39 = vmax.f32 %v12964_v18, %v12970_v61  ;;  %vm17324_vm14 = vmmov %vm17315_vm10 }
 0x405   : > { %v4507_v6 = vsel %vm1989_vm5, %v4465_v58, -inf  ;;  %v13366_v22 = vmax.f32 %v4362_v27, %v4506_v15  ;;  %v5072_v36 = vpack.c.bf16 %v17317_v40, %v17316_v53  ;;  %v5097_v17 = vpack.c.bf16 %v12589_v51, %v12715_v49 }
 0x406   : > { %v4171_v13 = vmax.f32 %v3979_v55, %v4123_v31  ;;  %v4837_v1 = vmax.f32 %v4741_v39, %v12976_v52  ;;  %v3841_v23 = vrot.slane %v13321_v25, 7  ;;  %v4033_v11 = vrot.slane %v13321_v25, 6 }
 0x407   : > { %v5028_v18 = vmax.f32 %v13088_v56, %v13366_v22  ;;  %5397 = vmatmul.mubr.bf16.gmra.mrb[48].mxu1 %v5072_v36  ;;  %v4241_v15 = vrot.slane %v13324_v35, 2  ;;  %v4433_v27 = vrot.slane %v13324_v35, 1  ;;  %v4742_v40 = vmax.f32 %v12966_v59, %v12972_v4 }
 0x408   : > { %v4363_v58 = vmax.f32 %v4171_v13, %v4315_v63  ;;  %v4933_v51 = vmax.f32 %v4837_v1, %v13254_v41  ;;  %5404 = vmatprep.mubr.bf16.mxu1 %v5097_v17  ;;  %v3873_v49 = vsel %vm1138_vm0, %v3841_v23, %v3857_v57  ;;  %v3889_v31 = vsel %vm1138_vm0, %v3825_v34, %v3841_v23 }
 0x409   : > { %v3932_v56 = vsel %vm1369_vm13, %v3889_v31, -inf  ;;  %v3933_v36 = vsel %vm1370_vm11, %v3873_v49, -inf  ;;  %v4065_v39 = vsel %vm17319_vm1, %v4033_v11, %v4049_v50  ;;  %v4081_v59 = vsel %vm17320_vm8, %v4017_v7, %v4033_v11  ;;  %vm17327_vm1 = vmmov %vm17324_vm14 }
 0x40a   : > { %v13394_v63 = vmax.f32 %v4363_v58, %v4507_v6  ;;  %v3980_v53 = vmax.f32 %v13321_v25, %v3932_v56  ;;  %v3981_v57 = vmax.f32 %v13324_v35, %v3933_v36  ;;  %v4124_v34 = vsel %vm1576_vm3, %v4081_v59, -inf  ;;  %v17331_v59 = vld [vmem:[#allocation91_spill] sm:$0xff] }
 0x40b   : > { %v4125_v13 = vsel %vm1577_vm2, %v4065_v39, -inf  ;;  %v4257_v1 = vsel %vm17322_vm6, %v4225_v62, %v4241_v15  ;;  %v4289_v50 = vsel %vm17323_vm15, %v4241_v15, %v4209_v43  ;;  %v4449_v11 = vsel %vm17324_vm14, %v4417_v38, %v4433_v27  ;;  %v17328_v43 = vld [vmem:[#allocation77_spill] sm:$0xff]  ;;  %v17329_v15 = vld [vmem:[#allocation59_spill] sm:$0xff] }
 0x40c   : > { %v5029_v7 = vmax.f32 %v4933_v51, %v13394_v63  ;;  %v4172_v6 = vmax.f32 %v3980_v53, %v4124_v34  ;;  %v4173_v23 = vmax.f32 %v3981_v57, %v4125_v13  ;;  %vm17325_vm9 = vcmp.eq.s32.totalorder %v16816_v42, 1  ;;  %v17332_v57 = vld [vmem:[#allocation97_spill] sm:$0xff]  ;;  %v17333_v13 = vld [vmem:[#allocation92_spill] sm:$0xff] }
 0x40d   : > { %v4316_v58 = vsel %vm17325_vm9, %v4257_v1, -inf  ;;  %vm17326_vm10 = vcmp.eq.s32.totalorder %v9849_v47, 1  ;;  %v4481_v31 = vsel %vm17327_vm1, %v4433_v27, %v4401_v24  ;;  %v4508_v62 = vsel %vm1990_vm7, %v4449_v11, -inf  ;;  %v17335_v27 = vld [vmem:[#allocation103_spill] sm:$0xff] }
 0x40e   : > { %v4317_v49 = vsel %vm17326_vm10, %v4289_v50, -inf  ;;  %v4743_v56 = vmax.f32 %v17329_v15, %v17328_v43  ;;  %v5120_v38 = vpack.c.bf16 %v5029_v7, %v5028_v18  ;;  %v4364_v36 = vmax.f32 %v4172_v6, %v4316_v58  ;;  %v17337_v50 = vld [vmem:[#allocation82_spill] sm:$0xff]  ;;  %v17342_v58 = vld [vmem:[#allocation25_spill] sm:$0xff] }
 0x40f   : > { %v4365_v51 = vmax.f32 %v4173_v23, %v4317_v49  ;;  %vm17330_vm8 = vcmp.eq.s32.totalorder %v10279_v30, 1  ;;  %v4838_v53 = vmax.f32 %v4742_v40, %v17331_v59  ;;  %vm17334_vm6 = vcmp.eq.s32.totalorder %v8855_v44, 1 }
 0x410   : > { %v4509_v39 = vsel %vm17330_vm8, %v4481_v31, -inf  ;;  %v4839_v34 = vmax.f32 %v4743_v56, %v17332_v57  ;;  %v2692_v24 = vsel %vm17334_vm6, %v17333_v13, -inf  ;;  %v17336_v1 = vrot.slane %v17335_v27, 6  ;;  %7269 = vmatprep.mubr.bf16.mxu0 %v5120_v38 }
 0x411   : > { %v17338_v11 = vrot.slane %v17337_v50, 6  ;;  %vm17339_vm15 = vcmp.lt.s32.totalorder %v8391_v2, 2  ;;  %v13432_v7 = vmax.f32 %v4364_v36, %v4508_v62  ;;  %v13434_v6 = vmax.f32 %v4365_v51, %v4509_v39  ;;  %v17345_v51 = vld [vmem:[#allocation106_spill] sm:$0xff] }
 0x412   : > { %v2740_v40 = vmax.f32 %v17337_v50, %v2692_v24  ;;  %v17343_v49 = vrot.slane %v17342_v58, 6  ;;  %vm17344_vm14 = vmmov %vm17339_vm15  ;;  %v4934_v15 = vmax.f32 %v4838_v53, %v13267_v54  ;;  %v4935_v56 = vmax.f32 %v4839_v34, %v13366_v22 }
 0x413   : > { %v2836_v18 = vsel %vm17339_vm15, %v17338_v11, %v17336_v1  ;;  %17340 = vst [vmem:[#allocation48_spill] sm:$0xff] %v13432_v7  ;;  %v17341_v23 = vmov %v17338_v11  ;;  %v17346_v39 = vmax.f32 %v17335_v27, %v17345_v51  ;;  %v17347_v24 = vrot.slane %v17342_v58, 2 }
 0x414   : > { %v2852_v31 = vsel %vm17344_vm14, %v17343_v49, %v17341_v23  ;;  %v2885_v62 = vsel %vm1576_vm3, %v2836_v18, -inf  ;;  %v17348_v1 = vrot.slane %v17335_v27, 2  ;;  %vm17349_vm9 = vcmp.lt.s32.totalorder %v8391_v2, 6  ;;  %v7537_v18 = vld [vmem:[#allocation8 + $0x20] sm:$0xff]  }
 0x415   : > { %v2884_v38 = vsel %vm1575_vm12, %v2852_v31, -inf  ;;  %v2933_v13 = vmax.f32 %v17346_v39, %v2885_v62  ;;  %v17351_v11 = vrot.slane %v17337_v50, 2  ;;  %vm17352_vm10 = vmmov %vm17349_vm9  ;;  %v5031_v49 = vmax.f32 %v4935_v56, %v13434_v6  ;;  %7317 = vmatprep.subr.bf16.mxu0 %v7537_v18 }
 0x416   : > { %v2932_v36 = vmax.f32 %v2740_v40, %v2884_v38  ;;  %v3012_v53 = vsel %vm17349_vm9, %v17348_v1, %v17347_v24  ;;  %v17350_v34 = vmov %v17348_v1  ;;  %v5030_v40 = vmax.f32 %v4934_v15, %v13432_v7  ;;  %vm17355_vm1 = vmmov %vm17349_vm9  ;;  %7318 = vmatpush3.bf16.msra.mxu0 %v7537_v18 }
 0x417   : > { %v3028_v23 = vsel %vm17352_vm10, %v17351_v11, %v17350_v34  ;;  %v17353_v31 = vmov %v17351_v11  ;;  %v17354_v38 = vmov %v17347_v24  ;;  %vm17356_vm8 = vcmp.eq.s32.totalorder %v16816_v42, 1  ;;  %v17358_v11 = vld [vmem:[#allocation61_spill] sm:$0xff] }
 0x418   : > { %v3044_v62 = vsel %vm17355_vm1, %v17354_v38, %v17353_v31  ;;  %v3076_v51 = vsel %vm1782_vm4, %v3028_v23, -inf  ;;  %v3077_v39 = vsel %vm17356_vm8, %v3012_v53, -inf  ;;  %vm17357_vm6 = vcmp.eq.s32.totalorder %v9849_v47, 1 }
 0x419   : > { %v3078_v24 = vsel %vm17357_vm6, %v3044_v62, -inf  ;;  %v3124_v1 = vmax.f32 %v2932_v36, %v3076_v51  ;;  %v3156_v15 = vrot.slane %v17337_v50, 1  ;;  %v5121_v56 = vpack.c.bf16 %v5031_v49, %v5030_v40 }
 0x41a   : > { %v3125_v34 = vmax.f32 %v2933_v13, %v3077_v39  ;;  %v3126_v35 = vmax.f32 %v17358_v11, %v3078_v24  ;;  %v17359_v25 = vrot.slane %v17342_v58, 1  ;;  %v17360_v31 = vrot.slane %v17335_v27, 1 }
 0x41b   : > { %vm17361_vm15 = vcmp.lt.s32.totalorder %v8391_v2, 7  ;;  %v3504_v49 = vmax.f32 %v17291_v29, %v17264_v19  ;;  %7270 = vmatmul.mubr.bf16.gmra.mrb[24].mxu0 %v5121_v56  ;;  %vm17366_vm10 = vcmp.eq.s32.totalorder %v10279_v30, 1  ;;  %v17367_v51 = vmax.f32 %v12672_v33, %v17250_v14 }
 0x41c   : > { %v3204_v23 = vsel %vm17361_vm15, %v17360_v31, %v17359_v25  ;;  %v17362_v53 = vmov %v17360_v31  ;;  %vm17363_vm14 = vmmov %vm17361_vm15  ;;  %v17364_v38 = vmov %v17359_v25  ;;  %v17368_v29 = vmax.f32 %v12674_v3, %v17251_v60 }
 0x41d   : > { %v3220_v36 = vsel %vm17363_vm14, %v3156_v15, %v17362_v53  ;;  %vm17365_vm9 = vmmov %vm17363_vm14  ;;  %v3269_v40 = vsel %vm1990_vm7, %v3204_v23, -inf  ;;  %v3598_v39 = vmax.f32 %v17367_v51, %v13143_v26  ;;  %v3600_v11 = vmax.f32 %v3504_v49, %v13147_v8  ;;  %v17369_v23 = vld [vmem:[#allocation71_spill] sm:$0xff]  ;;  %v17373_v49 = vld [vmem:[#allocation101_spill] sm:$0xff] }
 0x41e   : > { %v3236_v13 = vsel %vm17365_vm9, %v17364_v38, %v3156_v15  ;;  %v3268_v25 = vsel %vm1989_vm5, %v3220_v36, -inf  ;;  %v13502_v62 = vmax.f32 %v3125_v34, %v3269_v40  ;;  %v3599_v56 = vmax.f32 %v17368_v29, %v13145_v46  ;;  %v17371_v38 = vld [vmem:[#allocation104_spill] sm:$0xff] }
 0x41f   : > { %v3270_v18 = vsel %vm17366_vm10, %v3236_v13, -inf  ;;  %v13508_v24 = vmax.f32 %v3124_v1, %v3268_v25  ;;  %v3694_v31 = vmax.f32 %v3598_v39, %v13298_v48  ;;  %v4744_v34 = vmax.f32 %v12970_v61, %v12976_v52  ;;  %v17370_v1 = vld [vmem:[#allocation54_spill] sm:$0xff] }
 0x420   : > { %v13510_v15 = vmax.f32 %v3126_v35, %v3270_v18  ;;  %v4745_v33 = vmax.f32 %v12972_v4, %v17331_v59  ;;  %v5073_v53 = vpack.c.bf16 %v17370_v1, %v17369_v23  ;;  %v3695_v35 = vmax.f32 %v3599_v56, %v13289_v9 }
 0x421   : > { %v3696_v36 = vmax.f32 %v3600_v11, %v13303_v32  ;;  %v5098_v3 = vpack.c.bf16 %v13179_v37, %v13167_v12  ;;  %v2696_v13 = vsel %vm1369_vm13, %v17371_v38, -inf  ;;  %v13532_v40 = vmax.f32 %v3694_v31, %v13508_v24  ;;  %v17377_v37 = vld [vmem:[#allocation78_spill] sm:$0xff]  ;;  %v17381_v11 = vld [vmem:[#allocation49_spill] sm:$0xff] }
 0x422   : > { %v4840_v61 = vmax.f32 %v4744_v34, %v13254_v41  ;;  %v4841_v4 = vmax.f32 %v4745_v33, %v13267_v54  ;;  %5405 = vmatmul.mubr.bf16.gmra.mrb[52].mxu1 %v5073_v53  ;;  %v2744_v25 = vmax.f32 %v17373_v49, %v2696_v13  ;;  %v13538_v18 = vmax.f32 %v3695_v35, %v13502_v62 }
 0x423   : > { %17372 = vst [vmem:[#allocation99_spill] sm:$0xff] %v13532_v40  ;;  %v13541_v51 = vmax.f32 %v3696_v36, %v13510_v15  ;;  %5412 = vmatprep.mubr.bf16.mxu1 %v5098_v3  ;;  %v17376_v12 = vrot.slane %v17373_v49, 6  ;;  %v17378_v39 = vrot.slane %v17377_v37, 6  ;;  %vm17379_vm1 = vcmp.lt.s32.totalorder %v8391_v2, 2 }
 0x424   : > { %17374 = vst [vmem:[#allocation98_spill] sm:$0xff] %v13538_v18  ;;  %v17382_v31 = vrot.slane %v17381_v11, 6  ;;  %vm17383_vm8 = vmmov %vm17379_vm1  ;;  %v3826_v33 = vrot.slane %v13532_v40, 7  ;;  %v4018_v23 = vrot.slane %v13532_v40, 6  ;;  %v16102_v35 = vrot.slane %v13538_v18, 7 }
 0x425   : > { %17375 = vst [vmem:[#allocation32_spill] sm:$0xff] %v13541_v51  ;;  %v2837_v29 = vsel %vm17379_vm1, %v17378_v39, %v17376_v12  ;;  %v17380_v56 = vmov %v17378_v39  ;;  %v16104_v36 = vrot.slane %v13541_v51, 7  ;;  %v16105_v3 = vrot.slane %v13538_v18, 6  ;;  %vm17384_vm6 = vmmov %vm17379_vm1 }
 0x426   : > { %v2853_v34 = vsel %vm17383_vm8, %v17382_v31, %v17380_v56  ;;  %v16107_v38 = vrot.slane %v13541_v51, 6  ;;  %v4226_v13 = vrot.slane %v13538_v18, 2  ;;  %v4418_v39 = vrot.slane %v13538_v18, 1  ;;  %vm17385_vm15 = vmmov %vm17379_vm1 }
 0x427   : > { %v4434_v56 = vrot.slane %v13541_v51, 1  ;;  %v3890_v31 = vsel %vm1138_vm0, %v3826_v33, %v16102_v35  ;;  %v3906_v53 = vsel %vm1138_vm0, %v16104_v36, %v3826_v33  ;;  %v4082_v1 = vsel %vm17384_vm6, %v4018_v23, %v16105_v3 }
 0x428   : > { %v4098_v12 = vsel %vm17385_vm15, %v16107_v38, %v4018_v23  ;;  %vm17386_vm14 = vcmp.eq.s32.totalorder %v8855_v44, 1  ;;  %v3935_v35 = vsel %vm1369_vm13, %v3890_v31, -inf  ;;  %v4127_v33 = vsel %vm1576_vm3, %v4082_v1, -inf }
 0x429   : > { %v3934_v58 = vsel %vm17386_vm14, %v3906_v53, -inf  ;;  %v4126_v27 = vsel %vm1575_vm12, %v4098_v12, -inf  ;;  %v3983_v3 = vmax.f32 %v13538_v18, %v3935_v35  ;;  %v17387_v50 = vrot.slane %v13541_v51, 2 }
 0x42a   : > { %v3982_v36 = vmax.f32 %v13532_v40, %v3934_v58  ;;  %vm17388_vm9 = vcmp.lt.s32.totalorder %v8391_v2, 6  ;;  %v17389_v53 = vrot.slane %v13532_v40, 2  ;;  %vm17391_vm1 = vcmp.eq.s32.totalorder %v16816_v42, 1 }
 0x42b   : > { %v4258_v23 = vsel %vm17388_vm9, %v4226_v13, %v17387_v50  ;;  %vm17390_vm10 = vmmov %vm17388_vm9  ;;  %vm17392_vm8 = vcmp.lt.s32.totalorder %v8391_v2, 7  ;;  %v17393_v35 = vrot.slane %v13532_v40, 1  ;;  %v4175_v0 = vmax.f32 %v3983_v3, %v4127_v33 }
 0x42c   : > { %v4274_v31 = vsel %vm17390_vm10, %v17389_v53, %v4226_v13  ;;  %v4319_v1 = vsel %vm17391_vm1, %v4258_v23, -inf  ;;  %v4450_v58 = vsel %vm17392_vm8, %v4418_v39, %v4434_v56  ;;  %vm17394_vm6 = vmmov %vm17392_vm8  ;;  %v4174_v50 = vmax.f32 %v3982_v36, %v4126_v27  ;;  %v17395_v27 = vld [vmem:[#allocation63_spill] sm:$0xff] }
 0x42d   : > { %v4318_v12 = vsel %vm1782_vm4, %v4274_v31, -inf  ;;  %v4466_v38 = vsel %vm17394_vm6, %v17393_v35, %v4418_v39  ;;  %v4511_v13 = vsel %vm1990_vm7, %v4450_v58, -inf  ;;  %v4936_v53 = vmax.f32 %v4840_v61, %v13394_v63  ;;  %vm17399_vm15 = vmmov %vm17388_vm9 }
 0x42e   : > { %v4510_v28 = vsel %vm1989_vm5, %v4466_v38, -inf  ;;  %v4937_v23 = vmax.f32 %v4841_v4, %v13432_v7  ;;  %v2887_v31 = vsel %vm1575_vm12, %v2853_v34, -inf  ;;  %v2888_v55 = vsel %vm1576_vm3, %v2837_v29, -inf  ;;  %vm17402_vm14 = vmmov %vm17388_vm9 }
 0x42f   : > { %v4366_v44 = vmax.f32 %v4174_v50, %v4318_v12  ;;  %v4367_v39 = vmax.f32 %v4175_v0, %v4319_v1  ;;  %v17396_v36 = vmax.f32 %v17377_v37, %v17395_v27  ;;  %v2936_v38 = vmax.f32 %v2744_v25, %v2888_v55  ;;  %v17403_v0 = vld [vmem:[#allocation96_spill] sm:$0xff]  ;;  %vm17406_vm10 = vmmov %vm17391_vm1 }
 0x430   : > { %v17397_v33 = vrot.slane %v17381_v11, 2  ;;  %v17398_v58 = vrot.slane %v17373_v49, 2  ;;  %v17401_v34 = vrot.slane %v17377_v37, 2  ;;  %vm17404_vm9 = vcmp.eq.s32.totalorder %v9849_v47, 1  ;;  %vm17409_vm1 = vmmov %vm17394_vm6 }
 0x431   : > { %v2935_v3 = vmax.f32 %v17396_v36, %v2887_v31  ;;  %v3081_v12 = vsel %vm17404_vm9, %v17403_v0, -inf  ;;  %v3173_v55 = vrot.slane %v17373_v49, 1  ;;  %v13640_v25 = vmax.f32 %v4366_v44, %v4510_v28  ;;  %v17407_v36 = vld [vmem:[#allocation89_spill] sm:$0xff]  ;;  %vm17411_vm8 = vmmov %vm17409_vm1 }
 0x432   : > { %v3013_v61 = vsel %vm17399_vm15, %v17398_v58, %v17397_v33  ;;  %v17400_v4 = vmov %v17398_v58  ;;  %v13642_v1 = vmax.f32 %v4367_v39, %v4511_v13  ;;  %v3129_v33 = vmax.f32 %v17407_v36, %v3081_v12  ;;  %vm17414_vm6 = vmmov %vm17409_vm1 }
 0x433   : > { %v3029_v29 = vsel %vm17402_vm14, %v17401_v34, %v17400_v4  ;;  %v3080_v50 = vsel %vm17406_vm10, %v3013_v61, -inf  ;;  %v17408_v58 = vrot.slane %v17381_v11, 1  ;;  %v5032_v44 = vmax.f32 %v4936_v53, %v13640_v25  ;;  %vm17425_vm10 = vmmov %vm17409_vm1 }
 0x434   : > { %17405 = vst [vmem:[#allocation75_spill] sm:$0xff] %v13642_v1  ;;  %v3079_v35 = vsel %vm1782_vm4, %v3029_v29, -inf  ;;  %v3128_v27 = vmax.f32 %v2936_v38, %v3080_v50  ;;  %v5033_v28 = vmax.f32 %v4937_v23, %v13642_v1  ;;  %v17410_v13 = vrot.slane %v17377_v37, 1 }
 0x435   : > { %v3127_v31 = vmax.f32 %v2935_v3, %v3079_v35  ;;  %v3205_v4 = vsel %vm17409_vm1, %v3173_v55, %v17408_v58  ;;  %v17413_v3 = vmov %v17408_v58  ;;  %vm17415_vm15 = vcmp.eq.s32.totalorder %v10279_v30, 1 }
 0x436   : > { %v3221_v39 = vsel %vm17411_vm8, %v17410_v13, %v3173_v55  ;;  %v17412_v61 = vmov %v17410_v13  ;;  %v3272_v53 = vsel %vm1990_vm7, %v3205_v4, -inf  ;;  %v3505_v29 = vmax.f32 %v17250_v14, %v13143_v26  ;;  %vm17427_vm8 = vmmov %vm17415_vm15 }
 0x437   : > { %v3237_v38 = vsel %vm17414_vm6, %v17413_v3, %v17412_v61  ;;  %v3271_v34 = vsel %vm1989_vm5, %v3221_v39, -inf  ;;  %v5122_v0 = vpack.c.bf16 %v5033_v28, %v5032_v44  ;;  %v13675_v55 = vmax.f32 %v3128_v27, %v3272_v53 }
 0x438   : > { %v3273_v23 = vsel %vm17415_vm15, %v3237_v38, -inf  ;;  %v13673_v12 = vmax.f32 %v3127_v31, %v3271_v34  ;;  %v3506_v50 = vmax.f32 %v17251_v60, %v13145_v46  ;;  %v3507_v36 = vmax.f32 %v17264_v19, %v13147_v8 }
 0x439   : > { %v13677_v35 = vmax.f32 %v3129_v33, %v3273_v23  ;;  %v3601_v58 = vmax.f32 %v3505_v29, %v13298_v48  ;;  %v17416_v4 = vrot.slane %v13541_v51, 7  ;;  %v17417_v13 = vrot.slane %v13538_v18, 7  ;;  %7273 = vmatprep.mubr.bf16.mxu0 %v5122_v0 }
 0x43a   : > { %v17418_v27 = vrot.slane %v13541_v51, 6  ;;  %v17419_v60 = vrot.slane %v13538_v18, 6  ;;  %vm17420_vm14 = vcmp.lt.s32.totalorder %v8391_v2, 2  ;;  %v17421_v33 = vrot.slane %v13532_v40, 2 }
 0x43b   : > { %v3874_v14 = vsel %vm1138_vm0, %v17417_v13, %v17416_v4  ;;  %v17422_v44 = vrot.slane %v13541_v51, 2  ;;  %vm17423_vm9 = vcmp.lt.s32.totalorder %v8391_v2, 6  ;;  %v17424_v39 = vrot.slane %v13532_v40, 1  ;;  %vm17431_vm6 = vmmov %vm17420_vm14 }
 0x43c   : > { %v3936_v31 = vsel %vm1370_vm11, %v3874_v14, -inf  ;;  %v4066_v19 = vsel %vm17420_vm14, %v17419_v60, %v17418_v27  ;;  %v3602_v3 = vmax.f32 %v3506_v50, %v13289_v9  ;;  %v3603_v38 = vmax.f32 %v3507_v36, %v13303_v32  ;;  %vm17432_vm15 = vmmov %vm17423_vm9 }
 0x43d   : > { %v4290_v28 = vsel %vm17423_vm9, %v17422_v44, %v17421_v33  ;;  %v4482_v61 = vsel %vm17425_vm10, %v4434_v56, %v17424_v39  ;;  %v3697_v34 = vmax.f32 %v3601_v58, %v13508_v24  ;;  %v3984_v53 = vmax.f32 %v13541_v51, %v3936_v31  ;;  %vm17433_vm14 = vmmov %vm17425_vm10 }
 0x43e   : > { %v4128_v23 = vsel %vm1577_vm2, %v4066_v19, -inf  ;;  %vm17426_vm1 = vcmp.eq.s32.totalorder %v9849_v47, 1  ;;  %v4512_v0 = vsel %vm17427_vm8, %v4482_v61, -inf  ;;  %v4746_v56 = vmax.f32 %v17328_v43, %v17332_v57  ;;  %vm17437_vm10 = vmmov %vm17431_vm6 }
 0x43f   : > { %v4320_v29 = vsel %vm17426_vm1, %v4290_v28, -inf  ;;  %v3698_v50 = vmax.f32 %v3602_v3, %v13502_v62  ;;  %v3699_v36 = vmax.f32 %v3603_v38, %v13510_v15  ;;  %v13723_v58 = vmax.f32 %v3697_v34, %v13673_v12  ;;  %vm17438_vm1 = vmmov %vm17431_vm6 }
 0x440   : > { %v4176_v4 = vmax.f32 %v3984_v53, %v4128_v23  ;;  %v4747_v13 = vmax.f32 %v12976_v52, %v13254_v41  ;;  %v4842_v14 = vmax.f32 %v4746_v56, %v13366_v22  ;;  %v4748_v31 = vmax.f32 %v17331_v59, %v13267_v54  ;;  %vm17439_vm8 = vmmov %vm17432_vm15 }
 0x441   : > { %17428 = vst [vmem:[#allocation51_spill] sm:$0xff] %v13723_v58  ;;  %v4749_v27 = vmax.f32 %v17332_v57, %v13366_v22  ;;  %v13733_v43 = vmax.f32 %v3698_v50, %v13675_v55  ;;  %v13736_v60 = vmax.f32 %v3699_v36, %v13677_v35  ;;  %v3827_v19 = vrot.slane %v13723_v58, 7 }
 0x442   : > { %v4019_v33 = vrot.slane %v13723_v58, 6  ;;  %v4211_v52 = vrot.slane %v13723_v58, 2  ;;  %v4368_v44 = vmax.f32 %v4176_v4, %v4320_v29  ;;  %v4403_v28 = vrot.slane %v13723_v58, 1 }
 0x443   : > { %17429 = vst [vmem:[#allocation117_spill] sm:$0xff] %v13733_v43  ;;  %17430 = vst [vmem:[#allocation111_spill] sm:$0xff] %v13736_v60  ;;  %v4843_v59 = vmax.f32 %v4747_v13, %v13394_v63  ;;  %v3859_v39 = vrot.slane %v13736_v60, 7  ;;  %v4051_v57 = vrot.slane %v13736_v60, 6  ;;  %v4227_v61 = vrot.slane %v13733_v43, 2 }
 0x444   : > { %v4419_v3 = vrot.slane %v13733_v43, 1  ;;  %v13747_v38 = vmax.f32 %v4368_v44, %v4512_v0  ;;  %v4938_v34 = vmax.f32 %v4842_v14, %v13434_v6  ;;  %v3843_v23 = vrot.slane %v13733_v43, 7  ;;  %v17434_v0 = vld [vmem:[#allocation46_spill] sm:$0xff] }
 0x445   : > { %v4939_v53 = vmax.f32 %v4843_v59, %v13640_v25  ;;  %v3907_v29 = vsel %vm1138_vm0, %v3859_v39, %v3827_v19  ;;  %v4099_v56 = vsel %vm17431_vm6, %v4051_v57, %v4019_v33  ;;  %v4275_v50 = vsel %vm17432_vm15, %v4211_v52, %v4227_v61  ;;  %vm17440_vm6 = vmmov %vm17439_vm8 }
 0x446   : > { %v4467_v36 = vsel %vm17433_vm14, %v4403_v28, %v4419_v3  ;;  %vm17435_vm9 = vcmp.eq.s32.totalorder %v17434_v0, 1  ;;  %v4129_v13 = vsel %vm1575_vm12, %v4099_v56, -inf  ;;  %v4321_v14 = vsel %vm1782_vm4, %v4275_v50, -inf }
 0x447   : > { %v3937_v4 = vsel %vm17435_vm9, %v3907_v29, -inf  ;;  %v4513_v44 = vsel %vm1989_vm5, %v4467_v36, -inf  ;;  %v5034_v11 = vmax.f32 %v4938_v34, %v13747_v38  ;;  %v3875_v49 = vsel %vm1138_vm0, %v3843_v23, %v3859_v39 }
 0x448   : > { %v3985_v59 = vmax.f32 %v13723_v58, %v3937_v4  ;;  %v3891_v37 = vsel %vm1138_vm0, %v3827_v19, %v3843_v23  ;;  %v3939_v56 = vsel %vm1370_vm11, %v3875_v49, -inf  ;;  %v4035_v50 = vrot.slane %v13733_v43, 6 }
 0x449   : > { %v3938_v51 = vsel %vm1369_vm13, %v3891_v37, -inf  ;;  %v4243_v36 = vrot.slane %v13736_v60, 2  ;;  %v3987_v34 = vmax.f32 %v13736_v60, %v3939_v56  ;;  %v4435_v39 = vrot.slane %v13736_v60, 1 }
 0x44a   : > { %v4177_v18 = vmax.f32 %v3985_v59, %v4129_v13  ;;  %v3986_v4 = vmax.f32 %v13733_v43, %v3938_v51  ;;  %v4067_v19 = vsel %vm17437_vm10, %v4035_v50, %v4051_v57  ;;  %v4083_v37 = vsel %vm17438_vm1, %v4019_v33, %v4035_v50 }
 0x44b   : > { %v4259_v49 = vsel %vm17439_vm8, %v4227_v61, %v4243_v36  ;;  %v4291_v23 = vsel %vm17440_vm6, %v4243_v36, %v4211_v52  ;;  %v4130_v51 = vsel %vm1576_vm3, %v4083_v37, -inf  ;;  %v4131_v13 = vsel %vm1577_vm2, %v4067_v19, -inf }
 0x44c   : > { %v4369_v58 = vmax.f32 %v4177_v18, %v4321_v14  ;;  %vm17441_vm15 = vcmp.eq.s32.totalorder %v16816_v42, 1  ;;  %v4178_v57 = vmax.f32 %v3986_v4, %v4130_v51  ;;  %v4179_v56 = vmax.f32 %v3987_v34, %v4131_v13 }
 0x44d   : > { %v4322_v59 = vsel %vm17441_vm15, %v4259_v49, -inf  ;;  %vm17442_vm14 = vcmp.eq.s32.totalorder %v9849_v47, 1  ;;  %vm17443_vm9 = vcmp.lt.s32.totalorder %v8391_v2, 7  ;;  %v4844_v14 = vmax.f32 %v4748_v31, %v13432_v7 }
 0x44e   : > { %v4323_v33 = vsel %vm17442_vm14, %v4291_v23, -inf  ;;  %v4451_v61 = vsel %vm17443_vm9, %v4419_v3, %v4435_v39  ;;  %v13801_v50 = vmax.f32 %v4369_v58, %v4513_v44  ;;  %vm17444_vm10 = vmmov %vm17443_vm9  ;;  %v4370_v36 = vmax.f32 %v4178_v57, %v4322_v59  ;;  %v17446_v3 = vld [vmem:[#allocation67_spill] sm:$0xff]  ;;  %v17451_v59 = vld [vmem:[#allocation121_spill] sm:$0xff] }
 0x44f   : > { %v4483_v18 = vsel %vm17444_vm10, %v4435_v39, %v4403_v28  ;;  %v4514_v52 = vsel %vm1990_vm7, %v4451_v61, -inf  ;;  %v4371_v19 = vmax.f32 %v4179_v56, %v4323_v33  ;;  %vm17445_vm1 = vcmp.eq.s32.totalorder %v10279_v30, 1  ;;  %v17447_v44 = vld [vmem:[#allocation23_spill] sm:$0xff]  ;;  %v17448_v28 = vld [vmem:[#allocation108_spill] sm:$0xff]  ;;  %v17449_v39 = vld [vmem:[#allocation26_spill] sm:$0xff] }
 0x450   : > { %v4515_v4 = vsel %vm17445_vm1, %v4483_v18, -inf  ;;  %v4845_v34 = vmax.f32 %v4749_v27, %v13434_v6  ;;  %v5035_v37 = vmax.f32 %v4939_v53, %v13801_v50  ;;  %v4940_v58 = vmax.f32 %v4844_v14, %v13642_v1  ;;  %v17452_v53 = vld [vmem:[#allocation120_spill] sm:$0xff]  ;;  %v17454_v61 = vld [vmem:[#allocation119_spill] sm:$0xff] }
 0x451   : > { %v5074_v49 = vpack.c.bf16 %v17447_v44, %v17446_v3  ;;  %v5099_v23 = vpack.c.bf16 %v17449_v39, %v17448_v28  ;;  %v13817_v51 = vmax.f32 %v4370_v36, %v4514_v52  ;;  %v13819_v31 = vmax.f32 %v4371_v19, %v4515_v4  ;;  %v17458_v36 = vld [vmem:[#allocation118_spill] sm:$0xff]  ;;  %v17464_v39 = vld [vmem:[#allocation123_spill] sm:$0xff] }
 0x452   : > { %v4941_v13 = vmax.f32 %v4845_v34, %v13747_v38  ;;  %v2700_v27 = vsel %vm1370_vm11, %v17451_v59, -inf  ;;  %v5123_v57 = vpack.c.bf16 %v5035_v37, %v5034_v11  ;;  %v17453_v33 = vrot.slane %v17452_v53, 6 }
 0x453   : > { %17450 = vst [vmem:[#allocation88_spill] sm:$0xff] %v13817_v51  ;;  %5413 = vmatmul.mubr.bf16.gmra.mrb[56].mxu1 %v5074_v49  ;;  %v2748_v56 = vmax.f32 %v17452_v53, %v2700_v27  ;;  %v17455_v18 = vrot.slane %v17454_v61, 6  ;;  %vm17456_vm8 = vcmp.lt.s32.totalorder %v8391_v2, 2  ;;  %v17459_v19 = vrot.slane %v17458_v36, 6 }
 0x454   : > { %vm17460_vm6 = vmmov %vm17456_vm8  ;;  %v5036_v34 = vmax.f32 %v4940_v58, %v13817_v51  ;;  %v5037_v11 = vmax.f32 %v4941_v13, %v13819_v31  ;;  %5420 = vmatprep.mubr.bf16.mxu1 %v5099_v23  ;;  %v17462_v3 = vmov %v17453_v33  ;;  %7274 = vmatmul.mubr.bf16.gmra.mrb[28].mxu0 %v5123_v57  ;;  %v17465_v23 = vmax.f32 %v17454_v61, %v17464_v39  ;;  %v17469_v57 = vld [vmem:[#allocation122_spill] sm:$0xff] }
 0x455   : > { %v2822_v52 = vsel %vm17456_vm8, %v17455_v18, %v17453_v33  ;;  %v17457_v14 = vmov %v17455_v18  ;;  %v17461_v37 = vmov %v17459_v19  ;;  %vm17463_vm15 = vmmov %vm17460_vm6  ;;  %v17466_v59 = vrot.slane %v17452_v53, 2 }
 0x456   : > { %v2838_v4 = vsel %vm17460_vm6, %v17459_v19, %v17457_v14  ;;  %v2854_v44 = vsel %vm17463_vm15, %v17462_v3, %v17461_v37  ;;  %v2892_v58 = vsel %vm1577_vm2, %v2822_v52, -inf  ;;  %v17467_v27 = vrot.slane %v17454_v61, 2 }
 0x457   : > { %v2891_v49 = vsel %vm1576_vm3, %v2838_v4, -inf  ;;  %v2890_v28 = vsel %vm1575_vm12, %v2854_v44, -inf  ;;  %vm17468_vm14 = vcmp.lt.s32.totalorder %v8391_v2, 6  ;;  %v5124_v18 = vpack.c.bf16 %v5037_v11, %v5036_v34 }
 0x458   : > { %v2939_v13 = vmax.f32 %v17465_v23, %v2891_v49  ;;  %v3014_v33 = vsel %vm17468_vm14, %v17467_v27, %v17466_v59  ;;  %v17470_v14 = vmax.f32 %v17458_v36, %v17469_v57  ;;  %v2940_v4 = vmax.f32 %v2748_v56, %v2892_v58  ;;  %vm17473_vm9 = vmmov %vm17468_vm14 }
 0x459   : > { %v17471_v37 = vmov %v17467_v27  ;;  %v17472_v52 = vrot.slane %v17458_v36, 2  ;;  %v17475_v49 = vmov %v17466_v59  ;;  %vm17476_vm10 = vmmov %vm17473_vm9  ;;  %vm17477_vm1 = vcmp.eq.s32.totalorder %v16816_v42, 1  ;;  %7277 = vmatprep.mubr.bf16.mxu0 %v5124_v18 }
 0x45a   : > { %v2938_v19 = vmax.f32 %v17470_v14, %v2890_v28  ;;  %v3083_v56 = vsel %vm17477_vm1, %v3014_v33, -inf  ;;  %v3190_v11 = vrot.slane %v17452_v53, 1  ;;  %vm17478_vm8 = vcmp.eq.s32.totalorder %v9849_v47, 1 }
 0x45b   : > { %v3030_v3 = vsel %vm17473_vm9, %v17472_v52, %v17471_v37  ;;  %v17474_v44 = vmov %v17472_v52  ;;  %v3131_v23 = vmax.f32 %v2939_v13, %v3083_v56  ;;  %v17479_v59 = vrot.slane %v17454_v61, 1 }
 0x45c   : > { %v3046_v39 = vsel %vm17476_vm10, %v17475_v49, %v17474_v44  ;;  %v3082_v34 = vsel %vm1782_vm4, %v3030_v3, -inf  ;;  %v17480_v27 = vrot.slane %v17458_v36, 1  ;;  %vm17481_vm6 = vcmp.lt.s32.totalorder %v8391_v2, 7 }
 0x45d   : > { %v3084_v28 = vsel %vm17478_vm8, %v3046_v39, -inf  ;;  %v3130_v58 = vmax.f32 %v2938_v19, %v3082_v34  ;;  %v17482_v37 = vmov %v17479_v59  ;;  %vm17483_vm15 = vmmov %vm17481_vm6  ;;  %vm17486_vm9 = vcmp.eq.s32.totalorder %v10279_v30, 1 }
 0x45e   : > { %v3222_v57 = vsel %vm17481_vm6, %v17480_v27, %v17479_v59  ;;  %v3132_v14 = vmax.f32 %v2940_v4, %v3084_v28  ;;  %v3206_v33 = vsel %vm17483_vm15, %v17482_v37, %v3190_v11  ;;  %v17484_v18 = vmov %v17480_v27  ;;  %vm17485_vm14 = vmmov %vm17481_vm6  ;;  %v17489_v59 = vld [vmem:[#allocation125_spill] sm:$0xff] }
 0x45f   : > { %v3238_v52 = vsel %vm17485_vm14, %v3190_v11, %v17484_v18  ;;  %v3274_v13 = vsel %vm1989_vm5, %v3222_v57, -inf  ;;  %v3275_v19 = vsel %vm1990_vm7, %v3206_v33, -inf  ;;  %v3508_v44 = vmax.f32 %v13143_v26, %v13298_v48 }
 0x460   : > { %v3276_v3 = vsel %vm17486_vm9, %v3238_v52, -inf  ;;  %v13903_v4 = vmax.f32 %v3130_v58, %v3274_v13  ;;  %v13907_v49 = vmax.f32 %v3131_v23, %v3275_v19  ;;  %v3509_v34 = vmax.f32 %v13145_v46, %v13289_v9  ;;  %v17491_v46 = vld [vmem:[#allocation124_spill] sm:$0xff] }
 0x461   : > { %v13909_v39 = vmax.f32 %v3132_v14, %v3276_v3  ;;  %v3510_v56 = vmax.f32 %v13147_v8, %v13303_v32  ;;  %v3604_v11 = vmax.f32 %v3508_v44, %v13508_v24  ;;  %v4750_v28 = vmax.f32 %v13254_v41, %v13394_v63  ;;  %v17492_v14 = vld [vmem:[#allocation52_spill] sm:$0xff] }
 0x462   : > { %17487 = vst [vmem:[#allocation50_spill] sm:$0xff] %v13907_v49  ;;  %v4751_v58 = vmax.f32 %v13267_v54, %v13432_v7  ;;  %vm17490_vm10 = vcmp.eq.s32.totalorder %v17434_v0, 1  ;;  %v3605_v23 = vmax.f32 %v3509_v34, %v13502_v62  ;;  %v17493_v8 = vrot.slane %v17492_v14, 6  ;;  %v17497_v13 = vld [vmem:[#allocation64_spill] sm:$0xff] }
 0x463   : > { %17488 = vst [vmem:[#allocation100_spill] sm:$0xff] %v13909_v39  ;;  %v2701_v26 = vsel %vm17490_vm10, %v17489_v59, -inf  ;;  %v3606_v27 = vmax.f32 %v3510_v56, %v13510_v15  ;;  %v17494_v37 = vrot.slane %v17491_v46, 6  ;;  %vm17495_vm1 = vcmp.lt.s32.totalorder %v8391_v2, 2  ;;  %vm17510_vm9 = vmmov %vm17490_vm10 }
 0x464   : > { %v2749_v57 = vmax.f32 %v17491_v46, %v2701_v26  ;;  %v3700_v33 = vmax.f32 %v3604_v11, %v13673_v12  ;;  %v13934_v54 = vmax.f32 %v4750_v28, %v13640_v25  ;;  %v13937_v18 = vmax.f32 %v4751_v58, %v13642_v1  ;;  %vm17499_vm8 = vmmov %vm17495_vm1 }
 0x465   : > { %v2839_v41 = vsel %vm17495_vm1, %v17494_v37, %v17493_v8  ;;  %v17496_v52 = vmov %v17494_v37  ;;  %v17498_v19 = vrot.slane %v17497_v13, 6  ;;  %v3701_v44 = vmax.f32 %v3605_v23, %v13675_v55  ;;  %v17503_v8 = vld [vmem:[#allocation126_spill] sm:$0xff]  ;;  %vm17508_vm15 = vmmov %vm17495_vm1 }
 0x466   : > { %v3702_v34 = vmax.f32 %v3606_v27, %v13677_v35  ;;  %v2894_v11 = vsel %vm1576_vm3, %v2839_v41, -inf  ;;  %v13952_v28 = vmax.f32 %v3700_v33, %v13903_v4  ;;  %v4942_v58 = vmax.f32 %v13934_v54, %v13801_v50  ;;  %vm17509_vm14 = vmmov %vm17495_vm1 }
 0x467   : > { %v2855_v3 = vsel %vm17499_vm8, %v17498_v19, %v17496_v52  ;;  %v4943_v59 = vmax.f32 %v13937_v18, %v13817_v51  ;;  %v13959_v23 = vmax.f32 %v3701_v44, %v13907_v49  ;;  %v17504_v37 = vmax.f32 %v17492_v14, %v17503_v8  ;;  %v7538_v19 = vld [vmem:[#allocation8 + $0x28] sm:$0xff]  }
 0x468   : > { %v2893_v56 = vsel %vm1575_vm12, %v2855_v3, -inf  ;;  %17500 = vst [vmem:[#allocation113_spill] sm:$0xff] %v13952_v28  ;;  %v13962_v27 = vmax.f32 %v3702_v34, %v13909_v39  ;;  %v17505_v33 = vrot.slane %v17497_v13, 2  ;;  %v17506_v52 = vrot.slane %v17492_v14, 2  ;;  %7319 = vmatprep.subr.bf16.mxu0 %v7538_v19 }
 0x469   : > { %v2941_v26 = vmax.f32 %v2749_v57, %v2893_v56  ;;  %17501 = vst [vmem:[#allocation77_spill] sm:$0xff] %v13959_v23  ;;  %v2942_v41 = vmax.f32 %v17504_v37, %v2894_v11  ;;  %vm17507_vm6 = vcmp.lt.s32.totalorder %v8391_v2, 6  ;;  %v3828_v57 = vrot.slane %v13952_v28, 7  ;;  %7320 = vmatpush3.bf16.msra.mxu0 %v7538_v19 }
 0x46a   : > { %17502 = vst [vmem:[#allocation59_spill] sm:$0xff] %v13962_v27  ;;  %v3015_v54 = vsel %vm17507_vm6, %v17506_v52, %v17505_v33  ;;  %v4020_v18 = vrot.slane %v13952_v28, 6  ;;  %v4212_v3 = vrot.slane %v13952_v28, 2  ;;  %v3844_v34 = vrot.slane %v13959_v23, 7  ;;  %vm17511_vm10 = vmmov %vm17507_vm6 }
 0x46b   : > { %v3860_v56 = vrot.slane %v13962_v27, 7  ;;  %v4036_v11 = vrot.slane %v13959_v23, 6  ;;  %v4052_v8 = vrot.slane %v13962_v27, 6  ;;  %v4228_v37 = vrot.slane %v13959_v23, 2  ;;  %vm17512_vm1 = vmmov %vm17507_vm6 }
 0x46c   : > { %v4244_v33 = vrot.slane %v13962_v27, 2  ;;  %v4420_v52 = vrot.slane %v13959_v23, 1  ;;  %v4436_v53 = vrot.slane %v13962_v27, 1  ;;  %v3892_v44 = vsel %vm1138_vm0, %v3828_v57, %v3844_v34 }
 0x46d   : > { %v3908_v61 = vsel %vm1138_vm0, %v3860_v56, %v3828_v57  ;;  %v4084_v36 = vsel %vm17508_vm15, %v4020_v18, %v4036_v11  ;;  %v4100_v60 = vsel %vm17509_vm14, %v4052_v8, %v4020_v18  ;;  %v3941_v40 = vsel %vm1369_vm13, %v3892_v44, -inf  ;;  %vm17519_vm14 = vmmov %vm17512_vm1 }
 0x46e   : > { %v3940_v43 = vsel %vm17510_vm9, %v3908_v61, -inf  ;;  %v4132_v19 = vsel %vm1575_vm12, %v4100_v60, -inf  ;;  %v4133_v51 = vsel %vm1576_vm3, %v4084_v36, -inf  ;;  %v3989_v7 = vmax.f32 %v13959_v23, %v3941_v40 }
 0x46f   : > { %v3988_v57 = vmax.f32 %v13952_v28, %v3940_v43  ;;  %v4260_v1 = vsel %vm17511_vm10, %v4228_v37, %v4244_v33  ;;  %v4276_v18 = vsel %vm17512_vm1, %v4212_v3, %v4228_v37  ;;  %vm17513_vm8 = vcmp.eq.s32.totalorder %v16816_v42, 1 }
 0x470   : > { %v4324_v61 = vsel %vm1782_vm4, %v4276_v18, -inf  ;;  %v4325_v44 = vsel %vm17513_vm8, %v4260_v1, -inf  ;;  %vm17514_vm6 = vcmp.lt.s32.totalorder %v8391_v2, 7  ;;  %v17515_v36 = vrot.slane %v13952_v28, 1  ;;  %vm17520_vm9 = vmmov %vm17513_vm8 }
 0x471   : > { %v4452_v60 = vsel %vm17514_vm6, %v4420_v52, %v4436_v53  ;;  %vm17516_vm15 = vmmov %vm17514_vm6  ;;  %v4180_v43 = vmax.f32 %v3988_v57, %v4132_v19  ;;  %v4181_v23 = vmax.f32 %v3989_v7, %v4133_v51  ;;  %v17517_v18 = vrot.slane %v17492_v14, 2 }
 0x472   : > { %v4468_v40 = vsel %vm17516_vm15, %v17515_v36, %v4420_v52  ;;  %v4517_v37 = vsel %vm1990_vm7, %v4452_v60, -inf  ;;  %v17518_v1 = vrot.slane %v17491_v46, 2  ;;  %v3086_v10 = vsel %vm17520_vm9, %v3015_v54, -inf  ;;  %vm17523_vm10 = vmmov %vm17514_vm6 }
 0x473   : > { %v4516_v17 = vsel %vm1989_vm5, %v4468_v40, -inf  ;;  %v3159_v52 = vrot.slane %v17491_v46, 1  ;;  %v17521_v7 = vrot.slane %v17497_v13, 1  ;;  %v17522_v51 = vrot.slane %v17492_v14, 1  ;;  %vm17525_vm1 = vmmov %vm17514_vm6  ;;  %v17552_v13 = vld [vmem:[#allocation134_spill] sm:$0xff]  ;;  %v17554_v14 = vld [vmem:[#allocation133_spill] sm:$0xff] }
 0x474   : > { %v3031_v29 = vsel %vm17519_vm14, %v17518_v1, %v17517_v18  ;;  %v4372_v57 = vmax.f32 %v4180_v43, %v4324_v61  ;;  %v4373_v60 = vmax.f32 %v4181_v23, %v4325_v44  ;;  %v3134_v40 = vmax.f32 %v2942_v41, %v3086_v10  ;;  %vm17527_vm8 = vmmov %vm17525_vm1  ;;  %v17529_v44 = vld [vmem:[#allocation128_spill] sm:$0xff]  ;;  %v17530_v43 = vld [vmem:[#allocation127_spill] sm:$0xff] }
 0x475   : > { %v3207_v19 = vsel %vm17523_vm10, %v17522_v51, %v17521_v7  ;;  %v3085_v36 = vsel %vm1782_vm4, %v3031_v29, -inf  ;;  %v17524_v18 = vmov %v17522_v51  ;;  %v17526_v1 = vmov %v17521_v7  ;;  %vm17535_vm10 = vmmov %vm17525_vm1 }
 0x476   : > { %v3133_v0 = vmax.f32 %v2941_v26, %v3085_v36  ;;  %v3223_v54 = vsel %vm17525_vm1, %v3159_v52, %v17524_v18  ;;  %v3239_v46 = vsel %vm17527_vm8, %v17526_v1, %v3159_v52  ;;  %v3278_v7 = vsel %vm1990_vm7, %v3207_v19, -inf }
 0x477   : > { %v14048_v61 = vmax.f32 %v4372_v57, %v4516_v17  ;;  %v14050_v23 = vmax.f32 %v4373_v60, %v4517_v37  ;;  %v3277_v10 = vsel %vm1989_vm5, %v3223_v54, -inf  ;;  %vm17528_vm6 = vcmp.eq.s32.totalorder %v10279_v30, 1 }
 0x478   : > { %v3279_v29 = vsel %vm17528_vm6, %v3239_v46, -inf  ;;  %v14056_v26 = vmax.f32 %v3133_v0, %v3277_v10  ;;  %v14058_v41 = vmax.f32 %v3134_v40, %v3278_v7  ;;  %v17531_v52 = vmax.f32 %v17529_v44, %v17530_v43  ;;  %vm17537_vm1 = vmmov %vm17528_vm6  ;;  %v7539_v44 = vld [vmem:[#allocation8 + $0x30] sm:$0xff]  }
 0x479   : > { %v3511_v17 = vmax.f32 %v13298_v48, %v13508_v24  ;;  %v5038_v37 = vmax.f32 %v4942_v58, %v14048_v61  ;;  %v5039_v19 = vmax.f32 %v4943_v59, %v14050_v23  ;;  %v3512_v57 = vmax.f32 %v13289_v9, %v13502_v62  ;;  %7321 = vmatprep.subr.bf16.mxu0 %v7539_v44  ;;  %vm17543_vm6 = vmmov %vm17519_vm14 }
 0x47a   : > { %v14063_v51 = vmax.f32 %v17531_v52, %v3279_v29  ;;  %v3513_v0 = vmax.f32 %v13303_v32, %v13510_v15  ;;  %v3876_v60 = vsel %vm1138_vm0, %v3844_v34, %v3860_v56  ;;  %vm17532_vm15 = vcmp.lt.s32.totalorder %v8391_v2, 2  ;;  %7322 = vmatpush3.bf16.msra.mxu0 %v7539_v44 }
 0x47b   : > { %v3607_v46 = vmax.f32 %v3511_v17, %v13673_v12  ;;  %v4068_v36 = vsel %vm17532_vm15, %v4036_v11, %v4052_v8  ;;  %v4292_v48 = vsel %vm17519_vm14, %v4244_v33, %v4212_v3  ;;  %v5125_v58 = vpack.c.bf16 %v5039_v19, %v5038_v37  ;;  %v17541_v17 = vld [vmem:[#allocation85_spill] sm:$0xff]  ;;  %vm17542_vm8 = vmmov %vm17532_vm15 }
 0x47c   : > { %v3608_v59 = vmax.f32 %v3512_v57, %v13675_v55  ;;  %v3609_v40 = vmax.f32 %v3513_v0, %v13677_v35  ;;  %v3942_v9 = vsel %vm1370_vm11, %v3876_v60, -inf  ;;  %v4134_v34 = vsel %vm1577_vm2, %v4068_v36, -inf  ;;  %vm17549_vm14 = vmmov %vm17535_vm10 }
 0x47d   : > { %v3703_v32 = vmax.f32 %v3607_v46, %v13903_v4  ;;  %v3990_v18 = vmax.f32 %v13962_v27, %v3942_v9  ;;  %vm17533_vm9 = vcmp.eq.s32.totalorder %v9849_v47, 1  ;;  %7278 = vmatmul.mubr.bf16.gmra.mrb[32].mxu0 %v5125_v58  ;;  %v17534_v8 = vrot.slane %v13952_v28, 1 }
 0x47e   : > { %v4326_v56 = vsel %vm17533_vm9, %v4292_v48, -inf  ;;  %v3704_v3 = vmax.f32 %v3608_v59, %v13907_v49  ;;  %v3705_v11 = vmax.f32 %v3609_v40, %v13909_v39  ;;  %v4752_v54 = vmax.f32 %v13366_v22, %v13434_v6  ;;  %v17540_v22 = vld [vmem:[#allocation107_spill] sm:$0xff]  ;;  %vm17556_vm9 = vmmov %vm17542_vm8 }
 0x47f   : > { %v4484_v33 = vsel %vm17535_vm10, %v4436_v53, %v17534_v8  ;;  %v14099_v1 = vmax.f32 %v3703_v32, %v14056_v26  ;;  %v4182_v7 = vmax.f32 %v3990_v18, %v4134_v34  ;;  %v4753_v29 = vmax.f32 %v13394_v63, %v13640_v25  ;;  %v17546_v8 = vld [vmem:[#allocation46_spill] sm:$0xff]  ;;  %vm17557_vm10 = vmmov %vm17542_vm8 }
 0x480   : > { %v4518_v10 = vsel %vm17537_vm1, %v4484_v33, -inf  ;;  %v14106_v43 = vmax.f32 %v3704_v3, %v14058_v41  ;;  %v14109_v52 = vmax.f32 %v3705_v11, %v14063_v51  ;;  %v4848_v53 = vmax.f32 %v4752_v54, %v13747_v38  ;;  %v17545_v3 = vld [vmem:[#allocation86_spill] sm:$0xff]  ;;  %vm17560_vm1 = vmmov %vm17543_vm6 }
 0x481   : > { %17536 = vst [vmem:[#allocation91_spill] sm:$0xff] %v14099_v1  ;;  %v5075_v37 = vpack.c.bf16 %v17541_v17, %v17540_v22  ;;  %v3829_v19 = vrot.slane %v14099_v1, 7  ;;  %v4021_v57 = vrot.slane %v14099_v1, 6  ;;  %v4213_v0 = vrot.slane %v14099_v1, 2 }
 0x482   : > { %17538 = vst [vmem:[#allocation97_spill] sm:$0xff] %v14106_v43  ;;  %17539 = vst [vmem:[#allocation92_spill] sm:$0xff] %v14109_v52  ;;  %v4374_v46 = vmax.f32 %v4182_v7, %v4326_v56  ;;  %v3861_v63 = vrot.slane %v14109_v52, 7  ;;  %v4053_v60 = vrot.slane %v14109_v52, 6  ;;  %v4229_v36 = vrot.slane %v14106_v43, 2  ;;  %v17544_v56 = vld [vmem:[#allocation16_spill] sm:$0xff] }
 0x483   : > { %v4405_v48 = vrot.slane %v14099_v1, 1  ;;  %5421 = vmatmul.mubr.bf16.gmra.mrb[60].mxu1 %v5075_v37  ;;  %v4421_v58 = vrot.slane %v14106_v43, 1  ;;  %v4849_v40 = vmax.f32 %v4753_v29, %v13801_v50  ;;  %v4944_v9 = vmax.f32 %v4848_v53, %v13819_v31 }
 0x484   : > { %v14122_v59 = vmax.f32 %v4374_v46, %v4518_v10  ;;  %v3909_v32 = vsel %vm1138_vm0, %v3861_v63, %v3829_v19  ;;  %v4101_v18 = vsel %vm17542_vm8, %v4053_v60, %v4021_v57  ;;  %v4277_v34 = vsel %vm17543_vm6, %v4213_v0, %v4229_v36  ;;  %vm17561_vm8 = vmmov %vm17560_vm1 }
 0x485   : > { %v5100_v11 = vpack.c.bf16 %v17545_v3, %v17544_v56  ;;  %vm17547_vm15 = vcmp.eq.s32.totalorder %v17546_v8, 1  ;;  %v4135_v7 = vsel %vm1575_vm12, %v4101_v18, -inf  ;;  %v4327_v10 = vsel %vm1782_vm4, %v4277_v34, -inf  ;;  %v17550_v56 = vld [vmem:[#allocation75_spill] sm:$0xff]  ;;  %v17551_v3 = vld [vmem:[#allocation48_spill] sm:$0xff] }
 0x486   : > { %v3943_v33 = vsel %vm17547_vm15, %v3909_v32, -inf  ;;  %v4469_v29 = vsel %vm17549_vm14, %v4405_v48, %v4421_v58  ;;  %v4945_v22 = vmax.f32 %v4849_v40, %v14048_v61  ;;  %v5040_v17 = vmax.f32 %v4944_v9, %v14122_v59  ;;  %v17553_v40 = vld [vmem:[#allocation129_spill] sm:$0xff]  ;;  %vm17563_vm15 = vmmov %vm17549_vm14 }
 0x487   : > { %v3991_v44 = vmax.f32 %v14099_v1, %v3943_v33  ;;  %v4519_v53 = vsel %vm1989_vm5, %v4469_v29, -inf  ;;  %5428 = vmatprep.mubr.bf16.mxu1 %v5100_v11  ;;  %v3845_v37 = vrot.slane %v14106_v43, 7  ;;  %v4037_v46 = vrot.slane %v14106_v43, 6 }
 0x488   : > { %v4245_v32 = vrot.slane %v14109_v52, 2  ;;  %v4437_v18 = vrot.slane %v14109_v52, 1  ;;  %v4754_v33 = vmax.f32 %v17551_v3, %v17550_v56  ;;  %v4755_v29 = vmax.f32 %v13434_v6, %v13747_v38 }
 0x489   : > { %v4183_v34 = vmax.f32 %v3991_v44, %v4135_v7  ;;  %v17555_v9 = vmax.f32 %v17553_v40, %v17554_v14  ;;  %v3877_v1 = vsel %vm1138_vm0, %v3845_v37, %v3861_v63  ;;  %v3893_v27 = vsel %vm1138_vm0, %v3829_v19, %v3845_v37 }
 0x48a   : > { %v4069_v7 = vsel %vm17556_vm9, %v4037_v46, %v4053_v60  ;;  %v4085_v44 = vsel %vm17557_vm10, %v4021_v57, %v4037_v46  ;;  %v3944_v6 = vsel %vm1369_vm13, %v3893_v27, -inf  ;;  %v3945_v14 = vsel %vm1370_vm11, %v3877_v1, -inf  ;;  %vm17565_vm9 = vmmov %vm17563_vm15 }
 0x48b   : > { %v2944_v11 = vmax.f32 %v17555_v9, %v17552_v13  ;;  %v4375_v3 = vmax.f32 %v4183_v34, %v4327_v10  ;;  %v4136_v9 = vsel %vm1576_vm3, %v4085_v44, -inf  ;;  %v3992_v63 = vmax.f32 %v14106_v43, %v3944_v6 }
 0x48c   : > { %v3993_v19 = vmax.f32 %v14109_v52, %v3945_v14  ;;  %v4137_v60 = vsel %vm1577_vm2, %v4069_v7, -inf  ;;  %v4261_v57 = vsel %vm17560_vm1, %v4229_v36, %v4245_v32  ;;  %v4293_v27 = vsel %vm17561_vm8, %v4245_v32, %v4213_v0  ;;  %v17567_v32 = vld [vmem:[#allocation88_spill] sm:$0xff]  ;;  %vm17577_vm8 = vmmov %vm17565_vm9 }
 0x48d   : > { %v14179_v10 = vmax.f32 %v4375_v3, %v4519_v53  ;;  %vm17562_vm6 = vcmp.eq.s32.totalorder %v16816_v42, 1  ;;  %v4453_v37 = vsel %vm17563_vm15, %v4421_v58, %v4437_v18  ;;  %v4184_v46 = vmax.f32 %v3992_v63, %v4136_v9  ;;  %v17568_v9 = vld [vmem:[#allocation132_spill] sm:$0xff] }
 0x48e   : > { %v4328_v1 = vsel %vm17562_vm6, %v4261_v57, -inf  ;;  %v4185_v34 = vmax.f32 %v3993_v19, %v4137_v60  ;;  %vm17564_vm14 = vcmp.eq.s32.totalorder %v9849_v47, 1  ;;  %v4485_v7 = vsel %vm17565_vm9, %v4437_v18, %v4405_v48  ;;  %vm17570_vm1 = vmmov %vm17562_vm6 }
 0x48f   : > { %v4329_v44 = vsel %vm17564_vm14, %v4293_v27, -inf  ;;  %v5041_v36 = vmax.f32 %v4945_v22, %v14179_v10  ;;  %v4520_v53 = vsel %vm1990_vm7, %v4453_v37, -inf  ;;  %vm17566_vm10 = vcmp.eq.s32.totalorder %v10279_v30, 1  ;;  %v17569_v22 = vld [vmem:[#allocation136_spill] sm:$0xff]  ;;  %v17573_v37 = vld [vmem:[#allocation131_spill] sm:$0xff]  ;;  %vm17580_vm6 = vmmov %vm17577_vm8 }
 0x490   : > { %v4521_v0 = vsel %vm17566_vm10, %v4485_v7, -inf  ;;  %v4850_v3 = vmax.f32 %v4754_v33, %v17567_v32  ;;  %v4376_v6 = vmax.f32 %v4184_v46, %v4328_v1  ;;  %v4377_v58 = vmax.f32 %v4185_v34, %v4329_v44  ;;  %v17572_v1 = vld [vmem:[#allocation135_spill] sm:$0xff]  ;;  %v17575_v34 = vld [vmem:[#allocation130_spill] sm:$0xff]  ;;  %vm17582_vm15 = vmmov %vm17566_vm10 }
 0x491   : > { %v4851_v14 = vmax.f32 %v4755_v29, %v13819_v31  ;;  %v3088_v63 = vsel %vm1782_vm4, %v17568_v9, -inf  ;;  %v5126_v19 = vpack.c.bf16 %v5041_v36, %v5040_v17  ;;  %v3089_v18 = vsel %vm17570_vm1, %v17569_v22, -inf  ;;  %v17583_v22 = vld [vmem:[#allocation137_spill] sm:$0xff] }
 0x492   : > { %v4946_v48 = vmax.f32 %v4850_v3, %v14050_v23  ;;  %v3136_v60 = vmax.f32 %v2944_v11, %v3088_v63  ;;  %v14205_v57 = vmax.f32 %v4376_v6, %v4520_v53  ;;  %v14207_v27 = vmax.f32 %v4377_v58, %v4521_v0  ;;  %v17581_v53 = vld [vmem:[#allocation139_spill] sm:$0xff] }
 0x493   : > { %v4947_v33 = vmax.f32 %v4851_v14, %v14122_v59  ;;  %v3137_v29 = vmax.f32 %v17572_v1, %v3089_v18  ;;  %7281 = vmatprep.mubr.bf16.mxu0 %v5126_v19  ;;  %v17574_v46 = vrot.slane %v17573_v37, 1  ;;  %v17576_v17 = vrot.slane %v17575_v34, 1  ;;  %v17584_v18 = vld [vmem:[#allocation138_spill] sm:$0xff] }
 0x494   : > { %17571 = vst [vmem:[#allocation106_spill] sm:$0xff] %v14205_v57  ;;  %v17579_v11 = vrot.slane %v17553_v40, 1  ;;  %v3282_v0 = vsel %vm17582_vm15, %v17581_v53, -inf  ;;  %v3514_v3 = vmax.f32 %v13508_v24, %v13673_v12  ;;  %v5042_v6 = vmax.f32 %v4946_v48, %v14205_v57  ;;  %v17588_v53 = vld [vmem:[#allocation99_spill] sm:$0xff] }
 0x495   : > { %v3208_v44 = vsel %vm17577_vm8, %v17576_v17, %v17574_v46  ;;  %v17578_v7 = vmov %v17576_v17  ;;  %v5043_v58 = vmax.f32 %v4947_v33, %v14207_v27  ;;  %v17585_v1 = vmax.f32 %v17583_v22, %v17584_v18 }
 0x496   : > { %v3224_v36 = vsel %vm17580_vm6, %v17579_v11, %v17578_v7  ;;  %v3281_v9 = vsel %vm1990_vm7, %v3208_v44, -inf  ;;  %v3515_v24 = vmax.f32 %v13502_v62, %v13675_v55  ;;  %v3516_v33 = vmax.f32 %v13510_v15, %v13677_v35  ;;  %v17586_v7 = vld [vmem:[#allocation72_spill] sm:$0xff]  ;;  %v17587_v11 = vld [vmem:[#allocation66_spill] sm:$0xff] }
 0x497   : > { %v3280_v14 = vsel %vm1989_vm5, %v3224_v36, -inf  ;;  %v14236_v19 = vmax.f32 %v3137_v29, %v3281_v9  ;;  %v14241_v46 = vmax.f32 %v17585_v1, %v3282_v0  ;;  %v5127_v48 = vpack.c.bf16 %v5043_v58, %v5042_v6  ;;  %v17589_v0 = vld [vmem:[#allocation98_spill] sm:$0xff]  ;;  %v17591_v58 = vld [vmem:[#allocation153_spill] sm:$0xff] }
 0x498   : > { %v14234_v63 = vmax.f32 %v3136_v60, %v3280_v14  ;;  %v3610_v17 = vmax.f32 %v3514_v3, %v13903_v4  ;;  %v4756_v60 = vmax.f32 %v13640_v25, %v13801_v50  ;;  %v3611_v29 = vmax.f32 %v3515_v24, %v13907_v49  ;;  %v17590_v25 = vld [vmem:[#allocation164_spill] sm:$0xff]  ;;  %v17592_v14 = vld [vmem:[#allocation162_spill] sm:$0xff]  ;;  %v17594_v24 = vld [vmem:[#allocation165_spill] sm:$0xff] }
 0x499   : > { %v4757_v44 = vmax.f32 %v17550_v56, %v17567_v32  ;;  %v5076_v36 = vpack.c.bf16 %v17587_v11, %v17586_v7  ;;  %v5101_v62 = vpack.c.bf16 %v17589_v0, %v17588_v53  ;;  %7282 = vmatmul.mubr.bf16.gmra.mrb[36].mxu0 %v5127_v48  ;;  %v3612_v6 = vmax.f32 %v3516_v33, %v13909_v39  ;;  %v7540_v56 = vld [vmem:[#allocation8 + $0x38] sm:$0xff]   ;;  %v17595_v48 = vld [vmem:[#allocation154_spill] sm:$0xff] }
 0x49a   : > { %v3706_v15 = vmax.f32 %v3610_v17, %v14056_v26  ;;  %v14260_v3 = vmax.f32 %v4756_v60, %v14048_v61  ;;  %v17593_v9 = vmax.f32 %v17591_v58, %v17592_v14  ;;  %v3707_v18 = vmax.f32 %v3611_v29, %v14058_v41  ;;  %v17596_v33 = vld [vmem:[#allocation163_spill] sm:$0xff]  ;;  %7323 = vmatprep.subr.bf16.mxu0 %v7540_v56 }
 0x49b   : > { %v14270_v1 = vmax.f32 %v4757_v44, %v14050_v23  ;;  %5429 = vmatmul.mubr.bf16.gmra.mrb[64].mxu1 %v5076_v36  ;;  %v17597_v17 = vmax.f32 %v17595_v48, %v17596_v33  ;;  %v3517_v60 = vmax.f32 %v13673_v12, %v13903_v4  ;;  %v3708_v11 = vmax.f32 %v3612_v6, %v14063_v51 }
 0x49c   : > { %v14266_v22 = vmax.f32 %v17593_v9, %v17590_v25  ;;  %v14282_v53 = vmax.f32 %v3706_v15, %v14234_v63  ;;  %5436 = vmatprep.mubr.bf16.mxu1 %v5101_v62  ;;  %v3518_v44 = vmax.f32 %v13675_v55, %v13907_v49  ;;  %v14289_v36 = vmax.f32 %v3707_v18, %v14236_v19 }
 0x49d   : > { %v14276_v7 = vmax.f32 %v17597_v17, %v17594_v24  ;;  %v4949_v0 = vmax.f32 %v14270_v1, %v14205_v57  ;;  %v3519_v12 = vmax.f32 %v13677_v35, %v13909_v39  ;;  %v3613_v6 = vmax.f32 %v3517_v60, %v14056_v26  ;;  %7324 = vmatpush3.bf16.msra.mxu0 %v7540_v56 }
 0x49e   : > { %17598 = vst [vmem:[#allocation61_spill] sm:$0xff] %v14282_v53  ;;  %17599 = vst [vmem:[#allocation71_spill] sm:$0xff] %v14289_v36  ;;  %v14297_v15 = vmax.f32 %v3708_v11, %v14241_v46  ;;  %v3830_v62 = vrot.slane %v14282_v53, 7  ;;  %v4022_v25 = vrot.slane %v14282_v53, 6  ;;  %v4214_v55 = vrot.slane %v14282_v53, 2 }
 0x49f   : > { %v3846_v58 = vrot.slane %v14289_v36, 7  ;;  %v4038_v14 = vrot.slane %v14289_v36, 6  ;;  %v4230_v9 = vrot.slane %v14289_v36, 2  ;;  %v4422_v48 = vrot.slane %v14289_v36, 1 }
 0x4a0   : > { %17600 = vst [vmem:[#allocation54_spill] sm:$0xff] %v14297_v15  ;;  %v3862_v18 = vrot.slane %v14297_v15, 7  ;;  %v4054_v1 = vrot.slane %v14297_v15, 6  ;;  %v4246_v24 = vrot.slane %v14297_v15, 2  ;;  %vm17601_vm14 = vcmp.lt.s32.totalorder %v8391_v2, 2 }
 0x4a1   : > { %v3894_v33 = vsel %vm1138_vm0, %v3830_v62, %v3846_v58  ;;  %v4086_v56 = vsel %vm17601_vm14, %v4022_v25, %v4038_v14  ;;  %vm17602_vm9 = vcmp.lt.s32.totalorder %v8391_v2, 6  ;;  %v4438_v60 = vrot.slane %v14297_v15, 1  ;;  %vm17603_vm10 = vmmov %vm17601_vm14 }
 0x4a2   : > { %v4278_v17 = vsel %vm17602_vm9, %v4214_v55, %v4230_v9  ;;  %v3910_v11 = vsel %vm1138_vm0, %v3862_v18, %v3830_v62  ;;  %v3947_v29 = vsel %vm1369_vm13, %v3894_v33, -inf  ;;  %v4102_v35 = vsel %vm17603_vm10, %v4054_v1, %v4022_v25  ;;  %vm17605_vm8 = vmmov %vm17602_vm9 }
 0x4a3   : > { %v4139_v37 = vsel %vm1576_vm3, %v4086_v56, -inf  ;;  %vm17604_vm1 = vcmp.eq.s32.totalorder %v17546_v8, 1  ;;  %v3995_v40 = vmax.f32 %v14289_v36, %v3947_v29  ;;  %v4138_v52 = vsel %vm1575_vm12, %v4102_v35, -inf  ;;  %vm17610_vm9 = vmmov %vm17603_vm10 }
 0x4a4   : > { %v3946_v34 = vsel %vm17604_vm1, %v3910_v11, -inf  ;;  %v4262_v62 = vsel %vm17605_vm8, %v4230_v9, %v4246_v24  ;;  %v4330_v33 = vsel %vm1782_vm4, %v4278_v17, -inf  ;;  %vm17606_vm6 = vcmp.eq.s32.totalorder %v16816_v42, 1  ;;  %vm17617_vm10 = vmmov %vm17605_vm8 }
 0x4a5   : > { %v3994_v43 = vmax.f32 %v14282_v53, %v3946_v34  ;;  %v4331_v25 = vsel %vm17606_vm6, %v4262_v62, -inf  ;;  %vm17607_vm15 = vcmp.lt.s32.totalorder %v8391_v2, 7  ;;  %v4187_v11 = vmax.f32 %v3995_v40, %v4139_v37  ;;  %vm17618_vm1 = vmmov %vm17605_vm8 }
 0x4a6   : > { %v4454_v56 = vsel %vm17607_vm15, %v4422_v48, %v4438_v60  ;;  %v17608_v29 = vrot.slane %v14282_v53, 1  ;;  %vm17609_vm14 = vmmov %vm17607_vm15  ;;  %v3614_v34 = vmax.f32 %v3518_v44, %v14058_v41  ;;  %v3615_v62 = vmax.f32 %v3519_v12, %v14063_v51 }
 0x4a7   : > { %v4523_v9 = vsel %vm1990_vm7, %v4454_v56, -inf  ;;  %v4186_v36 = vmax.f32 %v3994_v43, %v4138_v52  ;;  %v3709_v39 = vmax.f32 %v3613_v6, %v14234_v63  ;;  %v4379_v49 = vmax.f32 %v4187_v11, %v4331_v25  ;;  %vm17620_vm6 = vmmov %vm17610_vm9 }
 0x4a8   : > { %v4470_v35 = vsel %vm17609_vm14, %v17608_v29, %v4422_v48  ;;  %v3710_v40 = vmax.f32 %v3614_v34, %v14236_v19  ;;  %v3878_v37 = vsel %vm1138_vm0, %v3846_v58, %v3862_v18  ;;  %v4070_v48 = vsel %vm17610_vm9, %v4038_v14, %v4054_v1  ;;  %vm17623_vm9 = vmmov %vm17609_vm14 }
 0x4a9   : > { %v4522_v17 = vsel %vm1989_vm5, %v4470_v35, -inf  ;;  %v4378_v56 = vmax.f32 %v4186_v36, %v4330_v33  ;;  %v3711_v44 = vmax.f32 %v3615_v62, %v14241_v46  ;;  %v14357_v43 = vmax.f32 %v3709_v39, %v14266_v22  ;;  %v17614_v36 = vld [vmem:[#allocation166_spill] sm:$0xff] }
 0x4aa   : > { %v3948_v52 = vsel %vm1370_vm11, %v3878_v37, -inf  ;;  %v14361_v12 = vmax.f32 %v4379_v49, %v4523_v9  ;;  %v14364_v6 = vmax.f32 %v3710_v40, %v14276_v7  ;;  %v4140_v58 = vsel %vm1577_vm2, %v4070_v48, -inf }
 0x4ab   : > { %17611 = vst [vmem:[#allocation104_spill] sm:$0xff] %v14357_v43  ;;  %v3996_v25 = vmax.f32 %v14297_v15, %v3948_v52  ;;  %v14369_v14 = vmax.f32 %v4378_v56, %v4522_v17  ;;  %v14372_v18 = vmax.f32 %v3711_v44, %v17614_v36  ;;  %v3831_v39 = vrot.slane %v14357_v43, 7 }
 0x4ac   : > { %17612 = vst [vmem:[#allocation63_spill] sm:$0xff] %v14361_v12  ;;  %17613 = vst [vmem:[#allocation96_spill] sm:$0xff] %v14364_v6  ;;  %v4023_v1 = vrot.slane %v14357_v43, 6  ;;  %v5045_v49 = vmax.f32 %v4949_v0, %v14361_v12  ;;  %v4215_v11 = vrot.slane %v14357_v43, 2  ;;  %v4231_v29 = vrot.slane %v14364_v6, 2 }
 0x4ad   : > { %17615 = vst [vmem:[#allocation89_spill] sm:$0xff] %v14372_v18  ;;  %v4188_v33 = vmax.f32 %v3996_v25, %v4140_v58  ;;  %v17616_v35 = vmax.f32 %v14260_v3, %v14179_v10  ;;  %v3863_v34 = vrot.slane %v14372_v18, 7  ;;  %v4055_v17 = vrot.slane %v14372_v18, 6 }
 0x4ae   : > { %v4294_v62 = vsel %vm17617_vm10, %v4246_v24, %v4214_v55  ;;  %v4279_v0 = vsel %vm17618_vm1, %v4215_v11, %v4231_v29  ;;  %vm17619_vm8 = vcmp.eq.s32.totalorder %v9849_v47, 1  ;;  %v4407_v37 = vrot.slane %v14357_v43, 1  ;;  %vm17625_vm1 = vmmov %vm17620_vm6 }
 0x4af   : > { %v5044_v9 = vmax.f32 %v17616_v35, %v14369_v14  ;;  %v4332_v40 = vsel %vm17619_vm8, %v4294_v62, -inf  ;;  %v4423_v48 = vrot.slane %v14364_v6, 1  ;;  %v3911_v3 = vsel %vm1138_vm0, %v3863_v34, %v3831_v39  ;;  %vm17626_vm8 = vmmov %vm17625_vm1 }
 0x4b0   : > { %v4103_v44 = vsel %vm17620_vm6, %v4055_v17, %v4023_v1  ;;  %v4333_v55 = vsel %vm1782_vm4, %v4279_v0, -inf  ;;  %vm17621_vm15 = vcmp.eq.s32.totalorder %v17546_v8, 1  ;;  %v4380_v25 = vmax.f32 %v4188_v33, %v4332_v40 }
 0x4b1   : > { %v5128_v56 = vpack.c.bf16 %v5045_v49, %v5044_v9  ;;  %v3949_v24 = vsel %vm17621_vm15, %v3911_v3, -inf  ;;  %v4141_v52 = vsel %vm1575_vm12, %v4103_v44, -inf  ;;  %v4471_v58 = vsel %vm17609_vm14, %v4407_v37, %v4423_v48 }
 0x4b2   : > { %v3997_v49 = vmax.f32 %v14357_v43, %v3949_v24  ;;  %v17622_v35 = vrot.slane %v14282_v53, 1  ;;  %v4525_v62 = vsel %vm1989_vm5, %v4471_v58, -inf  ;;  %v4758_v0 = vmax.f32 %v13747_v38, %v13819_v31 }
 0x4b3   : > { %7285 = vmatprep.mubr.bf16.mxu0 %v5128_v56  ;;  %vm17624_vm10 = vcmp.eq.s32.totalorder %v10279_v30, 1  ;;  %v4759_v40 = vmax.f32 %v13801_v50, %v14048_v61  ;;  %v3847_v56 = vrot.slane %v14364_v6, 7  ;;  %v4039_v3 = vrot.slane %v14364_v6, 6 }
 0x4b4   : > { %v4486_v9 = vsel %vm17623_vm9, %v4438_v60, %v17622_v35  ;;  %v4189_v44 = vmax.f32 %v3997_v49, %v4141_v52  ;;  %v4854_v60 = vmax.f32 %v4758_v0, %v14122_v59  ;;  %v4247_v58 = vrot.slane %v14372_v18, 2 }
 0x4b5   : > { %v4524_v33 = vsel %vm17624_vm10, %v4486_v9, -inf  ;;  %v4855_v35 = vmax.f32 %v4759_v40, %v14179_v10  ;;  %v3879_v38 = vsel %vm1138_vm0, %v3847_v56, %v3863_v34  ;;  %v3895_v9 = vsel %vm1138_vm0, %v3831_v39, %v3847_v56 }
 0x4b6   : > { %v14420_v24 = vmax.f32 %v4380_v25, %v4524_v33  ;;  %v4071_v50 = vsel %vm17625_vm1, %v4039_v3, %v4055_v17  ;;  %v4381_v43 = vmax.f32 %v4189_v44, %v4333_v55  ;;  %v4950_v52 = vmax.f32 %v4854_v60, %v14207_v27 }
 0x4b7   : > { %v3950_v25 = vsel %vm1369_vm13, %v3895_v9, -inf  ;;  %v3951_v49 = vsel %vm1370_vm11, %v3879_v38, -inf  ;;  %v4951_v0 = vmax.f32 %v4855_v35, %v14369_v14  ;;  %v4087_v39 = vsel %vm17626_vm8, %v4023_v1, %v4039_v3 }
 0x4b8   : > { %v3998_v33 = vmax.f32 %v14364_v6, %v3950_v25  ;;  %v3999_v34 = vmax.f32 %v14372_v18, %v3951_v49  ;;  %v14441_v40 = vmax.f32 %v4381_v43, %v4525_v62  ;;  %v5046_v17 = vmax.f32 %v4950_v52, %v14420_v24  ;;  %v17633_v49 = vld [vmem:[#allocation114_spill] sm:$0xff] }
 0x4b9   : > { %v4142_v55 = vsel %vm1576_vm3, %v4087_v39, -inf  ;;  %v4143_v56 = vsel %vm1577_vm2, %v4071_v50, -inf  ;;  %vm17627_vm6 = vcmp.lt.s32.totalorder %v8391_v2, 6  ;;  %vm17629_vm14 = vcmp.eq.s32.totalorder %v16816_v42, 1 }
 0x4ba   : > { %v4190_v44 = vmax.f32 %v3998_v33, %v4142_v55  ;;  %v4191_v60 = vmax.f32 %v3999_v34, %v4143_v56  ;;  %v4263_v35 = vsel %vm17627_vm6, %v4231_v29, %v4247_v58  ;;  %vm17628_vm15 = vmmov %vm17627_vm6  ;;  %v5047_v1 = vmax.f32 %v4951_v0, %v14441_v40  ;;  %v17634_v0 = vld [vmem:[#allocation47_spill] sm:$0xff] }
 0x4bb   : > { %v4295_v38 = vsel %vm17628_vm15, %v4247_v58, %v4215_v11  ;;  %v4334_v43 = vsel %vm17629_vm14, %v4263_v35, -inf  ;;  %vm17630_vm9 = vcmp.eq.s32.totalorder %v9849_v47, 1  ;;  %v4439_v3 = vrot.slane %v14372_v18, 1  ;;  %v17638_v55 = vld [vmem:[#allocation51_spill] sm:$0xff]  ;;  %vm17645_vm6 = vmmov %vm17629_vm14 }
 0x4bc   : > { %v4335_v62 = vsel %vm17630_vm9, %v4295_v38, -inf  ;;  %v4382_v9 = vmax.f32 %v4190_v44, %v4334_v43  ;;  %v4760_v52 = vmax.f32 %v17567_v32, %v14050_v23  ;;  %v4761_v29 = vmax.f32 %v13819_v31, %v14122_v59  ;;  %v17639_v44 = vld [vmem:[#allocation158_spill] sm:$0xff]  ;;  %v17641_v43 = vld [vmem:[#allocation141_spill] sm:$0xff]  ;;  %vm17647_vm15 = vmmov %vm17630_vm9 }
 0x4bd   : > { %v4383_v50 = vmax.f32 %v4191_v60, %v4335_v62  ;;  %v5129_v25 = vpack.c.bf16 %v5047_v1, %v5046_v17  ;;  %vm17631_vm10 = vcmp.lt.s32.totalorder %v8391_v2, 7  ;;  %v5077_v33 = vpack.c.bf16 %v17634_v0, %v17633_v49  ;;  %v17640_v1 = vld [vmem:[#allocation152_spill] sm:$0xff]  ;;  %v17642_v62 = vld [vmem:[#allocation150_spill] sm:$0xff]  ;;  %v17649_v49 = vld [vmem:[#allocation145_spill] sm:$0xff] }
 0x4be   : > { %v4455_v11 = vsel %vm17631_vm10, %v4423_v48, %v4439_v3  ;;  %vm17632_vm1 = vmmov %vm17631_vm10  ;;  %vm17635_vm8 = vcmp.eq.s32.totalorder %v10279_v30, 1  ;;  %v4856_v32 = vmax.f32 %v4760_v52, %v14205_v57  ;;  %v4857_v31 = vmax.f32 %v4761_v29, %v14207_v27  ;;  %v17644_v52 = vld [vmem:[#allocation159_spill] sm:$0xff]  ;;  %v17646_v29 = vld [vmem:[#allocation160_spill] sm:$0xff] }
 0x4bf   : > { %v4487_v58 = vsel %vm17632_vm1, %v4439_v3, %v4407_v37  ;;  %v4526_v34 = vsel %vm1990_vm7, %v4455_v11, -inf  ;;  %7286 = vmatmul.mubr.bf16.gmra.mrb[40].mxu0 %v5129_v25  ;;  %5437 = vmatmul.mubr.bf16.gmra.mrb[68].mxu1 %v5077_v33  ;;  %v17637_v37 = vld [vmem:[#allocation32_spill] sm:$0xff]  ;;  %v3094_v60 = vsel %vm1782_vm4, %v17639_v44, -inf  ;;  %v17643_v3 = vmax.f32 %v17641_v43, %v17642_v62  ;;  %v17648_v11 = vld [vmem:[#allocation155_spill] sm:$0xff]  ;;  %vm17652_vm14 = vmmov %vm17632_vm1 }
 0x4c0   : > { %v4527_v39 = vsel %vm17635_vm8, %v4487_v58, -inf  ;;  %v14474_v17 = vmax.f32 %v4382_v9, %v4526_v34  ;;  %v5102_v56 = vpack.c.bf16 %v17638_v55, %v17637_v37  ;;  %v4952_v35 = vmax.f32 %v4856_v32, %v14361_v12  ;;  %v17654_v32 = vld [vmem:[#allocation144_spill] sm:$0xff]  ;;  %vm17656_vm9 = vmmov %vm17632_vm1 }
 0x4c1   : > { %v14476_v48 = vmax.f32 %v4383_v50, %v4527_v39  ;;  %v4953_v38 = vmax.f32 %v4857_v31, %v14420_v24  ;;  %v2951_v9 = vmax.f32 %v17643_v3, %v17640_v1  ;;  %v3095_v50 = vsel %vm17645_vm6, %v17644_v52, -inf  ;;  %vm17660_vm10 = vmmov %vm17632_vm1 }
 0x4c2   : > { %17636 = vst [vmem:[#allocation67_spill] sm:$0xff] %v14474_v17  ;;  %5444 = vmatprep.mubr.bf16.mxu1 %v5102_v56  ;;  %v3096_v25 = vsel %vm17647_vm15, %v17646_v29, -inf  ;;  %v3142_v58 = vmax.f32 %v17648_v11, %v3094_v60  ;;  %v17650_v0 = vrot.slane %v17649_v49, 1  ;;  %v17651_v33 = vrot.slane %v17641_v43, 1  ;;  %v17657_v60 = vld [vmem:[#allocation156_spill] sm:$0xff]  ;;  %vm17661_vm1 = vmmov %vm17635_vm8 }
 0x4c3   : > { %v17655_v31 = vrot.slane %v17654_v32, 1  ;;  %v5048_v55 = vmax.f32 %v4952_v35, %v14474_v17  ;;  %v5049_v56 = vmax.f32 %v4953_v38, %v14476_v48  ;;  %v3143_v44 = vmax.f32 %v2951_v9, %v3095_v50 }
 0x4c4   : > { %v3210_v34 = vsel %vm17652_vm14, %v17651_v33, %v17650_v0  ;;  %v17653_v39 = vmov %v17651_v33  ;;  %v3144_v1 = vmax.f32 %v17657_v60, %v3096_v25  ;;  %v17659_v3 = vmov %v17650_v0  ;;  %v17662_v33 = vld [vmem:[#allocation50_spill] sm:$0xff] }
 0x4c5   : > { %v3226_v37 = vsel %vm17656_vm9, %v17655_v31, %v17653_v39  ;;  %v17658_v62 = vmov %v17655_v31  ;;  %v3287_v11 = vsel %vm1990_vm7, %v3210_v34, -inf  ;;  %v3520_v35 = vmax.f32 %v13903_v4, %v14056_v26  ;;  %v17663_v31 = vld [vmem:[#allocation100_spill] sm:$0xff] }
 0x4c6   : > { %v3242_v52 = vsel %vm17660_vm10, %v17659_v3, %v17658_v62  ;;  %v3286_v29 = vsel %vm1989_vm5, %v3226_v37, -inf  ;;  %v5130_v38 = vpack.c.bf16 %v5049_v56, %v5048_v55  ;;  %v14527_v25 = vmax.f32 %v3143_v44, %v3287_v11  ;;  %v17664_v55 = vld [vmem:[#allocation149_spill] sm:$0xff]  ;;  %v17665_v44 = vld [vmem:[#allocation140_spill] sm:$0xff] }
 0x4c7   : > { %v3288_v9 = vsel %vm17661_vm1, %v3242_v52, -inf  ;;  %v14525_v50 = vmax.f32 %v3142_v58, %v3286_v29  ;;  %v3521_v39 = vmax.f32 %v17662_v33, %v14058_v41  ;;  %v3522_v37 = vmax.f32 %v17663_v31, %v14063_v51 }
 0x4c8   : > { %v14529_v0 = vmax.f32 %v3144_v1, %v3288_v9  ;;  %v3616_v34 = vmax.f32 %v3520_v35, %v14234_v63  ;;  %7289 = vmatprep.mubr.bf16.mxu0 %v5130_v38  ;;  %v4762_v4 = vmax.f32 %v14048_v61, %v14179_v10  ;;  %v4763_v58 = vmax.f32 %v14050_v23, %v14205_v57  ;;  %v17667_v1 = vld [vmem:[#allocation142_spill] sm:$0xff]  ;;  %v17671_v9 = vld [vmem:[#allocation143_spill] sm:$0xff] }
 0x4c9   : > { %v2714_v56 = vsel %vm1369_vm13, %v17664_v55, -inf  ;;  %v17666_v60 = vrot.slane %v17665_v44, 6  ;;  %v17668_v62 = vrot.slane %v17667_v1, 6  ;;  %vm17669_vm8 = vcmp.lt.s32.totalorder %v8391_v2, 2 }
 0x4ca   : > { %v3617_v52 = vmax.f32 %v3521_v39, %v14236_v19  ;;  %v3618_v29 = vmax.f32 %v3522_v37, %v14241_v46  ;;  %v3712_v61 = vmax.f32 %v3616_v34, %v14266_v22  ;;  %v2762_v11 = vmax.f32 %v17665_v44, %v2714_v56  ;;  %vm17673_vm6 = vmmov %vm17669_vm8 }
 0x4cb   : > { %v2843_v3 = vsel %vm17669_vm8, %v17668_v62, %v17666_v60  ;;  %v14554_v23 = vmax.f32 %v4762_v4, %v14369_v14  ;;  %v14557_v35 = vmax.f32 %v4763_v58, %v14361_v12  ;;  %v17670_v38 = vmov %v17668_v62  ;;  %v17675_v60 = vld [vmem:[#allocation151_spill] sm:$0xff]  ;;  %vm17685_vm9 = vmmov %vm17673_vm6 }
 0x4cc   : > { %v17672_v33 = vrot.slane %v17671_v9, 6  ;;  %v2906_v39 = vsel %vm1576_vm3, %v2843_v3, -inf  ;;  %v3713_v37 = vmax.f32 %v3617_v52, %v14276_v7  ;;  %v3714_v34 = vmax.f32 %v3618_v29, %v17614_v36  ;;  %vm17686_vm10 = vmmov %vm17673_vm6 }
 0x4cd   : > { %v14570_v4 = vmax.f32 %v3712_v61, %v14525_v50  ;;  %v4954_v55 = vmax.f32 %v14554_v23, %v14441_v40  ;;  %v4955_v56 = vmax.f32 %v14557_v35, %v14474_v17  ;;  %v17676_v62 = vmax.f32 %v17667_v1, %v17675_v60 }
 0x4ce   : > { %v2859_v31 = vsel %vm17673_vm6, %v17672_v33, %v17670_v38  ;;  %v2954_v38 = vmax.f32 %v2762_v11, %v2906_v39  ;;  %v14582_v52 = vmax.f32 %v3713_v37, %v14527_v25  ;;  %v14585_v29 = vmax.f32 %v3714_v34, %v14529_v0 }
 0x4cf   : > { %17674 = vst [vmem:[#allocation23_spill] sm:$0xff] %v14570_v4  ;;  %v2905_v58 = vsel %vm1575_vm12, %v2859_v31, -inf  ;;  %v3832_v61 = vrot.slane %v14570_v4, 7  ;;  %v4024_v33 = vrot.slane %v14570_v4, 6  ;;  %v17679_v35 = vrot.slane %v17671_v9, 2 }
 0x4d0   : > { %v2953_v3 = vmax.f32 %v17676_v62, %v2905_v58  ;;  %17677 = vst [vmem:[#allocation108_spill] sm:$0xff] %v14582_v52  ;;  %17678 = vst [vmem:[#allocation26_spill] sm:$0xff] %v14585_v29  ;;  %v17680_v60 = vrot.slane %v17665_v44, 2  ;;  %vm17681_vm15 = vcmp.lt.s32.totalorder %v8391_v2, 6  ;;  %v17683_v37 = vrot.slane %v17667_v1, 2 }
 0x4d1   : > { %vm17684_vm14 = vmmov %vm17681_vm15  ;;  %v3848_v58 = vrot.slane %v14582_v52, 7  ;;  %v3864_v62 = vrot.slane %v14585_v29, 7  ;;  %v4040_v31 = vrot.slane %v14582_v52, 6  ;;  %v4056_v23 = vrot.slane %v14585_v29, 6 }
 0x4d2   : > { %v3019_v11 = vsel %vm17681_vm15, %v17680_v60, %v17679_v35  ;;  %v17682_v39 = vmov %v17680_v60  ;;  %v4232_v49 = vrot.slane %v14582_v52, 2  ;;  %v4248_v43 = vrot.slane %v14585_v29, 2  ;;  %vm17688_vm8 = vmmov %vm17684_vm14 }
 0x4d3   : > { %v3035_v34 = vsel %vm17684_vm14, %v17683_v37, %v17682_v39  ;;  %v4424_v35 = vrot.slane %v14582_v52, 1  ;;  %v4440_v60 = vrot.slane %v14585_v29, 1  ;;  %v3896_v32 = vsel %vm1138_vm0, %v3832_v61, %v3848_v58  ;;  %vm17690_vm6 = vmmov %vm17688_vm8 }
 0x4d4   : > { %v3912_v39 = vsel %vm1138_vm0, %v3864_v62, %v3832_v61  ;;  %v4088_v37 = vsel %vm17685_vm9, %v4024_v33, %v4040_v31  ;;  %v4104_v18 = vsel %vm17686_vm10, %v4056_v23, %v4024_v33  ;;  %vm17687_vm1 = vcmp.eq.s32.totalorder %v17546_v8, 1 }
 0x4d5   : > { %v3952_v6 = vsel %vm17687_vm1, %v3912_v39, -inf  ;;  %v3953_v15 = vsel %vm1369_vm13, %v3896_v32, -inf  ;;  %v4144_v53 = vsel %vm1575_vm12, %v4104_v18, -inf  ;;  %v4145_v17 = vsel %vm1576_vm3, %v4088_v37, -inf }
 0x4d6   : > { %v4000_v61 = vmax.f32 %v14570_v4, %v3952_v6  ;;  %v4001_v57 = vmax.f32 %v14582_v52, %v3953_v15  ;;  %v4264_v12 = vsel %vm17688_vm8, %v4232_v49, %v4248_v43  ;;  %v17689_v33 = vrot.slane %v14570_v4, 2 }
 0x4d7   : > { %vm17691_vm15 = vcmp.eq.s32.totalorder %v16816_v42, 1  ;;  %vm17692_vm14 = vcmp.lt.s32.totalorder %v8391_v2, 7  ;;  %v17693_v6 = vrot.slane %v14570_v4, 1  ;;  %vm17697_vm1 = vcmp.eq.s32.totalorder %v9849_v47, 1 }
 0x4d8   : > { %v4280_v39 = vsel %vm17690_vm6, %v17689_v33, %v4232_v49  ;;  %v4337_v18 = vsel %vm17691_vm15, %v4264_v12, -inf  ;;  %v4456_v37 = vsel %vm17692_vm14, %v4424_v35, %v4440_v60  ;;  %vm17694_vm9 = vmmov %vm17692_vm14  ;;  %v4192_v52 = vmax.f32 %v4000_v61, %v4144_v53 }
 0x4d9   : > { %v4336_v32 = vsel %vm1782_vm4, %v4280_v39, -inf  ;;  %v4472_v15 = vsel %vm17694_vm9, %v17693_v6, %v4424_v35  ;;  %v4193_v13 = vmax.f32 %v4001_v57, %v4145_v17  ;;  %v4529_v49 = vsel %vm1990_vm7, %v4456_v37, -inf  ;;  %vm17695_vm10 = vmmov %vm17691_vm15  ;;  %v17696_v39 = vld [vmem:[#allocation161_spill] sm:$0xff] }
 0x4da   : > { %v4528_v28 = vsel %vm1989_vm5, %v4472_v15, -inf  ;;  %v3097_v33 = vsel %vm1782_vm4, %v3035_v34, -inf  ;;  %v3098_v12 = vsel %vm17695_vm10, %v3019_v11, -inf  ;;  %v3099_v54 = vsel %vm17697_vm1, %v17696_v39, -inf  ;;  %v17698_v6 = vld [vmem:[#allocation157_spill] sm:$0xff]  ;;  %vm17700_vm8 = vmmov %vm17694_vm9 }
 0x4db   : > { %v3179_v35 = vrot.slane %v17665_v44, 1  ;;  %v4384_v53 = vmax.f32 %v4192_v52, %v4336_v32  ;;  %v4385_v57 = vmax.f32 %v4193_v13, %v4337_v18  ;;  %v3145_v17 = vmax.f32 %v2953_v3, %v3097_v33  ;;  %vm17702_vm6 = vmmov %vm17700_vm8 }
 0x4dc   : > { %v3146_v61 = vmax.f32 %v2954_v38, %v3098_v12  ;;  %v3147_v15 = vmax.f32 %v17698_v6, %v3099_v54  ;;  %v17699_v37 = vrot.slane %v17671_v9, 1  ;;  %v17701_v42 = vrot.slane %v17667_v1, 1  ;;  %vm17705_vm15 = vmmov %vm17702_vm6 }
 0x4dd   : > { %v14672_v3 = vmax.f32 %v4384_v53, %v4528_v28  ;;  %v14674_v54 = vmax.f32 %v4385_v57, %v4529_v49  ;;  %vm17706_vm14 = vcmp.eq.s32.totalorder %v10279_v30, 1  ;;  %v3524_v12 = vmax.f32 %v14058_v41, %v14236_v19 }
 0x4de   : > { %v3211_v34 = vsel %vm17700_vm8, %v3179_v35, %v17699_v37  ;;  %v3227_v11 = vsel %vm17702_vm6, %v17701_v42, %v3179_v35  ;;  %v17703_v39 = vmov %v17701_v42  ;;  %v17704_v44 = vmov %v17699_v37  ;;  %vm17711_vm8 = vmmov %vm17702_vm6 }
 0x4df   : > { %v3243_v13 = vsel %vm17705_vm15, %v17704_v44, %v17703_v39  ;;  %v3289_v38 = vsel %vm1989_vm5, %v3227_v11, -inf  ;;  %v3290_v52 = vsel %vm1990_vm7, %v3211_v34, -inf  ;;  %v3523_v44 = vmax.f32 %v14056_v26, %v14234_v63  ;;  %vm17713_vm6 = vmmov %vm17706_vm14 }
 0x4e0   : > { %v3291_v42 = vsel %vm17706_vm14, %v3243_v13, -inf  ;;  %v14682_v32 = vmax.f32 %v3145_v17, %v3289_v38  ;;  %v14684_v18 = vmax.f32 %v3146_v61, %v3290_v52  ;;  %v5050_v28 = vmax.f32 %v4954_v55, %v14672_v3  ;;  %vm17718_vm14 = vmmov %vm17711_vm8 }
 0x4e1   : > { %v5051_v49 = vmax.f32 %v4955_v56, %v14674_v54  ;;  %v14690_v33 = vmax.f32 %v3147_v15, %v3291_v42  ;;  %v3525_v35 = vmax.f32 %v14063_v51, %v14241_v46  ;;  %v3619_v53 = vmax.f32 %v3523_v44, %v14266_v22  ;;  %v17714_v42 = vld [vmem:[#allocation39_spill] sm:$0xff] }
 0x4e2   : > { %v3880_v57 = vsel %vm1138_vm0, %v3848_v58, %v3864_v62  ;;  %vm17707_vm9 = vcmp.lt.s32.totalorder %v8391_v2, 2  ;;  %v3620_v55 = vmax.f32 %v3524_v12, %v14276_v7  ;;  %v17708_v58 = vrot.slane %v14570_v4, 2  ;;  %v17715_v44 = vld [vmem:[#allocation115_spill] sm:$0xff] }
 0x4e3   : > { %v4072_v26 = vsel %vm17707_vm9, %v4040_v31, %v4056_v23  ;;  %v5131_v17 = vpack.c.bf16 %v5051_v49, %v5050_v28  ;;  %v3954_v56 = vsel %vm1370_vm11, %v3880_v57, -inf  ;;  %v3621_v61 = vmax.f32 %v3525_v35, %v17614_v36 }
 0x4e4   : > { %v4146_v41 = vsel %vm1577_vm2, %v4072_v26, -inf  ;;  %v3715_v51 = vmax.f32 %v3619_v53, %v14525_v50  ;;  %v4002_v6 = vmax.f32 %v14585_v29, %v3954_v56  ;;  %vm17709_vm10 = vcmp.lt.s32.totalorder %v8391_v2, 6  ;;  %v17748_v29 = vld [vmem:[#allocation113_spill] sm:$0xff] }
 0x4e5   : > { %v4296_v23 = vsel %vm17709_vm10, %v4248_v43, %v17708_v58  ;;  %7290 = vmatmul.mubr.bf16.gmra.mrb[44].mxu0 %v5131_v17  ;;  %v3716_v31 = vmax.f32 %v3620_v55, %v14527_v25  ;;  %v17710_v15 = vrot.slane %v14570_v4, 1  ;;  %v4764_v34 = vmax.f32 %v14122_v59, %v14207_v27  ;;  %vm17717_vm15 = vmmov %vm17709_vm10  ;;  %v17719_v58 = vld [vmem:[#allocation117_spill] sm:$0xff] }
 0x4e6   : > { %v4338_v62 = vsel %vm17697_vm1, %v4296_v23, -inf  ;;  %v3717_v11 = vmax.f32 %v3621_v61, %v14529_v0  ;;  %v14724_v39 = vmax.f32 %v3715_v51, %v14682_v32  ;;  %v4194_v43 = vmax.f32 %v4002_v6, %v4146_v41  ;;  %v17720_v23 = vld [vmem:[#allocation111_spill] sm:$0xff]  ;;  %vm17725_vm1 = vmmov %vm17707_vm9  ;;  %v17749_v4 = vld [vmem:[#allocation77_spill] sm:$0xff] }
 0x4e7   : > { %v4488_v37 = vsel %vm17711_vm8, %v4440_v60, %v17710_v15  ;;  %v14729_v38 = vmax.f32 %v3716_v31, %v14684_v18  ;;  %v4765_v52 = vmax.f32 %v14179_v10, %v14369_v14  ;;  %v4860_v60 = vmax.f32 %v4764_v34, %v14420_v24  ;;  %vm17727_vm8 = vmmov %vm17725_vm1 }
 0x4e8   : > { %17712 = vst [vmem:[#allocation121_spill] sm:$0xff] %v14724_v39  ;;  %v4530_v13 = vsel %vm17713_vm6, %v4488_v37, -inf  ;;  %v5078_v59 = vpack.c.bf16 %v17715_v44, %v17714_v42  ;;  %v14737_v28 = vmax.f32 %v3717_v11, %v14690_v33  ;;  %v3833_v49 = vrot.slane %v14724_v39, 7  ;;  %vm17729_vm6 = vmmov %vm17717_vm15 }
 0x4e9   : > { %v4025_v12 = vrot.slane %v14724_v39, 6  ;;  %v4217_v35 = vrot.slane %v14724_v39, 2  ;;  %v4233_v53 = vrot.slane %v14729_v38, 2  ;;  %v4386_v57 = vmax.f32 %v4194_v43, %v4338_v62 }
 0x4ea   : > { %17716 = vst [vmem:[#allocation123_spill] sm:$0xff] %v14737_v28  ;;  %v4409_v26 = vrot.slane %v14724_v39, 1  ;;  %v4425_v10 = vrot.slane %v14729_v38, 1  ;;  %5445 = vmatmul.mubr.bf16.gmra.mrb[72].mxu1 %v5078_v59  ;;  %v3865_v17 = vrot.slane %v14737_v28, 7  ;;  %v4057_v55 = vrot.slane %v14737_v28, 6 }
 0x4eb   : > { %v4861_v56 = vmax.f32 %v4765_v52, %v14441_v40  ;;  %v4956_v41 = vmax.f32 %v4860_v60, %v14476_v48  ;;  %v4281_v61 = vsel %vm17717_vm15, %v4217_v35, %v4233_v53  ;;  %v14753_v6 = vmax.f32 %v4386_v57, %v4530_v13  ;;  %vm17730_vm15 = vmmov %vm17729_vm6 }
 0x4ec   : > { %v4473_v51 = vsel %vm17718_vm14, %v4409_v26, %v4425_v10  ;;  %v5103_v31 = vpack.c.bf16 %v17720_v23, %v17719_v58  ;;  %v3913_v62 = vsel %vm1138_vm0, %v3865_v17, %v3833_v49  ;;  %v4105_v15 = vsel %vm17707_vm9, %v4057_v55, %v4025_v12  ;;  %v17724_v58 = vld [vmem:[#allocation106_spill] sm:$0xff]  ;;  %vm17731_vm9 = vmmov %vm17718_vm14 }
 0x4ed   : > { %v4339_v37 = vsel %vm1782_vm4, %v4281_v61, -inf  ;;  %v4531_v34 = vsel %vm1989_vm5, %v4473_v51, -inf  ;;  %vm17721_vm10 = vcmp.eq.s32.totalorder %v17546_v8, 1  ;;  %v4147_v13 = vsel %vm1575_vm12, %v4105_v15, -inf  ;;  %v17723_v51 = vld [vmem:[#allocation63_spill] sm:$0xff] }
 0x4ee   : > { %v3955_v11 = vsel %vm17721_vm10, %v3913_v62, -inf  ;;  %v4957_v52 = vmax.f32 %v4861_v56, %v14672_v3  ;;  %v5052_v60 = vmax.f32 %v4956_v41, %v14753_v6  ;;  %5452 = vmatprep.mubr.bf16.mxu1 %v5103_v31  ;;  %v3849_v44 = vrot.slane %v14729_v38, 7 }
 0x4ef   : > { %v4003_v42 = vmax.f32 %v14724_v39, %v3955_v11  ;;  %v4041_v59 = vrot.slane %v14729_v38, 6  ;;  %v4249_v57 = vrot.slane %v14737_v28, 2  ;;  %v4441_v61 = vrot.slane %v14737_v28, 1 }
 0x4f0   : > { %v4766_v23 = vmax.f32 %v17724_v58, %v17723_v51  ;;  %v4767_v62 = vmax.f32 %v14207_v27, %v14420_v24  ;;  %v3526_v56 = vmax.f32 %v14234_v63, %v14266_v22  ;;  %v3881_v31 = vsel %vm1138_vm0, %v3849_v44, %v3865_v17 }
 0x4f1   : > { %v4195_v41 = vmax.f32 %v4003_v42, %v4147_v13  ;;  %v3897_v15 = vsel %vm1138_vm0, %v3833_v49, %v3849_v44  ;;  %v4073_v11 = vsel %vm17725_vm1, %v4041_v59, %v4057_v55  ;;  %v3957_v58 = vsel %vm1370_vm11, %v3881_v31, -inf }
 0x4f2   : > { %v3956_v1 = vsel %vm1369_vm13, %v3897_v15, -inf  ;;  %v4089_v27 = vsel %vm17727_vm8, %v4025_v12, %v4041_v59  ;;  %v4149_v63 = vsel %vm1577_vm2, %v4073_v11, -inf  ;;  %v4005_v49 = vmax.f32 %v14737_v28, %v3957_v58  ;;  %v17732_v15 = vld [vmem:[#allocation83_spill] sm:$0xff] }
 0x4f3   : > { %v4387_v13 = vmax.f32 %v4195_v41, %v4339_v37  ;;  %v4004_v17 = vmax.f32 %v14729_v38, %v3956_v1  ;;  %v4148_v55 = vsel %vm1576_vm3, %v4089_v27, -inf  ;;  %v4265_v44 = vsel %vm17729_vm6, %v4233_v53, %v4249_v57 }
 0x4f4   : > { %v4297_v31 = vsel %vm17730_vm15, %v4249_v57, %v4217_v35  ;;  %v4457_v12 = vsel %vm17718_vm14, %v4425_v10, %v4441_v61  ;;  %v4489_v59 = vsel %vm17731_vm9, %v4441_v61, %v4409_v26  ;;  %v4197_v41 = vmax.f32 %v4005_v49, %v4149_v63  ;;  %v17736_v10 = vld [vmem:[#allocation67_spill] sm:$0xff] }
 0x4f5   : > { %v14808_v37 = vmax.f32 %v4387_v13, %v4531_v34  ;;  %v4196_v1 = vmax.f32 %v4004_v17, %v4148_v55  ;;  %vm17733_vm10 = vcmp.eq.s32.totalorder %v17732_v15, 1  ;;  %vm17734_vm1 = vcmp.eq.s32.totalorder %v9849_v47, 1 }
 0x4f6   : > { %v4340_v11 = vsel %vm17733_vm10, %v4265_v44, -inf  ;;  %v4341_v58 = vsel %vm17734_vm1, %v4297_v31, -inf  ;;  %v4532_v53 = vsel %vm1990_vm7, %v4457_v12, -inf  ;;  %vm17735_vm8 = vcmp.eq.s32.totalorder %v10279_v30, 1 }
 0x4f7   : > { %v4533_v35 = vsel %vm17735_vm8, %v4489_v59, -inf  ;;  %v4862_v57 = vmax.f32 %v4766_v23, %v17736_v10  ;;  %v5053_v26 = vmax.f32 %v4957_v52, %v14808_v37  ;;  %v4388_v34 = vmax.f32 %v4196_v1, %v4340_v11  ;;  %v17737_v59 = vld [vmem:[#allocation73_spill] sm:$0xff]  ;;  %v17738_v1 = vld [vmem:[#allocation79_spill] sm:$0xff] }
 0x4f8   : > { %v4389_v61 = vmax.f32 %v4197_v41, %v4341_v58  ;;  %v4863_v27 = vmax.f32 %v4767_v62, %v14476_v48  ;;  %v3527_v13 = vmax.f32 %v14236_v19, %v14276_v7  ;;  %v3528_v17 = vmax.f32 %v14241_v46, %v17614_v36 }
 0x4f9   : > { %v4958_v63 = vmax.f32 %v4862_v57, %v14674_v54  ;;  %v3622_v49 = vmax.f32 %v3526_v56, %v14525_v50  ;;  %v5132_v55 = vpack.c.bf16 %v5053_v26, %v5052_v60  ;;  %v14827_v44 = vmax.f32 %v4388_v34, %v4532_v53 }
 0x4fa   : > { %v14829_v23 = vmax.f32 %v4389_v61, %v4533_v35  ;;  %v4959_v52 = vmax.f32 %v4863_v27, %v14753_v6  ;;  %v3623_v31 = vmax.f32 %v3527_v13, %v14527_v25  ;;  %v3624_v62 = vmax.f32 %v3528_v17, %v14529_v0 }
 0x4fb   : > { %v14835_v12 = vmax.f32 %v3622_v49, %v14682_v32  ;;  %v4768_v19 = vmax.f32 %v14369_v14, %v14441_v40  ;;  %7293 = vmatprep.mubr.bf16.mxu0 %v5132_v55  ;;  %v5054_v46 = vmax.f32 %v4958_v63, %v14827_v44  ;;  %v4769_v56 = vmax.f32 %v17723_v51, %v17736_v10 }
 0x4fc   : > { %v5055_v60 = vmax.f32 %v4959_v52, %v14829_v23  ;;  %v5079_v41 = vpack.c.bf16 %v17738_v1, %v17737_v59  ;;  %v14846_v11 = vmax.f32 %v3623_v31, %v14684_v18  ;;  %v14849_v58 = vmax.f32 %v3624_v62, %v14690_v33 }
 0x4fd   : > { %v3834_v53 = vrot.slane %v14835_v12, 7  ;;  %v4026_v14 = vrot.slane %v14835_v12, 6  ;;  %v4218_v57 = vrot.slane %v14835_v12, 2  ;;  %v4410_v26 = vrot.slane %v14835_v12, 1 }
 0x4fe   : > { %17739 = vst [vmem:[#allocation122_spill] sm:$0xff] %v14846_v11  ;;  %v5133_v35 = vpack.c.bf16 %v5055_v60, %v5054_v46  ;;  %v4864_v51 = vmax.f32 %v4768_v19, %v14672_v3  ;;  %5453 = vmatmul.mubr.bf16.gmra.mrb[76].mxu1 %v5079_v41  ;;  %v3850_v34 = vrot.slane %v14846_v11, 7  ;;  %v3866_v61 = vrot.slane %v14849_v58, 7 }
 0x4ff   : > { %v4042_v27 = vrot.slane %v14846_v11, 6  ;;  %v4058_v63 = vrot.slane %v14849_v58, 6  ;;  %v4234_v13 = vrot.slane %v14846_v11, 2  ;;  %v4250_v17 = vrot.slane %v14849_v58, 2 }
 0x500   : > { %7294 = vmatmul.mubr.bf16.gmra.mrb[48].mxu0 %v5133_v35  ;;  %v4426_v49 = vrot.slane %v14846_v11, 1  ;;  %v16173_v55 = vrot.slane %v14849_v58, 1  ;;  %v3898_v52 = vsel %vm1138_vm0, %v3834_v53, %v3850_v34  ;;  %v3914_v31 = vsel %vm1138_vm0, %v3866_v61, %v3834_v53 }
 0x501   : > { %vm17740_vm6 = vcmp.lt.s32.totalorder %v8391_v2, 2  ;;  %vm17742_vm14 = vcmp.eq.s32.totalorder %v17546_v8, 1  ;;  %v3959_v60 = vsel %vm1369_vm13, %v3898_v52, -inf  ;;  %vm17743_vm9 = vcmp.lt.s32.totalorder %v8391_v2, 6 }
 0x502   : > { %v4090_v62 = vsel %vm17740_vm6, %v4026_v14, %v4042_v27  ;;  %vm17741_vm15 = vmmov %vm17740_vm6  ;;  %v3958_v46 = vsel %vm17742_vm14, %v3914_v31, -inf  ;;  %v4007_v53 = vmax.f32 %v14846_v11, %v3959_v60  ;;  %v4266_v35 = vsel %vm17743_vm9, %v4234_v13, %v4250_v17 }
 0x503   : > { %v4106_v19 = vsel %vm17741_vm15, %v4058_v63, %v4026_v14  ;;  %v4151_v1 = vsel %vm1576_vm3, %v4090_v62, -inf  ;;  %v4006_v41 = vmax.f32 %v14835_v12, %v3958_v46  ;;  %vm17744_vm10 = vmmov %vm17743_vm9  ;;  %vm17745_vm1 = vcmp.eq.s32.totalorder %v17732_v15, 1 }
 0x504   : > { %v4150_v59 = vsel %vm1575_vm12, %v4106_v19, -inf  ;;  %v4282_v14 = vsel %vm17744_vm10, %v4218_v57, %v4234_v13  ;;  %v4343_v52 = vsel %vm17745_vm1, %v4266_v35, -inf  ;;  %vm17746_vm8 = vcmp.lt.s32.totalorder %v8391_v2, 7  ;;  %vm17750_vm14 = vmmov %vm17743_vm9 }
 0x505   : > { %v4342_v31 = vsel %vm1782_vm4, %v4282_v14, -inf  ;;  %v4458_v62 = vsel %vm17746_vm8, %v4426_v49, %v16173_v55  ;;  %vm17747_vm6 = vmmov %vm17746_vm8  ;;  %v4198_v46 = vmax.f32 %v4006_v41, %v4150_v59  ;;  %v4199_v60 = vmax.f32 %v4007_v53, %v4151_v1 }
 0x506   : > { %v4474_v19 = vsel %vm17747_vm6, %v4410_v26, %v4426_v49  ;;  %v4535_v14 = vsel %vm1990_vm7, %v4458_v62, -inf  ;;  %v4865_v35 = vmax.f32 %v4769_v56, %v14674_v54  ;;  %v4960_v39 = vmax.f32 %v4864_v51, %v14808_v37  ;;  %vm17753_vm1 = vmmov %vm17741_vm15 }
 0x507   : > { %v4534_v13 = vsel %vm1989_vm5, %v4474_v19, -inf  ;;  %v5104_v55 = vpack.c.bf16 %v17749_v4, %v17748_v29  ;;  %v3529_v11 = vmax.f32 %v14266_v22, %v14525_v50  ;;  %v4390_v28 = vmax.f32 %v4198_v46, %v4342_v31  ;;  %vm17754_vm8 = vmmov %vm17750_vm14  ;;  %v14962_v19 = vpop.f32.mrb[32].mxu1  ;;  %v14964_v46 = vpop.f32.mrb[16].mxu0 }
 0x508   : > { %v4391_v49 = vmax.f32 %v4199_v60, %v4343_v52  ;;  %v3530_v59 = vmax.f32 %v14276_v7, %v14527_v25  ;;  %v3531_v1 = vmax.f32 %v17614_v36, %v14529_v0  ;;  %v4961_v41 = vmax.f32 %v4865_v35, %v14827_v44  ;;  %v5368_v35 = vpop.f32.mrb[33].mxu1 }
 0x509   : > { %5460 = vmatprep.mubr.bf16.mxu1 %v5104_v55  ;;  %v14914_v56 = vmax.f32 %v3529_v11, %v14682_v32  ;;  %v3882_v4 = vsel %vm1138_vm0, %v3850_v34, %v3866_v61  ;;  %v4074_v22 = vsel %vm17741_vm15, %v4042_v27, %v4058_v63  ;;  %v14920_v50 = vmax.f32 %v4390_v28, %v4534_v13 }
 0x50a   : > { %v14922_v29 = vmax.f32 %v4391_v49, %v4535_v14  ;;  %v14925_v7 = vmax.f32 %v3530_v59, %v14684_v18  ;;  %v14928_v36 = vmax.f32 %v3531_v1, %v14690_v33  ;;  %v3960_v0 = vsel %vm1370_vm11, %v3882_v4, -inf  ;;  %v14971_v49 = vpop.f32.mrb[17].mxu0  ;;  %v14984_v4 = vpop.f32.mrb[34].mxu1 }
 0x50b   : > { %v3835_v25 = vrot.slane %v14914_v56, 7  ;;  %v4027_v32 = vrot.slane %v14914_v56, 6  ;;  %v4152_v11 = vsel %vm1577_vm2, %v4074_v22, -inf  ;;  %v5056_v28 = vmax.f32 %v4960_v39, %v14920_v50  ;;  %v14986_v22 = vpop.f32.mrb[18].mxu0 }
 0x50c   : > { %v5057_v51 = vmax.f32 %v4961_v41, %v14922_v29  ;;  %v3867_v18 = vrot.slane %v14928_v36, 7  ;;  %v4008_v34 = vmax.f32 %v14849_v58, %v3960_v0  ;;  %v4059_v33 = vrot.slane %v14928_v36, 6 }
 0x50d   : > { %v4219_v61 = vrot.slane %v14914_v56, 2  ;;  %v4235_v27 = vrot.slane %v14925_v7, 2  ;;  %v4298_v63 = vsel %vm17750_vm14, %v4250_v17, %v4218_v57  ;;  %vm17751_vm9 = vcmp.eq.s32.totalorder %v9849_v47, 1 }
 0x50e   : > { %v5134_v55 = vpack.c.bf16 %v5057_v51, %v5056_v28  ;;  %v3915_v53 = vsel %vm1138_vm0, %v3867_v18, %v3835_v25  ;;  %v4200_v39 = vmax.f32 %v4008_v34, %v4152_v11  ;;  %v4344_v31 = vsel %vm17751_vm9, %v4298_v63, -inf  ;;  %v5371_v34 = vpop.f32.mrb[35].mxu1 }
 0x50f   : > { %vm17752_vm10 = vcmp.eq.s32.totalorder %v17546_v8, 1  ;;  %v4107_v62 = vsel %vm17753_vm1, %v4059_v33, %v4027_v32  ;;  %v4283_v57 = vsel %vm17754_vm8, %v4219_v61, %v4235_v27  ;;  %v4411_v17 = vrot.slane %v14914_v56, 1 }
 0x510   : > { %v3961_v52 = vsel %vm17752_vm10, %v3915_v53, -inf  ;;  %7297 = vmatprep.mubr.bf16.mxu0 %v5134_v55  ;;  %v4153_v60 = vsel %vm1575_vm12, %v4107_v62, -inf  ;;  %v4345_v13 = vsel %vm1782_vm4, %v4283_v57, -inf  ;;  %v4392_v14 = vmax.f32 %v4200_v39, %v4344_v31  ;;  %vm17757_vm4 = vmmov %vm17747_vm6  ;;  %v15002_v53 = vpop.f32.mrb[36].mxu1 }
 0x511   : > { %v4009_v8 = vmax.f32 %v14914_v56, %v3961_v52  ;;  %v4427_v59 = vrot.slane %v14925_v7, 1  ;;  %v17755_v1 = vrot.slane %v14849_v58, 1  ;;  %v4770_v43 = vmax.f32 %v14420_v24, %v14476_v48  ;;  %vm17764_vm15 = vmmov %vm17757_vm4 }
 0x512   : > { %v4771_v5 = vmax.f32 %v14441_v40, %v14672_v3  ;;  %vm17756_vm12 = vcmp.eq.s32.totalorder %v10279_v30, 1  ;;  %v3851_v28 = vrot.slane %v14925_v7, 7  ;;  %v4043_v51 = vrot.slane %v14925_v7, 6  ;;  %vm17765_vm14 = vmmov %vm17757_vm4 }
 0x513   : > { %v4490_v41 = vsel %vm17747_vm6, %v17755_v1, %v4410_v26  ;;  %v4201_v0 = vmax.f32 %v4009_v8, %v4153_v60  ;;  %v14992_v26 = vpop.f32.mrb[19].mxu0  ;;  %v4475_v24 = vsel %vm17757_vm4, %v4411_v17, %v4427_v59  ;;  %v4866_v63 = vmax.f32 %v4770_v43, %v14753_v6  ;;  %v5376_v8 = vpop.f32.mrb[37].mxu1 }
 0x514   : > { %v4536_v11 = vsel %vm17756_vm12, %v4490_v41, -inf  ;;  %v4867_v55 = vmax.f32 %v4771_v5, %v14808_v37  ;;  %v15004_v39 = vpop.f32.mrb[20].mxu0  ;;  %v4537_v52 = vsel %vm1989_vm5, %v4475_v24, -inf  ;;  %v3883_v62 = vsel %vm1138_vm0, %v3851_v28, %v3867_v18  ;;  %vm17763_vm5 = vmmov %vm17751_vm9 }
 0x515   : > { %v14998_v40 = vmax.f32 %v4392_v14, %v4536_v11  ;;  %v4393_v31 = vmax.f32 %v4201_v0, %v4345_v13  ;;  %v3899_v57 = vsel %vm1138_vm0, %v3835_v25, %v3851_v28  ;;  %v15012_v60 = vpop.f32.mrb[21].mxu0  ;;  %v4962_v14 = vmax.f32 %v4866_v63, %v14829_v23  ;;  %v15020_v13 = vpop.f32.mrb[38].mxu1  ;;  %vm17758_vm0 = vmmov %vm17753_vm1 }
 0x516   : > { %v4963_v35 = vmax.f32 %v4867_v55, %v14920_v50  ;;  %v3962_v1 = vsel %vm1369_vm13, %v3899_v57, -inf  ;;  %v3963_v16 = vsel %vm1370_vm11, %v3883_v62, -inf  ;;  %v15022_v41 = vpop.f32.mrb[22].mxu0  ;;  %v4075_v5 = vsel %vm17758_vm0, %v4043_v51, %v4059_v33  ;;  %v5379_v0 = vpop.f32.mrb[39].mxu1  ;;  %vm17759_vm11 = vmmov %vm17758_vm0 }
 0x517   : > { %v15024_v18 = vmax.f32 %v4393_v31, %v4537_v52  ;;  %v4010_v25 = vmax.f32 %v14925_v7, %v3962_v1  ;;  %v4011_v43 = vmax.f32 %v14928_v36, %v3963_v16  ;;  %v15030_v11 = vpop.f32.mrb[23].mxu0  ;;  %v5058_v9 = vmax.f32 %v4962_v14, %v14998_v40  ;;  %v15040_v24 = vpop.f32.mrb[40].mxu1  ;;  %vm17760_vm13 = vmmov %vm17754_vm8 }
 0x518   : > { %v4091_v21 = vsel %vm17759_vm11, %v4027_v32, %v4043_v51  ;;  %v4155_v28 = vsel %vm1577_vm2, %v4075_v5, -inf  ;;  %v4251_v34 = vrot.slane %v14928_v36, 2  ;;  %v15042_v63 = vpop.f32.mrb[24].mxu0  ;;  %v4443_v52 = vrot.slane %v14928_v36, 1  ;;  %v5384_v62 = vpop.f32.mrb[41].mxu1  ;;  %vm17761_vm2 = vmmov %vm17754_vm8 }
 0x519   : > { %v5059_v33 = vmax.f32 %v4963_v35, %v15024_v18  ;;  %v4154_v55 = vsel %vm1576_vm3, %v4091_v21, -inf  ;;  %v4203_v31 = vmax.f32 %v4011_v43, %v4155_v28  ;;  %v15048_v57 = vpop.f32.mrb[25].mxu0  ;;  %v4772_v42 = vmax.f32 %v17736_v10, %v14674_v54  ;;  %v15060_v8 = vpop.f32.mrb[42].mxu1  ;;  %v17767_v21 = vld [vmem:[#allocation103_spill] sm:$0xff]  ;;  %vm17768_vm9 = vmmov %vm17756_vm12 }
 0x51a   : > { %v4202_v32 = vmax.f32 %v4010_v25, %v4154_v55  ;;  %v4267_v20 = vsel %vm17760_vm13, %v4235_v27, %v4251_v34  ;;  %v4299_v51 = vsel %vm17761_vm2, %v4251_v34, %v4219_v61  ;;  %v15062_v14 = vpop.f32.mrb[26].mxu0  ;;  %vm17762_vm3 = vcmp.eq.s32.totalorder %v17732_v15, 1  ;;  %v5387_v25 = vpop.f32.mrb[43].mxu1  ;;  %v17770_v55 = vld [vmem:[#allocation91_spill] sm:$0xff] }
 0x51b   : > { %v5135_v35 = vpack.c.bf16 %v5059_v33, %v5058_v9  ;;  %v4346_v1 = vsel %vm17762_vm3, %v4267_v20, -inf  ;;  %v4347_v16 = vsel %vm17763_vm5, %v4299_v51, -inf  ;;  %v4459_v27 = vsel %vm17764_vm15, %v4427_v59, %v4443_v52  ;;  %v15070_v43 = vpop.f32.mrb[27].mxu0  ;;  %v15076_v0 = vpop.f32.mrb[44].mxu1  ;;  %v17766_v9 = vld [vmem:[#allocation82_spill] sm:$0xff] }
 0x51c   : > { %v4394_v61 = vmax.f32 %v4202_v32, %v4346_v1  ;;  %v4395_v5 = vmax.f32 %v4203_v31, %v4347_v16  ;;  %v4491_v10 = vsel %vm17765_vm14, %v4443_v52, %v4411_v17  ;;  %v4538_v47 = vsel %vm1990_vm7, %v4459_v27, -inf  ;;  %v5392_v34 = vpop.f32.mrb[45].mxu1  ;;  %v17769_v17 = vld [vmem:[#allocation59_spill] sm:$0xff] }
 0x51d   : > { %7298 = vmatmul.mubr.bf16.gmra.mrb[52].mxu0 %v5135_v35  ;;  %v4773_v15 = vmax.f32 %v14476_v48, %v14753_v6  ;;  %v4868_v59 = vmax.f32 %v4772_v42, %v14827_v44  ;;  %v5080_v28 = vpack.c.bf16 %v17767_v21, %v17766_v9  ;;  %v4539_v33 = vsel %vm17768_vm9, %v4491_v10, -inf  ;;  %v5393_v52 = vpop.f32.mrb[46].mxu1  ;;  %v17772_v21 = vld [vmem:[#allocation78_spill] sm:$0xff] }
 0x51e   : > { %v4586_v2 = vmax.f32 %v4394_v61, %v4538_v47  ;;  %v5105_v31 = vpack.c.bf16 %v17770_v55, %v17769_v17  ;;  %v4774_v45 = vmax.f32 %v14672_v3, %v14808_v37  ;;  %v4775_v32 = vmax.f32 %v14674_v54, %v14827_v44  ;;  %v5395_v20 = vpop.f32.mrb[47].mxu1  ;;  %v17773_v17 = vld [vmem:[#allocation97_spill] sm:$0xff]  ;;  %v17774_v55 = vld [vmem:[#allocation92_spill] sm:$0xff] }
 0x51f   : > { %v4869_v62 = vmax.f32 %v4773_v15, %v14829_v23  ;;  %v4964_v48 = vmax.f32 %v4868_v59, %v14922_v29  ;;  %5461 = vmatmul.mubr.bf16.gmra.mrb[80].mxu1 %v5080_v28  ;;  %v4776_v30 = vmax.f32 %v14753_v6, %v14829_v23  ;;  %v4587_v51 = vmax.f32 %v4395_v5, %v4539_v33  ;;  %v5398_v35 = vpop.f32.mrb[48].mxu1 }
 0x520   : > { %5468 = vmatprep.mubr.bf16.mxu1 %v5105_v31  ;;  %v4870_v42 = vmax.f32 %v4774_v45, %v14920_v50  ;;  %v4777_v3 = vmax.f32 %v14808_v37, %v14920_v50  ;;  %v4871_v27 = vmax.f32 %v4775_v32, %v14922_v29  ;;  %v5400_v54 = vpop.f32.mrb[49].mxu1  ;;  %v17771_v50 = vld [vmem:[#allocation25_spill] sm:$0xff]  ;;  %v5106_v31 = vpack.c.bf16 %v17774_v55, %v17773_v17 }
 0x521   : > { %v4965_v1 = vmax.f32 %v4869_v62, %v14998_v40  ;;  %v5060_v16 = vmax.f32 %v4964_v48, %v4586_v2  ;;  %v4872_v25 = vmax.f32 %v4776_v30, %v14998_v40  ;;  %v5401_v6 = vpop.f32.mrb[50].mxu1  ;;  %v5081_v28 = vpack.c.bf16 %v17772_v21, %v17771_v50  ;;  %v17780_v54 = vld [vmem:[#allocation71_spill] sm:$0xff]  ;;  %v17797_v55 = vld [vmem:[#allocation17_spill] sm:$0xff] }
 0x522   : > { %v4966_v61 = vmax.f32 %v4870_v42, %v15024_v18  ;;  %v4967_v5 = vmax.f32 %v4871_v27, %v4586_v2  ;;  %v5403_v15 = vpop.f32.mrb[51].mxu1  ;;  %v4873_v37 = vmax.f32 %v4777_v3, %v15024_v18  ;;  %v4778_v45 = vmax.f32 %v14827_v44, %v14922_v29  ;;  %v17775_v42 = vld [vmem:[#allocation123_spill] sm:$0xff]  ;;  %v17777_v44 = vld [vmem:[#allocation101_spill] sm:$0xff] }
 0x523   : > { %v5061_v10 = vmax.f32 %v4965_v1, %v4587_v51  ;;  %v4968_v47 = vmax.f32 %v4872_v25, %v4587_v51  ;;  %v5406_v59 = vpop.f32.mrb[52].mxu1  ;;  %v4779_v62 = vmax.f32 %v14829_v23, %v14998_v40  ;;  %v5112_v3 = vpack.c.bf16 %v17775_v42, %v14729_v38  ;;  %v17776_v1 = vld [vmem:[#allocation122_spill] sm:$0xff]  ;;  %v17778_v29 = vld [vmem:[#allocation49_spill] sm:$0xff]  ;;  %v17827_v42 = vld [vmem:[#allocation144_spill] sm:$0xff] }
 0x524   : > { %v5408_v34 = vpop.f32.mrb[53].mxu1  ;;  %v5137_v33 = vpack.c.bf16 %v4967_v5, %v4966_v61  ;;  %v4874_v18 = vmax.f32 %v4778_v45, %v4586_v2  ;;  %v5082_v27 = vpack.c.bf16 %v17778_v29, %v17777_v44  ;;  %v5114_v23 = vpack.c.bf16 %v14914_v56, %v14849_v58  ;;  %v17779_v25 = vld [vmem:[#allocation61_spill] sm:$0xff]  ;;  %v17801_v29 = vld [vmem:[#allocation84_spill] sm:$0xff]  ;;  %v17840_v56 = vld [vmem:[#allocation143_spill] sm:$0xff] }
 0x525   : > { %v5136_v9 = vpack.c.bf16 %v5061_v10, %v5060_v16  ;;  %v5409_v48 = vpop.f32.mrb[54].mxu1  ;;  %v5138_v32 = vpack.c.bf16 %v4873_v37, %v4968_v47  ;;  %v4875_v20 = vmax.f32 %v4779_v62, %v4587_v51  ;;  %v5113_v16 = vpack.c.bf16 %v17776_v1, %v14835_v12  ;;  %v17781_v51 = vld [vmem:[#allocation34_spill] sm:$0xff]  ;;  %v17782_v10 = vld [vmem:[#allocation40_spill] sm:$0xff] }
 0x526   : > { %v5411_v30 = vpop.f32.mrb[55].mxu1  ;;  %v5107_v61 = vpack.c.bf16 %v17780_v54, %v17779_v25  ;;  %v5115_v2 = vpack.c.bf16 %v14928_v36, %v14925_v7  ;;  %v1091_v5 = vpack.c.bf16 %v17782_v10, %v17781_v51  ;;  %v15129_v47 = vadd.f32 %v14964_v46, %v15002_v53  ;;  %v17795_v34 = vld [vmem:[#allocation96_spill] sm:$0xff]  ;;  %v17803_v25 = vld [vmem:[#allocation23_spill] sm:$0xff] }
 0x527   : > { %7301 = vmatprep.mubr.bf16.mxu0 %v5136_v9  ;;  %5469 = vmatmul.mubr.bf16.gmra.mrb[84].mxu1 %v5081_v28  ;;  %v5139_v40 = vpack.c.bf16 %v4875_v20, %v4874_v18  ;;  %v15133_v15 = vadd.f32 %v14971_v49, %v14962_v19  ;;  %v15137_v9 = vadd.f32 %v14986_v22, %v15020_v13  ;;  %v5414_v62 = vpop.f32.mrb[56].mxu1  ;;  %v17800_v30 = vld [vmem:[#allocation64_spill] sm:$0xff]  ;;  %v7275_v20 = vpop.f32.mrb[28].mxu0 }
 0x528   : > { %7302 = vmatmul.mubr.bf16.gmra.mrb[56].mxu0 %v5137_v33  ;;  %5476 = vmatprep.mubr.bf16.mxu1 %v5106_v31  ;;  %v15141_v37 = vadd.f32 %v14992_v26, %v14984_v4  ;;  %v15145_v50 = vadd.f32 %v15004_v39, %v15076_v0  ;;  %v15149_v46 = vadd.f32 %v15012_v60, %v15040_v24  ;;  %v17783_v39 = vld [vmem:[#allocation118_spill] sm:$0xff]  ;;  %v17784_v60 = vld [vmem:[#allocation119_spill] sm:$0xff]  ;;  %v17786_v24 = vld [vmem:[#allocation36_spill] sm:$0xff]  ;;  %v5639_v51 = vpop.f32.mrb[29].mxu0 }
 0x529   : > { %7305 = vmatprep.mubr.bf16.mxu0 %v5138_v32  ;;  %v15152_v53 = vadd.f32 %v15022_v41, %v5393_v52  ;;  %v15156_v19 = vadd.f32 %v15030_v11, %v15060_v8  ;;  %v15159_v49 = vadd.f32 %v15048_v57, %v5398_v35  ;;  %v15162_v4 = vadd.f32 %v15070_v43, %v5401_v6  ;;  %v17785_v41 = vld [vmem:[#allocation29_spill] sm:$0xff]  ;;  %v17787_v11 = vld [vmem:[#allocation54_spill] sm:$0xff]  ;;  %v17788_v8 = vld [vmem:[#allocation104_spill] sm:$0xff] }
 0x52a   : > { %v15165_v22 = vadd.f32 %v15042_v63, %v5406_v59  ;;  %v15168_v26 = vadd.f32 %v15062_v14, %v5409_v48  ;;  %v5083_v13 = vpack.c.bf16 %v17784_v60, %v17783_v39  ;;  %v1092_v0 = vpack.c.bf16 %v17786_v24, %v17785_v41  ;;  %v17789_v57 = vld [vmem:[#allocation55_spill] sm:$0xff]  ;;  %v17790_v35 = vld [vmem:[#allocation74_spill] sm:$0xff]  ;;  %v17791_v63 = vld [vmem:[#allocation120_spill] sm:$0xff]  ;;  %v5416_v48 = vpop.f32.mrb[57].mxu1 }
 0x52b   : > { %v5108_v52 = vpack.c.bf16 %v17788_v8, %v17787_v11  ;;  %v1093_v21 = vpack.c.bf16 %v17790_v35, %v17789_v57  ;;  %v17792_v43 = vld [vmem:[#allocation124_spill] sm:$0xff]  ;;  %v17793_v6 = vld [vmem:[#allocation42_spill] sm:$0xff]  ;;  %v17794_v59 = vld [vmem:[#allocation57_spill] sm:$0xff]  ;;  %v5417_v44 = vpop.f32.mrb[58].mxu1  ;;  %v15194_v41 = vadd.f32 %v5639_v51, %v5414_v62 }
 0x52c   : > { %v5084_v14 = vpack.c.bf16 %v17792_v43, %v17791_v63  ;;  %v1094_v28 = vpack.c.bf16 %v17794_v59, %v17793_v6  ;;  %v17796_v33 = vld [vmem:[#allocation89_spill] sm:$0xff]  ;;  %v17799_v32 = vld [vmem:[#allocation52_spill] sm:$0xff]  ;;  %v5419_v10 = vpop.f32.mrb[59].mxu1  ;;  %v17806_v39 = vld [vmem:[#allocation22_spill] sm:$0xff] }
 0x52d   : > { %v5109_v17 = vpack.c.bf16 %v17796_v33, %v17795_v34  ;;  %v17798_v31 = vld [vmem:[#allocation21_spill] sm:$0xff]  ;;  %v5085_v18 = vpack.c.bf16 %v17800_v30, %v17799_v32  ;;  %v17804_v54 = vld [vmem:[#allocation108_spill] sm:$0xff]  ;;  %v17808_v8 = vld [vmem:[#allocation130_spill] sm:$0xff] }
 0x52e   : > { %v1095_v45 = vpack.c.bf16 %v17798_v31, %v17797_v55  ;;  %v17807_v11 = vld [vmem:[#allocation129_spill] sm:$0xff]  ;;  %v17809_v57 = vld [vmem:[#allocation27_spill] sm:$0xff]  ;;  %v17811_v63 = vld [vmem:[#allocation26_spill] sm:$0xff] }
 0x52f   : > { %5477 = vmatmul.mubr.bf16.gmra.mrb[88].mxu1 %v5082_v27  ;;  %v17802_v27 = vld [vmem:[#allocation19_spill] sm:$0xff]  ;;  %v17810_v35 = vld [vmem:[#allocation33_spill] sm:$0xff]  ;;  %v17816_v33 = vld [vmem:[#allocation146_spill] sm:$0xff] }
 0x530   : > { %7306 = vmatmul.mubr.bf16.gmra.mrb[60].mxu0 %v5139_v40  ;;  %5484 = vmatprep.mubr.bf16.mxu1 %v5107_v61  ;;  %v1096_v40 = vpack.c.bf16 %v17802_v27, %v17801_v29  ;;  %v5110_v61 = vpack.c.bf16 %v17804_v54, %v17803_v25  ;;  %v17812_v43 = vld [vmem:[#allocation121_spill] sm:$0xff]  ;;  %v17813_v6 = vld [vmem:[#allocation35_spill] sm:$0xff]  ;;  %v17819_v62 = vld [vmem:[#allocation56_spill] sm:$0xff] }
 0x531   : > { %7325 = vmatprep.mubr.bf16.mxu0 %v1091_v5  ;;  %v17805_v5 = vld [vmem:[#allocation44_spill] sm:$0xff]  ;;  %v17814_v59 = vld [vmem:[#allocation41_spill] sm:$0xff]  ;;  %v17815_v34 = vld [vmem:[#allocation131_spill] sm:$0xff] }
 0x532   : > { %v1097_v60 = vpack.c.bf16 %v17806_v39, %v17805_v5  ;;  %v17817_v55 = vld [vmem:[#allocation31_spill] sm:$0xff]  ;;  %v17818_v31 = vld [vmem:[#allocation37_spill] sm:$0xff]  ;;  %v17820_v48 = vld [vmem:[#allocation76_spill] sm:$0xff] }
 0x533   : > { %v1101_v32 = vpack.c.bf16 %v17820_v48, %v17819_v62  ;;  %v17821_v30 = vld [vmem:[#allocation147_spill] sm:$0xff]  ;;  %v17824_v27 = vld [vmem:[#allocation70_spill] sm:$0xff]  ;;  %v17826_v54 = vld [vmem:[#allocation24_spill] sm:$0xff] }
 0x534   : > { %v17823_v29 = vld [vmem:[#allocation43_spill] sm:$0xff]  ;;  %v17825_v25 = vld [vmem:[#allocation18_spill] sm:$0xff]  ;;  %v17839_v58 = vld [vmem:[#allocation140_spill] sm:$0xff] }
 0x535   : > { %v17829_v39 = vld [vmem:[#allocation87_spill] sm:$0xff]  ;;  %v17844_v62 = vld [vmem:[#allocation60_spill] sm:$0xff] }
 0x537   : > { %5485 = vmatmul.mubr.bf16.gmra.mrb[92].mxu1 %v5083_v13  ;;  %v7276_v13 = vpop.f32.mrb[30].mxu0 }
 0x538   : > { %7326 = vmatmul.mubr.bf16.vlgmr.msra.gmra.mrb[64].mxu0 %v1092_v0  ;;  %5492 = vmatprep.mubr.bf16.mxu1 %v5108_v52  ;;  %v5642_v24 = vpop.f32.mrb[31].mxu0  ;;  %v5086_v52 = vpack.c.bf16 %v17808_v8, %v17807_v11  ;;  %v17831_v8 = vld [vmem:[#allocation81_spill] sm:$0xff] }
 0x539   : > { %7329 = vmatprep.mubr.bf16.mxu0 %v1093_v21  ;;  %v15196_v0 = vadd.f32 %v5642_v24, %v5417_v44  ;;  %v1098_v21 = vpack.c.bf16 %v17810_v35, %v17809_v57 }
 0x53f   : > { %5493 = vmatmul.mubr.bf16.gmra.mrb[96].mxu1 %v5084_v14  ;;  %v5111_v14 = vpack.c.bf16 %v17812_v43, %v17811_v63  ;;  %v17833_v43 = vld [vmem:[#allocation145_spill] sm:$0xff] }
 0x540   : > { %7330 = vmatmul.mubr.bf16.gmra.mrb[68].mxu0 %v1094_v28  ;;  %5500 = vmatprep.mubr.bf16.mxu1 %v5109_v17  ;;  %v1099_v28 = vpack.c.bf16 %v17814_v59, %v17813_v6  ;;  %v5087_v17 = vpack.c.bf16 %v17816_v33, %v17815_v34  ;;  %v17835_v59 = vld [vmem:[#allocation28_spill] sm:$0xff]  ;;  %v17837_v33 = vld [vmem:[#allocation93_spill] sm:$0xff] }
 0x541   : > { %7333 = vmatprep.mubr.bf16.mxu0 %v1095_v45  ;;  %v1100_v45 = vpack.c.bf16 %v17818_v31, %v17817_v55 }
 0x547   : > { %5501 = vmatmul.mubr.bf16.gmra.mrb[100].mxu1 %v5085_v18  ;;  %v17822_v18 = vld [vmem:[#allocation148_spill] sm:$0xff] }
 0x548   : > { %7334 = vmatmul.mubr.bf16.gmra.mrb[72].mxu0 %v1096_v40  ;;  %5508 = vmatprep.mubr.bf16.mxu1 %v5110_v61  ;;  %v5088_v44 = vpack.c.bf16 %v17822_v18, %v17821_v30  ;;  %v1102_v40 = vpack.c.bf16 %v17824_v27, %v17823_v29  ;;  %v1103_v61 = vpack.c.bf16 %v17826_v54, %v17825_v25  ;;  %v17846_v29 = vld [vmem:[#allocation68_spill] sm:$0xff]  ;;  %v17848_v25 = vld [vmem:[#allocation38_spill] sm:$0xff] }
 0x549   : > { %7337 = vmatprep.mubr.bf16.mxu0 %v1097_v60  ;;  %v17830_v60 = vld [vmem:[#allocation20_spill] sm:$0xff] }
 0x54a   : > { %v1104_v24 = vpack.c.bf16 %v17830_v60, %v17829_v39  ;;  %v17849_v39 = vld [vmem:[#allocation45_spill] sm:$0xff]  ;;  %v17850_v60 = vld [vmem:[#allocation30_spill] sm:$0xff] }
 0x54f   : > { %5509 = vmatmul.mubr.bf16.gmra.mrb[104].mxu1 %v5086_v52  ;;  %v17832_v52 = vld [vmem:[#allocation94_spill] sm:$0xff] }
 0x550   : > { %7338 = vmatmul.mubr.bf16.gmra.mrb[76].mxu0 %v1098_v21  ;;  %5516 = vmatprep.mubr.bf16.mxu1 %v5111_v14  ;;  %v7279_v51 = vpop.f32.mrb[32].mxu0  ;;  %v1105_v57 = vpack.c.bf16 %v17832_v52, %v17831_v8  ;;  %v17834_v14 = vld [vmem:[#allocation142_spill] sm:$0xff]  ;;  %v17852_v52 = vld [vmem:[#allocation105_spill] sm:$0xff] }
 0x551   : > { %7341 = vmatprep.mubr.bf16.mxu0 %v1099_v28  ;;  %v5655_v38 = vpop.f32.mrb[33].mxu0  ;;  %v5090_v6 = vpack.c.bf16 %v17834_v14, %v17833_v43  ;;  %v17836_v28 = vld [vmem:[#allocation80_spill] sm:$0xff]  ;;  %v17851_v8 = vld [vmem:[#allocation90_spill] sm:$0xff] }
 0x552   : > { %v7280_v5 = vpop.f32.mrb[34].mxu0  ;;  %v1106_v34 = vpack.c.bf16 %v17836_v28, %v17835_v59 }
 0x553   : > { %v5658_v11 = vpop.f32.mrb[35].mxu0 }
 0x556   : > { %v5422_v35 = vpop.f32.mrb[60].mxu1 }
 0x557   : > { %5517 = vmatmul.mubr.bf16.gmra.mrb[108].mxu1 %v5087_v17  ;;  %v15233_v12 = vadd.f32 %v7275_v20, %v5422_v35  ;;  %v5424_v1 = vpop.f32.mrb[61].mxu1  ;;  %v17838_v17 = vld [vmem:[#allocation95_spill] sm:$0xff]  ;;  %v17841_v20 = vld [vmem:[#allocation69_spill] sm:$0xff]  ;;  %v17854_v35 = vld [vmem:[#allocation102_spill] sm:$0xff] }
 0x558   : > { %7342 = vmatmul.mubr.bf16.gmra.mrb[80].mxu0 %v1100_v45  ;;  %5524 = vmatprep.mubr.bf16.mxu1 %v5112_v3  ;;  %v17828_v3 = vld [vmem:[#allocation141_spill] sm:$0xff]  ;;  %v1107_v55 = vpack.c.bf16 %v17838_v17, %v17837_v33  ;;  %v17843_v45 = vld [vmem:[#allocation110_spill] sm:$0xff] }
 0x559   : > { %7345 = vmatprep.mubr.bf16.mxu0 %v1101_v32  ;;  %v5089_v10 = vpack.c.bf16 %v17828_v3, %v17827_v42  ;;  %v1109_v48 = vpack.c.bf16 %v17844_v62, %v17843_v45 }
 0x55f   : > { %5525 = vmatmul.mubr.bf16.gmra.mrb[112].mxu1 %v5088_v44  ;;  %v17845_v44 = vld [vmem:[#allocation109_spill] sm:$0xff] }
 0x560   : > { %7346 = vmatmul.mubr.bf16.gmra.mrb[84].mxu0 %v1102_v40  ;;  %5532 = vmatprep.mubr.bf16.mxu1 %v5113_v16  ;;  %v5425_v16 = vpop.f32.mrb[62].mxu1  ;;  %v1110_v7 = vpack.c.bf16 %v17846_v29, %v17845_v44  ;;  %v17847_v40 = vld [vmem:[#allocation112_spill] sm:$0xff] }
 0x561   : > { %7349 = vmatprep.mubr.bf16.mxu0 %v1103_v61  ;;  %v15235_v21 = vadd.f32 %v7276_v13, %v5425_v16  ;;  %v5427_v63 = vpop.f32.mrb[63].mxu1  ;;  %v17842_v13 = vld [vmem:[#allocation62_spill] sm:$0xff]  ;;  %v1111_v54 = vpack.c.bf16 %v17848_v25, %v17847_v40 }
 0x562   : > { %v1108_v31 = vpack.c.bf16 %v17842_v13, %v17841_v20 }
 0x567   : > { %5533 = vmatmul.mubr.bf16.gmra.mrb[116].mxu1 %v5089_v10 }
 0x568   : > { %7350 = vmatmul.mubr.bf16.gmra.mrb[88].mxu0 %v1104_v24  ;;  %5540 = vmatprep.mubr.bf16.mxu1 %v5114_v23  ;;  %v5091_v23 = vpack.c.bf16 %v17840_v56, %v17839_v58  ;;  %v1112_v24 = vpack.c.bf16 %v17850_v60, %v17849_v39 }
 0x569   : > { %7353 = vmatprep.mubr.bf16.mxu0 %v1105_v57  ;;  %v1113_v57 = vpack.c.bf16 %v17852_v52, %v17851_v8 }
 0x56c   : > { %v7283_v32 = vpop.f32.mrb[36].mxu0 }
 0x56d   : > { %v5671_v30 = vpop.f32.mrb[37].mxu0 }
 0x56e   : > { %v5430_v18 = vpop.f32.mrb[64].mxu1  ;;  %v7284_v36 = vpop.f32.mrb[38].mxu0 }
 0x56f   : > { %5541 = vmatmul.mubr.bf16.gmra.mrb[120].mxu1 %v5090_v6  ;;  %v5432_v27 = vpop.f32.mrb[65].mxu1  ;;  %v5674_v61 = vpop.f32.mrb[39].mxu0 }
 0x570   : > { %7354 = vmatmul.mubr.bf16.gmra.mrb[92].mxu0 %v1106_v34  ;;  %5548 = vmatprep.mubr.bf16.mxu1 %v5115_v2  ;;  %v15254_v2 = vadd.f32 %v5655_v38, %v5430_v18  ;;  %v5433_v42 = vpop.f32.mrb[66].mxu1  ;;  %v17853_v38 = vld [vmem:[#allocation116_spill] sm:$0xff] }
 0x571   : > { %7357 = vmatprep.mubr.bf16.mxu0 %v1107_v55  ;;  %v15258_v3 = vadd.f32 %v5658_v11, %v5433_v42  ;;  %v5435_v10 = vpop.f32.mrb[67].mxu1  ;;  %v1114_v1 = vpack.c.bf16 %v17854_v35, %v17853_v38 }
 0x577   : > { %5549 = vmatmul.mubr.bf16.gmra.mrb[124].mxu1 %v5091_v23 }
 0x578   : > { %7358 = vmatmul.mubr.bf16.gmra.mrb[96].mxu0 %v1108_v31 }
 0x579   : > { %7361 = vmatprep.mubr.bf16.mxu0 %v1109_v48 }
 0x580   : > { %7362 = vmatmul.mubr.bf16.gmra.mrb[100].mxu0 %v1110_v7 }
 0x581   : > { %7365 = vmatprep.mubr.bf16.mxu0 %v1111_v54 }
 0x588   : > { %7366 = vmatmul.mubr.bf16.gmra.mrb[104].mxu0 %v1112_v24 }
 0x589   : > { %7369 = vmatprep.mubr.bf16.mxu0 %v1113_v57 }
 0x590   : > { %7370 = vmatmul.mubr.bf16.gmra.mrb[108].mxu0 %v1114_v1 }
 0x592   : > { %v7287_v16 = vpop.f32.mrb[40].mxu0  ;;  %v5438_v63 = vpop.f32.mrb[68].mxu1 }
 0x593   : > { %v5687_v43 = vpop.f32.mrb[41].mxu0  ;;  %v15266_v14 = vadd.f32 %v7279_v51, %v5438_v63  ;;  %v5440_v11 = vpop.f32.mrb[69].mxu1 }
 0x594   : > { %v7288_v6 = vpop.f32.mrb[42].mxu0  ;;  %v5441_v59 = vpop.f32.mrb[70].mxu1 }
 0x595   : > { %v5690_v28 = vpop.f32.mrb[43].mxu0  ;;  %v15268_v34 = vadd.f32 %v7280_v5, %v5441_v59  ;;  %v5443_v33 = vpop.f32.mrb[71].mxu1 }
 0x5b8   : > { %v7291_v17 = vpop.f32.mrb[44].mxu0 }
 0x5b9   : > { %v5703_v55 = vpop.f32.mrb[45].mxu0 }
 0x5ba   : > { %v7292_v58 = vpop.f32.mrb[46].mxu0 }
 0x5bb   : > { %v5706_v56 = vpop.f32.mrb[47].mxu0 }
 0x5bd   : > { %v5446_v23 = vpop.f32.mrb[72].mxu1 }
 0x5be   : > { %v15270_v20 = vadd.f32 %v5671_v30, %v5446_v23  ;;  %v5448_v13 = vpop.f32.mrb[73].mxu1 }
 0x5bf   : > { %v5449_v31 = vpop.f32.mrb[74].mxu1 }
 0x5c0   : > { %v15272_v45 = vadd.f32 %v5674_v61, %v5449_v31  ;;  %v5451_v51 = vpop.f32.mrb[75].mxu1 }
 0x5d1   : > { %v5454_v62 = vpop.f32.mrb[76].mxu1 }
 0x5d2   : > { %v15274_v48 = vadd.f32 %v7283_v32, %v5454_v62  ;;  %v5456_v18 = vpop.f32.mrb[77].mxu1 }
 0x5d3   : > { %v15276_v44 = vpop.f32.mrb[48].mxu0  ;;  %v5457_v5 = vpop.f32.mrb[78].mxu1 }
 0x5d4   : > { %v5719_v29 = vpop.f32.mrb[49].mxu0  ;;  %v15278_v7 = vadd.f32 %v7284_v36, %v5457_v5  ;;  %v5459_v27 = vpop.f32.mrb[79].mxu1 }
 0x5d5   : > { %v15280_v40 = vpop.f32.mrb[50].mxu0 }
 0x5d6   : > { %v15282_v30 = vpop.f32.mrb[51].mxu0 }
 0x5f0   : > { %v15284_v25 = vpop.f32.mrb[52].mxu0 }
 0x5f1   : > { %v15286_v54 = vpop.f32.mrb[53].mxu0 }
 0x5f2   : > { %v15288_v61 = vpop.f32.mrb[54].mxu0  ;;  %v5462_v32 = vpop.f32.mrb[80].mxu1 }
 0x5f3   : > { %v15290_v42 = vpop.f32.mrb[55].mxu0  ;;  %v15292_v10 = vadd.f32 %v5687_v43, %v5462_v32  ;;  %v5464_v39 = vpop.f32.mrb[81].mxu1  ;;  %v15323_v32 = vld [vmem:[%s15762_s5] ss:$0 sm:$0xff] }
 0x5f4   : > { %v5465_v60 = vpop.f32.mrb[82].mxu1 }
 0x5f5   : > { %v15294_v36 = vadd.f32 %v5690_v28, %v5465_v60  ;;  %v5467_v24 = vpop.f32.mrb[83].mxu1 }
 0x5fa   : > { %v5470_v8 = vpop.f32.mrb[84].mxu1 }
 0x5fb   : > { %v15296_v52 = vpop.f32.mrb[56].mxu0  ;;  %v15298_v57 = vadd.f32 %v7287_v16, %v5470_v8  ;;  %v5472_v38 = vpop.f32.mrb[85].mxu1 }
 0x5fc   : > { %v15300_v35 = vpop.f32.mrb[57].mxu0  ;;  %v5473_v1 = vpop.f32.mrb[86].mxu1 }
 0x5fd   : > { %v15302_v63 = vpop.f32.mrb[58].mxu0  ;;  %v15304_v11 = vadd.f32 %v7288_v6, %v5473_v1  ;;  %v5475_v43 = vpop.f32.mrb[87].mxu1 }
 0x5fe   : > { %v15306_v59 = vpop.f32.mrb[59].mxu0 }
 0x602   : > { %v5478_v33 = vpop.f32.mrb[88].mxu1 }
 0x603   : > { %v15308_v28 = vpop.f32.mrb[60].mxu0  ;;  %v15310_v23 = vadd.f32 %v5703_v55, %v5478_v33  ;;  %v5480_v13 = vpop.f32.mrb[89].mxu1 }
 0x604   : > { %17855 = vst [vmem:[#allocation125_spill] sm:$0xff] %v15308_v28  ;;  %v15312_v31 = vpop.f32.mrb[61].mxu0  ;;  %v5481_v16 = vpop.f32.mrb[90].mxu1 }
 0x605   : > { %v15314_v51 = vpop.f32.mrb[62].mxu0  ;;  %v15316_v62 = vadd.f32 %v5706_v56, %v5481_v16  ;;  %v5483_v18 = vpop.f32.mrb[91].mxu1 }
 0x606   : > { %17856 = vst [vmem:[#allocation126_spill] sm:$0xff] %v15314_v51  ;;  %v15318_v5 = vpop.f32.mrb[63].mxu0 }
 0x60a   : > { %v5486_v6 = vpop.f32.mrb[92].mxu1 }
 0x60b   : > { %v7327_v27 = vpop.f32.mrb[64].mxu0  ;;  %v15325_v55 = vadd.f32 %v7291_v17, %v5486_v6  ;;  %v5488_v39 = vpop.f32.mrb[93].mxu1 }
 0x60c   : > { %v5873_v60 = vadd.f32 %v7327_v27, %v15129_v47  ;;  %v5864_v24 = vpop.f32.mrb[65].mxu0  ;;  %v5489_v8 = vpop.f32.mrb[94].mxu1 }
 0x60d   : > { %v5865_v56 = vadd.f32 %v5864_v24, %v15133_v15  ;;  %v7328_v38 = vpop.f32.mrb[66].mxu0  ;;  %v15329_v1 = vadd.f32 %v7292_v58, %v5489_v8  ;;  %v5491_v43 = vpop.f32.mrb[95].mxu1 }
 0x60e   : > { %v15332_v33 = vadd.f32 %v15323_v32, %v5873_v60  ;;  %v5876_v13 = vadd.f32 %v7328_v38, %v15137_v9  ;;  %v5867_v16 = vpop.f32.mrb[67].mxu0 }
 0x60f   : > { %v15336_v17 = vadd.f32 %v15323_v32, %v5865_v56  ;;  %v5868_v18 = vadd.f32 %v5867_v16, %v15141_v37 }
 0x610   : > { %v6112_v47 = vsub.f32 0.0, %v15332_v33  ;;  %v15341_v6 = vadd.f32 %v15323_v32, %v5876_v13 }
 0x611   : > { %v6110_v15 = vsub.f32 0.0, %v15336_v17  ;;  %v15345_v58 = vadd.f32 %v15323_v32, %v5868_v18 }
 0x612   : > { %v6162_v27 = vmul.f32 1.442695, %v6112_v47  ;;  %v6113_v39 = vsub.f32 0.0, %v15341_v6  ;;  %v5494_v9 = vpop.f32.mrb[96].mxu1 }
 0x613   : > { %v6158_v60 = vmul.f32 1.442695, %v6110_v15  ;;  %v6111_v24 = vsub.f32 0.0, %v15345_v58  ;;  %v7331_v8 = vpop.f32.mrb[68].mxu0  ;;  %v15349_v56 = vadd.f32 %v5719_v29, %v5494_v9  ;;  %v5496_v37 = vpop.f32.mrb[97].mxu1 }
 0x614   : > { %7733 = vpow2.f32 %v6162_v27  ;;  %v6164_v38 = vmul.f32 1.442695, %v6113_v39  ;;  %v5889_v43 = vadd.f32 %v7331_v8, %v15145_v50  ;;  %v5880_v13 = vpop.f32.mrb[69].mxu0  ;;  %v5497_v16 = vpop.f32.mrb[98].mxu1 }
 0x615   : > { %7735 = vpow2.f32 %v6158_v60  ;;  %v6160_v18 = vmul.f32 1.442695, %v6111_v24  ;;  %v5881_v47 = vadd.f32 %v5880_v13, %v15149_v46  ;;  %v7332_v51 = vpop.f32.mrb[70].mxu0  ;;  %v15354_v28 = vadd.f32 %v15282_v30, %v5497_v16  ;;  %v5499_v15 = vpop.f32.mrb[99].mxu1 }
 0x616   : > { %7737 = vpow2.f32 %v6164_v38  ;;  %v15357_v29 = vadd.f32 %v15323_v32, %v5889_v43  ;;  %v5892_v27 = vadd.f32 %v7332_v51, %v15152_v53  ;;  %v5883_v39 = vpop.f32.mrb[71].mxu0 }
 0x617   : > { %17857 = vst [vmem:[#allocation128_spill] sm:$0xff] %v15354_v28  ;;  %7739 = vpow2.f32 %v6160_v18  ;;  %v15361_v50 = vadd.f32 %v15323_v32, %v5881_v47  ;;  %v5884_v9 = vadd.f32 %v5883_v39, %v15156_v19 }
 0x618   : > { %v6116_v46 = vsub.f32 0.0, %v15357_v29  ;;  %v15366_v60 = vadd.f32 %v15323_v32, %v5892_v27 }
 0x619   : > { %v6114_v30 = vsub.f32 0.0, %v15361_v50  ;;  %v15370_v24 = vadd.f32 %v15323_v32, %v5884_v9 }
 0x61a   : > { %v6170_v8 = vmul.f32 1.442695, %v6116_v46  ;;  %v6117_v53 = vsub.f32 0.0, %v15366_v60  ;;  %v5502_v51 = vpop.f32.mrb[100].mxu1 }
 0x61b   : > { %v6166_v37 = vmul.f32 1.442695, %v6114_v30  ;;  %v6115_v38 = vsub.f32 0.0, %v15370_v24  ;;  %v7335_v43 = vpop.f32.mrb[72].mxu0  ;;  %v15375_v19 = vadd.f32 %v15276_v44, %v5502_v51  ;;  %v5504_v13 = vpop.f32.mrb[101].mxu1 }
 0x61c   : > { %7741 = vpow2.f32 %v6170_v8  ;;  %v6172_v16 = vmul.f32 1.442695, %v6117_v53  ;;  %v5905_v18 = vadd.f32 %v7335_v43, %v15165_v22  ;;  %v5896_v47 = vpop.f32.mrb[73].mxu0  ;;  %v5505_v15 = vpop.f32.mrb[102].mxu1 }
 0x61d   : > { %7743 = vpow2.f32 %v6166_v37  ;;  %v6168_v27 = vmul.f32 1.442695, %v6115_v38  ;;  %v5897_v39 = vadd.f32 %v5896_v47, %v15159_v49  ;;  %v7336_v9 = vpop.f32.mrb[74].mxu0  ;;  %v15380_v46 = vadd.f32 %v15280_v40, %v5505_v15  ;;  %v5507_v30 = vpop.f32.mrb[103].mxu1 }
 0x61e   : > { %v7734_v28 = vpop.eup %7733  ;;  %7745 = vpow2.f32 %v6172_v16  ;;  %v15383_v44 = vadd.f32 %v15323_v32, %v5905_v18  ;;  %v5908_v8 = vadd.f32 %v7336_v9, %v15168_v26  ;;  %v5899_v53 = vpop.f32.mrb[75].mxu0 }
 0x61f   : > { %17858 = vst [vmem:[#allocation127_spill] sm:$0xff] %v15380_v46  ;;  %v7736_v22 = vpop.eup %7735  ;;  %v6256_v51 = vadd.f32 1.0, %v7734_v28  ;;  %7747 = vpow2.f32 %v6168_v27  ;;  %v15387_v37 = vadd.f32 %v15323_v32, %v5897_v39  ;;  %v5900_v49 = vadd.f32 %v5899_v53, %v15162_v4 }
 0x620   : > { %v7738_v38 = vpop.eup %7737  ;;  %v6254_v40 = vadd.f32 1.0, %v7736_v22  ;;  %v6120_v43 = vsub.f32 0.0, %v15383_v44  ;;  %v15392_v13 = vadd.f32 %v15323_v32, %v5908_v8 }
 0x621   : > { %v7740_v16 = vpop.eup %7739  ;;  %7749 = vrcp.f32 %v6256_v51  ;;  %v6257_v18 = vadd.f32 1.0, %v7738_v38  ;;  %v6118_v26 = vsub.f32 0.0, %v15387_v37  ;;  %v15396_v28 = vadd.f32 %v15323_v32, %v5900_v49 }
 0x622   : > { %7751 = vrcp.f32 %v6254_v40  ;;  %v6255_v47 = vadd.f32 1.0, %v7740_v16  ;;  %v6178_v15 = vmul.f32 1.442695, %v6120_v43  ;;  %v6121_v4 = vsub.f32 0.0, %v15392_v13  ;;  %v5510_v27 = vpop.f32.mrb[104].mxu1 }
 0x623   : > { %7753 = vrcp.f32 %v6257_v18  ;;  %v6174_v39 = vmul.f32 1.442695, %v6118_v26  ;;  %v6119_v9 = vsub.f32 0.0, %v15396_v28  ;;  %v7339_v30 = vpop.f32.mrb[76].mxu0  ;;  %v15401_v8 = vadd.f32 %v15286_v54, %v5510_v27  ;;  %v5512_v53 = vpop.f32.mrb[105].mxu1 }
 0x624   : > { %7755 = vrcp.f32 %v6255_v47  ;;  %v6180_v22 = vmul.f32 1.442695, %v6121_v4  ;;  %v5921_v51 = vadd.f32 %v7339_v30, %v15233_v12  ;;  %v5912_v49 = vpop.f32.mrb[77].mxu0  ;;  %v5513_v38 = vpop.f32.mrb[106].mxu1 }
 0x625   : > { %17859 = vst [vmem:[#allocation107_spill] sm:$0xff] %v15401_v8  ;;  %7757 = vpow2.f32 %v6178_v15  ;;  %v6176_v40 = vmul.f32 1.442695, %v6119_v9  ;;  %v5913_v43 = vadd.f32 %v5912_v49, %v15194_v41  ;;  %v7340_v16 = vpop.f32.mrb[78].mxu0  ;;  %v15406_v18 = vadd.f32 %v15290_v42, %v5513_v38  ;;  %v5515_v26 = vpop.f32.mrb[107].mxu1 }
 0x626   : > { %v7742_v46 = vpop.eup %7741  ;;  %7759 = vpow2.f32 %v6174_v39  ;;  %v15409_v54 = vadd.f32 %v15323_v32, %v5921_v51  ;;  %v5924_v47 = vadd.f32 %v7340_v16, %v15235_v21  ;;  %v5915_v4 = vpop.f32.mrb[79].mxu0 }
 0x627   : > { %17860 = vst [vmem:[#allocation85_spill] sm:$0xff] %v15406_v18  ;;  %v7744_v12 = vpop.eup %7743  ;;  %v6260_v27 = vadd.f32 1.0, %v7742_v46  ;;  %7761 = vpow2.f32 %v6180_v22  ;;  %v15413_v15 = vadd.f32 %v15323_v32, %v5913_v43  ;;  %v5916_v41 = vadd.f32 %v5915_v4, %v15196_v0 }
 0x628   : > { %v7746_v9 = vpop.eup %7745  ;;  %v6258_v42 = vadd.f32 1.0, %v7744_v12  ;;  %7763 = vpow2.f32 %v6176_v40  ;;  %v6124_v30 = vsub.f32 0.0, %v15409_v54  ;;  %v15418_v39 = vadd.f32 %v15323_v32, %v5924_v47 }
 0x629   : > { %v7748_v53 = vpop.eup %7747  ;;  %7765 = vrcp.f32 %v6260_v27  ;;  %v6261_v21 = vadd.f32 1.0, %v7746_v9  ;;  %v6122_v51 = vsub.f32 0.0, %v15413_v15  ;;  %v15422_v46 = vadd.f32 %v15323_v32, %v5916_v41 }
 0x62a   : > { %7767 = vrcp.f32 %v6258_v42  ;;  %v6259_v22 = vadd.f32 1.0, %v7748_v53  ;;  %v6186_v49 = vmul.f32 1.442695, %v6124_v30  ;;  %v6125_v0 = vsub.f32 0.0, %v15418_v39  ;;  %v5518_v38 = vpop.f32.mrb[108].mxu1 }
 0x62b   : > { %v7750_v40 = vpop.eup %7749  ;;  %7769 = vrcp.f32 %v6261_v21  ;;  %v6182_v43 = vmul.f32 1.442695, %v6122_v51  ;;  %v6123_v16 = vsub.f32 0.0, %v15422_v46  ;;  %v7343_v26 = vpop.f32.mrb[80].mxu0  ;;  %v15427_v47 = vadd.f32 %v15284_v25, %v5518_v38 }
 0x62c   : > { %v5520_v4 = vpop.f32.mrb[109].mxu1  ;;  %v7752_v12 = vpop.eup %7751  ;;  %v6352_v27 = vmul.f32 %v7750_v40, %v15332_v33  ;;  %7771 = vrcp.f32 %v6259_v22  ;;  %v6188_v41 = vmul.f32 1.442695, %v6125_v0  ;;  %v5937_v9 = vadd.f32 %v7343_v26, %v15266_v14 }
 0x62d   : > { %v5928_v42 = vpop.f32.mrb[81].mxu0  ;;  %v5521_v30 = vpop.f32.mrb[110].mxu1  ;;  %v6350_v21 = vmul.f32 %v7752_v12, %v15336_v17  ;;  %7773 = vpow2.f32 %v6186_v49  ;;  %v6184_v51 = vmul.f32 1.442695, %v6123_v16 }
 0x62e   : > { %v7754_v53 = vpop.eup %7753  ;;  %v5929_v18 = vadd.f32 %v5928_v42, %v15254_v2  ;;  %v7344_v8 = vpop.f32.mrb[82].mxu0  ;;  %7775 = vpow2.f32 %v6182_v43  ;;  %v15435_v33 = vadd.f32 %v15323_v32, %v5937_v9 }
 0x62f   : > { %v5523_v25 = vpop.f32.mrb[111].mxu1  ;;  %v7756_v38 = vpop.eup %7755  ;;  %v6353_v4 = vmul.f32 %v7754_v53, %v15341_v6  ;;  %v5940_v14 = vadd.f32 %v7344_v8, %v15268_v34  ;;  %7777 = vpow2.f32 %v6188_v41 }
 0x630   : > { %v5931_v22 = vpop.f32.mrb[83].mxu0  ;;  %v7758_v0 = vpop.eup %7757  ;;  %v6351_v17 = vmul.f32 %v7756_v38, %v15345_v58  ;;  %v15440_v49 = vadd.f32 %v15323_v32, %v5929_v18  ;;  %7779 = vpow2.f32 %v6184_v51  ;;  %v6128_v43 = vsub.f32 0.0, %v15435_v33 }
 0x631   : > { %v5932_v2 = vadd.f32 %v5931_v22, %v15258_v3  ;;  %v7760_v40 = vpop.eup %7759  ;;  %v6950_v16 = vpack.c.bf16 %v6353_v4, %v6352_v27  ;;  %v6264_v6 = vadd.f32 1.0, %v7758_v0  ;;  %v15446_v9 = vadd.f32 %v15323_v32, %v5940_v14 }
 0x632   : > { %v7762_v26 = vpop.eup %7761  ;;  %v6945_v12 = vpack.c.bf16 %v6351_v17, %v6350_v21  ;;  %v6262_v34 = vadd.f32 1.0, %v7760_v40  ;;  %v6126_v8 = vsub.f32 0.0, %v15440_v49  ;;  %v6194_v18 = vmul.f32 1.442695, %v6128_v43  ;;  %v5526_v41 = vpop.f32.mrb[112].mxu1 }
 0x633   : > { %v7764_v58 = vpop.eup %7763  ;;  %7062 = vst [vmem:[%s15450_s30 + $0x8] sm:$0xff] %v6950_v16   ;;  %7781 = vrcp.f32 %v6264_v6  ;;  %v6265_v3 = vadd.f32 1.0, %v7762_v26  ;;  %v15454_v27 = vadd.f32 %v15323_v32, %v5932_v2  ;;  %v6129_v51 = vsub.f32 0.0, %v15446_v9  ;;  %v7347_v25 = vpop.f32.mrb[84].mxu0 }
 0x634   : > { %v7766_v42 = vpop.eup %7765  ;;  %6946 = vst [vmem:[%s15450_s30] sm:$0xff] %v6945_v12   ;;  %7783 = vrcp.f32 %v6262_v34  ;;  %v6263_v53 = vadd.f32 1.0, %v7764_v58  ;;  %v6190_v21 = vmul.f32 1.442695, %v6126_v8  ;;  %v5528_v38 = vpop.f32.mrb[113].mxu1  ;;  %v15461_v0 = vadd.f32 %v15288_v61, %v5521_v30 }
 0x635   : > { %v7768_v4 = vpop.eup %7767  ;;  %v6356_v14 = vmul.f32 %v7766_v42, %v15357_v29  ;;  %7785 = vrcp.f32 %v6265_v3  ;;  %v6127_v22 = vsub.f32 0.0, %v15454_v27  ;;  %v5944_v17 = vpop.f32.mrb[85].mxu0  ;;  %v6196_v6 = vmul.f32 1.442695, %v6129_v51 }
 0x636   : > { %v5529_v2 = vpop.f32.mrb[114].mxu1  ;;  %v7770_v40 = vpop.eup %7769  ;;  %v6354_v16 = vmul.f32 %v7768_v4, %v15361_v50  ;;  %7787 = vrcp.f32 %v6263_v53  ;;  %v5953_v43 = vadd.f32 %v7347_v25, %v15274_v48  ;;  %v5945_v58 = vadd.f32 %v5944_v17, %v15270_v20 }
 0x637   : > { %v7348_v26 = vpop.f32.mrb[86].mxu0  ;;  %v5531_v12 = vpop.f32.mrb[115].mxu1  ;;  %v6357_v29 = vmul.f32 %v7770_v40, %v15366_v60  ;;  %7789 = vpow2.f32 %v6194_v18  ;;  %v6192_v8 = vmul.f32 1.442695, %v6127_v22 }
 0x638   : > { %v7772_v34 = vpop.eup %7771  ;;  %v5947_v61 = vpop.f32.mrb[87].mxu0  ;;  %7791 = vpow2.f32 %v6190_v21  ;;  %v15469_v50 = vadd.f32 %v15323_v32, %v5953_v43  ;;  %v5956_v48 = vadd.f32 %v7348_v26, %v15278_v7  ;;  %v15473_v60 = vadd.f32 %v15323_v32, %v5945_v58 }
 0x639   : > { %v7774_v30 = vpop.eup %7773  ;;  %v6355_v3 = vmul.f32 %v7772_v34, %v15370_v24  ;;  %v6960_v53 = vpack.c.bf16 %v6357_v29, %v6356_v14  ;;  %7793 = vpow2.f32 %v6196_v6  ;;  %v5948_v40 = vadd.f32 %v5947_v61, %v15272_v45 }
 0x63a   : > { %v7776_v42 = vpop.eup %7775  ;;  %v6268_v51 = vadd.f32 1.0, %v7774_v30  ;;  %7795 = vpow2.f32 %v6192_v8  ;;  %v6132_v24 = vsub.f32 0.0, %v15469_v50  ;;  %v6130_v7 = vsub.f32 0.0, %v15473_v60  ;;  %v15481_v14 = vpop.f32.mrb[116].mxu1 }
 0x63b   : > { %v7778_v20 = vpop.eup %7777  ;;  %v6955_v18 = vpack.c.bf16 %v6355_v3, %v6354_v16  ;;  %v6266_v25 = vadd.f32 1.0, %v7776_v42  ;;  %7064 = vst [vmem:[%s15450_s30 + $0x18] sm:$0xff] %v6960_v53   ;;  %v15479_v4 = vadd.f32 %v15323_v32, %v5956_v48  ;;  %v7351_v16 = vpop.f32.mrb[88].mxu0  ;;  %v15487_v34 = vadd.f32 %v15300_v35, %v5526_v41 }
 0x63c   : > { %v7780_v21 = vpop.eup %7779  ;;  %7797 = vrcp.f32 %v6268_v51  ;;  %v6269_v38 = vadd.f32 1.0, %v7778_v20  ;;  %v6202_v17 = vmul.f32 1.442695, %v6132_v24  ;;  %v5536_v6 = vpop.f32.mrb[117].mxu1  ;;  %v6198_v26 = vmul.f32 1.442695, %v6130_v7 }
 0x63d   : > { %7063 = vst [vmem:[%s15450_s30 + $0x10] sm:$0xff] %v6955_v18   ;;  %7799 = vrcp.f32 %v6266_v25  ;;  %v6267_v22 = vadd.f32 1.0, %v7780_v21  ;;  %v7782_v43 = vpop.eup %7781  ;;  %v6133_v12 = vsub.f32 0.0, %v15479_v4  ;;  %v5960_v29 = vpop.f32.mrb[89].mxu0  ;;  %v15493_v3 = vadd.f32 %v15323_v32, %v5948_v40 }
 0x63e   : > { %7801 = vrcp.f32 %v6269_v38  ;;  %v15489_v8 = vpop.f32.mrb[118].mxu1  ;;  %v7784_v58 = vpop.eup %7783  ;;  %v6360_v30 = vmul.f32 %v7782_v43, %v15383_v44  ;;  %v15496_v45 = vadd.f32 %v15306_v59, %v5529_v2  ;;  %v5969_v41 = vadd.f32 %v7351_v16, %v15298_v57 }
 0x63f   : > { %7803 = vrcp.f32 %v6267_v22  ;;  %v7352_v61 = vpop.f32.mrb[90].mxu0  ;;  %v5539_v48 = vpop.f32.mrb[119].mxu1  ;;  %v6358_v53 = vmul.f32 %v7784_v58, %v15387_v37  ;;  %v6204_v35 = vmul.f32 1.442695, %v6133_v12  ;;  %v6131_v18 = vsub.f32 0.0, %v15493_v3 }
 0x640   : > { %v7786_v42 = vpop.eup %7785  ;;  %7805 = vpow2.f32 %v6202_v17  ;;  %v5963_v51 = vpop.f32.mrb[91].mxu0  ;;  %v5961_v25 = vadd.f32 %v5960_v29, %v15292_v10  ;;  %v15505_v37 = vadd.f32 %v15323_v32, %v5969_v41  ;;  %v5972_v24 = vadd.f32 %v7352_v61, %v15304_v11 }
 0x641   : > { %v7788_v20 = vpop.eup %7787  ;;  %v6361_v44 = vmul.f32 %v7786_v42, %v15392_v13  ;;  %7807 = vpow2.f32 %v6198_v26  ;;  %v6200_v7 = vmul.f32 1.442695, %v6131_v18  ;;  %v5964_v26 = vadd.f32 %v5963_v51, %v15294_v36 }
 0x642   : > { %v7790_v59 = vpop.eup %7789  ;;  %v6359_v2 = vmul.f32 %v7788_v20, %v15396_v28  ;;  %7809 = vpow2.f32 %v6204_v35  ;;  %v15509_v13 = vadd.f32 %v15323_v32, %v5961_v25  ;;  %v6136_v28 = vsub.f32 0.0, %v15505_v37  ;;  %v5542_v16 = vpop.f32.mrb[120].mxu1 }
 0x643   : > { %v7792_v57 = vpop.eup %7791  ;;  %v6970_v21 = vpack.c.bf16 %v6361_v44, %v6360_v30  ;;  %v6272_v38 = vadd.f32 1.0, %v7790_v59  ;;  %v15513_v40 = vadd.f32 %v15323_v32, %v5972_v24  ;;  %v7355_v12 = vpop.f32.mrb[92].mxu0  ;;  %v15522_v44 = vadd.f32 %v15323_v32, %v5964_v26 }
 0x644   : > { %v7794_v22 = vpop.eup %7793  ;;  %v6965_v10 = vpack.c.bf16 %v6359_v2, %v6358_v53  ;;  %v6270_v17 = vadd.f32 1.0, %v7792_v57  ;;  %v6134_v43 = vsub.f32 0.0, %v15509_v13  ;;  %v5544_v29 = vpop.f32.mrb[121].mxu1  ;;  %v6210_v61 = vmul.f32 1.442695, %v6136_v28 }
 0x645   : > { %v7796_v6 = vpop.eup %7795  ;;  %7066 = vst [vmem:[%s15450_s30 + $0x28] sm:$0xff] %v6970_v21   ;;  %7811 = vrcp.f32 %v6272_v38  ;;  %v6273_v11 = vadd.f32 1.0, %v7794_v22  ;;  %v6137_v48 = vsub.f32 0.0, %v15513_v40  ;;  %v5976_v42 = vpop.f32.mrb[93].mxu0  ;;  %v15527_v2 = vadd.f32 %v15296_v52, %v15481_v14 }
 0x646   : > { %v7798_v58 = vpop.eup %7797  ;;  %7065 = vst [vmem:[%s15450_s30 + $0x20] sm:$0xff] %v6965_v10   ;;  %7813 = vrcp.f32 %v6270_v17  ;;  %v6271_v30 = vadd.f32 1.0, %v7796_v6  ;;  %v5545_v53 = vpop.f32.mrb[122].mxu1  ;;  %v6206_v20 = vmul.f32 1.442695, %v6134_v43  ;;  %v6135_v21 = vsub.f32 0.0, %v15522_v44 }
 0x647   : > { %v7800_v35 = vpop.eup %7799  ;;  %v6364_v41 = vmul.f32 %v7798_v58, %v15409_v54  ;;  %7815 = vrcp.f32 %v6273_v11  ;;  %v7356_v36 = vpop.f32.mrb[94].mxu0  ;;  %v6212_v59 = vmul.f32 1.442695, %v6137_v48  ;;  %v15533_v38 = vadd.f32 %v15302_v63, %v15489_v8 }
 0x648   : > { %v5547_v51 = vpop.f32.mrb[123].mxu1  ;;  %v7802_v18 = vpop.eup %7801  ;;  %v6362_v25 = vmul.f32 %v7800_v35, %v15413_v15  ;;  %7817 = vrcp.f32 %v6271_v30  ;;  %v5985_v10 = vadd.f32 %v7355_v12, %v15325_v55  ;;  %v5977_v52 = vadd.f32 %v5976_v42, %v15310_v23 }
 0x649   : > { %v5979_v24 = vpop.f32.mrb[95].mxu0  ;;  %v7804_v57 = vpop.eup %7803  ;;  %v6365_v54 = vmul.f32 %v7802_v18, %v15418_v39  ;;  %7819 = vpow2.f32 %v6200_v7  ;;  %v6208_v39 = vmul.f32 1.442695, %v6135_v21  ;;  %v15552_v58 = vadd.f32 %v15312_v31, %v5542_v16 }
 0x64a   : > { %v7806_v22 = vpop.eup %7805  ;;  %v6363_v15 = vmul.f32 %v7804_v57, %v15422_v46  ;;  %7821 = vpow2.f32 %v6210_v61  ;;  %v15539_v63 = vadd.f32 %v15323_v32, %v5985_v10  ;;  %v15541_v8 = vpop.f32.mrb[124].mxu1  ;;  %v15545_v23 = vadd.f32 %v15323_v32, %v5977_v52 }
 0x64b   : > { %v7808_v14 = vpop.eup %7807  ;;  %v6980_v17 = vpack.c.bf16 %v6365_v54, %v6364_v41  ;;  %v6276_v28 = vadd.f32 1.0, %v7806_v22  ;;  %7823 = vpow2.f32 %v6206_v20  ;;  %v5988_v46 = vadd.f32 %v7356_v36, %v15329_v1  ;;  %v7359_v43 = vpop.f32.mrb[96].mxu0 }
 0x64c   : > { %v7810_v7 = vpop.eup %7809  ;;  %v6975_v6 = vpack.c.bf16 %v6363_v15, %v6362_v25  ;;  %v6274_v11 = vadd.f32 1.0, %v7808_v14  ;;  %7825 = vpow2.f32 %v6212_v59  ;;  %v5552_v26 = vpop.f32.mrb[125].mxu1  ;;  %v6140_v12 = vsub.f32 0.0, %v15539_v63 }
 0x64d   : > { %7068 = vst [vmem:[%s15450_s30 + $0x38] sm:$0xff] %v6980_v17   ;;  %7827 = vrcp.f32 %v6276_v28  ;;  %v6277_v55 = vadd.f32 1.0, %v7810_v7  ;;  %v5980_v29 = vadd.f32 %v5979_v24, %v15316_v62  ;;  %v5992_v30 = vpop.f32.mrb[97].mxu0  ;;  %v15554_v61 = vpop.f32.mrb[126].mxu1  ;;  %v6138_v42 = vsub.f32 0.0, %v15545_v23 }
 0x64e   : > { %7067 = vst [vmem:[%s15450_s30 + $0x30] sm:$0xff] %v6975_v6   ;;  %7829 = vrcp.f32 %v6274_v11  ;;  %v15558_v1 = vadd.f32 %v15323_v32, %v5988_v46  ;;  %v15561_v35 = vadd.f32 %v15318_v5, %v5545_v53  ;;  %v7360_v41 = vpop.f32.mrb[98].mxu0  ;;  %v5555_v20 = vpop.f32.mrb[127].mxu1  ;;  %v6218_v31 = vmul.f32 1.442695, %v6140_v12 }
 0x64f   : > { %v7812_v48 = vpop.eup %7811  ;;  %7831 = vrcp.f32 %v6277_v55  ;;  %v15565_v16 = vadd.f32 %v15323_v32, %v5980_v29  ;;  %v5995_v51 = vpop.f32.mrb[99].mxu0  ;;  %v6214_v59 = vmul.f32 1.442695, %v6138_v42  ;;  %v6001_v5 = vadd.f32 %v7359_v43, %v15375_v19  ;;  %v17861_v55 = vld [vmem:[#allocation127_spill] sm:$0xff] }
 0x650   : > { %v7814_v36 = vpop.eup %7813  ;;  %v6368_v62 = vmul.f32 %v7812_v48, %v15435_v33  ;;  %7833 = vpow2.f32 %v6208_v39  ;;  %v6141_v24 = vsub.f32 0.0, %v15558_v1  ;;  %v5993_v54 = vadd.f32 %v5992_v30, %v15349_v56  ;;  %v17862_v30 = vld [vmem:[#allocation128_spill] sm:$0xff] }
 0x651   : > { %v7816_v18 = vpop.eup %7815  ;;  %v6366_v25 = vmul.f32 %v7814_v36, %v15440_v49  ;;  %7835 = vpow2.f32 %v6218_v31  ;;  %v6139_v33 = vsub.f32 0.0, %v15565_v16  ;;  %v15575_v49 = vadd.f32 %v15323_v32, %v6001_v5 }
 0x652   : > { %v7818_v53 = vpop.eup %7817  ;;  %v6369_v57 = vmul.f32 %v7816_v18, %v15446_v9  ;;  %7837 = vpow2.f32 %v6214_v59  ;;  %v6220_v15 = vmul.f32 1.442695, %v6141_v24  ;;  %v15578_v9 = vadd.f32 %v15323_v32, %v5993_v54 }
 0x653   : > { %v7820_v21 = vpop.eup %7819  ;;  %v6367_v22 = vmul.f32 %v7818_v53, %v15454_v27  ;;  %v6216_v14 = vmul.f32 1.442695, %v6139_v33  ;;  %v6144_v27 = vsub.f32 0.0, %v15575_v49  ;;  %v7363_v39 = vpop.f32.mrb[100].mxu0  ;;  %v6004_v46 = vadd.f32 %v7360_v41, %v17861_v55 }
 0x654   : > { %v7822_v10 = vpop.eup %7821  ;;  %v6990_v52 = vpack.c.bf16 %v6369_v57, %v6368_v62  ;;  %v6275_v19 = vadd.f32 1.0, %v7820_v21  ;;  %7839 = vpow2.f32 %v6220_v15  ;;  %v6142_v11 = vsub.f32 0.0, %v15578_v9  ;;  %v6008_v43 = vpop.f32.mrb[101].mxu0  ;;  %v17864_v57 = vld [vmem:[#allocation126_spill] sm:$0xff] }
 0x655   : > { %v7824_v17 = vpop.eup %7823  ;;  %v6985_v28 = vpack.c.bf16 %v6367_v22, %v6366_v25  ;;  %v6280_v56 = vadd.f32 1.0, %v7822_v10  ;;  %v6226_v29 = vmul.f32 1.442695, %v6144_v27  ;;  %v5996_v48 = vadd.f32 %v5995_v51, %v17862_v30  ;;  %v7364_v42 = vpop.f32.mrb[102].mxu0  ;;  %v17863_v51 = vld [vmem:[#allocation125_spill] sm:$0xff]  ;;  %v17865_v10 = vld [vmem:[#allocation107_spill] sm:$0xff] }
 0x656   : > { %v7826_v7 = vpop.eup %7825  ;;  %7070 = vst [vmem:[%s15450_s30 + $0x48] sm:$0xff] %v6990_v52   ;;  %7841 = vrcp.f32 %v6275_v19  ;;  %v6278_v6 = vadd.f32 1.0, %v7824_v17  ;;  %v6222_v62 = vmul.f32 1.442695, %v6142_v11  ;;  %v15588_v31 = vadd.f32 %v15323_v32, %v6004_v46  ;;  %v6011_v18 = vpop.f32.mrb[103].mxu0 }
 0x657   : > { %v7828_v26 = vpop.eup %7827  ;;  %7069 = vst [vmem:[%s15450_s30 + $0x40] sm:$0xff] %v6985_v28   ;;  %7843 = vrcp.f32 %v6280_v56  ;;  %v6281_v12 = vadd.f32 1.0, %v7826_v7  ;;  %v15594_v59 = vadd.f32 %v15323_v32, %v5996_v48  ;;  %v15598_v24 = vadd.f32 %v17863_v51, %v15541_v8 }
 0x658   : > { %v7830_v20 = vpop.eup %7829  ;;  %v6372_v36 = vmul.f32 %v7828_v26, %v15469_v50  ;;  %7845 = vrcp.f32 %v6278_v6  ;;  %v6145_v53 = vsub.f32 0.0, %v15588_v31  ;;  %v15604_v33 = vadd.f32 %v17864_v57, %v15554_v61  ;;  %v17866_v6 = vld [vmem:[#allocation85_spill] sm:$0xff] }
 0x659   : > { %v7832_v25 = vpop.eup %7831  ;;  %v15591_v41 = vmul.f32 %v7830_v20, %v15473_v60  ;;  %7847 = vrcp.f32 %v6281_v12  ;;  %v6143_v54 = vsub.f32 0.0, %v15594_v59  ;;  %v6017_v21 = vadd.f32 %v7363_v39, %v15427_v47 }
 0x65a   : > { %v7834_v5 = vpop.eup %7833  ;;  %v6373_v50 = vmul.f32 %v7832_v25, %v15479_v4  ;;  %7849 = vpow2.f32 %v6216_v14  ;;  %v6228_v15 = vmul.f32 1.442695, %v6145_v53  ;;  %v6009_v4 = vadd.f32 %v6008_v43, %v17865_v10 }
 0x65b   : > { %v6279_v60 = vadd.f32 1.0, %v7834_v5  ;;  %7851 = vpow2.f32 %v6226_v29  ;;  %v7836_v22 = vpop.eup %7835  ;;  %v6224_v14 = vmul.f32 1.442695, %v6143_v54  ;;  %v15610_v61 = vadd.f32 %v15323_v32, %v6017_v21  ;;  %v7367_v17 = vpop.f32.mrb[104].mxu0 }
 0x65c   : > { %v7000_v8 = vpack.c.bf16 %v6373_v50, %v6372_v36  ;;  %7853 = vpow2.f32 %v6222_v62  ;;  %v7838_v52 = vpop.eup %7837  ;;  %v6284_v19 = vadd.f32 1.0, %v7836_v22  ;;  %v15614_v56 = vadd.f32 %v15323_v32, %v6009_v4  ;;  %v6024_v27 = vpop.f32.mrb[105].mxu0 }
 0x65d   : > { %7855 = vrcp.f32 %v6279_v60  ;;  %v6282_v28 = vadd.f32 1.0, %v7838_v52  ;;  %v6020_v47 = vadd.f32 %v7364_v42, %v15461_v0  ;;  %v6148_v7 = vsub.f32 0.0, %v15610_v61  ;;  %v7368_v46 = vpop.f32.mrb[106].mxu0 }
 0x65e   : > { %7072 = vst [vmem:[%s15450_s30 + $0x58] sm:$0xff] %v7000_v8   ;;  %7857 = vpow2.f32 %v6228_v15  ;;  %v7840_v39 = vpop.eup %7839  ;;  %v6012_v11 = vadd.f32 %v6011_v18, %v17866_v6  ;;  %v6033_v55 = vadd.f32 %v7367_v17, %v15527_v2  ;;  %v6146_v12 = vsub.f32 0.0, %v15614_v56  ;;  %v6027_v30 = vpop.f32.mrb[107].mxu0 }
 0x65f   : > { %7859 = vrcp.f32 %v6284_v19  ;;  %v6285_v26 = vadd.f32 1.0, %v7840_v39  ;;  %v15622_v29 = vadd.f32 %v15323_v32, %v6020_v47  ;;  %v6234_v42 = vmul.f32 1.442695, %v6148_v7 }
 0x660   : > { %v7842_v43 = vpop.eup %7841  ;;  %7861 = vrcp.f32 %v6282_v28  ;;  %v15626_v20 = vadd.f32 %v15323_v32, %v6012_v11  ;;  %v6230_v62 = vmul.f32 1.442695, %v6146_v12  ;;  %v15635_v60 = vadd.f32 %v15323_v32, %v6033_v55 }
 0x661   : > { %v7844_v0 = vpop.eup %7843  ;;  %v6371_v48 = vmul.f32 %v7842_v43, %v15493_v3  ;;  %7863 = vpow2.f32 %v6224_v14  ;;  %v6149_v18 = vsub.f32 0.0, %v15622_v29  ;;  %v6025_v22 = vadd.f32 %v6024_v27, %v15487_v34 }
 0x662   : > { %v7846_v36 = vpop.eup %7845  ;;  %v6376_v2 = vmul.f32 %v7844_v0, %v15505_v37  ;;  %7865 = vrcp.f32 %v6285_v26  ;;  %v6147_v3 = vsub.f32 0.0, %v15626_v20  ;;  %v6028_v27 = vadd.f32 %v6027_v30, %v15496_v45 }
 0x663   : > { %v7848_v25 = vpop.eup %7847  ;;  %v6995_v51 = vpack.c.bf16 %v6371_v48, %v15591_v41  ;;  %v6374_v5 = vmul.f32 %v7846_v36, %v15509_v13  ;;  %7867 = vpow2.f32 %v6234_v42  ;;  %v6236_v57 = vmul.f32 1.442695, %v6149_v18  ;;  %v7371_v41 = vpop.f32.mrb[108].mxu0 }
 0x664   : > { %v7850_v50 = vpop.eup %7849  ;;  %v6377_v53 = vmul.f32 %v7848_v25, %v15513_v40  ;;  %7869 = vpow2.f32 %v6230_v62  ;;  %v6232_v21 = vmul.f32 1.442695, %v6147_v3  ;;  %v6036_v13 = vadd.f32 %v7368_v46, %v15533_v38  ;;  %v6040_v4 = vpop.f32.mrb[109].mxu0 }
 0x665   : > { %v7852_v37 = vpop.eup %7851  ;;  %7071 = vst [vmem:[%s15450_s30 + $0x50] sm:$0xff] %v6995_v51   ;;  %v6283_v54 = vadd.f32 1.0, %v7850_v50  ;;  %7871 = vpow2.f32 %v6236_v57  ;;  %v6152_v40 = vsub.f32 0.0, %v15635_v60  ;;  %v15642_v14 = vadd.f32 %v15323_v32, %v6025_v22  ;;  %v7372_v34 = vpop.f32.mrb[110].mxu0 }
 0x666   : > { %v7854_v8 = vpop.eup %7853  ;;  %v7010_v15 = vpack.c.bf16 %v6377_v53, %v6376_v2  ;;  %v6288_v10 = vadd.f32 1.0, %v7852_v37  ;;  %v15645_v17 = vadd.f32 %v15323_v32, %v6036_v13  ;;  %v6043_v39 = vpop.f32.mrb[111].mxu0  ;;  %v15653_v26 = vadd.f32 %v15323_v32, %v6028_v27 }
 0x667   : > { %v7856_v52 = vpop.eup %7855  ;;  %7873 = vrcp.f32 %v6283_v54  ;;  %v6286_v19 = vadd.f32 1.0, %v7854_v8  ;;  %v6242_v47 = vmul.f32 1.442695, %v6152_v40  ;;  %v6150_v11 = vsub.f32 0.0, %v15642_v14 }
 0x668   : > { %v7858_v28 = vpop.eup %7857  ;;  %7074 = vst [vmem:[%s15450_s30 + $0x68] sm:$0xff] %v7010_v15   ;;  %v6375_v38 = vmul.f32 %v7856_v52, %v15522_v44  ;;  %7875 = vrcp.f32 %v6288_v10  ;;  %v6153_v55 = vsub.f32 0.0, %v15645_v17  ;;  %v6151_v42 = vsub.f32 0.0, %v15653_v26 }
 0x669   : > { %v7860_v7 = vpop.eup %7859  ;;  %7877 = vrcp.f32 %v6286_v19  ;;  %v6289_v6 = vadd.f32 1.0, %v7858_v28  ;;  %v6238_v45 = vmul.f32 1.442695, %v6150_v11  ;;  %v6049_v36 = vadd.f32 %v7371_v41, %v15598_v24 }
 0x66a   : > { %v7862_v46 = vpop.eup %7861  ;;  %v7005_v43 = vpack.c.bf16 %v6375_v38, %v6374_v5  ;;  %7879 = vpow2.f32 %v6232_v21  ;;  %v6380_v12 = vmul.f32 %v7860_v7, %v15539_v63  ;;  %v6244_v30 = vmul.f32 1.442695, %v6153_v55  ;;  %v7928_v5 = vld [vmem:[%s15762_s5] ss:$0 sm:$0xff] }
 0x66b   : > { %v7864_v44 = vpop.eup %7863  ;;  %7881 = vrcp.f32 %v6289_v6  ;;  %v6041_v32 = vadd.f32 %v6040_v4, %v15552_v58  ;;  %v6052_v18 = vadd.f32 %v7372_v34, %v15604_v33  ;;  %v6240_v51 = vmul.f32 1.442695, %v6151_v42 }
 0x66c   : > { %v7866_v0 = vpop.eup %7865  ;;  %7073 = vst [vmem:[%s15450_s30 + $0x60] sm:$0xff] %v7005_v43   ;;  %v6287_v48 = vadd.f32 1.0, %v7864_v44  ;;  %7883 = vpow2.f32 %v6242_v47  ;;  %v15665_v3 = vadd.f32 %v7928_v5, %v6049_v36  ;;  %v6044_v57 = vadd.f32 %v6043_v39, %v15561_v35 }
 0x66d   : > { %v7868_v2 = vpop.eup %7867  ;;  %v6381_v62 = vmul.f32 %v7866_v0, %v15558_v1  ;;  %7885 = vpow2.f32 %v6238_v45  ;;  %v15667_v1 = vadd.f32 %v7928_v5, %v6041_v32  ;;  %v15670_v33 = vadd.f32 %v7928_v5, %v6052_v18 }
 0x66e   : > { %v7870_v63 = vpop.eup %7869  ;;  %7887 = vrcp.f32 %v6287_v48  ;;  %v6292_v25 = vadd.f32 1.0, %v7868_v2  ;;  %v6156_v58 = vsub.f32 0.0, %v15665_v3  ;;  %v6378_v54 = vmul.f32 %v7862_v46, %v15545_v23 }
 0x66f   : > { %v7020_v24 = vpack.c.bf16 %v6381_v62, %v6380_v12  ;;  %v6290_v50 = vadd.f32 1.0, %v7870_v63  ;;  %7889 = vpow2.f32 %v6244_v30  ;;  %v7872_v53 = vpop.eup %7871  ;;  %v6154_v22 = vsub.f32 0.0, %v15667_v1 }
 0x670   : > { %7891 = vrcp.f32 %v6292_v25  ;;  %v6293_v21 = vadd.f32 1.0, %v7872_v53  ;;  %v6250_v8 = vmul.f32 1.442695, %v6156_v58  ;;  %v6157_v15 = vsub.f32 0.0, %v15670_v33 }
 0x671   : > { %v7874_v37 = vpop.eup %7873  ;;  %7076 = vst [vmem:[%s15450_s30 + $0x78] sm:$0xff] %v7020_v24   ;;  %7893 = vrcp.f32 %v6290_v50  ;;  %v6246_v40 = vmul.f32 1.442695, %v6154_v22  ;;  %v15678_v35 = vadd.f32 %v7928_v5, %v6044_v57 }
 0x672   : > { %v7876_v13 = vpop.eup %7875  ;;  %v6379_v41 = vmul.f32 %v7874_v37, %v15565_v16  ;;  %7895 = vpow2.f32 %v6240_v51  ;;  %v6252_v52 = vmul.f32 1.442695, %v6157_v15 }
 0x673   : > { %v7878_v10 = vpop.eup %7877  ;;  %7897 = vrcp.f32 %v6293_v21  ;;  %v6155_v28 = vsub.f32 0.0, %v15678_v35  ;;  %v6384_v38 = vmul.f32 %v7876_v13, %v15575_v49 }
 0x674   : > { %v7880_v4 = vpop.eup %7879  ;;  %v7015_v23 = vpack.c.bf16 %v6379_v41, %v6378_v54  ;;  %7899 = vpow2.f32 %v6250_v8  ;;  %v6382_v46 = vmul.f32 %v7878_v10, %v15578_v9 }
 0x675   : > { %v7882_v19 = vpop.eup %7881  ;;  %v6291_v34 = vadd.f32 1.0, %v7880_v4  ;;  %7901 = vpow2.f32 %v6246_v40  ;;  %v6248_v7 = vmul.f32 1.442695, %v6155_v28 }
 0x676   : > { %v7884_v16 = vpop.eup %7883  ;;  %7075 = vst [vmem:[%s15450_s30 + $0x70] sm:$0xff] %v7015_v23   ;;  %v6385_v47 = vmul.f32 %v7882_v19, %v15588_v31  ;;  %7903 = vpow2.f32 %v6252_v52 }
 0x677   : > { %v7886_v27 = vpop.eup %7885  ;;  %7905 = vrcp.f32 %v6291_v34  ;;  %v6296_v39 = vadd.f32 1.0, %v7884_v16 }
 0x678   : > { %v7888_v6 = vpop.eup %7887  ;;  %v7030_v11 = vpack.c.bf16 %v6385_v47, %v6384_v38  ;;  %v6294_v44 = vadd.f32 1.0, %v7886_v27 }
 0x679   : > { %v7890_v55 = vpop.eup %7889  ;;  %v6383_v43 = vmul.f32 %v7888_v6, %v15594_v59  ;;  %7907 = vrcp.f32 %v6296_v39 }
 0x67a   : > { %v7892_v12 = vpop.eup %7891  ;;  %7078 = vst [vmem:[%s15450_s30 + $0x88] sm:$0xff] %v7030_v11   ;;  %v6297_v49 = vadd.f32 1.0, %v7890_v55  ;;  %7909 = vpow2.f32 %v6248_v7 }
 0x67b   : > { %v7894_v45 = vpop.eup %7893  ;;  %v7025_v31 = vpack.c.bf16 %v6383_v43, %v6382_v46  ;;  %v6388_v9 = vmul.f32 %v7892_v12, %v15610_v61 }
 0x67c   : > { %v7896_v30 = vpop.eup %7895  ;;  %7911 = vrcp.f32 %v6297_v49  ;;  %v6386_v25 = vmul.f32 %v7894_v45, %v15614_v56 }
 0x67d   : > { %v7898_v0 = vpop.eup %7897  ;;  %7077 = vst [vmem:[%s15450_s30 + $0x80] sm:$0xff] %v7025_v31   ;;  %7913 = vrcp.f32 %v6294_v44  ;;  %v6295_v48 = vadd.f32 1.0, %v7896_v30 }
 0x67e   : > { %v7900_v42 = vpop.eup %7899  ;;  %v6389_v59 = vmul.f32 %v7898_v0, %v15622_v29 }
 0x67f   : > { %v7902_v36 = vpop.eup %7901  ;;  %7915 = vrcp.f32 %v6295_v48  ;;  %v6300_v2 = vadd.f32 1.0, %v7900_v42 }
 0x680   : > { %v7904_v62 = vpop.eup %7903  ;;  %v7040_v32 = vpack.c.bf16 %v6389_v59, %v6388_v9  ;;  %v6298_v5 = vadd.f32 1.0, %v7902_v36 }
 0x681   : > { %v7906_v18 = vpop.eup %7905  ;;  %7917 = vrcp.f32 %v6300_v2  ;;  %v6301_v63 = vadd.f32 1.0, %v7904_v62 }
 0x682   : > { %7080 = vst [vmem:[%s15450_s30 + $0x98] sm:$0xff] %v7040_v32   ;;  %v6387_v51 = vmul.f32 %v7906_v18, %v15626_v20 }
 0x683   : > { %7919 = vrcp.f32 %v6301_v63  ;;  %v7908_v24 = vpop.eup %7907 }
 0x684   : > { %v7035_v61 = vpack.c.bf16 %v6387_v51, %v6386_v25  ;;  %v7910_v29 = vpop.eup %7909  ;;  %7921 = vrcp.f32 %v6298_v5  ;;  %v6392_v57 = vmul.f32 %v7908_v24, %v15635_v60 }
 0x685   : > { %v6299_v53 = vadd.f32 1.0, %v7910_v29 }
 0x686   : > { %v7912_v50 = vpop.eup %7911  ;;  %7079 = vst [vmem:[%s15450_s30 + $0x90] sm:$0xff] %v7035_v61  }
 0x687   : > { %v7914_v58 = vpop.eup %7913  ;;  %v6393_v56 = vmul.f32 %v7912_v50, %v15645_v17  ;;  %7923 = vrcp.f32 %v6299_v53 }
 0x688   : > { %v6390_v54 = vmul.f32 %v7914_v58, %v15642_v14 }
 0x689   : > { %v7916_v20 = vpop.eup %7915  ;;  %v7050_v37 = vpack.c.bf16 %v6393_v56, %v6392_v57 }
 0x68a   : > { %v6391_v21 = vmul.f32 %v7916_v20, %v15653_v26 }
 0x68b   : > { %v7918_v22 = vpop.eup %7917  ;;  %7082 = vst [vmem:[%s15450_s30 + $0xa8] sm:$0xff] %v7050_v37  }
 0x68c   : > { %v7045_v13 = vpack.c.bf16 %v6391_v21, %v6390_v54  ;;  %v6396_v60 = vmul.f32 %v7918_v22, %v15665_v3 }
 0x68d   : > { %v7920_v41 = vpop.eup %7919 }
 0x68e   : > { %7081 = vst [vmem:[%s15450_s30 + $0xa0] sm:$0xff] %v7045_v13   ;;  %v6397_v17 = vmul.f32 %v7920_v41, %v15670_v33  ;;  %v7922_v8 = vpop.eup %7921 }
 0x68f   : > { %v6394_v14 = vmul.f32 %v7922_v8, %v15667_v1 }
 0x690   : > { %v7060_v15 = vpack.c.bf16 %v6397_v17, %v6396_v60 }
 0x691   : > { %v7924_v10 = vpop.eup %7923 }
 0x692   : > { %7084 = vst [vmem:[%s15450_s30 + $0xb8] sm:$0xff] %v7060_v15   ;;  %v6395_v26 = vmul.f32 %v7924_v10, %v15678_v35 }
 0x694   : > { %v7055_v40 = vpack.c.bf16 %v6395_v26, %v6394_v14 }
 0x696   : > { %7083 = vst [vmem:[%s15450_s30 + $0xb0] sm:$0xff] %v7055_v40  }
 0x697   : > { %8056 = shalt.err (!%p8053_p4)
}
 0x698   : > { %s8057_s12 = scalar_lea.hbm %s15710_s29, 3072  ;;  %s8061_s9 = scalar_lea.hbm %s15763_s6, 6144 }
 0x699   : > { %p8058_p9 = scmp.ne.s32.totalorder %s15710_s29, %s8057_s12  ;;  %p8062_p8 = scmp.lt.u32.totalorder %s15710_s29, %s15763_s6 }
 0x69a   : > { %p8063_p13 = scmp.lt.u32.totalorder %s8061_s9, %s8057_s12  ;;  %p8065_p10 = scmp.lt.u32.totalorder %s8057_s12, %s15710_s29 }
 0x69b   : > { %p8059_p0 = pnand %p8058_p9, %p8318_p5 }
 0x69c   : > { %p8064_p6 = por %p8063_p13, %p8062_p8 }
 0x69d   : > { %p8060_p11 = pneg %p8059_p0 }
 0x69e   : > { %p8066_p3 = por %p8065_p10, %p8064_p6 }
 0x6a0   : > { %p8067_p7 = pnand %p8066_p3, %p8060_p11 }
 0x6a2   : > { %8070 = shalt.err (!%p8067_p7)
}
 0x6a3   : > { %s8127_s19 = smov 64   ;;  %s8128_s27 = smov 4  }
 0x6a4   : > { %7407 = dma.vmem_to_hbm [thread:$0]  (%p8318_p5), %s15712_s26, 3072, %s15710_s29, %s6639_s25, %s8127_s19, %s8127_s19, %s8128_s27  }
 0x6a5 PF: > { %s6667_s7 = sand.u32 1, %s8105_s21   ;;  %p17867_p12 = scmp.ne.s32.totalorder %s16179_s28, 0 }
 0x6a6   : > { %p17868_p1 = scmp.ge.s32.totalorder %s8117_s24, 2  ;;  %s6668_s11 = scalar_lea.sflag [#allocation5], %s6667_s7 }
 0x6a8   : > { %p7424_p2 = pnand %p17868_p1, %p17867_p12 }
 0x6aa   : > { %8100 = dma.done.wait (!%p7424_p2), %s6668_s11, 3072  }
 0x6ab   : > { %8102 = vsyncadd (!%p7424_p2), %s6668_s11, 4294964224  ;;  %p21_p4 = scmp.ge.s32.totalorder %s8304_s18, 4   ;;  %s17869_s21 = smov %s8109_s22 }
 0x6ac   : > { %s17870_s22 = smov %s8113_s23  ;;  %s17871_s23 = smov %s8314_s14 }
 0x6ad   : > { %s17872_s24 = smov %s8304_s18  ;;  %23 = sbr.rel (!%p21_p4) target bundleno = 7 (0x7), region = 106 }
 0x6b4   :  { %6673 = vsyncpa [#allocation4], 1 }
 0x6b5   :  { %6675 = vsyncpa [#allocation4 + $0x1], 1 }
 0x6b6   :  { %6676 = vsyncpa [#allocation7], 1 }
 0x6b7   :  { %6677 = vsyncpa [#allocation10], 1 }
 0x6b8   :  { %6678 = vsyncpa [#allocation5], 1 }
 0x6b9   :  { %6680 = vsyncpa [#allocation5 + $0x1], 1 }

</bundles_post_ra>
